<compile_context>
chip_gen: v6e
topology: v6e:2x2x1
jax: 0.10.0
libtpu: 0.0.40
codegen_flags: <defaults>
</compile_context>

<pallas_src>
import functools

import numpy as np
import jax
import jax.numpy as jnp
from jax.experimental import pallas as pl
from jax.experimental.pallas import tpu as pltpu


def _round_up(v, m):
    return ((v + m - 1) // m) * m


def _pick_cout_tile(cout):
    """256-wide Cout tiles fill v6e/v7x's 256-wide MXU; v5e's MXU is 128 wide."""
    try:
        kind = jax.devices()[0].device_kind.lower()
    except Exception:
        kind = ""
    is_v5e = ("v5 lite" in kind) or ("v5e" in kind) or ("v5litepod" in kind)
    for cand in ((128, 256) if is_v5e else (256, 128)):
        if cout % cand == 0:
            return cand
    return cout


# ----------------------------------------------------------------------------
# Kernel 1: (M, K)bf16 @ (K, C)bf16 -> f32 acc -> + bias -> optional ReLU
# Used for every 1x1 convolution (BN scale/shift folded into weights/bias).
# ----------------------------------------------------------------------------
def _matmul_bias_kernel(x_ref, w_ref, b_ref, o_ref, *, apply_relu):
    acc = jnp.dot(x_ref[...], w_ref[...], preferred_element_type=jnp.float32)
    acc = acc + b_ref[...]
    if apply_relu:
        acc = jnp.maximum(acc, 0.0)
    o_ref[...] = acc.astype(o_ref.dtype)


def _pick_tm(M):
    # Prefer >=2 grid steps (keeps both v7x TensorCores busy) with a large tile.
    for cand in (512, 256, 128, 64):
        if M % cand == 0 and M // cand >= 2:
            return cand, M
    for cand in (1024, 512, 256, 128, 64, 32, 16, 8):
        if M % cand == 0:
            return cand, M
    return 256, _round_up(M, 256)      # pad with a big tile rather than tm=128


def matmul_bias(x, w, bias, *, relu, out_dtype=jnp.bfloat16):
    """x: (M, K); w: (K, C) bf16; bias: (C,) f32. Returns (M, C) out_dtype."""
    x = x.astype(jnp.bfloat16)
    M, K = x.shape
    C = w.shape[1]
    tm, Mp = _pick_tm(M)
    if Mp != M:
        x = jnp.pad(x, ((0, Mp - M), (0, 0)))

    out = pl.pallas_call(
        functools.partial(_matmul_bias_kernel, apply_relu=relu),
        out_shape=jax.ShapeDtypeStruct((Mp, C), out_dtype),
        grid=(Mp // tm,),
        in_specs=[
            pl.BlockSpec((tm, K), lambda i: (i, 0)),
            pl.BlockSpec((K, C), lambda i: (0, 0)),
            pl.BlockSpec((1, C), lambda i: (0, 0)),
        ],
        out_specs=pl.BlockSpec((tm, C), lambda i: (i, 0)),
        compiler_params=pltpu.CompilerParams(
            dimension_semantics=("parallel",)),
    )(x, w, bias[None, :])
    return out if Mp == M else out[:M]


# ----------------------------------------------------------------------------
# Kernel 2: 3x3 conv (stride 1, pad 1, BN folded) + bias + ReLU, row-tiled.
#
# Wrapper builds a dx-packed, row-flattened input per row tile:
#   x_tiles[n, r, j*Wp + w, dx*Cin + c] = xpad[n, r*th + j, w + dx, c]
# with j in [0, th+2) (2-row halo).  Inside the kernel, tap row-offset dy is the
# contiguous, sublane-aligned slice rows [dy*Wp, dy*Wp + th*Wp), matmul'd
# against w3[dy] (shape (3*Cin, Cout)).  3 MXU matmuls per block, K = 3*Cin.
# ----------------------------------------------------------------------------
def _conv3x3_kernel(x_ref, w_ref, b_ref, o_ref, *, th, wp):
    rows = th * wp
    acc = jnp.dot(x_ref[pl.ds(0, rows), :], w_ref[0],
                  preferred_element_type=jnp.float32)
    for dy in (1, 2):
        acc = acc + jnp.dot(x_ref[pl.ds(dy * wp, rows), :], w_ref[dy],
                            preferred_element_type=jnp.float32)
    acc = jnp.maximum(acc + b_ref[...], 0.0)
    o_ref[...] = acc.astype(o_ref.dtype)


def conv3x3_bias_relu(x_nhwc, w3, bias, *, tcout=None, max_tile_rows=2048):
    """x: (N,H,W,Cin); w3: (3, 3*Cin, Cout) bf16 (BN folded); bias: (Cout,) f32."""
    N, H, W, Cin = x_nhwc.shape
    K3, Cout = w3.shape[1], w3.shape[2]
    assert K3 == 3 * Cin
    if tcout is None:
        tcout = _pick_cout_tile(Cout)
    assert Cout % tcout == 0

    Wp = _round_up(W, 8)                       # sublane-aligned flattened row stride
    th = max(1, min(H, max_tile_rows // Wp))   # output rows per grid step
    if th >= H and H >= 8:
        th = (H + 1) // 2                      # ensure >=2 row tiles when possible
    n_tiles = -(-H // th)
    Hp = n_tiles * th

    x_bf = x_nhwc.astype(jnp.bfloat16)
    xpad = jnp.pad(x_bf, ((0, 0), (1, Hp - H + 1), (1, Wp - W + 1), (0, 0)))
    # dx-packed channels: xcols[n, h, w, dx*Cin + c] = xpad[n, h, w + dx, c]
    xcols = jnp.concatenate([xpad[:, :, d:d + Wp, :] for d in range(3)], axis=-1)
    # explicit overlapping row tiles (2-row halo), flattened row-major (bf16 glue)
    x_tiles = jnp.stack(
        [xcols[:, r * th:r * th + th + 2] for r in range(n_tiles)], axis=1)
    x_tiles = x_tiles.reshape(N, n_tiles, (th + 2) * Wp, K3)

    out = pl.pallas_call(
        functools.partial(_conv3x3_kernel, th=th, wp=Wp),
        out_shape=jax.ShapeDtypeStruct((N, n_tiles, th * Wp, Cout), jnp.bfloat16),
        grid=(N, n_tiles, Cout // tcout),
        in_specs=[
            pl.BlockSpec((None, None, (th + 2) * Wp, K3),
                         lambda n, r, c: (n, r, 0, 0)),
            pl.BlockSpec((3, K3, tcout), lambda n, r, c: (0, 0, c)),
            pl.BlockSpec((1, tcout), lambda n, r, c: (0, c)),
        ],
        out_specs=pl.BlockSpec((None, None, th * Wp, tcout),
                               lambda n, r, c: (n, r, 0, c)),
        compiler_params=pltpu.CompilerParams(
            dimension_semantics=("parallel", "parallel", "parallel"),
            vmem_limit_bytes=32 * 1024 * 1024),
    )(x_tiles, w3, bias[None, :])
    out = out.reshape(N, Hp, Wp, Cout)
    return out[:, :H, :W, :]


# ----------------------------------------------------------------------------
# Bilinear resize with align_corners=True (matches torch F.interpolate),
# expressed as two small dense matmuls (no gathers -> TPU friendly).
# ----------------------------------------------------------------------------
def _interp_matrix(out_size, in_size):
    m = np.zeros((out_size, in_size), np.float64)
    if in_size == 1 or out_size == 1:
        m[:, 0] = 1.0
    else:
        src = np.arange(out_size, dtype=np.float64) * (in_size - 1) / (out_size - 1)
        i0 = np.clip(np.floor(src).astype(np.int64), 0, in_size - 1)
        i1 = np.clip(i0 + 1, 0, in_size - 1)
        frac = src - i0
        m[np.arange(out_size), i0] += 1.0 - frac
        m[np.arange(out_size), i1] += frac
    return jnp.asarray(m.astype(np.float32))


def bilinear_align_corners(x, out_h, out_w):
    N, H, W, C = x.shape
    mh = _interp_matrix(out_h, H)
    mw = _interp_matrix(out_w, W)
    x = jnp.einsum("oh,nhwc->nowc", mh, x.astype(jnp.float32))
    x = jnp.einsum("pw,nhwc->nhpc", mw, x)
    return x


# ----------------------------------------------------------------------------
# Parameter construction (kaiming-normal like nn.init.kaiming_normal_).
# BN (eval) folded with the general formula; at init: gamma=1, beta=0,
# running_mean=0, running_var=1.  Weights stored bf16 (MXU), biases f32.
# ----------------------------------------------------------------------------
def make_decoder_params(key, num_classes, low_level_inplanes=256):
    eps = 1e-5

    def bn_fold(w_hwio, gamma, beta, mean, var):
        scale = gamma / jnp.sqrt(var + eps)
        return w_hwio * scale, beta - mean * scale

    def kaiming(k, kh, kw, cin, cout):
        fan_in = cin * kh * kw
        std = np.sqrt(2.0 / fan_in)
        return jax.random.normal(k, (kh, kw, cin, cout), jnp.float32) * std

    keys = jax.random.split(key, 6)
    p = {}
    ones48, zeros48 = jnp.ones((48,), jnp.float32), jnp.zeros((48,), jnp.float32)
    ones256, zeros256 = jnp.ones((256,), jnp.float32), jnp.zeros((256,), jnp.float32)

    # conv1 + bn1 (low-level feats): 1x1, 256 -> 48, output padded to 64 lanes
    w, b = bn_fold(kaiming(keys[0], 1, 1, low_level_inplanes, 48)[0, 0],
                   ones48, zeros48, zeros48, ones48)
    p["w_conv1"] = jnp.pad(w, ((0, 0), (0, 16))).astype(jnp.bfloat16)
    p["b_conv1"] = jnp.pad(b, (0, 16))

    # conv_y_aspp: 1x1, 256 -> 48, padded to 64 lanes
    w, b = bn_fold(kaiming(keys[1], 1, 1, 256, 48)[0, 0],
                   ones48, zeros48, zeros48, ones48)
    p["w_yaspp"] = jnp.pad(w, ((0, 0), (0, 16))).astype(jnp.bfloat16)
    p["b_yaspp"] = jnp.pad(b, (0, 16))

    # last_conv1: 3x3, 352 -> 256; input channels re-laid-out for the 384-wide
    # lane-aligned concat [x:256 | y:48+16pad | llf:48+16pad].
    w352 = kaiming(keys[2], 3, 3, 352, 256)
    w384 = jnp.zeros((3, 3, 384, 256), jnp.float32)
    w384 = w384.at[:, :, 0:256].set(w352[:, :, 0:256])       # x branch
    w384 = w384.at[:, :, 256:304].set(w352[:, :, 256:304])   # y branch (real 48)
    w384 = w384.at[:, :, 320:368].set(w352[:, :, 304:352])   # llf branch (real 48)
    w, b = bn_fold(w384, ones256, zeros256, zeros256, ones256)
    p["w_last1"] = w.reshape(3, 3 * 384, 256).astype(jnp.bfloat16)   # (dy, dx*Cin+c, co)
    p["b_last1"] = b

    # last_conv2: 3x3, 256 -> 256
    w, b = bn_fold(kaiming(keys[3], 3, 3, 256, 256),
                   ones256, zeros256, zeros256, ones256)
    p["w_last2"] = w.reshape(3, 3 * 256, 256).astype(jnp.bfloat16)
    p["b_last2"] = b

    # last_conv3: 1x1 with bias, 256 -> num_classes, padded to 128 lanes.
    nc_pad = _round_up(num_classes, 128)
    w3 = kaiming(keys[4], 1, 1, 256, num_classes)[0, 0]
    bound = 1.0 / np.sqrt(256.0)
    b3 = jax.random.uniform(keys[5], (num_classes,), jnp.float32, -bound, bound)
    p["w_last3"] = jnp.pad(w3, ((0, 0), (0, nc_pad - num_classes))).astype(jnp.bfloat16)
    p["b_last3"] = jnp.pad(b3, (0, nc_pad - num_classes))
    return p


# ----------------------------------------------------------------------------
# Decoder forward (NHWC).  Dropout = identity (eval), BN folded into convs.
# ----------------------------------------------------------------------------
def decoder_forward(params, x, low_level_feat, y_aspp, *, num_classes):
    N, Hl, Wl, Cll = low_level_feat.shape
    Ny, Hy, Wy, Cy = y_aspp.shape

    # conv1 + bn1 + relu on low-level features (1x1 conv -> matmul kernel)
    llf = matmul_bias(low_level_feat.reshape(N * Hl * Wl, Cll),
                      params["w_conv1"], params["b_conv1"], relu=True)
    llf = llf.reshape(N, Hl, Wl, -1)

    # conv_y_aspp branch: 1x1 conv + BN + ReLU, then bilinear upsample (bf16 out)
    y = matmul_bias(y_aspp.reshape(Ny * Hy * Wy, Cy),
                    params["w_yaspp"], params["b_yaspp"], relu=True)
    y = y.reshape(Ny, Hy, Wy, -1)
    y = bilinear_align_corners(y, Hl, Wl).astype(jnp.bfloat16)

    # upsample ASPP output, cast to bf16 before the concat (all glue in bf16)
    xu = bilinear_align_corners(x, Hl, Wl).astype(jnp.bfloat16)

    # lane-aligned channel concat: 256 + 64 + 64 = 384
    cat = jnp.concatenate([xu, y, llf], axis=-1)

    # last_conv1 / last_conv2: 3x3 conv + BN + ReLU (+ Dropout == identity)
    h = conv3x3_bias_relu(cat, params["w_last1"], params["b_last1"])
    h = conv3x3_bias_relu(h, params["w_last2"], params["b_last2"])

    # last_conv3: 1x1 conv with bias (128-padded lane-dense store), no ReLU
    out = matmul_bias(h.reshape(N * Hl * Wl, h.shape[-1]), params["w_last3"],
                      params["b_last3"], relu=False, out_dtype=jnp.float32)
    return out.reshape(N, Hl, Wl, -1)[..., :num_classes]


# ----------------------------------------------------------------------------
# Pure-JAX reference with the SAME bf16-operand / f32-accumulate quantization,
# for correctness checking of the Pallas kernels.
# ----------------------------------------------------------------------------
def decoder_forward_ref(params, x, low_level_feat, y_aspp, *, num_classes):
    def conv1x1(t, w, b, relu, out_dtype):
        o = jnp.einsum("nhwc,co->nhwo", t.astype(jnp.bfloat16), w,
                       preferred_element_type=jnp.float32) + b
        if relu:
            o = jnp.maximum(o, 0.0)
        return o.astype(out_dtype)

    def conv3x3(t, w3, b):
        k3, cout = w3.shape[1], w3.shape[2]
        w = w3.reshape(3, 3, k3 // 3, cout)
        o = jax.lax.conv_general_dilated(
            t.astype(jnp.bfloat16), w, window_strides=(1, 1),
            padding=((1, 1), (1, 1)),
            dimension_numbers=("NHWC", "HWIO", "NHWC"),
            preferred_element_type=jnp.float32)
        return jnp.maximum(o + b, 0.0).astype(jnp.bfloat16)

    N, Hl, Wl, _ = low_level_feat.shape
    llf = conv1x1(low_level_feat, params["w_conv1"], params["b_conv1"],
                  True, jnp.bfloat16)
    y = conv1x1(y_aspp, params["w_yaspp"], params["b_yaspp"], True, jnp.bfloat16)
    y = bilinear_align_corners(y, Hl, Wl).astype(jnp.bfloat16)
    xu = bilinear_align_corners(x, Hl, Wl).astype(jnp.bfloat16)
    cat = jnp.concatenate([xu, y, llf], axis=-1)
    h = conv3x3(cat, params["w_last1"], params["b_last1"])
    h = conv3x3(h, params["w_last2"], params["b_last2"])
    out = conv1x1(h, params["w_last3"], params["b_last3"], False, jnp.float32)
    return out[..., :num_classes]


if __name__ == "__main__":
    key = jax.random.PRNGKey(0)
    k_param, k_x, k_llf, k_y = jax.random.split(key, 4)

    num_classes = 6
    N = 2
    # ASPP-resolution inputs (x, y_aspp) and 2x-larger low-level features.
    x = jax.random.normal(k_x, (N, 8, 8, 256), jnp.float32)
    low_level_feat = jax.random.normal(k_llf, (N, 16, 16, 256), jnp.float32)
    y_aspp = jax.random.normal(k_y, (N, 8, 8, 256), jnp.float32)

    params = make_decoder_params(k_param, num_classes)

    fwd = jax.jit(decoder_forward, static_argnames=("num_classes",))
    out = jax.block_until_ready(
        fwd(params, x, low_level_feat, y_aspp, num_classes=num_classes))
    assert out.shape == (N, 16, 16, num_classes), out.shape

    # Cross-check Pallas kernels against a pure-JAX reference (same bf16 quant).
    ref_fn = jax.jit(decoder_forward_ref, static_argnames=("num_classes",))
    ref = jax.block_until_ready(
        ref_fn(params, x, low_level_feat, y_aspp, num_classes=num_classes))
    np.testing.assert_allclose(np.asarray(out, dtype=np.float32),
                               np.asarray(ref, dtype=np.float32),
                               rtol=2e-2, atol=2e-2)

    print("KERNEL_OK")
</pallas_src>

<mosaic_0001>
module attributes {stable_mosaic.version = 11 : i64} {
  func.func @_matmul_bias_kernel(%arg0: i32, %arg1: memref<64x256xbf16, #tpu.memory_space<vmem>>, %arg2: memref<256x64xbf16, #tpu.memory_space<vmem>>, %arg3: memref<1x64xf32, #tpu.memory_space<vmem>>, %arg4: memref<64x64xbf16, #tpu.memory_space<vmem>>) attributes {dimension_semantics = [#tpu.dimension_semantics<parallel>], iteration_bounds = array<i64: 2>, scalar_prefetch = 0 : i64, scratch_operands = 0 : i64, tpu.core_type = #tpu.core_type<tc>, window_params = [{transform_indices = @transform_0, window_bounds = array<i64: 64, 256>}, {pipeline_mode = #tpu.pipeline_mode<synchronous>, transform_indices = @transform_1, window_bounds = array<i64: 256, 64>}, {pipeline_mode = #tpu.pipeline_mode<synchronous>, transform_indices = @transform_2, window_bounds = array<i64: 1, 64>}, {transform_indices = @transform_3, window_bounds = array<i64: 64, 64>}]} {
    %c0 = arith.constant 0 : index
    %c0_0 = arith.constant 0 : index
    %0 = vector.load %arg1[%c0, %c0_0] : memref<64x256xbf16, #tpu.memory_space<vmem>>, vector<64x256xbf16>
    %c0_1 = arith.constant 0 : index
    %c0_2 = arith.constant 0 : index
    %1 = vector.load %arg2[%c0_1, %c0_2] : memref<256x64xbf16, #tpu.memory_space<vmem>>, vector<256x64xbf16>
    %cst = arith.constant dense<0.000000e+00> : vector<64x64xf32>
    %2 = tpu.matmul %0, %1, %cst {dimension_numbers = #tpu.dot_dimension_numbers<[1], [0], [0], [1], [0, 0, 1, 1], [], []>} : vector<64x256xbf16>, vector<256x64xbf16>, vector<64x64xf32> -> vector<64x64xf32>
    %c0_3 = arith.constant 0 : index
    %c0_4 = arith.constant 0 : index
    %3 = vector.load %arg3[%c0_3, %c0_4] : memref<1x64xf32, #tpu.memory_space<vmem>>, vector<1x64xf32>
    %4 = vector.broadcast %3 : vector<1x64xf32> to vector<64x64xf32>
    %5 = arith.addf %2, %4 : vector<64x64xf32>
    %cst_5 = arith.constant 0.000000e+00 : f32
    %6 = vector.broadcast %cst_5 : f32 to vector<64x64xf32>
    %7 = arith.maximumf %5, %6 : vector<64x64xf32>
    %8 = arith.truncf %7 : vector<64x64xf32> to vector<64x64xbf16>
    %c0_6 = arith.constant 0 : index
    %c0_7 = arith.constant 0 : index
    %9 = vector.load %arg4[%c0_6, %c0_7] : memref<64x64xbf16, #tpu.memory_space<vmem>>, vector<64x64xbf16>
    tpu.vector_store %arg4[%c0_6, %c0_7], %8 {strides = array<i32>} : memref<64x64xbf16, #tpu.memory_space<vmem>>, vector<64x64xbf16>,
    return
  }
  func.func @transform_0(%arg0: i32) -> (i32, i32) {
    %c0_i32 = arith.constant 0 : i32
    %c0_i32_0 = arith.constant 0 : i32
    return %arg0, %c0_i32 : i32, i32
  }
  func.func @transform_1(%arg0: i32) -> (i32, i32) {
    %c0_i32 = arith.constant 0 : i32
    %c0_i32_0 = arith.constant 0 : i32
    %c0_i32_1 = arith.constant 0 : i32
    return %c0_i32, %c0_i32_0 : i32, i32
  }
  func.func @transform_2(%arg0: i32) -> (i32, i32) {
    %c0_i32 = arith.constant 0 : i32
    %c0_i32_0 = arith.constant 0 : i32
    %c0_i32_1 = arith.constant 0 : i32
    return %c0_i32, %c0_i32_0 : i32, i32
  }
  func.func @transform_3(%arg0: i32) -> (i32, i32) {
    %c0_i32 = arith.constant 0 : i32
    %c0_i32_0 = arith.constant 0 : i32
    return %arg0, %c0_i32 : i32, i32
  }
}

module attributes {stable_mosaic.version = 11 : i64} {
  func.func @_matmul_bias_kernel(%arg0: i32, %arg1: memref<256x256xbf16, #tpu.memory_space<vmem>>, %arg2: memref<256x64xbf16, #tpu.memory_space<vmem>>, %arg3: memref<1x64xf32, #tpu.memory_space<vmem>>, %arg4: memref<256x64xbf16, #tpu.memory_space<vmem>>) attributes {dimension_semantics = [#tpu.dimension_semantics<parallel>], iteration_bounds = array<i64: 2>, scalar_prefetch = 0 : i64, scratch_operands = 0 : i64, tpu.core_type = #tpu.core_type<tc>, window_params = [{transform_indices = @transform_0, window_bounds = array<i64: 256, 256>}, {pipeline_mode = #tpu.pipeline_mode<synchronous>, transform_indices = @transform_1, window_bounds = array<i64: 256, 64>}, {pipeline_mode = #tpu.pipeline_mode<synchronous>, transform_indices = @transform_2, window_bounds = array<i64: 1, 64>}, {transform_indices = @transform_3, window_bounds = array<i64: 256, 64>}]} {
    %c0 = arith.constant 0 : index
    %c0_0 = arith.constant 0 : index
    %0 = vector.load %arg1[%c0, %c0_0] : memref<256x256xbf16, #tpu.memory_space<vmem>>, vector<256x256xbf16>
    %c0_1 = arith.constant 0 : index
    %c0_2 = arith.constant 0 : index
    %1 = vector.load %arg2[%c0_1, %c0_2] : memref<256x64xbf16, #tpu.memory_space<vmem>>, vector<256x64xbf16>
    %cst = arith.constant dense<0.000000e+00> : vector<256x64xf32>
    %2 = tpu.matmul %0, %1, %cst {dimension_numbers = #tpu.dot_dimension_numbers<[1], [0], [0], [1], [0, 0, 1, 1], [], []>} : vector<256x256xbf16>, vector<256x64xbf16>, vector<256x64xf32> -> vector<256x64xf32>
    %c0_3 = arith.constant 0 : index
    %c0_4 = arith.constant 0 : index
    %3 = vector.load %arg3[%c0_3, %c0_4] : memref<1x64xf32, #tpu.memory_space<vmem>>, vector<1x64xf32>
    %4 = vector.broadcast %3 : vector<1x64xf32> to vector<256x64xf32>
    %5 = arith.addf %2, %4 : vector<256x64xf32>
    %cst_5 = arith.constant 0.000000e+00 : f32
    %6 = vector.broadcast %cst_5 : f32 to vector<256x64xf32>
    %7 = arith.maximumf %5, %6 : vector<256x64xf32>
    %8 = arith.truncf %7 : vector<256x64xf32> to vector<256x64xbf16>
    %c0_6 = arith.constant 0 : index
    %c0_7 = arith.constant 0 : index
    %9 = vector.load %arg4[%c0_6, %c0_7] : memref<256x64xbf16, #tpu.memory_space<vmem>>, vector<256x64xbf16>
    tpu.vector_store %arg4[%c0_6, %c0_7], %8 {strides = array<i32>} : memref<256x64xbf16, #tpu.memory_space<vmem>>, vector<256x64xbf16>,
    return
  }
  func.func @transform_0(%arg0: i32) -> (i32, i32) {
    %c0_i32 = arith.constant 0 : i32
    %c0_i32_0 = arith.constant 0 : i32
    return %arg0, %c0_i32 : i32, i32
  }
  func.func @transform_1(%arg0: i32) -> (i32, i32) {
    %c0_i32 = arith.constant 0 : i32
    %c0_i32_0 = arith.constant 0 : i32
    %c0_i32_1 = arith.constant 0 : i32
    return %c0_i32, %c0_i32_0 : i32, i32
  }
  func.func @transform_2(%arg0: i32) -> (i32, i32) {
    %c0_i32 = arith.constant 0 : i32
    %c0_i32_0 = arith.constant 0 : i32
    %c0_i32_1 = arith.constant 0 : i32
    return %c0_i32, %c0_i32_0 : i32, i32
  }
  func.func @transform_3(%arg0: i32) -> (i32, i32) {
    %c0_i32 = arith.constant 0 : i32
    %c0_i32_0 = arith.constant 0 : i32
    return %arg0, %c0_i32 : i32, i32
  }
}

module attributes {stable_mosaic.version = 11 : i64} {
  func.func @_conv3x3_kernel(%arg0: i32, %arg1: i32, %arg2: i32, %arg3: memref<1x1x160x1152xbf16, #tpu.memory_space<vmem>>, %arg4: memref<3x1152x256xbf16, #tpu.memory_space<vmem>>, %arg5: memref<1x256xf32, #tpu.memory_space<vmem>>, %arg6: memref<1x1x128x256xbf16, #tpu.memory_space<vmem>>) attributes {dimension_semantics = [#tpu.dimension_semantics<parallel>, #tpu.dimension_semantics<parallel>, #tpu.dimension_semantics<parallel>], iteration_bounds = array<i64: 2, 2, 1>, scalar_prefetch = 0 : i64, scratch_operands = 0 : i64, tpu.core_type = #tpu.core_type<tc>, window_params = [{transform_indices = @transform_0, window_bounds = array<i64: 1, 1, 160, 1152>}, {transform_indices = @transform_1, window_bounds = array<i64: 3, 1152, 256>}, {transform_indices = @transform_2, window_bounds = array<i64: 1, 256>}, {transform_indices = @transform_3, window_bounds = array<i64: 1, 1, 128, 256>}]} {
    %c0 = arith.constant 0 : index
    %c0_0 = arith.constant 0 : index
    %c0_1 = arith.constant 0 : index
    %c0_2 = arith.constant 0 : index
    %0 = vector.load %arg3[%c0, %c0_0, %c0_1, %c0_2] : memref<1x1x160x1152xbf16, #tpu.memory_space<vmem>>, vector<1x1x128x1152xbf16>
    %1 = vector.shape_cast %0 : vector<1x1x128x1152xbf16> to vector<128x1152xbf16>
    %c0_3 = arith.constant 0 : index
    %c0_4 = arith.constant 0 : index
    %c0_5 = arith.constant 0 : index
    %2 = vector.load %arg4[%c0_3, %c0_4, %c0_5] : memref<3x1152x256xbf16, #tpu.memory_space<vmem>>, vector<1x1152x256xbf16>
    %3 = vector.shape_cast %2 : vector<1x1152x256xbf16> to vector<1152x256xbf16>
    %cst = arith.constant dense<0.000000e+00> : vector<128x256xf32>
    %4 = tpu.matmul %1, %3, %cst {dimension_numbers = #tpu.dot_dimension_numbers<[1], [0], [0], [1], [0, 0, 1, 1], [], []>} : vector<128x1152xbf16>, vector<1152x256xbf16>, vector<128x256xf32> -> vector<128x256xf32>
    %c0_6 = arith.constant 0 : index
    %c0_7 = arith.constant 0 : index
    %c16 = arith.constant 16 : index
    %c0_8 = arith.constant 0 : index
    %5 = vector.load %arg3[%c0_6, %c0_7, %c16, %c0_8] : memref<1x1x160x1152xbf16, #tpu.memory_space<vmem>>, vector<1x1x128x1152xbf16>
    %6 = vector.shape_cast %5 : vector<1x1x128x1152xbf16> to vector<128x1152xbf16>
    %c1 = arith.constant 1 : index
    %c0_9 = arith.constant 0 : index
    %c0_10 = arith.constant 0 : index
    %7 = vector.load %arg4[%c1, %c0_9, %c0_10] : memref<3x1152x256xbf16, #tpu.memory_space<vmem>>, vector<1x1152x256xbf16>
    %8 = vector.shape_cast %7 : vector<1x1152x256xbf16> to vector<1152x256xbf16>
    %cst_11 = arith.constant dense<0.000000e+00> : vector<128x256xf32>
    %9 = tpu.matmul %6, %8, %cst_11 {dimension_numbers = #tpu.dot_dimension_numbers<[1], [0], [0], [1], [0, 0, 1, 1], [], []>} : vector<128x1152xbf16>, vector<1152x256xbf16>, vector<128x256xf32> -> vector<128x256xf32>
    %10 = arith.addf %4, %9 : vector<128x256xf32>
    %c0_12 = arith.constant 0 : index
    %c0_13 = arith.constant 0 : index
    %c32 = arith.constant 32 : index
    %c0_14 = arith.constant 0 : index
    %11 = vector.load %arg3[%c0_12, %c0_13, %c32, %c0_14] : memref<1x1x160x1152xbf16, #tpu.memory_space<vmem>>, vector<1x1x128x1152xbf16>
    %12 = vector.shape_cast %11 : vector<1x1x128x1152xbf16> to vector<128x1152xbf16>
    %c2 = arith.constant 2 : index
    %c0_15 = arith.constant 0 : index
    %c0_16 = arith.constant 0 : index
    %13 = vector.load %arg4[%c2, %c0_15, %c0_16] : memref<3x1152x256xbf16, #tpu.memory_space<vmem>>, vector<1x1152x256xbf16>
    %14 = vector.shape_cast %13 : vector<1x1152x256xbf16> to vector<1152x256xbf16>
    %cst_17 = arith.constant dense<0.000000e+00> : vector<128x256xf32>
    %15 = tpu.matmul %12, %14, %cst_17 {dimension_numbers = #tpu.dot_dimension_numbers<[1], [0], [0], [1], [0, 0, 1, 1], [], []>} : vector<128x1152xbf16>, vector<1152x256xbf16>, vector<128x256xf32> -> vector<128x256xf32>
    %16 = arith.addf %10, %15 : vector<128x256xf32>
    %c0_18 = arith.constant 0 : index
    %c0_19 = arith.constant 0 : index
    %17 = vector.load %arg5[%c0_18, %c0_19] : memref<1x256xf32, #tpu.memory_space<vmem>>, vector<1x256xf32>
    %18 = vector.broadcast %17 : vector<1x256xf32> to vector<128x256xf32>
    %19 = arith.addf %16, %18 : vector<128x256xf32>
    %cst_20 = arith.constant 0.000000e+00 : f32
    %20 = vector.broadcast %cst_20 : f32 to vector<128x256xf32>
    %21 = arith.maximumf %19, %20 : vector<128x256xf32>
    %22 = arith.truncf %21 : vector<128x256xf32> to vector<128x256xbf16>
    %c0_21 = arith.constant 0 : index
    %c0_22 = arith.constant 0 : index
    %c0_23 = arith.constant 0 : index
    %c0_24 = arith.constant 0 : index
    %23 = vector.load %arg6[%c0_21, %c0_22, %c0_23, %c0_24] : memref<1x1x128x256xbf16, #tpu.memory_space<vmem>>, vector<1x1x128x256xbf16>
    %24 = vector.shape_cast %23 : vector<1x1x128x256xbf16> to vector<128x256xbf16>
    %25 = vector.shape_cast %22 : vector<128x256xbf16> to vector<1x1x128x256xbf16>
    tpu.vector_store %arg6[%c0_21, %c0_22, %c0_23, %c0_24], %25 {strides = array<i32>} : memref<1x1x128x256xbf16, #tpu.memory_space<vmem>>, vector<1x1x128x256xbf16>,
    return
  }
  func.func @transform_0(%arg0: i32, %arg1: i32, %arg2: i32) -> (i32, i32, i32, i32) {
    %c0_i32 = arith.constant 0 : i32
    %c0_i32_0 = arith.constant 0 : i32
    %c0_i32_1 = arith.constant 0 : i32
    return %arg0, %arg1, %c0_i32, %c0_i32_0 : i32, i32, i32, i32
  }
  func.func @transform_1(%arg0: i32, %arg1: i32, %arg2: i32) -> (i32, i32, i32) {
    %c0_i32 = arith.constant 0 : i32
    %c0_i32_0 = arith.constant 0 : i32
    %c0_i32_1 = arith.constant 0 : i32
    return %c0_i32, %c0_i32_0, %arg2 : i32, i32, i32
  }
  func.func @transform_2(%arg0: i32, %arg1: i32, %arg2: i32) -> (i32, i32) {
    %c0_i32 = arith.constant 0 : i32
    %c0_i32_0 = arith.constant 0 : i32
    return %c0_i32, %arg2 : i32, i32
  }
  func.func @transform_3(%arg0: i32, %arg1: i32, %arg2: i32) -> (i32, i32, i32, i32) {
    %c0_i32 = arith.constant 0 : i32
    %c0_i32_0 = arith.constant 0 : i32
    return %arg0, %arg1, %c0_i32, %arg2 : i32, i32, i32, i32
  }
}

module attributes {stable_mosaic.version = 11 : i64} {
  func.func @_conv3x3_kernel(%arg0: i32, %arg1: i32, %arg2: i32, %arg3: memref<1x1x160x768xbf16, #tpu.memory_space<vmem>>, %arg4: memref<3x768x256xbf16, #tpu.memory_space<vmem>>, %arg5: memref<1x256xf32, #tpu.memory_space<vmem>>, %arg6: memref<1x1x128x256xbf16, #tpu.memory_space<vmem>>) attributes {dimension_semantics = [#tpu.dimension_semantics<parallel>, #tpu.dimension_semantics<parallel>, #tpu.dimension_semantics<parallel>], iteration_bounds = array<i64: 2, 2, 1>, scalar_prefetch = 0 : i64, scratch_operands = 0 : i64, tpu.core_type = #tpu.core_type<tc>, window_params = [{transform_indices = @transform_0, window_bounds = array<i64: 1, 1, 160, 768>}, {transform_indices = @transform_1, window_bounds = array<i64: 3, 768, 256>}, {transform_indices = @transform_2, window_bounds = array<i64: 1, 256>}, {transform_indices = @transform_3, window_bounds = array<i64: 1, 1, 128, 256>}]} {
    %c0 = arith.constant 0 : index
    %c0_0 = arith.constant 0 : index
    %c0_1 = arith.constant 0 : index
    %c0_2 = arith.constant 0 : index
    %0 = vector.load %arg3[%c0, %c0_0, %c0_1, %c0_2] : memref<1x1x160x768xbf16, #tpu.memory_space<vmem>>, vector<1x1x128x768xbf16>
    %1 = vector.shape_cast %0 : vector<1x1x128x768xbf16> to vector<128x768xbf16>
    %c0_3 = arith.constant 0 : index
    %c0_4 = arith.constant 0 : index
    %c0_5 = arith.constant 0 : index
    %2 = vector.load %arg4[%c0_3, %c0_4, %c0_5] : memref<3x768x256xbf16, #tpu.memory_space<vmem>>, vector<1x768x256xbf16>
    %3 = vector.shape_cast %2 : vector<1x768x256xbf16> to vector<768x256xbf16>
    %cst = arith.constant dense<0.000000e+00> : vector<128x256xf32>
    %4 = tpu.matmul %1, %3, %cst {dimension_numbers = #tpu.dot_dimension_numbers<[1], [0], [0], [1], [0, 0, 1, 1], [], []>} : vector<128x768xbf16>, vector<768x256xbf16>, vector<128x256xf32> -> vector<128x256xf32>
    %c0_6 = arith.constant 0 : index
    %c0_7 = arith.constant 0 : index
    %c16 = arith.constant 16 : index
    %c0_8 = arith.constant 0 : index
    %5 = vector.load %arg3[%c0_6, %c0_7, %c16, %c0_8] : memref<1x1x160x768xbf16, #tpu.memory_space<vmem>>, vector<1x1x128x768xbf16>
    %6 = vector.shape_cast %5 : vector<1x1x128x768xbf16> to vector<128x768xbf16>
    %c1 = arith.constant 1 : index
    %c0_9 = arith.constant 0 : index
    %c0_10 = arith.constant 0 : index
    %7 = vector.load %arg4[%c1, %c0_9, %c0_10] : memref<3x768x256xbf16, #tpu.memory_space<vmem>>, vector<1x768x256xbf16>
    %8 = vector.shape_cast %7 : vector<1x768x256xbf16> to vector<768x256xbf16>
    %cst_11 = arith.constant dense<0.000000e+00> : vector<128x256xf32>
    %9 = tpu.matmul %6, %8, %cst_11 {dimension_numbers = #tpu.dot_dimension_numbers<[1], [0], [0], [1], [0, 0, 1, 1], [], []>} : vector<128x768xbf16>, vector<768x256xbf16>, vector<128x256xf32> -> vector<128x256xf32>
    %10 = arith.addf %4, %9 : vector<128x256xf32>
    %c0_12 = arith.constant 0 : index
    %c0_13 = arith.constant 0 : index
    %c32 = arith.constant 32 : index
    %c0_14 = arith.constant 0 : index
    %11 = vector.load %arg3[%c0_12, %c0_13, %c32, %c0_14] : memref<1x1x160x768xbf16, #tpu.memory_space<vmem>>, vector<1x1x128x768xbf16>
    %12 = vector.shape_cast %11 : vector<1x1x128x768xbf16> to vector<128x768xbf16>
    %c2 = arith.constant 2 : index
    %c0_15 = arith.constant 0 : index
    %c0_16 = arith.constant 0 : index
    %13 = vector.load %arg4[%c2, %c0_15, %c0_16] : memref<3x768x256xbf16, #tpu.memory_space<vmem>>, vector<1x768x256xbf16>
    %14 = vector.shape_cast %13 : vector<1x768x256xbf16> to vector<768x256xbf16>
    %cst_17 = arith.constant dense<0.000000e+00> : vector<128x256xf32>
    %15 = tpu.matmul %12, %14, %cst_17 {dimension_numbers = #tpu.dot_dimension_numbers<[1], [0], [0], [1], [0, 0, 1, 1], [], []>} : vector<128x768xbf16>, vector<768x256xbf16>, vector<128x256xf32> -> vector<128x256xf32>
    %16 = arith.addf %10, %15 : vector<128x256xf32>
    %c0_18 = arith.constant 0 : index
    %c0_19 = arith.constant 0 : index
    %17 = vector.load %arg5[%c0_18, %c0_19] : memref<1x256xf32, #tpu.memory_space<vmem>>, vector<1x256xf32>
    %18 = vector.broadcast %17 : vector<1x256xf32> to vector<128x256xf32>
    %19 = arith.addf %16, %18 : vector<128x256xf32>
    %cst_20 = arith.constant 0.000000e+00 : f32
    %20 = vector.broadcast %cst_20 : f32 to vector<128x256xf32>
    %21 = arith.maximumf %19, %20 : vector<128x256xf32>
    %22 = arith.truncf %21 : vector<128x256xf32> to vector<128x256xbf16>
    %c0_21 = arith.constant 0 : index
    %c0_22 = arith.constant 0 : index
    %c0_23 = arith.constant 0 : index
    %c0_24 = arith.constant 0 : index
    %23 = vector.load %arg6[%c0_21, %c0_22, %c0_23, %c0_24] : memref<1x1x128x256xbf16, #tpu.memory_space<vmem>>, vector<1x1x128x256xbf16>
    %24 = vector.shape_cast %23 : vector<1x1x128x256xbf16> to vector<128x256xbf16>
    %25 = vector.shape_cast %22 : vector<128x256xbf16> to vector<1x1x128x256xbf16>
    tpu.vector_store %arg6[%c0_21, %c0_22, %c0_23, %c0_24], %25 {strides = array<i32>} : memref<1x1x128x256xbf16, #tpu.memory_space<vmem>>, vector<1x1x128x256xbf16>,
    return
  }
  func.func @transform_0(%arg0: i32, %arg1: i32, %arg2: i32) -> (i32, i32, i32, i32) {
    %c0_i32 = arith.constant 0 : i32
    %c0_i32_0 = arith.constant 0 : i32
    %c0_i32_1 = arith.constant 0 : i32
    return %arg0, %arg1, %c0_i32, %c0_i32_0 : i32, i32, i32, i32
  }
  func.func @transform_1(%arg0: i32, %arg1: i32, %arg2: i32) -> (i32, i32, i32) {
    %c0_i32 = arith.constant 0 : i32
    %c0_i32_0 = arith.constant 0 : i32
    %c0_i32_1 = arith.constant 0 : i32
    return %c0_i32, %c0_i32_0, %arg2 : i32, i32, i32
  }
  func.func @transform_2(%arg0: i32, %arg1: i32, %arg2: i32) -> (i32, i32) {
    %c0_i32 = arith.constant 0 : i32
    %c0_i32_0 = arith.constant 0 : i32
    return %c0_i32, %arg2 : i32, i32
  }
  func.func @transform_3(%arg0: i32, %arg1: i32, %arg2: i32) -> (i32, i32, i32, i32) {
    %c0_i32 = arith.constant 0 : i32
    %c0_i32_0 = arith.constant 0 : i32
    return %arg0, %arg1, %c0_i32, %arg2 : i32, i32, i32, i32
  }
}

module attributes {stable_mosaic.version = 11 : i64} {
  func.func @_matmul_bias_kernel(%arg0: i32, %arg1: memref<256x256xbf16, #tpu.memory_space<vmem>>, %arg2: memref<256x128xbf16, #tpu.memory_space<vmem>>, %arg3: memref<1x128xf32, #tpu.memory_space<vmem>>, %arg4: memref<256x128xf32, #tpu.memory_space<vmem>>) attributes {dimension_semantics = [#tpu.dimension_semantics<parallel>], iteration_bounds = array<i64: 2>, scalar_prefetch = 0 : i64, scratch_operands = 0 : i64, tpu.core_type = #tpu.core_type<tc>, window_params = [{transform_indices = @transform_0, window_bounds = array<i64: 256, 256>}, {pipeline_mode = #tpu.pipeline_mode<synchronous>, transform_indices = @transform_1, window_bounds = array<i64: 256, 128>}, {pipeline_mode = #tpu.pipeline_mode<synchronous>, transform_indices = @transform_2, window_bounds = array<i64: 1, 128>}, {transform_indices = @transform_3, window_bounds = array<i64: 256, 128>}]} {
    %c0 = arith.constant 0 : index
    %c0_0 = arith.constant 0 : index
    %0 = vector.load %arg1[%c0, %c0_0] : memref<256x256xbf16, #tpu.memory_space<vmem>>, vector<256x256xbf16>
    %c0_1 = arith.constant 0 : index
    %c0_2 = arith.constant 0 : index
    %1 = vector.load %arg2[%c0_1, %c0_2] : memref<256x128xbf16, #tpu.memory_space<vmem>>, vector<256x128xbf16>
    %cst = arith.constant dense<0.000000e+00> : vector<256x128xf32>
    %2 = tpu.matmul %0, %1, %cst {dimension_numbers = #tpu.dot_dimension_numbers<[1], [0], [0], [1], [0, 0, 1, 1], [], []>} : vector<256x256xbf16>, vector<256x128xbf16>, vector<256x128xf32> -> vector<256x128xf32>
    %c0_3 = arith.constant 0 : index
    %c0_4 = arith.constant 0 : index
    %3 = vector.load %arg3[%c0_3, %c0_4] : memref<1x128xf32, #tpu.memory_space<vmem>>, vector<1x128xf32>
    %4 = vector.broadcast %3 : vector<1x128xf32> to vector<256x128xf32>
    %5 = arith.addf %2, %4 : vector<256x128xf32>
    %c0_5 = arith.constant 0 : index
    %c0_6 = arith.constant 0 : index
    %6 = vector.load %arg4[%c0_5, %c0_6] : memref<256x128xf32, #tpu.memory_space<vmem>>, vector<256x128xf32>
    tpu.vector_store %arg4[%c0_5, %c0_6], %5 {strides = array<i32>} : memref<256x128xf32, #tpu.memory_space<vmem>>, vector<256x128xf32>,
    return
  }
  func.func @transform_0(%arg0: i32) -> (i32, i32) {
    %c0_i32 = arith.constant 0 : i32
    %c0_i32_0 = arith.constant 0 : i32
    return %arg0, %c0_i32 : i32, i32
  }
  func.func @transform_1(%arg0: i32) -> (i32, i32) {
    %c0_i32 = arith.constant 0 : i32
    %c0_i32_0 = arith.constant 0 : i32
    %c0_i32_1 = arith.constant 0 : i32
    return %c0_i32, %c0_i32_0 : i32, i32
  }
  func.func @transform_2(%arg0: i32) -> (i32, i32) {
    %c0_i32 = arith.constant 0 : i32
    %c0_i32_0 = arith.constant 0 : i32
    %c0_i32_1 = arith.constant 0 : i32
    return %c0_i32, %c0_i32_0 : i32, i32
  }
  func.func @transform_3(%arg0: i32) -> (i32, i32) {
    %c0_i32 = arith.constant 0 : i32
    %c0_i32_0 = arith.constant 0 : i32
    return %arg0, %c0_i32 : i32, i32
  }
}

</mosaic_0001>

<bundles_post_ra>
// kernel: decoder_forward.6
= control target key start
LH: loop header
LB: loop body
LE: loop exit
PB: predicated region body
PF: predicated region fallthrough
CT: control target
= control target key end

     0   :  { %8 = vsyncpa [#allocation3], 0  ;;  %s774_s12 = smov 0   ;;  %s892_s0 = inlined_call_operand.vmem [shape: bf16[128,256], index: 0, kind: input, shape index: {}]   ;;  %s893_s1 = inlined_call_operand.vmem [shape: bf16[256,64], index: 1, kind: input, shape index: {}]   ;;  %s894_s2 = inlined_call_operand.hbm [shape: f32[1,64], index: 2, kind: input, shape index: {}]   ;;  %s895_s3 = inlined_call_operand.vmem [shape: bf16[128,64], index: 3, kind: output, shape index: {}]  }
   0x1 LB: > { %s556_s13 = sadd.s32 4294967295, %s751_s12   ;;  %p558_p0 = scmp.ge.s32.totalorder %s751_s12, 1  ;;  %s751_s12 = sphi %s774_s12, %s14_s12  }
   0x2   : > { %p113_p1 = scmp.lt.s32.totalorder %s751_s12, 3  ;;  %p786_p3 = scmp.eq.s32.totalorder %s556_s13, 0 }
   0x3   : > { %s753_s16 = smov [#allocation2]  }
   0x4   : > { %p782_p2 = pnand %p558_p0, %p113_p1  ;;  %s129_s17 = sshll.u32 %s753_s16, 4  ;;  %s130_s17 = int_to_ptr.vmem [resolvable:$true] %s129_s17 }
   0x5   : > { %s726_s18 = scalar_lea.vmem %s130_s17, 16  ;;  %s733_s19 = scalar_lea.vmem %s130_s17, 32 }
   0x6   : > { %p672_p4 = pneg %p782_p2  ;;  %p727_p7 = scmp.ne.s32.totalorder %s130_s17, %s726_s18 }
   0x7   : > { %p734_p10 = scmp.lt.s32.totalorder %s130_s17, %s130_s17  ;;  %p735_p11 = scmp.lt.s32.totalorder %s733_s19, %s726_s18 }
   0x8   : > { %p673_p5 = pnand %p786_p3, %p672_p4 }
   0x9   : > { %p736_p12 = por %p735_p11, %p734_p10 }
   0xa   : > { %p717_p6 = pneg %p673_p5 }
   0xc   : > { %p729_p8 = pnand %p727_p7, %p717_p6 }
   0xe   : > { %p730_p9 = pneg %p729_p8 }
  0x10   : > { %p737_p13 = pnand %p736_p12, %p730_p9 }
  0x12   : > { %740 = shalt.err (!%p737_p13)
}
  0x13   : > { %675 = dma.hbm_to_vmem [thread:$0]  (!%p673_p5), %s894_s2, 16, %s130_s17, [#allocation3]  }
  0x14   : > { %152 = sbr.rel (%p782_p2) target bundleno = 275 (0x113), region = 32 }
  0x19   : > { %746 = dma.done.wait (%p786_p3), [#allocation3], 16  }
  0x1a   : > { %748 = vsyncadd (%p786_p3), [#allocation3], 4294967280  ;;  %v687_v0 = vld [vmem:[%s893_s1 + $0x78] sm:$0xff]   ;;  %s563_s24 = sshll.u32 %s556_s13, 3  ;;  %v689_v2 = vld [vmem:[%s893_s1 + $0x70] sm:$0xff]   ;;  %vm479_vm0 = vcmask 519168  }
  0x1b   : > { %v688_v1 = vld [vmem:[%s893_s1 + $0x38] sm:$0xff]   ;;  %612 = vmatprep.subr.bf16.mxu0 %v687_v0  ;;  %652 = vmatprep.subr.bf16.mxu1 %v687_v0  ;;  %v690_v3 = vld [vmem:[%s893_s1 + $0x30] sm:$0xff]   ;;  %p178_p0 = scmp.lt.s32.totalorder %s563_s24, 15  ;;  %v691_v4 = vld [vmem:[%s893_s1 + $0x68] sm:$0xff]  }
  0x1c   : > { %613 = vmatpush3.bf16.msra.mxu0 %v688_v1  ;;  %660 = vmatpush3.bf16.msra.mxu1 %v688_v1  ;;  %v692_v5 = vld [vmem:[%s893_s1 + $0x28] sm:$0xff]   ;;  %v693_v6 = vld [vmem:[%s893_s1 + $0x60] sm:$0xff]   ;;  %v695_v8 = vld [vmem:[%s893_s1 + $0x58] sm:$0xff]  }
  0x1d   : > { %614 = vmatprep.subr.bf16.mxu0 %v689_v2  ;;  %653 = vmatprep.subr.bf16.mxu1 %v689_v2  ;;  %s899_s24 = smov (!%p178_p0, %s563_s24), 15  ;;  %v694_v7 = vld [vmem:[%s893_s1 + $0x20] sm:$0xff]   ;;  %v696_v9 = vld [vmem:[%s893_s1 + $0x18] sm:$0xff]   ;;  %v697_v10 = vld [vmem:[%s893_s1 + $0x50] sm:$0xff]  }
  0x1e   : > { %s603_s13 = sshll.u32 %s899_s24, 3  ;;  %v698_v13 = vld [vmem:[%s893_s1 + $0x10] sm:$0xff]   ;;  %v699_v14 = vld [vmem:[%s893_s1 + $0x48] sm:$0xff]   ;;  %v701_v16 = vld [vmem:[%s893_s1 + $0x40] sm:$0xff]   ;;  %s567_s7 = sshll.u32 %s899_s24, 2 }
  0x1f   : > { %s836_s18 = scalar_lea.vmem %s892_s0, %s603_s13  ;;  %v700_v15 = vld [vmem:[%s893_s1 + $0x8] sm:$0xff]   ;;  %v702_v17 = vld [vmem:[%s893_s1] sm:$0xff]   ;;  %s871_s10 = scalar_lea.vmem %s895_s3, %s567_s7 }
  0x20   : > { %615 = vmatpush3.bf16.msra.mxu0 %v690_v3  ;;  %661 = vmatpush3.bf16.msra.mxu1 %v690_v3  ;;  %v705_v11 = vld [vmem:[%s836_s18 + $0x4] ss:$8 sps:$4 sm:$0xff]   ;;  %v703_v18 = vld [vmem:[%s836_s18] ss:$8 sps:$4 sm:$0xff]   ;;  %v709_v20 = vld [vmem:[%s836_s18 + $0x14] ss:$8 sps:$4 sm:$0xff]  }
  0x21   : > { %616 = vmatprep.subr.bf16.mxu0 %v691_v4  ;;  %654 = vmatprep.subr.bf16.mxu1 %v691_v4  ;;  %v708_v12 = vld [vmem:[%s836_s18 + $0x24] ss:$8 sps:$4 sm:$0xff]   ;;  %v706_v19 = vld [vmem:[%s836_s18 + $0x20] ss:$8 sps:$4 sm:$0xff]   ;;  %v711_v21 = vld [vmem:[%s836_s18 + $0x34] ss:$8 sps:$4 sm:$0xff]  }
  0x22   : > { %406 = vmatprep.mubr.bf16.mxu0 %v705_v11  ;;  %422 = vmatprep.mubr.bf16.mxu1 %v708_v12  ;;  %v713_v22 = vld [vmem:[%s836_s18 + $0x10] ss:$8 sps:$4 sm:$0xff]   ;;  %v568_v26 = vld [vmem:[#allocation2] ss:$0 sm:$0xff] }
  0x23   : > { %v714_v23 = vld [vmem:[%s836_s18 + $0x30] ss:$8 sps:$4 sm:$0xff]  }
  0x24   : > { %617 = vmatpush3.bf16.msra.mxu0 %v692_v5  ;;  %662 = vmatpush3.bf16.msra.mxu1 %v692_v5 }
  0x25   : > { %618 = vmatprep.subr.bf16.mxu0 %v693_v6  ;;  %655 = vmatprep.subr.bf16.mxu1 %v693_v6 }
  0x28   : > { %619 = vmatpush3.bf16.msra.mxu0 %v694_v7  ;;  %663 = vmatpush3.bf16.msra.mxu1 %v694_v7 }
  0x29   : > { %620 = vmatprep.subr.bf16.mxu0 %v695_v8  ;;  %656 = vmatprep.subr.bf16.mxu1 %v695_v8 }
  0x2c   : > { %621 = vmatpush3.bf16.msra.mxu0 %v696_v9  ;;  %664 = vmatpush3.bf16.msra.mxu1 %v696_v9 }
  0x2d   : > { %622 = vmatprep.subr.bf16.mxu0 %v697_v10  ;;  %657 = vmatprep.subr.bf16.mxu1 %v697_v10 }
  0x30   : > { %623 = vmatpush3.bf16.msra.mxu0 %v698_v13  ;;  %665 = vmatpush3.bf16.msra.mxu1 %v698_v13 }
  0x31   : > { %624 = vmatprep.subr.bf16.mxu0 %v699_v14  ;;  %658 = vmatprep.subr.bf16.mxu1 %v699_v14 }
  0x34   : > { %625 = vmatpush3.bf16.msra.mxu0 %v700_v15  ;;  %666 = vmatpush3.bf16.msra.mxu1 %v700_v15 }
  0x35   : > { %626 = vmatprep.subr.bf16.mxu0 %v701_v16  ;;  %659 = vmatprep.subr.bf16.mxu1 %v701_v16 }
  0x38   : > { %627 = vmatpush3.bf16.msra.mxu0 %v702_v17  ;;  %667 = vmatpush3.bf16.msra.mxu1 %v702_v17 }
  0x3b   : > { %407 = vmatmul.mubr.bf16.vlgmr.msra.gmra.mxu0 %v703_v18  ;;  %423 = vmatmul.mubr.bf16.vlgmr.msra.gmra.mxu1 %v706_v19 }
  0x3c   : > { %414 = vmatprep.mubr.bf16.mxu0 %v709_v20  ;;  %430 = vmatprep.mubr.bf16.mxu1 %v711_v21 }
  0x43   : > { %415 = vmatmul.mubr.bf16.gmra.mxu0 %v713_v22  ;;  %431 = vmatmul.mubr.bf16.gmra.mxu1 %v714_v23 }
  0xfb   : > { %v628_v24 = vpop.f32.mrf.mxu0  ;;  %v640_v25 = vpop.f32.mrf.mxu1 }
  0xfd   : > { %v629_v27 = vpop.f32.mrf.mxu0  ;;  %v641_v28 = vpop.f32.mrf.mxu1 }
  0xfe   : > { %v630_v29 = vadd.f32 %v629_v27, %v628_v24  ;;  %v642_v30 = vadd.f32 %v641_v28, %v640_v25 }
  0xff   : > { %v631_v31 = vpop.f32.mrf.mxu0  ;;  %v643_v32 = vpop.f32.mrf.mxu1 }
 0x100   : > { %v409_v33 = vadd.f32 %v630_v29, %v568_v26  ;;  %v425_v34 = vadd.f32 %v642_v30, %v568_v26 }
 0x101   : > { %v632_v35 = vpop.f32.mrf.mxu0  ;;  %v644_v36 = vpop.f32.mrf.mxu1 }
 0x102   : > { %v439_v37 = vmax.f32 %v409_v33, 0.0  ;;  %v443_v38 = vmax.f32 %v425_v34, 0.0  ;;  %v633_v39 = vadd.f32 %v632_v35, %v631_v31  ;;  %v645_v40 = vadd.f32 %v644_v36, %v643_v32 }
 0x103   : > { %v634_v41 = vpop.f32.mrf.mxu0  ;;  %v646_v42 = vpop.f32.mrf.mxu1 }
 0x104   : > { %v604_v43 = vpack.c.bf16 %v439_v37, %v439_v37  ;;  %v608_v44 = vpack.c.bf16 %v443_v38, %v443_v38  ;;  %v412_v45 = vadd.f32 %v633_v39, %v568_v26  ;;  %v428_v46 = vadd.f32 %v645_v40, %v568_v26 }
 0x105   : > { %v635_v47 = vpop.f32.mrf.mxu0  ;;  %v647_v48 = vpop.f32.mrf.mxu1 }
 0x106   : > { %480 = vst.msk [vmem:[%s871_s10] sm:$0xf] %vm479_vm0, %v604_v43  ;;  %484 = vst.msk [vmem:[%s871_s10 + $0x10] sm:$0xf] %vm479_vm0, %v608_v44  ;;  %v440_v49 = vmax.f32 %v412_v45, 0.0  ;;  %v444_v50 = vmax.f32 %v428_v46, 0.0  ;;  %v636_v51 = vadd.f32 %v635_v47, %v634_v41  ;;  %v648_v52 = vadd.f32 %v647_v48, %v646_v42 }
 0x107   : > { %v637_v53 = vpop.f32.mrf.mxu0  ;;  %v649_v54 = vpop.f32.mrf.mxu1 }
 0x108   : > { %v605_v55 = vpack.c.bf16 %v440_v49, %v440_v49  ;;  %v609_v56 = vpack.c.bf16 %v444_v50, %v444_v50  ;;  %v417_v57 = vadd.f32 %v636_v51, %v568_v26  ;;  %v433_v58 = vadd.f32 %v648_v52, %v568_v26 }
 0x109   : > { %v638_v59 = vpop.f32.mrf.mxu0  ;;  %v650_v60 = vpop.f32.mrf.mxu1 }
 0x10a   : > { %481 = vst.msk [vmem:[%s871_s10 + $0x4] sm:$0xf] %vm479_vm0, %v605_v55  ;;  %485 = vst.msk [vmem:[%s871_s10 + $0x14] sm:$0xf] %vm479_vm0, %v609_v56  ;;  %v441_v61 = vmax.f32 %v417_v57, 0.0  ;;  %v445_v62 = vmax.f32 %v433_v58, 0.0  ;;  %v639_v63 = vadd.f32 %v638_v59, %v637_v53  ;;  %v651_v0 = vadd.f32 %v650_v60, %v649_v54 }
 0x10c   : > { %v606_v1 = vpack.c.bf16 %v441_v61, %v441_v61  ;;  %v610_v2 = vpack.c.bf16 %v445_v62, %v445_v62  ;;  %v420_v3 = vadd.f32 %v639_v63, %v568_v26  ;;  %v436_v4 = vadd.f32 %v651_v0, %v568_v26 }
 0x10e   : > { %482 = vst.msk [vmem:[%s871_s10 + $0x8] sm:$0xf] %vm479_vm0, %v606_v1  ;;  %486 = vst.msk [vmem:[%s871_s10 + $0x18] sm:$0xf] %vm479_vm0, %v610_v2  ;;  %v442_v5 = vmax.f32 %v420_v3, 0.0  ;;  %v446_v6 = vmax.f32 %v436_v4, 0.0 }
 0x110   : > { %v607_v7 = vpack.c.bf16 %v442_v5, %v442_v5  ;;  %v611_v8 = vpack.c.bf16 %v446_v6, %v446_v6 }
 0x112   : > { %483 = vst.msk [vmem:[%s871_s10 + $0xc] sm:$0xf] %vm479_vm0, %v607_v7  ;;  %487 = vst.msk [vmem:[%s871_s10 + $0x1c] sm:$0xf] %vm479_vm0, %v611_v8 }
 0x113 PF: > { %s14_s12 = sadd.s32 1, %s751_s12  }
 0x114   : > { %p11_p1 = scmp.ge.s32.totalorder %s14_s12, 4  }
 0x116   :  { %13 = sbr.rel (!%p11_p1) target bundleno = 1 (0x1), region = 67 }
 0x11b   :  { %510 = vsyncpa [#allocation3], 1 }
 0x11c   :  { %512 = vsyncpa [#allocation3 + $0x1], 1 }

// kernel: decoder_forward.5
= control target key start
LH: loop header
LB: loop body
LE: loop exit
PB: predicated region body
PF: predicated region fallthrough
CT: control target
= control target key end

     0   :  { %s1269_s12 = smov 0   ;;  %s1475_s0 = inlined_call_operand.vmem [shape: bf16[512,256], index: 0, kind: input, shape index: {}]   ;;  %s1476_s1 = inlined_call_operand.vmem [shape: bf16[256,64], index: 1, kind: input, shape index: {}]   ;;  %s1477_s2 = inlined_call_operand.vmem [shape: f32[1,64], index: 2, kind: input, shape index: {}]   ;;  %s1478_s3 = inlined_call_operand.vmem [shape: bf16[512,64], index: 3, kind: output, shape index: {}]  }
   0x1 LB: > { %s915_s13 = sadd.s32 4294967295, %s1247_s12   ;;  %p919_p0 = scmp.ge.s32.totalorder %s1247_s12, 1  ;;  %s1247_s12 = sphi %s1269_s12, %s13_s12  }
   0x2   : > { %p139_p1 = scmp.lt.s32.totalorder %s1247_s12, 3 }
   0x4   : > { %p140_p2 = pnand %p919_p0, %p139_p1 }
   0x5   : > { %s920_s16 = sshll.u32 (!%p140_p2), %s915_s13, 5 }
   0x6   : > { %143 = sbr.rel (%p140_p2) target bundleno = 308 (0x134), region = 32  ;;  %p165_p3 = scmp.lt.s32.totalorder (!%p140_p2), %s920_s16, 63 }
   0xb   : > { %v1177_v0 = vld [vmem:[%s1476_s1 + $0x78] sm:$0xff]   ;;  %v1179_v2 = vld [vmem:[%s1476_s1 + $0x70] sm:$0xff]   ;;  %v1181_v4 = vld [vmem:[%s1476_s1 + $0x68] sm:$0xff]   ;;  %s1480_s16 = smov (!%p165_p3, %s920_s16), 63  ;;  %vm826_vm0 = vcmask 519168  }
   0xc   : > { %v1178_v1 = vld [vmem:[%s1476_s1 + $0x38] sm:$0xff]   ;;  %1041 = vmatprep.subr.bf16.mxu0 %v1177_v0  ;;  %1153 = vmatprep.subr.bf16.mxu1 %v1177_v0  ;;  %v1180_v3 = vld [vmem:[%s1476_s1 + $0x30] sm:$0xff]   ;;  %v1182_v5 = vld [vmem:[%s1476_s1 + $0x28] sm:$0xff]   ;;  %s1008_s4 = sshll.u32 %s1480_s16, 3  ;;  %s924_s28 = sshll.u32 %s1480_s16, 2 }
   0xd   : > { %1042 = vmatpush3.bf16.msra.mxu0 %v1178_v1  ;;  %1161 = vmatpush3.bf16.msra.mxu1 %v1178_v1  ;;  %v1183_v6 = vld [vmem:[%s1476_s1 + $0x60] sm:$0xff]   ;;  %v1185_v8 = vld [vmem:[%s1476_s1 + $0x58] sm:$0xff]   ;;  %s1310_s9 = scalar_lea.vmem %s1475_s0, %s1008_s4  ;;  %v1187_v10 = vld [vmem:[%s1476_s1 + $0x50] sm:$0xff]   ;;  %s1376_s4 = scalar_lea.vmem %s1478_s3, %s924_s28 }
   0xe   : > { %1043 = vmatprep.subr.bf16.mxu0 %v1179_v2  ;;  %1154 = vmatprep.subr.bf16.mxu1 %v1179_v2  ;;  %v1184_v7 = vld [vmem:[%s1476_s1 + $0x20] sm:$0xff]   ;;  %v1186_v9 = vld [vmem:[%s1476_s1 + $0x18] sm:$0xff]   ;;  %v1188_v13 = vld [vmem:[%s1476_s1 + $0x10] sm:$0xff]  }
   0xf   : > { %v1195_v11 = vld [vmem:[%s1310_s9 + $0x4] ss:$8 sps:$4 sm:$0xff]   ;;  %v1193_v18 = vld [vmem:[%s1310_s9] ss:$8 sps:$4 sm:$0xff]   ;;  %v1199_v20 = vld [vmem:[%s1310_s9 + $0x14] ss:$8 sps:$4 sm:$0xff]  }
  0x10   : > { %v1198_v12 = vld [vmem:[%s1310_s9 + $0x84] ss:$8 sps:$4 sm:$0xff]   ;;  %537 = vmatprep.mubr.bf16.mxu0 %v1195_v11  ;;  %v1196_v19 = vld [vmem:[%s1310_s9 + $0x80] ss:$8 sps:$4 sm:$0xff]   ;;  %v1201_v21 = vld [vmem:[%s1310_s9 + $0x94] ss:$8 sps:$4 sm:$0xff]  }
  0x11   : > { %1044 = vmatpush3.bf16.msra.mxu0 %v1180_v3  ;;  %1162 = vmatpush3.bf16.msra.mxu1 %v1180_v3  ;;  %v1189_v14 = vld [vmem:[%s1476_s1 + $0x48] sm:$0xff]   ;;  %v1191_v16 = vld [vmem:[%s1476_s1 + $0x40] sm:$0xff]   ;;  %v1203_v22 = vld [vmem:[%s1310_s9 + $0x10] ss:$8 sps:$4 sm:$0xff]  }
  0x12   : > { %1045 = vmatprep.subr.bf16.mxu0 %v1181_v4  ;;  %1155 = vmatprep.subr.bf16.mxu1 %v1181_v4  ;;  %v1190_v15 = vld [vmem:[%s1476_s1 + $0x8] sm:$0xff]   ;;  %v1192_v17 = vld [vmem:[%s1476_s1] sm:$0xff]   ;;  %v1204_v23 = vld [vmem:[%s1310_s9 + $0x90] ss:$8 sps:$4 sm:$0xff]  }
  0x13   : > { %601 = vmatprep.mubr.bf16.mxu1 %v1198_v12  ;;  %v1205_v24 = vld [vmem:[%s1310_s9 + $0x24] ss:$8 sps:$4 sm:$0xff]   ;;  %v1209_v26 = vld [vmem:[%s1310_s9 + $0x20] ss:$8 sps:$4 sm:$0xff]   ;;  %v1211_v28 = vld [vmem:[%s1310_s9 + $0x34] ss:$8 sps:$4 sm:$0xff]  }
  0x14   : > { %v1207_v25 = vld [vmem:[%s1310_s9 + $0xa4] ss:$8 sps:$4 sm:$0xff]   ;;  %v1210_v27 = vld [vmem:[%s1310_s9 + $0xa0] ss:$8 sps:$4 sm:$0xff]   ;;  %v1213_v29 = vld [vmem:[%s1310_s9 + $0xb4] ss:$8 sps:$4 sm:$0xff]  }
  0x15   : > { %1046 = vmatpush3.bf16.msra.mxu0 %v1182_v5  ;;  %1163 = vmatpush3.bf16.msra.mxu1 %v1182_v5  ;;  %v1215_v30 = vld [vmem:[%s1310_s9 + $0x30] ss:$8 sps:$4 sm:$0xff]   ;;  %v1217_v32 = vld [vmem:[%s1310_s9 + $0x44] ss:$8 sps:$4 sm:$0xff]   ;;  %v1221_v34 = vld [vmem:[%s1310_s9 + $0x40] ss:$8 sps:$4 sm:$0xff]  }
  0x16   : > { %1047 = vmatprep.subr.bf16.mxu0 %v1183_v6  ;;  %1156 = vmatprep.subr.bf16.mxu1 %v1183_v6  ;;  %v1216_v31 = vld [vmem:[%s1310_s9 + $0xb0] ss:$8 sps:$4 sm:$0xff]   ;;  %v1219_v33 = vld [vmem:[%s1310_s9 + $0xc4] ss:$8 sps:$4 sm:$0xff]   ;;  %v1222_v35 = vld [vmem:[%s1310_s9 + $0xc0] ss:$8 sps:$4 sm:$0xff]  }
  0x17   : > { %v1223_v36 = vld [vmem:[%s1310_s9 + $0x54] ss:$8 sps:$4 sm:$0xff]   ;;  %v1227_v38 = vld [vmem:[%s1310_s9 + $0x50] ss:$8 sps:$4 sm:$0xff]   ;;  %v1229_v40 = vld [vmem:[%s1310_s9 + $0x64] ss:$8 sps:$4 sm:$0xff]  }
  0x18   : > { %v1225_v37 = vld [vmem:[%s1310_s9 + $0xd4] ss:$8 sps:$4 sm:$0xff]   ;;  %v1228_v39 = vld [vmem:[%s1310_s9 + $0xd0] ss:$8 sps:$4 sm:$0xff]   ;;  %v1231_v41 = vld [vmem:[%s1310_s9 + $0xe4] ss:$8 sps:$4 sm:$0xff]  }
  0x19   : > { %1048 = vmatpush3.bf16.msra.mxu0 %v1184_v7  ;;  %1164 = vmatpush3.bf16.msra.mxu1 %v1184_v7  ;;  %v1233_v42 = vld [vmem:[%s1310_s9 + $0x60] ss:$8 sps:$4 sm:$0xff]   ;;  %v1235_v44 = vld [vmem:[%s1310_s9 + $0x74] ss:$8 sps:$4 sm:$0xff]   ;;  %v1239_v46 = vld [vmem:[%s1310_s9 + $0x70] ss:$8 sps:$4 sm:$0xff]  }
  0x1a   : > { %1049 = vmatprep.subr.bf16.mxu0 %v1185_v8  ;;  %1157 = vmatprep.subr.bf16.mxu1 %v1185_v8  ;;  %v1234_v43 = vld [vmem:[%s1310_s9 + $0xe0] ss:$8 sps:$4 sm:$0xff]   ;;  %v1237_v45 = vld [vmem:[%s1310_s9 + $0xf4] ss:$8 sps:$4 sm:$0xff]   ;;  %v1240_v47 = vld [vmem:[%s1310_s9 + $0xf0] ss:$8 sps:$4 sm:$0xff]  }
  0x1b   : > { %v1368_v50 = vld [vmem:[%s1477_s2] ss:$0 sm:$0xff] }
  0x1d   : > { %1050 = vmatpush3.bf16.msra.mxu0 %v1186_v9  ;;  %1165 = vmatpush3.bf16.msra.mxu1 %v1186_v9 }
  0x1e   : > { %1051 = vmatprep.subr.bf16.mxu0 %v1187_v10  ;;  %1158 = vmatprep.subr.bf16.mxu1 %v1187_v10 }
  0x21   : > { %1052 = vmatpush3.bf16.msra.mxu0 %v1188_v13  ;;  %1166 = vmatpush3.bf16.msra.mxu1 %v1188_v13 }
  0x22   : > { %1053 = vmatprep.subr.bf16.mxu0 %v1189_v14  ;;  %1159 = vmatprep.subr.bf16.mxu1 %v1189_v14 }
  0x25   : > { %1054 = vmatpush3.bf16.msra.mxu0 %v1190_v15  ;;  %1167 = vmatpush3.bf16.msra.mxu1 %v1190_v15 }
  0x26   : > { %1055 = vmatprep.subr.bf16.mxu0 %v1191_v16  ;;  %1160 = vmatprep.subr.bf16.mxu1 %v1191_v16 }
  0x29   : > { %1056 = vmatpush3.bf16.msra.mxu0 %v1192_v17  ;;  %1168 = vmatpush3.bf16.msra.mxu1 %v1192_v17 }
  0x2c   : > { %538 = vmatmul.mubr.bf16.vlgmr.msra.gmra.mxu0 %v1193_v18  ;;  %602 = vmatmul.mubr.bf16.vlgmr.msra.gmra.mxu1 %v1196_v19 }
  0x2d   : > { %545 = vmatprep.mubr.bf16.mxu0 %v1199_v20  ;;  %609 = vmatprep.mubr.bf16.mxu1 %v1201_v21 }
  0x34   : > { %546 = vmatmul.mubr.bf16.gmra.mxu0 %v1203_v22  ;;  %610 = vmatmul.mubr.bf16.gmra.mxu1 %v1204_v23 }
  0x35   : > { %553 = vmatprep.mubr.bf16.mxu0 %v1205_v24  ;;  %617 = vmatprep.mubr.bf16.mxu1 %v1207_v25 }
  0x3c   : > { %554 = vmatmul.mubr.bf16.gmra.mxu0 %v1209_v26  ;;  %618 = vmatmul.mubr.bf16.gmra.mxu1 %v1210_v27 }
  0x3d   : > { %561 = vmatprep.mubr.bf16.mxu0 %v1211_v28  ;;  %625 = vmatprep.mubr.bf16.mxu1 %v1213_v29 }
  0x44   : > { %562 = vmatmul.mubr.bf16.gmra.mxu0 %v1215_v30  ;;  %626 = vmatmul.mubr.bf16.gmra.mxu1 %v1216_v31 }
  0x45   : > { %569 = vmatprep.mubr.bf16.mxu0 %v1217_v32  ;;  %633 = vmatprep.mubr.bf16.mxu1 %v1219_v33 }
  0x4c   : > { %570 = vmatmul.mubr.bf16.gmra.mxu0 %v1221_v34  ;;  %634 = vmatmul.mubr.bf16.gmra.mxu1 %v1222_v35 }
  0x4d   : > { %577 = vmatprep.mubr.bf16.mxu0 %v1223_v36  ;;  %641 = vmatprep.mubr.bf16.mxu1 %v1225_v37 }
  0x54   : > { %578 = vmatmul.mubr.bf16.gmra.mxu0 %v1227_v38  ;;  %642 = vmatmul.mubr.bf16.gmra.mxu1 %v1228_v39 }
  0x55   : > { %585 = vmatprep.mubr.bf16.mxu0 %v1229_v40  ;;  %649 = vmatprep.mubr.bf16.mxu1 %v1231_v41 }
  0x5c   : > { %586 = vmatmul.mubr.bf16.gmra.mxu0 %v1233_v42  ;;  %650 = vmatmul.mubr.bf16.gmra.mxu1 %v1234_v43 }
  0x5d   : > { %593 = vmatprep.mubr.bf16.mxu0 %v1235_v44  ;;  %657 = vmatprep.mubr.bf16.mxu1 %v1237_v45 }
  0x64   : > { %594 = vmatmul.mubr.bf16.gmra.mxu0 %v1239_v46  ;;  %658 = vmatmul.mubr.bf16.gmra.mxu1 %v1240_v47 }
  0xec   : > { %v1057_v48 = vpop.f32.mrf.mxu0  ;;  %v1105_v49 = vpop.f32.mrf.mxu1 }
  0xee   : > { %v1058_v51 = vpop.f32.mrf.mxu0  ;;  %v1106_v52 = vpop.f32.mrf.mxu1 }
  0xef   : > { %v1059_v53 = vadd.f32 %v1058_v51, %v1057_v48  ;;  %v1107_v54 = vadd.f32 %v1106_v52, %v1105_v49 }
  0xf0   : > { %v1060_v55 = vpop.f32.mrf.mxu0  ;;  %v1108_v56 = vpop.f32.mrf.mxu1 }
  0xf1   : > { %v540_v57 = vadd.f32 %v1059_v53, %v1368_v50  ;;  %v604_v58 = vadd.f32 %v1107_v54, %v1368_v50 }
  0xf2   : > { %v1061_v59 = vpop.f32.mrf.mxu0  ;;  %v1109_v60 = vpop.f32.mrf.mxu1 }
  0xf3   : > { %v666_v61 = vmax.f32 %v540_v57, 0.0  ;;  %v682_v62 = vmax.f32 %v604_v58, 0.0  ;;  %v1062_v63 = vadd.f32 %v1061_v59, %v1060_v55  ;;  %v1110_v0 = vadd.f32 %v1109_v60, %v1108_v56 }
  0xf4   : > { %v1063_v1 = vpop.f32.mrf.mxu0  ;;  %v1111_v2 = vpop.f32.mrf.mxu1 }
  0xf5   : > { %v1009_v3 = vpack.c.bf16 %v666_v61, %v666_v61  ;;  %v1025_v4 = vpack.c.bf16 %v682_v62, %v682_v62  ;;  %v543_v5 = vadd.f32 %v1062_v63, %v1368_v50  ;;  %v607_v6 = vadd.f32 %v1110_v0, %v1368_v50 }
  0xf6   : > { %v1064_v7 = vpop.f32.mrf.mxu0  ;;  %v1112_v8 = vpop.f32.mrf.mxu1 }
  0xf7   : > { %827 = vst.msk [vmem:[%s1376_s4] sm:$0xf] %vm826_vm0, %v1009_v3  ;;  %843 = vst.msk [vmem:[%s1376_s4 + $0x40] sm:$0xf] %vm826_vm0, %v1025_v4  ;;  %v667_v9 = vmax.f32 %v543_v5, 0.0  ;;  %v683_v10 = vmax.f32 %v607_v6, 0.0  ;;  %v1065_v11 = vadd.f32 %v1064_v7, %v1063_v1  ;;  %v1113_v12 = vadd.f32 %v1112_v8, %v1111_v2 }
  0xf8   : > { %v1066_v13 = vpop.f32.mrf.mxu0  ;;  %v1114_v14 = vpop.f32.mrf.mxu1 }
  0xf9   : > { %v1010_v15 = vpack.c.bf16 %v667_v9, %v667_v9  ;;  %v1026_v16 = vpack.c.bf16 %v683_v10, %v683_v10  ;;  %v548_v17 = vadd.f32 %v1065_v11, %v1368_v50  ;;  %v612_v18 = vadd.f32 %v1113_v12, %v1368_v50 }
  0xfa   : > { %v1067_v19 = vpop.f32.mrf.mxu0  ;;  %v1115_v20 = vpop.f32.mrf.mxu1 }
  0xfb   : > { %828 = vst.msk [vmem:[%s1376_s4 + $0x4] sm:$0xf] %vm826_vm0, %v1010_v15  ;;  %844 = vst.msk [vmem:[%s1376_s4 + $0x44] sm:$0xf] %vm826_vm0, %v1026_v16  ;;  %v668_v21 = vmax.f32 %v548_v17, 0.0  ;;  %v684_v22 = vmax.f32 %v612_v18, 0.0  ;;  %v1068_v23 = vadd.f32 %v1067_v19, %v1066_v13  ;;  %v1116_v24 = vadd.f32 %v1115_v20, %v1114_v14 }
  0xfc   : > { %v1069_v25 = vpop.f32.mrf.mxu0  ;;  %v1117_v26 = vpop.f32.mrf.mxu1 }
  0xfd   : > { %v1011_v27 = vpack.c.bf16 %v668_v21, %v668_v21  ;;  %v1027_v28 = vpack.c.bf16 %v684_v22, %v684_v22  ;;  %v551_v29 = vadd.f32 %v1068_v23, %v1368_v50  ;;  %v615_v30 = vadd.f32 %v1116_v24, %v1368_v50 }
  0xfe   : > { %v1070_v31 = vpop.f32.mrf.mxu0  ;;  %v1118_v32 = vpop.f32.mrf.mxu1 }
  0xff   : > { %829 = vst.msk [vmem:[%s1376_s4 + $0x8] sm:$0xf] %vm826_vm0, %v1011_v27  ;;  %845 = vst.msk [vmem:[%s1376_s4 + $0x48] sm:$0xf] %vm826_vm0, %v1027_v28  ;;  %v669_v33 = vmax.f32 %v551_v29, 0.0  ;;  %v685_v34 = vmax.f32 %v615_v30, 0.0  ;;  %v1071_v35 = vadd.f32 %v1070_v31, %v1069_v25  ;;  %v1119_v36 = vadd.f32 %v1118_v32, %v1117_v26 }
 0x100   : > { %v1072_v37 = vpop.f32.mrf.mxu0  ;;  %v1120_v38 = vpop.f32.mrf.mxu1 }
 0x101   : > { %v1012_v39 = vpack.c.bf16 %v669_v33, %v669_v33  ;;  %v1028_v40 = vpack.c.bf16 %v685_v34, %v685_v34  ;;  %v556_v41 = vadd.f32 %v1071_v35, %v1368_v50  ;;  %v620_v42 = vadd.f32 %v1119_v36, %v1368_v50 }
 0x102   : > { %v1073_v43 = vpop.f32.mrf.mxu0  ;;  %v1121_v44 = vpop.f32.mrf.mxu1 }
 0x103   : > { %830 = vst.msk [vmem:[%s1376_s4 + $0xc] sm:$0xf] %vm826_vm0, %v1012_v39  ;;  %846 = vst.msk [vmem:[%s1376_s4 + $0x4c] sm:$0xf] %vm826_vm0, %v1028_v40  ;;  %v670_v45 = vmax.f32 %v556_v41, 0.0  ;;  %v686_v46 = vmax.f32 %v620_v42, 0.0  ;;  %v1074_v47 = vadd.f32 %v1073_v43, %v1072_v37  ;;  %v1122_v48 = vadd.f32 %v1121_v44, %v1120_v38 }
 0x104   : > { %v1075_v49 = vpop.f32.mrf.mxu0  ;;  %v1123_v51 = vpop.f32.mrf.mxu1 }
 0x105   : > { %v1013_v52 = vpack.c.bf16 %v670_v45, %v670_v45  ;;  %v1029_v53 = vpack.c.bf16 %v686_v46, %v686_v46  ;;  %v559_v54 = vadd.f32 %v1074_v47, %v1368_v50  ;;  %v623_v55 = vadd.f32 %v1122_v48, %v1368_v50 }
 0x106   : > { %v1076_v56 = vpop.f32.mrf.mxu0  ;;  %v1124_v57 = vpop.f32.mrf.mxu1 }
 0x107   : > { %831 = vst.msk [vmem:[%s1376_s4 + $0x10] sm:$0xf] %vm826_vm0, %v1013_v52  ;;  %847 = vst.msk [vmem:[%s1376_s4 + $0x50] sm:$0xf] %vm826_vm0, %v1029_v53  ;;  %v671_v58 = vmax.f32 %v559_v54, 0.0  ;;  %v687_v59 = vmax.f32 %v623_v55, 0.0  ;;  %v1077_v60 = vadd.f32 %v1076_v56, %v1075_v49  ;;  %v1125_v61 = vadd.f32 %v1124_v57, %v1123_v51 }
 0x108   : > { %v1078_v62 = vpop.f32.mrf.mxu0  ;;  %v1126_v63 = vpop.f32.mrf.mxu1 }
 0x109   : > { %v1014_v0 = vpack.c.bf16 %v671_v58, %v671_v58  ;;  %v1030_v1 = vpack.c.bf16 %v687_v59, %v687_v59  ;;  %v564_v2 = vadd.f32 %v1077_v60, %v1368_v50  ;;  %v628_v3 = vadd.f32 %v1125_v61, %v1368_v50 }
 0x10a   : > { %v1079_v4 = vpop.f32.mrf.mxu0  ;;  %v1127_v5 = vpop.f32.mrf.mxu1 }
 0x10b   : > { %832 = vst.msk [vmem:[%s1376_s4 + $0x14] sm:$0xf] %vm826_vm0, %v1014_v0  ;;  %848 = vst.msk [vmem:[%s1376_s4 + $0x54] sm:$0xf] %vm826_vm0, %v1030_v1  ;;  %v672_v6 = vmax.f32 %v564_v2, 0.0  ;;  %v688_v7 = vmax.f32 %v628_v3, 0.0  ;;  %v1080_v8 = vadd.f32 %v1079_v4, %v1078_v62  ;;  %v1128_v9 = vadd.f32 %v1127_v5, %v1126_v63 }
 0x10c   : > { %v1081_v10 = vpop.f32.mrf.mxu0  ;;  %v1129_v11 = vpop.f32.mrf.mxu1 }
 0x10d   : > { %v1015_v12 = vpack.c.bf16 %v672_v6, %v672_v6  ;;  %v1031_v13 = vpack.c.bf16 %v688_v7, %v688_v7  ;;  %v567_v14 = vadd.f32 %v1080_v8, %v1368_v50  ;;  %v631_v15 = vadd.f32 %v1128_v9, %v1368_v50 }
 0x10e   : > { %v1082_v16 = vpop.f32.mrf.mxu0  ;;  %v1130_v17 = vpop.f32.mrf.mxu1 }
 0x10f   : > { %833 = vst.msk [vmem:[%s1376_s4 + $0x18] sm:$0xf] %vm826_vm0, %v1015_v12  ;;  %849 = vst.msk [vmem:[%s1376_s4 + $0x58] sm:$0xf] %vm826_vm0, %v1031_v13  ;;  %v673_v18 = vmax.f32 %v567_v14, 0.0  ;;  %v689_v19 = vmax.f32 %v631_v15, 0.0  ;;  %v1083_v20 = vadd.f32 %v1082_v16, %v1081_v10  ;;  %v1131_v21 = vadd.f32 %v1130_v17, %v1129_v11 }
 0x110   : > { %v1084_v22 = vpop.f32.mrf.mxu0  ;;  %v1132_v23 = vpop.f32.mrf.mxu1 }
 0x111   : > { %v1016_v24 = vpack.c.bf16 %v673_v18, %v673_v18  ;;  %v1032_v25 = vpack.c.bf16 %v689_v19, %v689_v19  ;;  %v572_v26 = vadd.f32 %v1083_v20, %v1368_v50  ;;  %v636_v27 = vadd.f32 %v1131_v21, %v1368_v50 }
 0x112   : > { %v1085_v28 = vpop.f32.mrf.mxu0  ;;  %v1133_v29 = vpop.f32.mrf.mxu1 }
 0x113   : > { %834 = vst.msk [vmem:[%s1376_s4 + $0x1c] sm:$0xf] %vm826_vm0, %v1016_v24  ;;  %850 = vst.msk [vmem:[%s1376_s4 + $0x5c] sm:$0xf] %vm826_vm0, %v1032_v25  ;;  %v674_v30 = vmax.f32 %v572_v26, 0.0  ;;  %v690_v31 = vmax.f32 %v636_v27, 0.0  ;;  %v1086_v32 = vadd.f32 %v1085_v28, %v1084_v22  ;;  %v1134_v33 = vadd.f32 %v1133_v29, %v1132_v23 }
 0x114   : > { %v1087_v34 = vpop.f32.mrf.mxu0  ;;  %v1135_v35 = vpop.f32.mrf.mxu1 }
 0x115   : > { %v1017_v36 = vpack.c.bf16 %v674_v30, %v674_v30  ;;  %v1033_v37 = vpack.c.bf16 %v690_v31, %v690_v31  ;;  %v575_v38 = vadd.f32 %v1086_v32, %v1368_v50  ;;  %v639_v39 = vadd.f32 %v1134_v33, %v1368_v50 }
 0x116   : > { %v1088_v40 = vpop.f32.mrf.mxu0  ;;  %v1136_v41 = vpop.f32.mrf.mxu1 }
 0x117   : > { %835 = vst.msk [vmem:[%s1376_s4 + $0x20] sm:$0xf] %vm826_vm0, %v1017_v36  ;;  %851 = vst.msk [vmem:[%s1376_s4 + $0x60] sm:$0xf] %vm826_vm0, %v1033_v37  ;;  %v675_v42 = vmax.f32 %v575_v38, 0.0  ;;  %v691_v43 = vmax.f32 %v639_v39, 0.0  ;;  %v1089_v44 = vadd.f32 %v1088_v40, %v1087_v34  ;;  %v1137_v45 = vadd.f32 %v1136_v41, %v1135_v35 }
 0x118   : > { %v1090_v46 = vpop.f32.mrf.mxu0  ;;  %v1138_v47 = vpop.f32.mrf.mxu1 }
 0x119   : > { %v1018_v48 = vpack.c.bf16 %v675_v42, %v675_v42  ;;  %v1034_v49 = vpack.c.bf16 %v691_v43, %v691_v43  ;;  %v580_v51 = vadd.f32 %v1089_v44, %v1368_v50  ;;  %v644_v52 = vadd.f32 %v1137_v45, %v1368_v50 }
 0x11a   : > { %v1091_v53 = vpop.f32.mrf.mxu0  ;;  %v1139_v54 = vpop.f32.mrf.mxu1 }
 0x11b   : > { %836 = vst.msk [vmem:[%s1376_s4 + $0x24] sm:$0xf] %vm826_vm0, %v1018_v48  ;;  %852 = vst.msk [vmem:[%s1376_s4 + $0x64] sm:$0xf] %vm826_vm0, %v1034_v49  ;;  %v676_v55 = vmax.f32 %v580_v51, 0.0  ;;  %v692_v56 = vmax.f32 %v644_v52, 0.0  ;;  %v1092_v57 = vadd.f32 %v1091_v53, %v1090_v46  ;;  %v1140_v58 = vadd.f32 %v1139_v54, %v1138_v47 }
 0x11c   : > { %v1093_v59 = vpop.f32.mrf.mxu0  ;;  %v1141_v60 = vpop.f32.mrf.mxu1 }
 0x11d   : > { %v1019_v61 = vpack.c.bf16 %v676_v55, %v676_v55  ;;  %v1035_v62 = vpack.c.bf16 %v692_v56, %v692_v56  ;;  %v583_v63 = vadd.f32 %v1092_v57, %v1368_v50  ;;  %v647_v0 = vadd.f32 %v1140_v58, %v1368_v50 }
 0x11e   : > { %v1094_v1 = vpop.f32.mrf.mxu0  ;;  %v1142_v2 = vpop.f32.mrf.mxu1 }
 0x11f   : > { %837 = vst.msk [vmem:[%s1376_s4 + $0x28] sm:$0xf] %vm826_vm0, %v1019_v61  ;;  %853 = vst.msk [vmem:[%s1376_s4 + $0x68] sm:$0xf] %vm826_vm0, %v1035_v62  ;;  %v677_v3 = vmax.f32 %v583_v63, 0.0  ;;  %v693_v4 = vmax.f32 %v647_v0, 0.0  ;;  %v1095_v5 = vadd.f32 %v1094_v1, %v1093_v59  ;;  %v1143_v6 = vadd.f32 %v1142_v2, %v1141_v60 }
 0x120   : > { %v1096_v7 = vpop.f32.mrf.mxu0  ;;  %v1144_v8 = vpop.f32.mrf.mxu1 }
 0x121   : > { %v1020_v9 = vpack.c.bf16 %v677_v3, %v677_v3  ;;  %v1036_v10 = vpack.c.bf16 %v693_v4, %v693_v4  ;;  %v588_v11 = vadd.f32 %v1095_v5, %v1368_v50  ;;  %v652_v12 = vadd.f32 %v1143_v6, %v1368_v50 }
 0x122   : > { %v1097_v13 = vpop.f32.mrf.mxu0  ;;  %v1145_v14 = vpop.f32.mrf.mxu1 }
 0x123   : > { %838 = vst.msk [vmem:[%s1376_s4 + $0x2c] sm:$0xf] %vm826_vm0, %v1020_v9  ;;  %854 = vst.msk [vmem:[%s1376_s4 + $0x6c] sm:$0xf] %vm826_vm0, %v1036_v10  ;;  %v678_v15 = vmax.f32 %v588_v11, 0.0  ;;  %v694_v16 = vmax.f32 %v652_v12, 0.0  ;;  %v1098_v17 = vadd.f32 %v1097_v13, %v1096_v7  ;;  %v1146_v18 = vadd.f32 %v1145_v14, %v1144_v8 }
 0x124   : > { %v1099_v19 = vpop.f32.mrf.mxu0  ;;  %v1147_v20 = vpop.f32.mrf.mxu1 }
 0x125   : > { %v1021_v21 = vpack.c.bf16 %v678_v15, %v678_v15  ;;  %v1037_v22 = vpack.c.bf16 %v694_v16, %v694_v16  ;;  %v591_v23 = vadd.f32 %v1098_v17, %v1368_v50  ;;  %v655_v24 = vadd.f32 %v1146_v18, %v1368_v50 }
 0x126   : > { %v1100_v25 = vpop.f32.mrf.mxu0  ;;  %v1148_v26 = vpop.f32.mrf.mxu1 }
 0x127   : > { %839 = vst.msk [vmem:[%s1376_s4 + $0x30] sm:$0xf] %vm826_vm0, %v1021_v21  ;;  %855 = vst.msk [vmem:[%s1376_s4 + $0x70] sm:$0xf] %vm826_vm0, %v1037_v22  ;;  %v679_v27 = vmax.f32 %v591_v23, 0.0  ;;  %v695_v28 = vmax.f32 %v655_v24, 0.0  ;;  %v1101_v29 = vadd.f32 %v1100_v25, %v1099_v19  ;;  %v1149_v30 = vadd.f32 %v1148_v26, %v1147_v20 }
 0x128   : > { %v1102_v31 = vpop.f32.mrf.mxu0  ;;  %v1150_v32 = vpop.f32.mrf.mxu1 }
 0x129   : > { %v1022_v33 = vpack.c.bf16 %v679_v27, %v679_v27  ;;  %v1038_v34 = vpack.c.bf16 %v695_v28, %v695_v28  ;;  %v596_v35 = vadd.f32 %v1101_v29, %v1368_v50  ;;  %v660_v36 = vadd.f32 %v1149_v30, %v1368_v50 }
 0x12a   : > { %v1103_v37 = vpop.f32.mrf.mxu0  ;;  %v1151_v38 = vpop.f32.mrf.mxu1 }
 0x12b   : > { %840 = vst.msk [vmem:[%s1376_s4 + $0x34] sm:$0xf] %vm826_vm0, %v1022_v33  ;;  %856 = vst.msk [vmem:[%s1376_s4 + $0x74] sm:$0xf] %vm826_vm0, %v1038_v34  ;;  %v680_v39 = vmax.f32 %v596_v35, 0.0  ;;  %v696_v40 = vmax.f32 %v660_v36, 0.0  ;;  %v1104_v41 = vadd.f32 %v1103_v37, %v1102_v31  ;;  %v1152_v42 = vadd.f32 %v1151_v38, %v1150_v32 }
 0x12d   : > { %v1023_v43 = vpack.c.bf16 %v680_v39, %v680_v39  ;;  %v1039_v44 = vpack.c.bf16 %v696_v40, %v696_v40  ;;  %v599_v45 = vadd.f32 %v1104_v41, %v1368_v50  ;;  %v663_v46 = vadd.f32 %v1152_v42, %v1368_v50 }
 0x12f   : > { %841 = vst.msk [vmem:[%s1376_s4 + $0x38] sm:$0xf] %vm826_vm0, %v1023_v43  ;;  %857 = vst.msk [vmem:[%s1376_s4 + $0x78] sm:$0xf] %vm826_vm0, %v1039_v44  ;;  %v681_v47 = vmax.f32 %v599_v45, 0.0  ;;  %v697_v48 = vmax.f32 %v663_v46, 0.0 }
 0x131   : > { %v1024_v49 = vpack.c.bf16 %v681_v47, %v681_v47  ;;  %v1040_v51 = vpack.c.bf16 %v697_v48, %v697_v48 }
 0x133   : > { %842 = vst.msk [vmem:[%s1376_s4 + $0x3c] sm:$0xf] %vm826_vm0, %v1024_v49  ;;  %858 = vst.msk [vmem:[%s1376_s4 + $0x7c] sm:$0xf] %vm826_vm0, %v1040_v51 }
 0x134 PF: > { %s13_s12 = sadd.s32 1, %s1247_s12  }
 0x135   : > { %p10_p4 = scmp.ge.s32.totalorder %s13_s12, 4  }
 0x137   :  { %12 = sbr.rel (!%p10_p4) target bundleno = 1 (0x1), region = 62 }

// kernel: decoder_forward.9
= control target key start
LH: loop header
LB: loop body
LE: loop exit
PB: predicated region body
PF: predicated region fallthrough
CT: control target
= control target key end

     0   :  { %s1044_s12 = smov 0   ;;  %s1221_s0 = inlined_call_operand.vmem [shape: bf16[512,256], index: 0, kind: input, shape index: {}]   ;;  %s1222_s1 = inlined_call_operand.vmem [shape: bf16[256,128], index: 1, kind: input, shape index: {}]   ;;  %s1223_s2 = inlined_call_operand.vmem [shape: f32[1,128], index: 2, kind: input, shape index: {}]   ;;  %s1224_s3 = inlined_call_operand.vmem [shape: f32[512,128], index: 3, kind: output, shape index: {}]  }
   0x1 LB: > { %s754_s13 = sadd.s32 4294967295, %s1022_s12   ;;  %p758_p0 = scmp.ge.s32.totalorder %s1022_s12, 1  ;;  %s1022_s12 = sphi %s1044_s12, %s13_s12  }
   0x2   : > { %p139_p1 = scmp.lt.s32.totalorder %s1022_s12, 3 }
   0x4   : > { %p140_p2 = pnand %p758_p0, %p139_p1 }
   0x5   : > { %s759_s16 = sshll.u32 (!%p140_p2), %s754_s13, 5 }
   0x6   : > { %143 = sbr.rel (%p140_p2) target bundleno = 304 (0x130), region = 32  ;;  %p165_p3 = scmp.lt.s32.totalorder (!%p140_p2), %s759_s16, 63 }
   0xb   : > { %v952_v0 = vld [vmem:[%s1222_s1 + $0x78] sm:$0xff]   ;;  %v954_v2 = vld [vmem:[%s1222_s1 + $0x70] sm:$0xff]   ;;  %v956_v4 = vld [vmem:[%s1222_s1 + $0x68] sm:$0xff]   ;;  %s1226_s16 = smov (!%p165_p3, %s759_s16), 63 }
   0xc   : > { %v953_v1 = vld [vmem:[%s1222_s1 + $0x38] sm:$0xff]   ;;  %816 = vmatprep.subr.bf16.mxu0 %v952_v0  ;;  %928 = vmatprep.subr.bf16.mxu1 %v952_v0  ;;  %v955_v3 = vld [vmem:[%s1222_s1 + $0x30] sm:$0xff]   ;;  %v957_v5 = vld [vmem:[%s1222_s1 + $0x28] sm:$0xff]   ;;  %s815_s4 = sshll.u32 %s1226_s16, 3 }
   0xd   : > { %817 = vmatpush3.bf16.msra.mxu0 %v953_v1  ;;  %936 = vmatpush3.bf16.msra.mxu1 %v953_v1  ;;  %v958_v6 = vld [vmem:[%s1222_s1 + $0x60] sm:$0xff]   ;;  %v960_v8 = vld [vmem:[%s1222_s1 + $0x58] sm:$0xff]   ;;  %s1087_s9 = scalar_lea.vmem %s1221_s0, %s815_s4  ;;  %v962_v10 = vld [vmem:[%s1222_s1 + $0x50] sm:$0xff]   ;;  %s1152_s30 = scalar_lea.vmem %s1224_s3, %s815_s4 }
   0xe   : > { %818 = vmatprep.subr.bf16.mxu0 %v954_v2  ;;  %929 = vmatprep.subr.bf16.mxu1 %v954_v2  ;;  %v959_v7 = vld [vmem:[%s1222_s1 + $0x20] sm:$0xff]   ;;  %v961_v9 = vld [vmem:[%s1222_s1 + $0x18] sm:$0xff]   ;;  %v963_v13 = vld [vmem:[%s1222_s1 + $0x10] sm:$0xff]  }
   0xf   : > { %v970_v11 = vld [vmem:[%s1087_s9 + $0x4] ss:$8 sps:$4 sm:$0xff]   ;;  %v968_v18 = vld [vmem:[%s1087_s9] ss:$8 sps:$4 sm:$0xff]   ;;  %v974_v20 = vld [vmem:[%s1087_s9 + $0x14] ss:$8 sps:$4 sm:$0xff]  }
  0x10   : > { %v973_v12 = vld [vmem:[%s1087_s9 + $0x84] ss:$8 sps:$4 sm:$0xff]   ;;  %537 = vmatprep.mubr.bf16.mxu0 %v970_v11  ;;  %v971_v19 = vld [vmem:[%s1087_s9 + $0x80] ss:$8 sps:$4 sm:$0xff]   ;;  %v976_v21 = vld [vmem:[%s1087_s9 + $0x94] ss:$8 sps:$4 sm:$0xff]  }
  0x11   : > { %819 = vmatpush3.bf16.msra.mxu0 %v955_v3  ;;  %937 = vmatpush3.bf16.msra.mxu1 %v955_v3  ;;  %v964_v14 = vld [vmem:[%s1222_s1 + $0x48] sm:$0xff]   ;;  %v966_v16 = vld [vmem:[%s1222_s1 + $0x40] sm:$0xff]   ;;  %v978_v22 = vld [vmem:[%s1087_s9 + $0x10] ss:$8 sps:$4 sm:$0xff]  }
  0x12   : > { %820 = vmatprep.subr.bf16.mxu0 %v956_v4  ;;  %930 = vmatprep.subr.bf16.mxu1 %v956_v4  ;;  %v965_v15 = vld [vmem:[%s1222_s1 + $0x8] sm:$0xff]   ;;  %v967_v17 = vld [vmem:[%s1222_s1] sm:$0xff]   ;;  %v979_v23 = vld [vmem:[%s1087_s9 + $0x90] ss:$8 sps:$4 sm:$0xff]  }
  0x13   : > { %601 = vmatprep.mubr.bf16.mxu1 %v973_v12  ;;  %v980_v24 = vld [vmem:[%s1087_s9 + $0x24] ss:$8 sps:$4 sm:$0xff]   ;;  %v984_v26 = vld [vmem:[%s1087_s9 + $0x20] ss:$8 sps:$4 sm:$0xff]   ;;  %v986_v28 = vld [vmem:[%s1087_s9 + $0x34] ss:$8 sps:$4 sm:$0xff]  }
  0x14   : > { %v982_v25 = vld [vmem:[%s1087_s9 + $0xa4] ss:$8 sps:$4 sm:$0xff]   ;;  %v985_v27 = vld [vmem:[%s1087_s9 + $0xa0] ss:$8 sps:$4 sm:$0xff]   ;;  %v988_v29 = vld [vmem:[%s1087_s9 + $0xb4] ss:$8 sps:$4 sm:$0xff]  }
  0x15   : > { %821 = vmatpush3.bf16.msra.mxu0 %v957_v5  ;;  %938 = vmatpush3.bf16.msra.mxu1 %v957_v5  ;;  %v990_v30 = vld [vmem:[%s1087_s9 + $0x30] ss:$8 sps:$4 sm:$0xff]   ;;  %v992_v32 = vld [vmem:[%s1087_s9 + $0x44] ss:$8 sps:$4 sm:$0xff]   ;;  %v996_v34 = vld [vmem:[%s1087_s9 + $0x40] ss:$8 sps:$4 sm:$0xff]  }
  0x16   : > { %822 = vmatprep.subr.bf16.mxu0 %v958_v6  ;;  %931 = vmatprep.subr.bf16.mxu1 %v958_v6  ;;  %v991_v31 = vld [vmem:[%s1087_s9 + $0xb0] ss:$8 sps:$4 sm:$0xff]   ;;  %v994_v33 = vld [vmem:[%s1087_s9 + $0xc4] ss:$8 sps:$4 sm:$0xff]   ;;  %v997_v35 = vld [vmem:[%s1087_s9 + $0xc0] ss:$8 sps:$4 sm:$0xff]  }
  0x17   : > { %v998_v36 = vld [vmem:[%s1087_s9 + $0x54] ss:$8 sps:$4 sm:$0xff]   ;;  %v1002_v38 = vld [vmem:[%s1087_s9 + $0x50] ss:$8 sps:$4 sm:$0xff]   ;;  %v1004_v40 = vld [vmem:[%s1087_s9 + $0x64] ss:$8 sps:$4 sm:$0xff]  }
  0x18   : > { %v1000_v37 = vld [vmem:[%s1087_s9 + $0xd4] ss:$8 sps:$4 sm:$0xff]   ;;  %v1003_v39 = vld [vmem:[%s1087_s9 + $0xd0] ss:$8 sps:$4 sm:$0xff]   ;;  %v1006_v41 = vld [vmem:[%s1087_s9 + $0xe4] ss:$8 sps:$4 sm:$0xff]  }
  0x19   : > { %823 = vmatpush3.bf16.msra.mxu0 %v959_v7  ;;  %939 = vmatpush3.bf16.msra.mxu1 %v959_v7  ;;  %v1008_v42 = vld [vmem:[%s1087_s9 + $0x60] ss:$8 sps:$4 sm:$0xff]   ;;  %v1010_v44 = vld [vmem:[%s1087_s9 + $0x74] ss:$8 sps:$4 sm:$0xff]   ;;  %v1014_v46 = vld [vmem:[%s1087_s9 + $0x70] ss:$8 sps:$4 sm:$0xff]  }
  0x1a   : > { %824 = vmatprep.subr.bf16.mxu0 %v960_v8  ;;  %932 = vmatprep.subr.bf16.mxu1 %v960_v8  ;;  %v1009_v43 = vld [vmem:[%s1087_s9 + $0xe0] ss:$8 sps:$4 sm:$0xff]   ;;  %v1012_v45 = vld [vmem:[%s1087_s9 + $0xf4] ss:$8 sps:$4 sm:$0xff]   ;;  %v1015_v47 = vld [vmem:[%s1087_s9 + $0xf0] ss:$8 sps:$4 sm:$0xff]  }
  0x1b   : > { %v1145_v50 = vld [vmem:[%s1223_s2] ss:$0 sm:$0xff] }
  0x1d   : > { %825 = vmatpush3.bf16.msra.mxu0 %v961_v9  ;;  %940 = vmatpush3.bf16.msra.mxu1 %v961_v9 }
  0x1e   : > { %826 = vmatprep.subr.bf16.mxu0 %v962_v10  ;;  %933 = vmatprep.subr.bf16.mxu1 %v962_v10 }
  0x21   : > { %827 = vmatpush3.bf16.msra.mxu0 %v963_v13  ;;  %941 = vmatpush3.bf16.msra.mxu1 %v963_v13 }
  0x22   : > { %828 = vmatprep.subr.bf16.mxu0 %v964_v14  ;;  %934 = vmatprep.subr.bf16.mxu1 %v964_v14 }
  0x25   : > { %829 = vmatpush3.bf16.msra.mxu0 %v965_v15  ;;  %942 = vmatpush3.bf16.msra.mxu1 %v965_v15 }
  0x26   : > { %830 = vmatprep.subr.bf16.mxu0 %v966_v16  ;;  %935 = vmatprep.subr.bf16.mxu1 %v966_v16 }
  0x29   : > { %831 = vmatpush3.bf16.msra.mxu0 %v967_v17  ;;  %943 = vmatpush3.bf16.msra.mxu1 %v967_v17 }
  0x2c   : > { %538 = vmatmul.mubr.bf16.vlgmr.msra.gmra.mxu0 %v968_v18  ;;  %602 = vmatmul.mubr.bf16.vlgmr.msra.gmra.mxu1 %v971_v19 }
  0x2d   : > { %545 = vmatprep.mubr.bf16.mxu0 %v974_v20  ;;  %609 = vmatprep.mubr.bf16.mxu1 %v976_v21 }
  0x34   : > { %546 = vmatmul.mubr.bf16.gmra.mxu0 %v978_v22  ;;  %610 = vmatmul.mubr.bf16.gmra.mxu1 %v979_v23 }
  0x35   : > { %553 = vmatprep.mubr.bf16.mxu0 %v980_v24  ;;  %617 = vmatprep.mubr.bf16.mxu1 %v982_v25 }
  0x3c   : > { %554 = vmatmul.mubr.bf16.gmra.mxu0 %v984_v26  ;;  %618 = vmatmul.mubr.bf16.gmra.mxu1 %v985_v27 }
  0x3d   : > { %561 = vmatprep.mubr.bf16.mxu0 %v986_v28  ;;  %625 = vmatprep.mubr.bf16.mxu1 %v988_v29 }
  0x44   : > { %562 = vmatmul.mubr.bf16.gmra.mxu0 %v990_v30  ;;  %626 = vmatmul.mubr.bf16.gmra.mxu1 %v991_v31 }
  0x45   : > { %569 = vmatprep.mubr.bf16.mxu0 %v992_v32  ;;  %633 = vmatprep.mubr.bf16.mxu1 %v994_v33 }
  0x4c   : > { %570 = vmatmul.mubr.bf16.gmra.mxu0 %v996_v34  ;;  %634 = vmatmul.mubr.bf16.gmra.mxu1 %v997_v35 }
  0x4d   : > { %577 = vmatprep.mubr.bf16.mxu0 %v998_v36  ;;  %641 = vmatprep.mubr.bf16.mxu1 %v1000_v37 }
  0x54   : > { %578 = vmatmul.mubr.bf16.gmra.mxu0 %v1002_v38  ;;  %642 = vmatmul.mubr.bf16.gmra.mxu1 %v1003_v39 }
  0x55   : > { %585 = vmatprep.mubr.bf16.mxu0 %v1004_v40  ;;  %649 = vmatprep.mubr.bf16.mxu1 %v1006_v41 }
  0x5c   : > { %586 = vmatmul.mubr.bf16.gmra.mxu0 %v1008_v42  ;;  %650 = vmatmul.mubr.bf16.gmra.mxu1 %v1009_v43 }
  0x5d   : > { %593 = vmatprep.mubr.bf16.mxu0 %v1010_v44  ;;  %657 = vmatprep.mubr.bf16.mxu1 %v1012_v45 }
  0x64   : > { %594 = vmatmul.mubr.bf16.gmra.mxu0 %v1014_v46  ;;  %658 = vmatmul.mubr.bf16.gmra.mxu1 %v1015_v47 }
  0xec   : > { %v832_v48 = vpop.f32.mrf.mxu0  ;;  %v880_v49 = vpop.f32.mrf.mxu1 }
  0xee   : > { %v833_v51 = vpop.f32.mrf.mxu0  ;;  %v881_v52 = vpop.f32.mrf.mxu1 }
  0xef   : > { %v834_v53 = vadd.f32 %v833_v51, %v832_v48  ;;  %v882_v54 = vadd.f32 %v881_v52, %v880_v49 }
  0xf0   : > { %v835_v55 = vpop.f32.mrf.mxu0  ;;  %v883_v56 = vpop.f32.mrf.mxu1 }
  0xf1   : > { %v540_v57 = vadd.f32 %v834_v53, %v1145_v50  ;;  %v604_v58 = vadd.f32 %v882_v54, %v1145_v50 }
  0xf2   : > { %v836_v59 = vpop.f32.mrf.mxu0  ;;  %v884_v60 = vpop.f32.mrf.mxu1 }
  0xf3   : > { %666 = vst [vmem:[%s1152_s30] sm:$0xff] %v540_v57  ;;  %682 = vst [vmem:[%s1152_s30 + $0x80] sm:$0xff] %v604_v58  ;;  %v837_v61 = vadd.f32 %v836_v59, %v835_v55  ;;  %v885_v62 = vadd.f32 %v884_v60, %v883_v56 }
  0xf4   : > { %v838_v63 = vpop.f32.mrf.mxu0  ;;  %v886_v0 = vpop.f32.mrf.mxu1 }
  0xf5   : > { %v543_v1 = vadd.f32 %v837_v61, %v1145_v50  ;;  %v607_v2 = vadd.f32 %v885_v62, %v1145_v50 }
  0xf6   : > { %v839_v3 = vpop.f32.mrf.mxu0  ;;  %v887_v4 = vpop.f32.mrf.mxu1 }
  0xf7   : > { %667 = vst [vmem:[%s1152_s30 + $0x8] sm:$0xff] %v543_v1  ;;  %683 = vst [vmem:[%s1152_s30 + $0x88] sm:$0xff] %v607_v2  ;;  %v840_v5 = vadd.f32 %v839_v3, %v838_v63  ;;  %v888_v6 = vadd.f32 %v887_v4, %v886_v0 }
  0xf8   : > { %v841_v7 = vpop.f32.mrf.mxu0  ;;  %v889_v8 = vpop.f32.mrf.mxu1 }
  0xf9   : > { %v548_v9 = vadd.f32 %v840_v5, %v1145_v50  ;;  %v612_v10 = vadd.f32 %v888_v6, %v1145_v50 }
  0xfa   : > { %v842_v11 = vpop.f32.mrf.mxu0  ;;  %v890_v12 = vpop.f32.mrf.mxu1 }
  0xfb   : > { %668 = vst [vmem:[%s1152_s30 + $0x10] sm:$0xff] %v548_v9  ;;  %684 = vst [vmem:[%s1152_s30 + $0x90] sm:$0xff] %v612_v10  ;;  %v843_v13 = vadd.f32 %v842_v11, %v841_v7  ;;  %v891_v14 = vadd.f32 %v890_v12, %v889_v8 }
  0xfc   : > { %v844_v15 = vpop.f32.mrf.mxu0  ;;  %v892_v16 = vpop.f32.mrf.mxu1 }
  0xfd   : > { %v551_v17 = vadd.f32 %v843_v13, %v1145_v50  ;;  %v615_v18 = vadd.f32 %v891_v14, %v1145_v50 }
  0xfe   : > { %v845_v19 = vpop.f32.mrf.mxu0  ;;  %v893_v20 = vpop.f32.mrf.mxu1 }
  0xff   : > { %669 = vst [vmem:[%s1152_s30 + $0x18] sm:$0xff] %v551_v17  ;;  %685 = vst [vmem:[%s1152_s30 + $0x98] sm:$0xff] %v615_v18  ;;  %v846_v21 = vadd.f32 %v845_v19, %v844_v15  ;;  %v894_v22 = vadd.f32 %v893_v20, %v892_v16 }
 0x100   : > { %v847_v23 = vpop.f32.mrf.mxu0  ;;  %v895_v24 = vpop.f32.mrf.mxu1 }
 0x101   : > { %v556_v25 = vadd.f32 %v846_v21, %v1145_v50  ;;  %v620_v26 = vadd.f32 %v894_v22, %v1145_v50 }
 0x102   : > { %v848_v27 = vpop.f32.mrf.mxu0  ;;  %v896_v28 = vpop.f32.mrf.mxu1 }
 0x103   : > { %670 = vst [vmem:[%s1152_s30 + $0x20] sm:$0xff] %v556_v25  ;;  %686 = vst [vmem:[%s1152_s30 + $0xa0] sm:$0xff] %v620_v26  ;;  %v849_v29 = vadd.f32 %v848_v27, %v847_v23  ;;  %v897_v30 = vadd.f32 %v896_v28, %v895_v24 }
 0x104   : > { %v850_v31 = vpop.f32.mrf.mxu0  ;;  %v898_v32 = vpop.f32.mrf.mxu1 }
 0x105   : > { %v559_v33 = vadd.f32 %v849_v29, %v1145_v50  ;;  %v623_v34 = vadd.f32 %v897_v30, %v1145_v50 }
 0x106   : > { %v851_v35 = vpop.f32.mrf.mxu0  ;;  %v899_v36 = vpop.f32.mrf.mxu1 }
 0x107   : > { %671 = vst [vmem:[%s1152_s30 + $0x28] sm:$0xff] %v559_v33  ;;  %687 = vst [vmem:[%s1152_s30 + $0xa8] sm:$0xff] %v623_v34  ;;  %v852_v37 = vadd.f32 %v851_v35, %v850_v31  ;;  %v900_v38 = vadd.f32 %v899_v36, %v898_v32 }
 0x108   : > { %v853_v39 = vpop.f32.mrf.mxu0  ;;  %v901_v40 = vpop.f32.mrf.mxu1 }
 0x109   : > { %v564_v41 = vadd.f32 %v852_v37, %v1145_v50  ;;  %v628_v42 = vadd.f32 %v900_v38, %v1145_v50 }
 0x10a   : > { %v854_v43 = vpop.f32.mrf.mxu0  ;;  %v902_v44 = vpop.f32.mrf.mxu1 }
 0x10b   : > { %672 = vst [vmem:[%s1152_s30 + $0x30] sm:$0xff] %v564_v41  ;;  %688 = vst [vmem:[%s1152_s30 + $0xb0] sm:$0xff] %v628_v42  ;;  %v855_v45 = vadd.f32 %v854_v43, %v853_v39  ;;  %v903_v46 = vadd.f32 %v902_v44, %v901_v40 }
 0x10c   : > { %v856_v47 = vpop.f32.mrf.mxu0  ;;  %v904_v48 = vpop.f32.mrf.mxu1 }
 0x10d   : > { %v567_v49 = vadd.f32 %v855_v45, %v1145_v50  ;;  %v631_v51 = vadd.f32 %v903_v46, %v1145_v50 }
 0x10e   : > { %v857_v52 = vpop.f32.mrf.mxu0  ;;  %v905_v53 = vpop.f32.mrf.mxu1 }
 0x10f   : > { %673 = vst [vmem:[%s1152_s30 + $0x38] sm:$0xff] %v567_v49  ;;  %689 = vst [vmem:[%s1152_s30 + $0xb8] sm:$0xff] %v631_v51  ;;  %v858_v54 = vadd.f32 %v857_v52, %v856_v47  ;;  %v906_v55 = vadd.f32 %v905_v53, %v904_v48 }
 0x110   : > { %v859_v56 = vpop.f32.mrf.mxu0  ;;  %v907_v57 = vpop.f32.mrf.mxu1 }
 0x111   : > { %v572_v58 = vadd.f32 %v858_v54, %v1145_v50  ;;  %v636_v59 = vadd.f32 %v906_v55, %v1145_v50 }
 0x112   : > { %v860_v60 = vpop.f32.mrf.mxu0  ;;  %v908_v61 = vpop.f32.mrf.mxu1 }
 0x113   : > { %674 = vst [vmem:[%s1152_s30 + $0x40] sm:$0xff] %v572_v58  ;;  %690 = vst [vmem:[%s1152_s30 + $0xc0] sm:$0xff] %v636_v59  ;;  %v861_v62 = vadd.f32 %v860_v60, %v859_v56  ;;  %v909_v63 = vadd.f32 %v908_v61, %v907_v57 }
 0x114   : > { %v862_v0 = vpop.f32.mrf.mxu0  ;;  %v910_v1 = vpop.f32.mrf.mxu1 }
 0x115   : > { %v575_v2 = vadd.f32 %v861_v62, %v1145_v50  ;;  %v639_v3 = vadd.f32 %v909_v63, %v1145_v50 }
 0x116   : > { %v863_v4 = vpop.f32.mrf.mxu0  ;;  %v911_v5 = vpop.f32.mrf.mxu1 }
 0x117   : > { %675 = vst [vmem:[%s1152_s30 + $0x48] sm:$0xff] %v575_v2  ;;  %691 = vst [vmem:[%s1152_s30 + $0xc8] sm:$0xff] %v639_v3  ;;  %v864_v6 = vadd.f32 %v863_v4, %v862_v0  ;;  %v912_v7 = vadd.f32 %v911_v5, %v910_v1 }
 0x118   : > { %v865_v8 = vpop.f32.mrf.mxu0  ;;  %v913_v9 = vpop.f32.mrf.mxu1 }
 0x119   : > { %v580_v10 = vadd.f32 %v864_v6, %v1145_v50  ;;  %v644_v11 = vadd.f32 %v912_v7, %v1145_v50 }
 0x11a   : > { %v866_v12 = vpop.f32.mrf.mxu0  ;;  %v914_v13 = vpop.f32.mrf.mxu1 }
 0x11b   : > { %676 = vst [vmem:[%s1152_s30 + $0x50] sm:$0xff] %v580_v10  ;;  %692 = vst [vmem:[%s1152_s30 + $0xd0] sm:$0xff] %v644_v11  ;;  %v867_v14 = vadd.f32 %v866_v12, %v865_v8  ;;  %v915_v15 = vadd.f32 %v914_v13, %v913_v9 }
 0x11c   : > { %v868_v16 = vpop.f32.mrf.mxu0  ;;  %v916_v17 = vpop.f32.mrf.mxu1 }
 0x11d   : > { %v583_v18 = vadd.f32 %v867_v14, %v1145_v50  ;;  %v647_v19 = vadd.f32 %v915_v15, %v1145_v50 }
 0x11e   : > { %v869_v20 = vpop.f32.mrf.mxu0  ;;  %v917_v21 = vpop.f32.mrf.mxu1 }
 0x11f   : > { %677 = vst [vmem:[%s1152_s30 + $0x58] sm:$0xff] %v583_v18  ;;  %693 = vst [vmem:[%s1152_s30 + $0xd8] sm:$0xff] %v647_v19  ;;  %v870_v22 = vadd.f32 %v869_v20, %v868_v16  ;;  %v918_v23 = vadd.f32 %v917_v21, %v916_v17 }
 0x120   : > { %v871_v24 = vpop.f32.mrf.mxu0  ;;  %v919_v25 = vpop.f32.mrf.mxu1 }
 0x121   : > { %v588_v26 = vadd.f32 %v870_v22, %v1145_v50  ;;  %v652_v27 = vadd.f32 %v918_v23, %v1145_v50 }
 0x122   : > { %v872_v28 = vpop.f32.mrf.mxu0  ;;  %v920_v29 = vpop.f32.mrf.mxu1 }
 0x123   : > { %678 = vst [vmem:[%s1152_s30 + $0x60] sm:$0xff] %v588_v26  ;;  %694 = vst [vmem:[%s1152_s30 + $0xe0] sm:$0xff] %v652_v27  ;;  %v873_v30 = vadd.f32 %v872_v28, %v871_v24  ;;  %v921_v31 = vadd.f32 %v920_v29, %v919_v25 }
 0x124   : > { %v874_v32 = vpop.f32.mrf.mxu0  ;;  %v922_v33 = vpop.f32.mrf.mxu1 }
 0x125   : > { %v591_v34 = vadd.f32 %v873_v30, %v1145_v50  ;;  %v655_v35 = vadd.f32 %v921_v31, %v1145_v50 }
 0x126   : > { %v875_v36 = vpop.f32.mrf.mxu0  ;;  %v923_v37 = vpop.f32.mrf.mxu1 }
 0x127   : > { %679 = vst [vmem:[%s1152_s30 + $0x68] sm:$0xff] %v591_v34  ;;  %695 = vst [vmem:[%s1152_s30 + $0xe8] sm:$0xff] %v655_v35  ;;  %v876_v38 = vadd.f32 %v875_v36, %v874_v32  ;;  %v924_v39 = vadd.f32 %v923_v37, %v922_v33 }
 0x128   : > { %v877_v40 = vpop.f32.mrf.mxu0  ;;  %v925_v41 = vpop.f32.mrf.mxu1 }
 0x129   : > { %v596_v42 = vadd.f32 %v876_v38, %v1145_v50  ;;  %v660_v43 = vadd.f32 %v924_v39, %v1145_v50 }
 0x12a   : > { %v878_v44 = vpop.f32.mrf.mxu0  ;;  %v926_v45 = vpop.f32.mrf.mxu1 }
 0x12b   : > { %680 = vst [vmem:[%s1152_s30 + $0x70] sm:$0xff] %v596_v42  ;;  %696 = vst [vmem:[%s1152_s30 + $0xf0] sm:$0xff] %v660_v43  ;;  %v879_v46 = vadd.f32 %v878_v44, %v877_v40  ;;  %v927_v47 = vadd.f32 %v926_v45, %v925_v41 }
 0x12d   : > { %v599_v48 = vadd.f32 %v879_v46, %v1145_v50  ;;  %v663_v49 = vadd.f32 %v927_v47, %v1145_v50 }
 0x12f   : > { %681 = vst [vmem:[%s1152_s30 + $0x78] sm:$0xff] %v599_v48  ;;  %697 = vst [vmem:[%s1152_s30 + $0xf8] sm:$0xff] %v663_v49 }
 0x130 PF: > { %s13_s12 = sadd.s32 1, %s1022_s12  }
 0x131   : > { %p10_p4 = scmp.ge.s32.totalorder %s13_s12, 4  }
 0x133   :  { %12 = sbr.rel (!%p10_p4) target bundleno = 1 (0x1), region = 62 }

// kernel: decoder_forward.7
= control target key start
LH: loop header
LB: loop body
LE: loop exit
PB: predicated region body
PF: predicated region fallthrough
CT: control target
= control target key end

     0   :  { %s7837_s12 = smov 0   ;;  %s7839_s13 = smov 0   ;;  %s10168_s0 = inlined_call_operand.vmem [shape: bf16[2,2,160,1152], index: 0, kind: input, shape index: {}]   ;;  %s10169_s1 = inlined_call_operand.vmem [shape: bf16[3,1152,256], index: 1, kind: input, shape index: {}]   ;;  %s10170_s2 = inlined_call_operand.vmem [shape: f32[1,256], index: 2, kind: input, shape index: {}]   ;;  %s10171_s3 = inlined_call_operand.vmem [shape: bf16[2,2,128,256], index: 3, kind: output, shape index: {}]  }
   0x1   :  { %s7841_s14 = smov 0   ;;  %s7843_s15 = smov 0  }
   0x2   :  { %s7845_s16 = smov 0  }
   0x3 LB: > { %s28_s17 = sadd.s32 1, %s7806_s14  ;;  %s32_s18 = sadd.s32 1, %s7810_s15  ;;  %s7814_s16 = sphi %s7845_s16, %s13_s16   ;;  %s7810_s15 = sphi %s7843_s15, %s10261_s15   ;;  %s7806_s14 = sphi %s7841_s14, %s10260_s14   ;;  %s7802_s13 = sphi %s7839_s13, %s10259_s13   ;;  %s7798_s12 = sphi %s7837_s12, %s10258_s12  }
   0x4   : > { %p30_p0 = scmp.ge.s32.totalorder %s28_s17, 2  ;;  %p5873_p1 = scmp.ge.s32.totalorder %s7814_s16, 1 }
   0x5   : > { %p187_p2 = scmp.lt.s32.totalorder %s7814_s16, 5 }
   0x6   : > { %s10263_s17 = smov (%p30_p0, %s28_s17), 0  ;;  %s10265_s18 = smov (!%p30_p0, %s32_s18), %s7810_s15 }
   0x7   : > { %p188_p3 = pnand %p5873_p1, %p187_p2  ;;  %p34_p4 = scmp.ge.s32.totalorder %s10265_s18, 2 }
   0x9   : > { %s10267_s18 = smov (%p34_p4, %s10265_s18), 0  ;;  %191 = sbr.rel (%p188_p3) target bundleno = 765 (0x2fd), region = 32 }
   0xe   : > { %v6844_v0 = vld [vmem:[%s10169_s1 + $0x4f4] ss:$8 sps:$4 sm:$0xff]   ;;  %v6848_v2 = vld [vmem:[%s10169_s1 + $0x4f0] ss:$8 sps:$4 sm:$0xff]   ;;  %v6850_v4 = vld [vmem:[%s10169_s1 + $0x4e4] ss:$8 sps:$4 sm:$0xff]  }
   0xf   : > { %v6846_v1 = vld [vmem:[%s10169_s1 + $0x5f4] ss:$8 sps:$4 sm:$0xff]   ;;  %1734 = vmatprep.subr.bf16.mxu0 %v6844_v0  ;;  %v6849_v3 = vld [vmem:[%s10169_s1 + $0x5f0] ss:$8 sps:$4 sm:$0xff]   ;;  %v6852_v5 = vld [vmem:[%s10169_s1 + $0x5e4] ss:$8 sps:$4 sm:$0xff]  }
  0x10   : > { %1847 = vmatprep.subr.bf16.mxu1 %v6846_v1  ;;  %1735 = vmatpush1.bf16.msra.mxu0 %v6848_v2  ;;  %v6854_v6 = vld [vmem:[%s10169_s1 + $0x4e0] ss:$8 sps:$4 sm:$0xff]   ;;  %v6856_v8 = vld [vmem:[%s10169_s1 + $0x4d4] ss:$8 sps:$4 sm:$0xff]   ;;  %v6860_v10 = vld [vmem:[%s10169_s1 + $0x4d0] ss:$8 sps:$4 sm:$0xff]  }
  0x11   : > { %1848 = vmatpush1.bf16.msra.mxu1 %v6849_v3  ;;  %1736 = vmatprep.subr.bf16.mxu0 %v6850_v4  ;;  %v6855_v7 = vld [vmem:[%s10169_s1 + $0x5e0] ss:$8 sps:$4 sm:$0xff]   ;;  %v6858_v9 = vld [vmem:[%s10169_s1 + $0x5d4] ss:$8 sps:$4 sm:$0xff]   ;;  %v6861_v11 = vld [vmem:[%s10169_s1 + $0x5d0] ss:$8 sps:$4 sm:$0xff]  }
  0x12   : > { %1849 = vmatprep.subr.bf16.mxu1 %v6852_v5  ;;  %v6862_v12 = vld [vmem:[%s10169_s1 + $0x4c4] ss:$8 sps:$4 sm:$0xff]   ;;  %v6866_v14 = vld [vmem:[%s10169_s1 + $0x4c0] ss:$8 sps:$4 sm:$0xff]   ;;  %v6868_v16 = vld [vmem:[%s10169_s1 + $0x4b4] ss:$8 sps:$4 sm:$0xff]  }
  0x13   : > { %v6864_v13 = vld [vmem:[%s10169_s1 + $0x5c4] ss:$8 sps:$4 sm:$0xff]   ;;  %v6867_v15 = vld [vmem:[%s10169_s1 + $0x5c0] ss:$8 sps:$4 sm:$0xff]   ;;  %v6870_v17 = vld [vmem:[%s10169_s1 + $0x5b4] ss:$8 sps:$4 sm:$0xff]  }
  0x14   : > { %1737 = vmatpush1.bf16.msra.mxu0 %v6854_v6  ;;  %v6872_v18 = vld [vmem:[%s10169_s1 + $0x4b0] ss:$8 sps:$4 sm:$0xff]   ;;  %v6874_v20 = vld [vmem:[%s10169_s1 + $0x4a4] ss:$8 sps:$4 sm:$0xff]   ;;  %v6878_v22 = vld [vmem:[%s10169_s1 + $0x4a0] ss:$8 sps:$4 sm:$0xff]  }
  0x15   : > { %1850 = vmatpush1.bf16.msra.mxu1 %v6855_v7  ;;  %1738 = vmatprep.subr.bf16.mxu0 %v6856_v8  ;;  %v6873_v19 = vld [vmem:[%s10169_s1 + $0x5b0] ss:$8 sps:$4 sm:$0xff]   ;;  %v6876_v21 = vld [vmem:[%s10169_s1 + $0x5a4] ss:$8 sps:$4 sm:$0xff]   ;;  %v6879_v23 = vld [vmem:[%s10169_s1 + $0x5a0] ss:$8 sps:$4 sm:$0xff]  }
  0x16   : > { %1851 = vmatprep.subr.bf16.mxu1 %v6858_v9  ;;  %v6880_v24 = vld [vmem:[%s10169_s1 + $0x494] ss:$8 sps:$4 sm:$0xff]   ;;  %p232_p5 = scmp.lt.s32.totalorder %s7802_s13, 1  ;;  %p234_p6 = scmp.lt.s32.totalorder %s7798_s12, 1  ;;  %v6884_v26 = vld [vmem:[%s10169_s1 + $0x490] ss:$8 sps:$4 sm:$0xff]  }
  0x17   : > { %v6882_v25 = vld [vmem:[%s10169_s1 + $0x594] ss:$8 sps:$4 sm:$0xff]   ;;  %v6885_v27 = vld [vmem:[%s10169_s1 + $0x590] ss:$8 sps:$4 sm:$0xff]   ;;  %v6886_v28 = vld [vmem:[%s10169_s1 + $0x484] ss:$8 sps:$4 sm:$0xff]  }
  0x18   : > { %1739 = vmatpush1.bf16.msra.mxu0 %v6860_v10  ;;  %v6888_v29 = vld [vmem:[%s10169_s1 + $0x584] ss:$8 sps:$4 sm:$0xff]   ;;  %s10269_s13 = smov (!%p232_p5, %s7802_s13), 1  ;;  %s10271_s12 = smov (!%p234_p6, %s7798_s12), 1  ;;  %v6890_v30 = vld [vmem:[%s10169_s1 + $0x480] ss:$8 sps:$4 sm:$0xff]  }
  0x19   : > { %1852 = vmatpush1.bf16.msra.mxu1 %v6861_v11  ;;  %1740 = vmatprep.subr.bf16.mxu0 %v6862_v12  ;;  %v6891_v31 = vld [vmem:[%s10169_s1 + $0x580] ss:$8 sps:$4 sm:$0xff]   ;;  %v6892_v32 = vld [vmem:[%s10169_s1 + $0x574] ss:$8 sps:$4 sm:$0xff]   ;;  %s6802_s27 = smul.u32 360, %s10269_s13  ;;  %s5875_s4 = sshll.u32 %s10271_s12, 5 }
  0x1a   : > { %1853 = vmatprep.subr.bf16.mxu1 %v6864_v13  ;;  %v6894_v33 = vld [vmem:[%s10169_s1 + $0x674] ss:$8 sps:$4 sm:$0xff]   ;;  %s6801_s28 = smul.u32 180, %s10271_s12  ;;  %v6896_v34 = vld [vmem:[%s10169_s1 + $0x570] ss:$8 sps:$4 sm:$0xff]   ;;  %s5876_s5 = sshll.u32 %s10269_s13, 6 }
  0x1b   : > { %v6897_v35 = vld [vmem:[%s10169_s1 + $0x670] ss:$8 sps:$4 sm:$0xff]   ;;  %v6898_v36 = vld [vmem:[%s10169_s1 + $0x564] ss:$8 sps:$4 sm:$0xff]   ;;  %v6902_v38 = vld [vmem:[%s10169_s1 + $0x560] ss:$8 sps:$4 sm:$0xff]   ;;  %s10037_s12 = sadd.s32 %s5876_s5, %s5875_s4 }
  0x1c   : > { %1741 = vmatpush1.bf16.msra.mxu0 %v6866_v14  ;;  %v6900_v37 = vld [vmem:[%s10169_s1 + $0x664] ss:$8 sps:$4 sm:$0xff]   ;;  %s238_s10 = sadd.s32 %s6802_s27, %s6801_s28  ;;  %v6903_v39 = vld [vmem:[%s10169_s1 + $0x660] ss:$8 sps:$4 sm:$0xff]   ;;  %v6904_v40 = vld [vmem:[%s10169_s1 + $0x554] ss:$8 sps:$4 sm:$0xff]  }
  0x1d   : > { %1854 = vmatpush1.bf16.msra.mxu1 %v6867_v15  ;;  %1742 = vmatprep.subr.bf16.mxu0 %v6868_v16  ;;  %v6906_v41 = vld [vmem:[%s10169_s1 + $0x654] ss:$8 sps:$4 sm:$0xff]   ;;  %s5874_s26 = sshll.u32 %s238_s10, 2  ;;  %v6908_v42 = vld [vmem:[%s10169_s1 + $0x550] ss:$8 sps:$4 sm:$0xff]   ;;  %s5877_s13 = sshll.u32 %s10037_s12, 2 }
  0x1e   : > { %1855 = vmatprep.subr.bf16.mxu1 %v6870_v17  ;;  %v6909_v43 = vld [vmem:[%s10169_s1 + $0x650] ss:$8 sps:$4 sm:$0xff]   ;;  %v6910_v44 = vld [vmem:[%s10169_s1 + $0x544] ss:$8 sps:$4 sm:$0xff]   ;;  %s8019_s8 = scalar_lea.vmem %s10168_s0, %s5874_s26  ;;  %v6914_v46 = vld [vmem:[%s10169_s1 + $0x540] ss:$8 sps:$4 sm:$0xff]   ;;  %s10058_s9 = scalar_lea.vmem %s10171_s3, %s5877_s13 }
  0x1f   : > { %v6912_v45 = vld [vmem:[%s10169_s1 + $0x644] ss:$8 sps:$4 sm:$0xff]   ;;  %v6915_v47 = vld [vmem:[%s10169_s1 + $0x640] ss:$8 sps:$4 sm:$0xff]   ;;  %v6916_v48 = vld [vmem:[%s10169_s1 + $0x534] ss:$8 sps:$4 sm:$0xff]  }
  0x20   : > { %1743 = vmatpush1.bf16.msra.mxu0 %v6872_v18  ;;  %v6942_v49 = vld [vmem:[%s8019_s8 + $0x4c] ss:$36 sps:$4 sm:$0xff]   ;;  %v6918_v50 = vld [vmem:[%s10169_s1 + $0x634] ss:$8 sps:$4 sm:$0xff]   ;;  %v6926_v56 = vld [vmem:[%s10169_s1 + $0x520] ss:$8 sps:$4 sm:$0xff]  }
  0x21   : > { %1856 = vmatpush1.bf16.msra.mxu1 %v6873_v19  ;;  %1744 = vmatprep.subr.bf16.mxu0 %v6874_v20  ;;  %v6945_v51 = vld [vmem:[%s8019_s8 + $0x54] ss:$36 sps:$4 sm:$0xff]   ;;  %v6922_v54 = vld [vmem:[%s10169_s1 + $0x524] ss:$8 sps:$4 sm:$0xff]   ;;  %v6927_v57 = vld [vmem:[%s10169_s1 + $0x620] ss:$8 sps:$4 sm:$0xff]  }
  0x22   : > { %1857 = vmatprep.subr.bf16.mxu1 %v6876_v21  ;;  %1766 = vmatprep.mubr.bf16.mxu0 %v6942_v49  ;;  %v6920_v52 = vld [vmem:[%s10169_s1 + $0x530] ss:$8 sps:$4 sm:$0xff]   ;;  %v6924_v55 = vld [vmem:[%s10169_s1 + $0x624] ss:$8 sps:$4 sm:$0xff]   ;;  %v6928_v58 = vld [vmem:[%s10169_s1 + $0x514] ss:$8 sps:$4 sm:$0xff]  }
  0x23   : > { %v6921_v53 = vld [vmem:[%s10169_s1 + $0x630] ss:$8 sps:$4 sm:$0xff]   ;;  %1879 = vmatprep.mubr.bf16.mxu1 %v6945_v51  ;;  %v6930_v59 = vld [vmem:[%s10169_s1 + $0x614] ss:$8 sps:$4 sm:$0xff]   ;;  %v6934_v62 = vld [vmem:[%s10169_s1 + $0x504] ss:$8 sps:$4 sm:$0xff]  }
  0x24   : > { %1745 = vmatpush1.bf16.msra.mxu0 %v6878_v22  ;;  %v6932_v60 = vld [vmem:[%s10169_s1 + $0x510] ss:$8 sps:$4 sm:$0xff]   ;;  %v6936_v63 = vld [vmem:[%s10169_s1 + $0x604] ss:$8 sps:$4 sm:$0xff]   ;;  %v6938_v0 = vld [vmem:[%s10169_s1 + $0x500] ss:$8 sps:$4 sm:$0xff]  }
  0x25   : > { %1858 = vmatpush1.bf16.msra.mxu1 %v6879_v23  ;;  %1746 = vmatprep.subr.bf16.mxu0 %v6880_v24  ;;  %v6933_v61 = vld [vmem:[%s10169_s1 + $0x610] ss:$8 sps:$4 sm:$0xff]   ;;  %v6939_v1 = vld [vmem:[%s10169_s1 + $0x600] ss:$8 sps:$4 sm:$0xff]   ;;  %v6948_v2 = vld [vmem:[%s10169_s1 + $0x6f4] ss:$8 sps:$4 sm:$0xff]  }
  0x26   : > { %1859 = vmatprep.subr.bf16.mxu1 %v6882_v25  ;;  %v6951_v3 = vld [vmem:[%s10169_s1 + $0x7f4] ss:$8 sps:$4 sm:$0xff]   ;;  %v6940_v4 = vld [vmem:[%s8019_s8 + $0x48] ss:$36 sps:$4 sm:$0xff]   ;;  %v6946_v6 = vld [vmem:[%s10169_s1 + $0x6f0] ss:$8 sps:$4 sm:$0xff]  }
  0x27   : > { %v6943_v5 = vld [vmem:[%s8019_s8 + $0x50] ss:$36 sps:$4 sm:$0xff]   ;;  %v6954_v8 = vld [vmem:[%s10169_s1 + $0x6e4] ss:$8 sps:$4 sm:$0xff]   ;;  %v6960_v11 = vld [vmem:[%s8019_s8 + $0x9c] ss:$36 sps:$4 sm:$0xff]  }
  0x28   : > { %1747 = vmatpush1.bf16.msra.mxu0 %v6884_v26  ;;  %v6949_v7 = vld [vmem:[%s10169_s1 + $0x7f0] ss:$8 sps:$4 sm:$0xff]   ;;  %v6957_v9 = vld [vmem:[%s10169_s1 + $0x7e4] ss:$8 sps:$4 sm:$0xff]   ;;  %v6952_v12 = vld [vmem:[%s10169_s1 + $0x6e0] ss:$8 sps:$4 sm:$0xff]  }
  0x29   : > { %1860 = vmatpush1.bf16.msra.mxu1 %v6885_v27  ;;  %1748 = vmatprep.subr.bf16.mxu0 %v6886_v28  ;;  %v6958_v10 = vld [vmem:[%s8019_s8 + $0x94] ss:$36 sps:$4 sm:$0xff]   ;;  %v6955_v13 = vld [vmem:[%s10169_s1 + $0x7e0] ss:$8 sps:$4 sm:$0xff]   ;;  %v6972_v20 = vld [vmem:[%s10169_s1 + $0x6c4] ss:$8 sps:$4 sm:$0xff]  }
  0x2a   : > { %1861 = vmatprep.subr.bf16.mxu1 %v6888_v29  ;;  %v6966_v14 = vld [vmem:[%s10169_s1 + $0x6d4] ss:$8 sps:$4 sm:$0xff]   ;;  %v6964_v18 = vld [vmem:[%s10169_s1 + $0x6d0] ss:$8 sps:$4 sm:$0xff]   ;;  %v6975_v21 = vld [vmem:[%s10169_s1 + $0x7c4] ss:$8 sps:$4 sm:$0xff]  }
  0x2b   : > { %v6969_v15 = vld [vmem:[%s10169_s1 + $0x7d4] ss:$8 sps:$4 sm:$0xff]   ;;  %v6967_v19 = vld [vmem:[%s10169_s1 + $0x7d0] ss:$8 sps:$4 sm:$0xff]   ;;  %v6978_v23 = vld [vmem:[%s8019_s8 + $0xe4] ss:$36 sps:$4 sm:$0xff]  }
  0x2c   : > { %1749 = vmatpush1.bf16.msra.mxu0 %v6890_v30  ;;  %v6962_v16 = vld [vmem:[%s8019_s8 + $0x90] ss:$36 sps:$4 sm:$0xff]   ;;  %v6963_v17 = vld [vmem:[%s8019_s8 + $0x98] ss:$36 sps:$4 sm:$0xff]   ;;  %v6970_v24 = vld [vmem:[%s10169_s1 + $0x6c0] ss:$8 sps:$4 sm:$0xff]  }
  0x2d   : > { %1862 = vmatpush1.bf16.msra.mxu1 %v6891_v31  ;;  %1750 = vmatprep.subr.bf16.mxu0 %v6892_v32  ;;  %v6976_v22 = vld [vmem:[%s8019_s8 + $0xdc] ss:$36 sps:$4 sm:$0xff]   ;;  %v6982_v30 = vld [vmem:[%s10169_s1 + $0x6b0] ss:$8 sps:$4 sm:$0xff]   ;;  %v6990_v32 = vld [vmem:[%s10169_s1 + $0x6a4] ss:$8 sps:$4 sm:$0xff]  }
  0x2e   : > { %1863 = vmatprep.subr.bf16.mxu1 %v6894_v33  ;;  %v6973_v25 = vld [vmem:[%s10169_s1 + $0x7c0] ss:$8 sps:$4 sm:$0xff]   ;;  %v6984_v26 = vld [vmem:[%s10169_s1 + $0x6b4] ss:$8 sps:$4 sm:$0xff]   ;;  %v6985_v31 = vld [vmem:[%s10169_s1 + $0x7b0] ss:$8 sps:$4 sm:$0xff]  }
  0x2f   : > { %v6987_v27 = vld [vmem:[%s10169_s1 + $0x7b4] ss:$8 sps:$4 sm:$0xff]   ;;  %v6981_v29 = vld [vmem:[%s8019_s8 + $0xe0] ss:$36 sps:$4 sm:$0xff]  }
  0x30   : > { %1751 = vmatpush2.bf16.msra.mxu0 %v6896_v34  ;;  %v6980_v28 = vld [vmem:[%s8019_s8 + $0xd8] ss:$36 sps:$4 sm:$0xff]   ;;  %v6993_v33 = vld [vmem:[%s10169_s1 + $0x7a4] ss:$8 sps:$4 sm:$0xff]   ;;  %v7009_v49 = vld [vmem:[%s10169_s1 + $0x780] ss:$8 sps:$4 sm:$0xff]  }
  0x31   : > { %1864 = vmatpush2.bf16.msra.mxu1 %v6897_v35  ;;  %1752 = vmatprep.subr.bf16.mxu0 %v6898_v36  ;;  %v6994_v34 = vld [vmem:[%s8019_s8 + $0x124] ss:$36 sps:$4 sm:$0xff]   ;;  %v6996_v35 = vld [vmem:[%s8019_s8 + $0x12c] ss:$36 sps:$4 sm:$0xff]   ;;  %v7023_v51 = vld [vmem:[%s10169_s1 + $0x874] ss:$8 sps:$4 sm:$0xff]  }
  0x32   : > { %1865 = vmatprep.subr.bf16.mxu1 %v6900_v37  ;;  %v6988_v36 = vld [vmem:[%s10169_s1 + $0x6a0] ss:$8 sps:$4 sm:$0xff]  }
  0x33   : > { %v6991_v37 = vld [vmem:[%s10169_s1 + $0x7a0] ss:$8 sps:$4 sm:$0xff]  }
  0x34   : > { %1753 = vmatpush2.bf16.msra.mxu0 %v6902_v38  ;;  %v7002_v38 = vld [vmem:[%s10169_s1 + $0x694] ss:$8 sps:$4 sm:$0xff]  }
  0x35   : > { %1866 = vmatpush2.bf16.msra.mxu1 %v6903_v39  ;;  %1754 = vmatprep.subr.bf16.mxu0 %v6904_v40  ;;  %v7005_v39 = vld [vmem:[%s10169_s1 + $0x794] ss:$8 sps:$4 sm:$0xff]   ;;  %v6998_v40 = vld [vmem:[%s8019_s8 + $0x120] ss:$36 sps:$4 sm:$0xff]  }
  0x36   : > { %1867 = vmatprep.subr.bf16.mxu1 %v6906_v41  ;;  %v6999_v41 = vld [vmem:[%s8019_s8 + $0x128] ss:$36 sps:$4 sm:$0xff]  }
  0x38   : > { %1755 = vmatpush2.bf16.msra.mxu0 %v6908_v42  ;;  %v7000_v42 = vld [vmem:[%s10169_s1 + $0x690] ss:$8 sps:$4 sm:$0xff]  }
  0x39   : > { %1868 = vmatpush2.bf16.msra.mxu1 %v6909_v43  ;;  %1756 = vmatprep.subr.bf16.mxu0 %v6910_v44  ;;  %v7003_v43 = vld [vmem:[%s10169_s1 + $0x790] ss:$8 sps:$4 sm:$0xff]   ;;  %v7008_v44 = vld [vmem:[%s10169_s1 + $0x684] ss:$8 sps:$4 sm:$0xff]  }
  0x3a   : > { %1869 = vmatprep.subr.bf16.mxu1 %v6912_v45  ;;  %v7011_v45 = vld [vmem:[%s10169_s1 + $0x784] ss:$8 sps:$4 sm:$0xff]  }
  0x3c   : > { %1757 = vmatpush2.bf16.msra.mxu0 %v6914_v46  ;;  %v7012_v46 = vld [vmem:[%s8019_s8 + $0x16c] ss:$36 sps:$4 sm:$0xff]  }
  0x3d   : > { %1870 = vmatpush2.bf16.msra.mxu1 %v6915_v47  ;;  %1758 = vmatprep.subr.bf16.mxu0 %v6916_v48  ;;  %v7014_v47 = vld [vmem:[%s8019_s8 + $0x174] ss:$36 sps:$4 sm:$0xff]   ;;  %v7006_v48 = vld [vmem:[%s10169_s1 + $0x680] ss:$8 sps:$4 sm:$0xff]  }
  0x3e   : > { %1871 = vmatprep.subr.bf16.mxu1 %v6918_v50  ;;  %v7020_v50 = vld [vmem:[%s10169_s1 + $0x774] ss:$8 sps:$4 sm:$0xff]  }
  0x40   : > { %1759 = vmatpush2.bf16.msra.mxu0 %v6920_v52  ;;  %v7016_v52 = vld [vmem:[%s8019_s8 + $0x168] ss:$36 sps:$4 sm:$0xff]  }
  0x41   : > { %1872 = vmatpush2.bf16.msra.mxu1 %v6921_v53  ;;  %1760 = vmatprep.subr.bf16.mxu0 %v6922_v54  ;;  %v7017_v53 = vld [vmem:[%s8019_s8 + $0x170] ss:$36 sps:$4 sm:$0xff]  }
  0x42   : > { %1873 = vmatprep.subr.bf16.mxu1 %v6924_v55  ;;  %v7018_v54 = vld [vmem:[%s10169_s1 + $0x770] ss:$8 sps:$4 sm:$0xff]  }
  0x43   : > { %v7021_v55 = vld [vmem:[%s10169_s1 + $0x870] ss:$8 sps:$4 sm:$0xff]  }
  0x44   : > { %1761 = vmatpush2.bf16.msra.mxu0 %v6926_v56  ;;  %v7026_v56 = vld [vmem:[%s10169_s1 + $0x764] ss:$8 sps:$4 sm:$0xff]  }
  0x45   : > { %1874 = vmatpush2.bf16.msra.mxu1 %v6927_v57  ;;  %1762 = vmatprep.subr.bf16.mxu0 %v6928_v58  ;;  %v7029_v57 = vld [vmem:[%s10169_s1 + $0x864] ss:$8 sps:$4 sm:$0xff]   ;;  %v7030_v58 = vld [vmem:[%s8019_s8 + $0x1b4] ss:$36 sps:$4 sm:$0xff]  }
  0x46   : > { %1875 = vmatprep.subr.bf16.mxu1 %v6930_v59  ;;  %v7032_v59 = vld [vmem:[%s8019_s8 + $0x1bc] ss:$36 sps:$4 sm:$0xff]  }
  0x48   : > { %1763 = vmatpush2.bf16.msra.mxu0 %v6932_v60  ;;  %v7024_v60 = vld [vmem:[%s10169_s1 + $0x760] ss:$8 sps:$4 sm:$0xff]  }
  0x49   : > { %1876 = vmatpush2.bf16.msra.mxu1 %v6933_v61  ;;  %1764 = vmatprep.subr.bf16.mxu0 %v6934_v62  ;;  %v7027_v61 = vld [vmem:[%s10169_s1 + $0x860] ss:$8 sps:$4 sm:$0xff]   ;;  %v7038_v62 = vld [vmem:[%s10169_s1 + $0x754] ss:$8 sps:$4 sm:$0xff]  }
  0x4a   : > { %1877 = vmatprep.subr.bf16.mxu1 %v6936_v63  ;;  %v7041_v63 = vld [vmem:[%s10169_s1 + $0x854] ss:$8 sps:$4 sm:$0xff]  }
  0x4c   : > { %1765 = vmatpush2.bf16.msra.mxu0 %v6938_v0  ;;  %v7034_v0 = vld [vmem:[%s8019_s8 + $0x1b0] ss:$36 sps:$4 sm:$0xff]  }
  0x4d   : > { %1878 = vmatpush2.bf16.msra.mxu1 %v6939_v1  ;;  %1960 = vmatprep.subr.bf16.mxu0 %v6948_v2  ;;  %v7035_v1 = vld [vmem:[%s8019_s8 + $0x1b8] ss:$36 sps:$4 sm:$0xff]  }
  0x4e   : > { %2073 = vmatprep.subr.bf16.mxu1 %v6951_v3  ;;  %v7036_v2 = vld [vmem:[%s10169_s1 + $0x750] ss:$8 sps:$4 sm:$0xff]  }
  0x4f   : > { %1767 = vmatmul.mubr.bf16.vlgmr.msra.gmra.mxu0 %v6940_v4  ;;  %v7039_v3 = vld [vmem:[%s10169_s1 + $0x850] ss:$8 sps:$4 sm:$0xff]   ;;  %v7044_v4 = vld [vmem:[%s10169_s1 + $0x744] ss:$8 sps:$4 sm:$0xff]  }
  0x50   : > { %1880 = vmatmul.mubr.bf16.vlgmr.msra.gmra.mxu1 %v6943_v5  ;;  %1961 = vmatpush1.bf16.msra.mxu0 %v6946_v6  ;;  %v7047_v5 = vld [vmem:[%s10169_s1 + $0x844] ss:$8 sps:$4 sm:$0xff]   ;;  %v7048_v6 = vld [vmem:[%s8019_s8 + $0x1fc] ss:$36 sps:$4 sm:$0xff]  }
  0x51   : > { %2074 = vmatpush1.bf16.msra.mxu1 %v6949_v7  ;;  %1962 = vmatprep.subr.bf16.mxu0 %v6954_v8  ;;  %v7050_v7 = vld [vmem:[%s8019_s8 + $0x204] ss:$36 sps:$4 sm:$0xff]  }
  0x52   : > { %2075 = vmatprep.subr.bf16.mxu1 %v6957_v9  ;;  %1776 = vmatprep.mubr.bf16.mxu0 %v6958_v10  ;;  %v7042_v8 = vld [vmem:[%s10169_s1 + $0x740] ss:$8 sps:$4 sm:$0xff]   ;;  %v7056_v10 = vld [vmem:[%s10169_s1 + $0x734] ss:$8 sps:$4 sm:$0xff]  }
  0x53   : > { %1889 = vmatprep.mubr.bf16.mxu1 %v6960_v11  ;;  %v7045_v9 = vld [vmem:[%s10169_s1 + $0x840] ss:$8 sps:$4 sm:$0xff]   ;;  %v7052_v11 = vld [vmem:[%s8019_s8 + $0x1f8] ss:$36 sps:$4 sm:$0xff]  }
  0x54   : > { %1963 = vmatpush1.bf16.msra.mxu0 %v6952_v12  ;;  %v7059_v12 = vld [vmem:[%s10169_s1 + $0x834] ss:$8 sps:$4 sm:$0xff]  }
  0x55   : > { %2076 = vmatpush1.bf16.msra.mxu1 %v6955_v13  ;;  %1964 = vmatprep.subr.bf16.mxu0 %v6966_v14  ;;  %v7053_v13 = vld [vmem:[%s8019_s8 + $0x200] ss:$36 sps:$4 sm:$0xff]   ;;  %v7054_v14 = vld [vmem:[%s10169_s1 + $0x730] ss:$8 sps:$4 sm:$0xff]  }
  0x56   : > { %2077 = vmatprep.subr.bf16.mxu1 %v6969_v15  ;;  %v7057_v15 = vld [vmem:[%s10169_s1 + $0x830] ss:$8 sps:$4 sm:$0xff]  }
  0x57   : > { %1777 = vmatmul.mubr.bf16.gmra.mxu0 %v6962_v16  ;;  %v7062_v16 = vld [vmem:[%s10169_s1 + $0x724] ss:$8 sps:$4 sm:$0xff]  }
  0x58   : > { %1890 = vmatmul.mubr.bf16.gmra.mxu1 %v6963_v17  ;;  %1965 = vmatpush1.bf16.msra.mxu0 %v6964_v18  ;;  %v7065_v17 = vld [vmem:[%s10169_s1 + $0x824] ss:$8 sps:$4 sm:$0xff]  }
  0x59   : > { %2078 = vmatpush1.bf16.msra.mxu1 %v6967_v19  ;;  %1966 = vmatprep.subr.bf16.mxu0 %v6972_v20  ;;  %v7066_v18 = vld [vmem:[%s8019_s8 + $0x244] ss:$36 sps:$4 sm:$0xff]   ;;  %v7068_v19 = vld [vmem:[%s8019_s8 + $0x24c] ss:$36 sps:$4 sm:$0xff]  }
  0x5a   : > { %2079 = vmatprep.subr.bf16.mxu1 %v6975_v21  ;;  %1786 = vmatprep.mubr.bf16.mxu0 %v6976_v22  ;;  %v7060_v20 = vld [vmem:[%s10169_s1 + $0x720] ss:$8 sps:$4 sm:$0xff]   ;;  %v7074_v22 = vld [vmem:[%s10169_s1 + $0x714] ss:$8 sps:$4 sm:$0xff]  }
  0x5b   : > { %1899 = vmatprep.mubr.bf16.mxu1 %v6978_v23  ;;  %v7063_v21 = vld [vmem:[%s10169_s1 + $0x820] ss:$8 sps:$4 sm:$0xff]   ;;  %v7077_v23 = vld [vmem:[%s10169_s1 + $0x814] ss:$8 sps:$4 sm:$0xff]  }
  0x5c   : > { %1967 = vmatpush1.bf16.msra.mxu0 %v6970_v24  ;;  %v7070_v24 = vld [vmem:[%s8019_s8 + $0x240] ss:$36 sps:$4 sm:$0xff]  }
  0x5d   : > { %2080 = vmatpush1.bf16.msra.mxu1 %v6973_v25  ;;  %1968 = vmatprep.subr.bf16.mxu0 %v6984_v26  ;;  %v7071_v25 = vld [vmem:[%s8019_s8 + $0x248] ss:$36 sps:$4 sm:$0xff]   ;;  %v7072_v26 = vld [vmem:[%s10169_s1 + $0x710] ss:$8 sps:$4 sm:$0xff]  }
  0x5e   : > { %2081 = vmatprep.subr.bf16.mxu1 %v6987_v27  ;;  %v7075_v27 = vld [vmem:[%s10169_s1 + $0x810] ss:$8 sps:$4 sm:$0xff]  }
  0x5f   : > { %1787 = vmatmul.mubr.bf16.gmra.mxu0 %v6980_v28  ;;  %v7080_v28 = vld [vmem:[%s10169_s1 + $0x704] ss:$8 sps:$4 sm:$0xff]  }
  0x60   : > { %1900 = vmatmul.mubr.bf16.gmra.mxu1 %v6981_v29  ;;  %1969 = vmatpush1.bf16.msra.mxu0 %v6982_v30  ;;  %v7083_v29 = vld [vmem:[%s10169_s1 + $0x804] ss:$8 sps:$4 sm:$0xff]   ;;  %v7086_v30 = vld [vmem:[%s8019_s8 + $0x5c] ss:$36 sps:$4 sm:$0xff]  }
  0x61   : > { %2082 = vmatpush1.bf16.msra.mxu1 %v6985_v31  ;;  %1970 = vmatprep.subr.bf16.mxu0 %v6990_v32  ;;  %v7089_v31 = vld [vmem:[%s8019_s8 + $0x64] ss:$36 sps:$4 sm:$0xff]  }
  0x62   : > { %2083 = vmatprep.subr.bf16.mxu1 %v6993_v33  ;;  %1796 = vmatprep.mubr.bf16.mxu0 %v6994_v34  ;;  %v7078_v32 = vld [vmem:[%s10169_s1 + $0x700] ss:$8 sps:$4 sm:$0xff]   ;;  %v7092_v34 = vld [vmem:[%s10169_s1 + $0x8f4] ss:$8 sps:$4 sm:$0xff]  }
  0x63   : > { %1909 = vmatprep.mubr.bf16.mxu1 %v6996_v35  ;;  %v7081_v33 = vld [vmem:[%s10169_s1 + $0x800] ss:$8 sps:$4 sm:$0xff]   ;;  %v7095_v35 = vld [vmem:[%s10169_s1 + $0x74] ss:$8 sps:$4 sm:$0xff]  }
  0x64   : > { %1971 = vmatpush1.bf16.msra.mxu0 %v6988_v36  ;;  %v7084_v36 = vld [vmem:[%s8019_s8 + $0x58] ss:$36 sps:$4 sm:$0xff]  }
  0x65   : > { %2084 = vmatpush1.bf16.msra.mxu1 %v6991_v37  ;;  %1972 = vmatprep.subr.bf16.mxu0 %v7002_v38  ;;  %v7087_v37 = vld [vmem:[%s8019_s8 + $0x60] ss:$36 sps:$4 sm:$0xff]   ;;  %v7090_v38 = vld [vmem:[%s10169_s1 + $0x8f0] ss:$8 sps:$4 sm:$0xff]  }
  0x66   : > { %2085 = vmatprep.subr.bf16.mxu1 %v7005_v39  ;;  %v7093_v39 = vld [vmem:[%s10169_s1 + $0x70] ss:$8 sps:$4 sm:$0xff]  }
  0x67   : > { %1797 = vmatmul.mubr.bf16.gmra.mxu0 %v6998_v40  ;;  %v7098_v40 = vld [vmem:[%s10169_s1 + $0x64] ss:$8 sps:$4 sm:$0xff]  }
  0x68   : > { %1910 = vmatmul.mubr.bf16.gmra.mxu1 %v6999_v41  ;;  %1973 = vmatpush1.bf16.msra.mxu0 %v7000_v42  ;;  %v7099_v41 = vld [vmem:[%s8019_s8 + $0xa4] ss:$36 sps:$4 sm:$0xff]   ;;  %v7101_v42 = vld [vmem:[%s8019_s8 + $0xac] ss:$36 sps:$4 sm:$0xff]  }
  0x69   : > { %2086 = vmatpush1.bf16.msra.mxu1 %v7003_v43  ;;  %1974 = vmatprep.subr.bf16.mxu0 %v7008_v44  ;;  %v7107_v43 = vld [vmem:[%s10169_s1 + $0x8e4] ss:$8 sps:$4 sm:$0xff]   ;;  %v7096_v44 = vld [vmem:[%s10169_s1 + $0x60] ss:$8 sps:$4 sm:$0xff]  }
  0x6a   : > { %2087 = vmatprep.subr.bf16.mxu1 %v7011_v45  ;;  %1806 = vmatprep.mubr.bf16.mxu0 %v7012_v46  ;;  %v7105_v45 = vld [vmem:[%s10169_s1 + $0x8e0] ss:$8 sps:$4 sm:$0xff]   ;;  %v7110_v46 = vld [vmem:[%s10169_s1 + $0x54] ss:$8 sps:$4 sm:$0xff]  }
  0x6b   : > { %1919 = vmatprep.mubr.bf16.mxu1 %v7014_v47  ;;  %v7122_v47 = vld [vmem:[%s10169_s1 + $0x8d4] ss:$8 sps:$4 sm:$0xff]  }
  0x6c   : > { %1975 = vmatpush1.bf16.msra.mxu0 %v7006_v48  ;;  %v7103_v48 = vld [vmem:[%s8019_s8 + $0xa0] ss:$36 sps:$4 sm:$0xff]  }
  0x6d   : > { %2088 = vmatpush1.bf16.msra.mxu1 %v7009_v49  ;;  %1976 = vmatprep.subr.bf16.mxu0 %v7020_v50  ;;  %v7104_v49 = vld [vmem:[%s8019_s8 + $0xa8] ss:$36 sps:$4 sm:$0xff]   ;;  %v7108_v50 = vld [vmem:[%s10169_s1 + $0x50] ss:$8 sps:$4 sm:$0xff]  }
  0x6e   : > { %2089 = vmatprep.subr.bf16.mxu1 %v7023_v51  ;;  %v7113_v51 = vld [vmem:[%s10169_s1 + $0x44] ss:$8 sps:$4 sm:$0xff]  }
  0x6f   : > { %1807 = vmatmul.mubr.bf16.gmra.mxu0 %v7016_v52  ;;  %v7114_v52 = vld [vmem:[%s8019_s8 + $0xec] ss:$36 sps:$4 sm:$0xff]  }
  0x70   : > { %1920 = vmatmul.mubr.bf16.gmra.mxu1 %v7017_v53  ;;  %1977 = vmatpush2.bf16.msra.mxu0 %v7018_v54  ;;  %v7116_v53 = vld [vmem:[%s8019_s8 + $0xf4] ss:$36 sps:$4 sm:$0xff]  }
  0x71   : > { %2090 = vmatpush2.bf16.msra.mxu1 %v7021_v55  ;;  %1978 = vmatprep.subr.bf16.mxu0 %v7026_v56  ;;  %v7120_v54 = vld [vmem:[%s10169_s1 + $0x8d0] ss:$8 sps:$4 sm:$0xff]   ;;  %v7137_v55 = vld [vmem:[%s10169_s1 + $0x8c4] ss:$8 sps:$4 sm:$0xff]   ;;  %v7111_v56 = vld [vmem:[%s10169_s1 + $0x40] ss:$8 sps:$4 sm:$0xff]  }
  0x72   : > { %2091 = vmatprep.subr.bf16.mxu1 %v7029_v57  ;;  %1816 = vmatprep.mubr.bf16.mxu0 %v7030_v58  ;;  %v7118_v57 = vld [vmem:[%s8019_s8 + $0xe8] ss:$36 sps:$4 sm:$0xff]   ;;  %v7125_v58 = vld [vmem:[%s10169_s1 + $0x34] ss:$8 sps:$4 sm:$0xff]  }
  0x73   : > { %1929 = vmatprep.mubr.bf16.mxu1 %v7032_v59  ;;  %v7119_v59 = vld [vmem:[%s8019_s8 + $0xf0] ss:$36 sps:$4 sm:$0xff]  }
  0x74   : > { %1979 = vmatpush2.bf16.msra.mxu0 %v7024_v60  ;;  %v7135_v60 = vld [vmem:[%s10169_s1 + $0x8c0] ss:$8 sps:$4 sm:$0xff]  }
  0x75   : > { %2092 = vmatpush2.bf16.msra.mxu1 %v7027_v61  ;;  %1980 = vmatprep.subr.bf16.mxu0 %v7038_v62  ;;  %v7123_v61 = vld [vmem:[%s10169_s1 + $0x30] ss:$8 sps:$4 sm:$0xff]   ;;  %v7128_v62 = vld [vmem:[%s10169_s1 + $0x24] ss:$8 sps:$4 sm:$0xff]  }
  0x76   : > { %2093 = vmatprep.subr.bf16.mxu1 %v7041_v63  ;;  %v7129_v63 = vld [vmem:[%s8019_s8 + $0x134] ss:$36 sps:$4 sm:$0xff]  }
  0x77   : > { %1817 = vmatmul.mubr.bf16.gmra.mxu0 %v7034_v0  ;;  %v7131_v0 = vld [vmem:[%s8019_s8 + $0x13c] ss:$36 sps:$4 sm:$0xff]  }
  0x78   : > { %1930 = vmatmul.mubr.bf16.gmra.mxu1 %v7035_v1  ;;  %1981 = vmatpush2.bf16.msra.mxu0 %v7036_v2  ;;  %v7152_v1 = vld [vmem:[%s10169_s1 + $0x8b4] ss:$8 sps:$4 sm:$0xff]   ;;  %v7150_v2 = vld [vmem:[%s10169_s1 + $0x8b0] ss:$8 sps:$4 sm:$0xff]  }
  0x79   : > { %2094 = vmatpush2.bf16.msra.mxu1 %v7039_v3  ;;  %1982 = vmatprep.subr.bf16.mxu0 %v7044_v4  ;;  %v7126_v3 = vld [vmem:[%s10169_s1 + $0x20] ss:$8 sps:$4 sm:$0xff]   ;;  %v7167_v4 = vld [vmem:[%s10169_s1 + $0x8a4] ss:$8 sps:$4 sm:$0xff]  }
  0x7a   : > { %2095 = vmatprep.subr.bf16.mxu1 %v7047_v5  ;;  %1826 = vmatprep.mubr.bf16.mxu0 %v7048_v6  ;;  %v7140_v5 = vld [vmem:[%s10169_s1 + $0x14] ss:$8 sps:$4 sm:$0xff]  }
  0x7b   : > { %1939 = vmatprep.mubr.bf16.mxu1 %v7050_v7  ;;  %v7133_v6 = vld [vmem:[%s8019_s8 + $0x130] ss:$36 sps:$4 sm:$0xff]   ;;  %v7134_v7 = vld [vmem:[%s8019_s8 + $0x138] ss:$36 sps:$4 sm:$0xff]  }
  0x7c   : > { %1983 = vmatpush2.bf16.msra.mxu0 %v7042_v8  ;;  %v7138_v8 = vld [vmem:[%s10169_s1 + $0x10] ss:$8 sps:$4 sm:$0xff]  }
  0x7d   : > { %2096 = vmatpush2.bf16.msra.mxu1 %v7045_v9  ;;  %1984 = vmatprep.subr.bf16.mxu0 %v7056_v10  ;;  %v7143_v9 = vld [vmem:[%s10169_s1 + $0x4] ss:$8 sps:$4 sm:$0xff]   ;;  %v7144_v10 = vld [vmem:[%s8019_s8 + $0x17c] ss:$36 sps:$4 sm:$0xff]  }
  0x7e   : > { %2097 = vmatprep.subr.bf16.mxu1 %v7059_v12  ;;  %v7165_v12 = vld [vmem:[%s10169_s1 + $0x8a0] ss:$8 sps:$4 sm:$0xff]  }
  0x7f   : > { %1827 = vmatmul.mubr.bf16.gmra.mxu0 %v7052_v11  ;;  %v7146_v11 = vld [vmem:[%s8019_s8 + $0x184] ss:$36 sps:$4 sm:$0xff]  }
  0x80   : > { %1940 = vmatmul.mubr.bf16.gmra.mxu1 %v7053_v13  ;;  %1985 = vmatpush2.bf16.msra.mxu0 %v7054_v14  ;;  %v7182_v13 = vld [vmem:[%s10169_s1 + $0x894] ss:$8 sps:$4 sm:$0xff]   ;;  %v7141_v14 = vld [vmem:[%s10169_s1] ss:$8 sps:$4 sm:$0xff]  }
  0x81   : > { %2098 = vmatpush2.bf16.msra.mxu1 %v7057_v15  ;;  %1986 = vmatprep.subr.bf16.mxu0 %v7062_v16  ;;  %v7148_v15 = vld [vmem:[%s8019_s8 + $0x178] ss:$36 sps:$4 sm:$0xff]  }
  0x82   : > { %2099 = vmatprep.subr.bf16.mxu1 %v7065_v17  ;;  %1836 = vmatprep.mubr.bf16.mxu0 %v7066_v18  ;;  %v7155_v16 = vld [vmem:[%s10169_s1 + $0xf4] ss:$8 sps:$4 sm:$0xff]   ;;  %v7149_v17 = vld [vmem:[%s8019_s8 + $0x180] ss:$36 sps:$4 sm:$0xff]   ;;  %v7180_v18 = vld [vmem:[%s10169_s1 + $0x890] ss:$8 sps:$4 sm:$0xff]  }
  0x83   : > { %1949 = vmatprep.mubr.bf16.mxu1 %v7068_v19  ;;  %v7153_v19 = vld [vmem:[%s10169_s1 + $0xf0] ss:$8 sps:$4 sm:$0xff]  }
  0x84   : > { %1987 = vmatpush2.bf16.msra.mxu0 %v7060_v20  ;;  %v7158_v20 = vld [vmem:[%s10169_s1 + $0xe4] ss:$8 sps:$4 sm:$0xff]  }
  0x85   : > { %2100 = vmatpush2.bf16.msra.mxu1 %v7063_v21  ;;  %1988 = vmatprep.subr.bf16.mxu0 %v7074_v22  ;;  %v7159_v21 = vld [vmem:[%s8019_s8 + $0x1c4] ss:$36 sps:$4 sm:$0xff]   ;;  %v7161_v22 = vld [vmem:[%s8019_s8 + $0x1cc] ss:$36 sps:$4 sm:$0xff]  }
  0x86   : > { %2101 = vmatprep.subr.bf16.mxu1 %v7077_v23  ;;  %v7197_v23 = vld [vmem:[%s10169_s1 + $0x884] ss:$8 sps:$4 sm:$0xff]  }
  0x87   : > { %1837 = vmatmul.mubr.bf16.gmra.mxu0 %v7070_v24  ;;  %v7195_v24 = vld [vmem:[%s10169_s1 + $0x880] ss:$8 sps:$4 sm:$0xff]  }
  0x88   : > { %1950 = vmatmul.mubr.bf16.gmra.mxu1 %v7071_v25  ;;  %1989 = vmatpush2.bf16.msra.mxu0 %v7072_v26  ;;  %v7156_v25 = vld [vmem:[%s10169_s1 + $0xe0] ss:$8 sps:$4 sm:$0xff]   ;;  %v7210_v26 = vld [vmem:[%s10169_s1 + $0x174] ss:$8 sps:$4 sm:$0xff]  }
  0x89   : > { %2102 = vmatpush2.bf16.msra.mxu1 %v7075_v27  ;;  %1990 = vmatprep.subr.bf16.mxu0 %v7080_v28  ;;  %v7170_v27 = vld [vmem:[%s10169_s1 + $0xd4] ss:$8 sps:$4 sm:$0xff]   ;;  %v7163_v28 = vld [vmem:[%s8019_s8 + $0x1c0] ss:$36 sps:$4 sm:$0xff]  }
  0x8a   : > { %2103 = vmatprep.subr.bf16.mxu1 %v7083_v29  ;;  %1992 = vmatprep.mubr.bf16.mxu0 %v7086_v30  ;;  %v7164_v29 = vld [vmem:[%s8019_s8 + $0x1c8] ss:$36 sps:$4 sm:$0xff]   ;;  %v7168_v30 = vld [vmem:[%s10169_s1 + $0xd0] ss:$8 sps:$4 sm:$0xff]  }
  0x8b   : > { %2105 = vmatprep.mubr.bf16.mxu1 %v7089_v31  ;;  %v7174_v31 = vld [vmem:[%s8019_s8 + $0x20c] ss:$36 sps:$4 sm:$0xff]  }
  0x8c   : > { %1991 = vmatpush2.bf16.msra.mxu0 %v7078_v32  ;;  %v7173_v32 = vld [vmem:[%s10169_s1 + $0xc4] ss:$8 sps:$4 sm:$0xff]  }
  0x8d   : > { %2104 = vmatpush2.bf16.msra.mxu1 %v7081_v33  ;;  %2186 = vmatprep.subr.bf16.mxu0 %v7092_v34  ;;  %v7176_v33 = vld [vmem:[%s8019_s8 + $0x214] ss:$36 sps:$4 sm:$0xff]   ;;  %v7171_v34 = vld [vmem:[%s10169_s1 + $0xc0] ss:$8 sps:$4 sm:$0xff]  }
  0x8e   : > { %3065 = vmatprep.subr.bf16.mxu1 %v7095_v35  ;;  %v7178_v35 = vld [vmem:[%s8019_s8 + $0x208] ss:$36 sps:$4 sm:$0xff]  }
  0x8f   : > { %1993 = vmatmul.mubr.bf16.vlgmr.msra.gmra.mxu0 %v7084_v36  ;;  %v7185_v36 = vld [vmem:[%s10169_s1 + $0xb4] ss:$8 sps:$4 sm:$0xff]  }
  0x90   : > { %2106 = vmatmul.mubr.bf16.vlgmr.msra.gmra.mxu1 %v7087_v37  ;;  %2187 = vmatpush1.bf16.msra.mxu0 %v7090_v38  ;;  %v7179_v37 = vld [vmem:[%s8019_s8 + $0x210] ss:$36 sps:$4 sm:$0xff]  }
  0x91   : > { %3066 = vmatpush1.bf16.msra.mxu1 %v7093_v39  ;;  %2002 = vmatprep.mubr.bf16.mxu0 %v7099_v41  ;;  %v7183_v38 = vld [vmem:[%s10169_s1 + $0xb0] ss:$8 sps:$4 sm:$0xff]   ;;  %v7191_v41 = vld [vmem:[%s8019_s8 + $0x25c] ss:$36 sps:$4 sm:$0xff]  }
  0x92   : > { %3067 = vmatprep.subr.bf16.mxu1 %v7098_v40  ;;  %2115 = vmatprep.mubr.bf16.mxu1 %v7101_v42  ;;  %v7189_v39 = vld [vmem:[%s8019_s8 + $0x254] ss:$36 sps:$4 sm:$0xff]   ;;  %v7188_v40 = vld [vmem:[%s10169_s1 + $0xa4] ss:$8 sps:$4 sm:$0xff]   ;;  %v7186_v42 = vld [vmem:[%s10169_s1 + $0xa0] ss:$8 sps:$4 sm:$0xff]  }
  0x93   : > { %2188 = vmatprep.subr.bf16.mxu0 %v7107_v43  ;;  %v7200_v43 = vld [vmem:[%s10169_s1 + $0x94] ss:$8 sps:$4 sm:$0xff]  }
  0x94   : > { %2189 = vmatpush1.bf16.msra.mxu0 %v7105_v45  ;;  %v7194_v45 = vld [vmem:[%s8019_s8 + $0x258] ss:$36 sps:$4 sm:$0xff]  }
  0x95   : > { %3068 = vmatpush1.bf16.msra.mxu1 %v7096_v44  ;;  %2190 = vmatprep.subr.bf16.mxu0 %v7122_v47  ;;  %v7193_v44 = vld [vmem:[%s8019_s8 + $0x250] ss:$36 sps:$4 sm:$0xff]   ;;  %v7203_v47 = vld [vmem:[%s10169_s1 + $0x84] ss:$8 sps:$4 sm:$0xff]  }
  0x96   : > { %3069 = vmatprep.subr.bf16.mxu1 %v7110_v46  ;;  %v7198_v46 = vld [vmem:[%s10169_s1 + $0x90] ss:$8 sps:$4 sm:$0xff]  }
  0x97   : > { %2003 = vmatmul.mubr.bf16.gmra.mxu0 %v7103_v48  ;;  %v7206_v48 = vld [vmem:[%s8019_s8 + $0x4] ss:$36 sps:$4 sm:$0xff]  }
  0x98   : > { %2116 = vmatmul.mubr.bf16.gmra.mxu1 %v7104_v49  ;;  %2012 = vmatprep.mubr.bf16.mxu0 %v7114_v52  ;;  %v7201_v49 = vld [vmem:[%s10169_s1 + $0x80] ss:$8 sps:$4 sm:$0xff]  }
  0x99   : > { %3070 = vmatpush1.bf16.msra.mxu1 %v7108_v50  ;;  %2125 = vmatprep.mubr.bf16.mxu1 %v7116_v53  ;;  %v7816_v50 = vmov 0   ;;  %v7204_v52 = vld [vmem:[%s8019_s8] ss:$36 sps:$4 sm:$0xff]   ;;  %v7207_v53 = vld [vmem:[%s8019_s8 + $0x68] ss:$36 sps:$4 sm:$0xff]  }
  0x9a   : > { %3071 = vmatprep.subr.bf16.mxu1 %v7113_v51  ;;  %2191 = vmatpush1.bf16.msra.mxu0 %v7120_v54  ;;  %v7213_v51 = vld [vmem:[%s10169_s1 + $0x274] ss:$8 sps:$4 sm:$0xff]   ;;  %v7208_v54 = vld [vmem:[%s10169_s1 + $0x170] ss:$8 sps:$4 sm:$0xff]  }
  0x9b   : > { %2192 = vmatprep.subr.bf16.mxu0 %v7137_v55  ;;  %v7211_v55 = vld [vmem:[%s10169_s1 + $0x270] ss:$8 sps:$4 sm:$0xff]  }
  0x9d   : > { %3072 = vmatpush1.bf16.msra.mxu1 %v7111_v56  ;;  %v7216_v56 = vld [vmem:[%s10169_s1 + $0x164] ss:$8 sps:$4 sm:$0xff]  }
  0x9e   : > { %3073 = vmatprep.subr.bf16.mxu1 %v7125_v58  ;;  %2193 = vmatpush1.bf16.msra.mxu0 %v7135_v60  ;;  %v7214_v58 = vld [vmem:[%s10169_s1 + $0x160] ss:$8 sps:$4 sm:$0xff]   ;;  %v7223_v60 = vld [vmem:[%s10169_s1 + $0x154] ss:$8 sps:$4 sm:$0xff]  }
  0x9f   : > { %2013 = vmatmul.mubr.bf16.gmra.mxu0 %v7118_v57  ;;  %2194 = vmatprep.subr.bf16.mxu0 %v7152_v1  ;;  %v7219_v57 = vld [vmem:[%s10169_s1 + $0x264] ss:$8 sps:$4 sm:$0xff]   ;;  %v7224_v1 = vld [vmem:[%s10169_s1 + $0x250] ss:$8 sps:$4 sm:$0xff]  }
  0xa0   : > { %2126 = vmatmul.mubr.bf16.gmra.mxu1 %v7119_v59  ;;  %2022 = vmatprep.mubr.bf16.mxu0 %v7129_v63  ;;  %v7217_v59 = vld [vmem:[%s10169_s1 + $0x260] ss:$8 sps:$4 sm:$0xff]   ;;  %v7220_v63 = vld [vmem:[%s8019_s8 + $0xb0] ss:$36 sps:$4 sm:$0xff]  }
  0xa1   : > { %3074 = vmatpush1.bf16.msra.mxu1 %v7123_v61  ;;  %2135 = vmatprep.mubr.bf16.mxu1 %v7131_v0  ;;  %v7226_v61 = vld [vmem:[%s10169_s1 + $0x254] ss:$8 sps:$4 sm:$0xff]   ;;  %v7221_v0 = vld [vmem:[%s10169_s1 + $0x150] ss:$8 sps:$4 sm:$0xff]  }
  0xa2   : > { %3075 = vmatprep.subr.bf16.mxu1 %v7128_v62  ;;  %2195 = vmatpush1.bf16.msra.mxu0 %v7150_v2  ;;  %v7713_v62 = vld [vmem:[%s8019_s8 + $0x4c] ss:$36 sps:$4 sm:$0xff]  }
  0xa3   : > { %2196 = vmatprep.subr.bf16.mxu0 %v7167_v4  ;;  %v7229_v2 = vld [vmem:[%s10169_s1 + $0x144] ss:$8 sps:$4 sm:$0xff]  }
  0xa4   : > { %v7714_v4 = vld [vmem:[%s8019_s8 + $0x48] ss:$36 sps:$4 sm:$0xff]  }
  0xa5   : > { %3076 = vmatpush1.bf16.msra.mxu1 %v7126_v3  ;;  %v7232_v3 = vld [vmem:[%s10169_s1 + $0x244] ss:$8 sps:$4 sm:$0xff]  }
  0xa6   : > { %3077 = vmatprep.subr.bf16.mxu1 %v7140_v5  ;;  %2197 = vmatpush1.bf16.msra.mxu0 %v7165_v12  ;;  %v7227_v5 = vld [vmem:[%s10169_s1 + $0x140] ss:$8 sps:$4 sm:$0xff]   ;;  %v7237_v12 = vld [vmem:[%s10169_s1 + $0x230] ss:$8 sps:$4 sm:$0xff]  }
  0xa7   : > { %2023 = vmatmul.mubr.bf16.gmra.mxu0 %v7133_v6  ;;  %2198 = vmatprep.subr.bf16.mxu0 %v7182_v13  ;;  %v7230_v6 = vld [vmem:[%s10169_s1 + $0x240] ss:$8 sps:$4 sm:$0xff]   ;;  %v7242_v13 = vld [vmem:[%s10169_s1 + $0x124] ss:$8 sps:$4 sm:$0xff]  }
  0xa8   : > { %2136 = vmatmul.mubr.bf16.gmra.mxu1 %v7134_v7  ;;  %2032 = vmatprep.mubr.bf16.mxu0 %v7144_v10  ;;  %v7236_v7 = vld [vmem:[%s10169_s1 + $0x134] ss:$8 sps:$4 sm:$0xff]  }
  0xa9   : > { %3078 = vmatpush1.bf16.msra.mxu1 %v7138_v8  ;;  %2145 = vmatprep.mubr.bf16.mxu1 %v7146_v11  ;;  %v7239_v8 = vld [vmem:[%s10169_s1 + $0x234] ss:$8 sps:$4 sm:$0xff]   ;;  %v7234_v11 = vld [vmem:[%s10169_s1 + $0x130] ss:$8 sps:$4 sm:$0xff]  }
  0xaa   : > { %3079 = vmatprep.subr.bf16.mxu1 %v7143_v9  ;;  %2199 = vmatpush1.bf16.msra.mxu0 %v7180_v18  ;;  %v7715_v9 = vld [vmem:[%s8019_s8 + $0x94] ss:$36 sps:$4 sm:$0xff]  }
  0xab   : > { %2200 = vmatprep.subr.bf16.mxu0 %v7197_v23  ;;  %v7233_v10 = vld [vmem:[%s8019_s8 + $0xf8] ss:$36 sps:$4 sm:$0xff]  }
  0xac   : > { %v7249_v18 = vld [vmem:[%s10169_s1 + $0x114] ss:$8 sps:$4 sm:$0xff]   ;;  %v7250_v23 = vld [vmem:[%s10169_s1 + $0x210] ss:$8 sps:$4 sm:$0xff]  }
  0xad   : > { %3080 = vmatpush1.bf16.msra.mxu1 %v7141_v14  ;;  %v7245_v14 = vld [vmem:[%s10169_s1 + $0x224] ss:$8 sps:$4 sm:$0xff]  }
  0xae   : > { %3081 = vmatprep.subr.bf16.mxu1 %v7155_v16  ;;  %2201 = vmatpush1.bf16.msra.mxu0 %v7195_v24  ;;  %v7240_v16 = vld [vmem:[%s10169_s1 + $0x120] ss:$8 sps:$4 sm:$0xff]   ;;  %v7255_v24 = vld [vmem:[%s10169_s1 + $0x104] ss:$8 sps:$4 sm:$0xff]  }
  0xaf   : > { %2033 = vmatmul.mubr.bf16.gmra.mxu0 %v7148_v15  ;;  %3178 = vmatprep.subr.bf16.mxu0 %v7210_v26  ;;  %v7716_v15 = vld [vmem:[%s8019_s8 + $0x90] ss:$36 sps:$4 sm:$0xff]   ;;  %v7718_v26 = vld [vmem:[%s8019_s8 + $0xd8] ss:$36 sps:$4 sm:$0xff]  }
  0xb0   : > { %2146 = vmatmul.mubr.bf16.gmra.mxu1 %v7149_v17  ;;  %2042 = vmatprep.mubr.bf16.mxu0 %v7159_v21  ;;  %v7243_v17 = vld [vmem:[%s10169_s1 + $0x220] ss:$8 sps:$4 sm:$0xff]  }
  0xb1   : > { %3082 = vmatpush2.bf16.msra.mxu1 %v7153_v19  ;;  %2155 = vmatprep.mubr.bf16.mxu1 %v7161_v22  ;;  %v7252_v19 = vld [vmem:[%s10169_s1 + $0x214] ss:$8 sps:$4 sm:$0xff]   ;;  %v7246_v21 = vld [vmem:[%s8019_s8 + $0x140] ss:$36 sps:$4 sm:$0xff]   ;;  %v7247_v22 = vld [vmem:[%s10169_s1 + $0x110] ss:$8 sps:$4 sm:$0xff]  }
  0xb2   : > { %3083 = vmatprep.subr.bf16.mxu1 %v7158_v20  ;;  %v7717_v20 = vld [vmem:[%s8019_s8 + $0xdc] ss:$36 sps:$4 sm:$0xff]  }
  0xb5   : > { %3084 = vmatpush2.bf16.msra.mxu1 %v7156_v25  ;;  %v7258_v25 = vld [vmem:[%s10169_s1 + $0x204] ss:$8 sps:$4 sm:$0xff]  }
  0xb6   : > { %3085 = vmatprep.subr.bf16.mxu1 %v7170_v27  ;;  %v7253_v27 = vld [vmem:[%s10169_s1 + $0x100] ss:$8 sps:$4 sm:$0xff]  }
  0xb7   : > { %2043 = vmatmul.mubr.bf16.gmra.mxu0 %v7163_v28  ;;  %v7256_v28 = vld [vmem:[%s10169_s1 + $0x200] ss:$8 sps:$4 sm:$0xff]  }
  0xb8   : > { %2156 = vmatmul.mubr.bf16.gmra.mxu1 %v7164_v29  ;;  %2052 = vmatprep.mubr.bf16.mxu0 %v7174_v31  ;;  %v7262_v29 = vld [vmem:[%s10169_s1 + $0x1f4] ss:$8 sps:$4 sm:$0xff]   ;;  %v7719_v31 = vld [vmem:[%s8019_s8 + $0x124] ss:$36 sps:$4 sm:$0xff]  }
  0xb9   : > { %3086 = vmatpush2.bf16.msra.mxu1 %v7168_v30  ;;  %2165 = vmatprep.mubr.bf16.mxu1 %v7176_v33  ;;  %v7265_v30 = vld [vmem:[%s10169_s1 + $0x2f4] ss:$8 sps:$4 sm:$0xff]   ;;  %v7260_v33 = vld [vmem:[%s10169_s1 + $0x1f0] ss:$8 sps:$4 sm:$0xff]  }
  0xba   : > { %3087 = vmatprep.subr.bf16.mxu1 %v7173_v32  ;;  %v7259_v32 = vld [vmem:[%s8019_s8 + $0x188] ss:$36 sps:$4 sm:$0xff]  }
  0xbd   : > { %3088 = vmatpush2.bf16.msra.mxu1 %v7171_v34  ;;  %v7263_v34 = vld [vmem:[%s10169_s1 + $0x2f0] ss:$8 sps:$4 sm:$0xff]  }
  0xbe   : > { %3089 = vmatprep.subr.bf16.mxu1 %v7185_v36  ;;  %v7271_v36 = vld [vmem:[%s10169_s1 + $0x2e4] ss:$8 sps:$4 sm:$0xff]  }
  0xbf   : > { %2053 = vmatmul.mubr.bf16.gmra.mxu0 %v7178_v35  ;;  %v7268_v35 = vld [vmem:[%s10169_s1 + $0x1e4] ss:$8 sps:$4 sm:$0xff]  }
  0xc0   : > { %2166 = vmatmul.mubr.bf16.gmra.mxu1 %v7179_v37  ;;  %2062 = vmatprep.mubr.bf16.mxu0 %v7189_v39  ;;  %v7720_v37 = vld [vmem:[%s8019_s8 + $0x120] ss:$36 sps:$4 sm:$0xff]  }
  0xc1   : > { %3090 = vmatpush2.bf16.msra.mxu1 %v7183_v38  ;;  %2175 = vmatprep.mubr.bf16.mxu1 %v7191_v41  ;;  %v7266_v38 = vld [vmem:[%s10169_s1 + $0x1e0] ss:$8 sps:$4 sm:$0xff]   ;;  %v7278_v41 = vld [vmem:[%s10169_s1 + $0x2d4] ss:$8 sps:$4 sm:$0xff]  }
  0xc2   : > { %3091 = vmatprep.subr.bf16.mxu1 %v7188_v40  ;;  %v7269_v39 = vld [vmem:[%s10169_s1 + $0x2e0] ss:$8 sps:$4 sm:$0xff]   ;;  %v7275_v40 = vld [vmem:[%s10169_s1 + $0x1d4] ss:$8 sps:$4 sm:$0xff]  }
  0xc5   : > { %3092 = vmatpush2.bf16.msra.mxu1 %v7186_v42  ;;  %v7721_v42 = vld [vmem:[%s8019_s8 + $0x16c] ss:$36 sps:$4 sm:$0xff]  }
  0xc6   : > { %3093 = vmatprep.subr.bf16.mxu1 %v7200_v43  ;;  %v7272_v43 = vld [vmem:[%s8019_s8 + $0x1d0] ss:$36 sps:$4 sm:$0xff]  }
  0xc7   : > { %2063 = vmatmul.mubr.bf16.gmra.mxu0 %v7193_v44  ;;  %v7273_v44 = vld [vmem:[%s10169_s1 + $0x1d0] ss:$8 sps:$4 sm:$0xff]  }
  0xc8   : > { %2176 = vmatmul.mubr.bf16.gmra.mxu1 %v7194_v45  ;;  %2218 = vmatprep.mubr.bf16.mxu0 %v7816_v50  ;;  %v7276_v45 = vld [vmem:[%s10169_s1 + $0x2d0] ss:$8 sps:$4 sm:$0xff]  }
  0xc9   : > { %3094 = vmatpush2.bf16.msra.mxu1 %v7198_v46  ;;  %3097 = vmatprep.mubr.bf16.mxu1 %v7206_v48  ;;  %v7281_v46 = vld [vmem:[%s10169_s1 + $0x1c4] ss:$8 sps:$4 sm:$0xff]  }
  0xca   : > { %3095 = vmatprep.subr.bf16.mxu1 %v7203_v47  ;;  %v7284_v47 = vld [vmem:[%s10169_s1 + $0x2c4] ss:$8 sps:$4 sm:$0xff]  }
  0xcb   : > { %v7722_v48 = vld [vmem:[%s8019_s8 + $0x168] ss:$36 sps:$4 sm:$0xff]  }
  0xcd   : > { %3096 = vmatpush2.bf16.msra.mxu1 %v7201_v49  ;;  %v7279_v49 = vld [vmem:[%s10169_s1 + $0x1c0] ss:$8 sps:$4 sm:$0xff]  }
  0xce   : > { %3291 = vmatprep.subr.bf16.mxu1 %v7213_v51  ;;  %v7282_v51 = vld [vmem:[%s10169_s1 + $0x2c0] ss:$8 sps:$4 sm:$0xff]  }
  0xcf   : > { %2219 = vmatmul.mubr.bf16.vlgmr.msra.gmra.mxu0 %v7207_v53  ;;  %v7291_v53 = vld [vmem:[%s10169_s1 + $0x2b4] ss:$8 sps:$4 sm:$0xff]  }
  0xd0   : > { %3098 = vmatmul.mubr.bf16.vlgmr.msra.gmra.mxu1 %v7204_v52  ;;  %3179 = vmatpush1.bf16.msra.mxu0 %v7208_v54  ;;  %v7288_v52 = vld [vmem:[%s10169_s1 + $0x1b4] ss:$8 sps:$4 sm:$0xff]  }
  0xd1   : > { %3292 = vmatpush1.bf16.msra.mxu1 %v7211_v55  ;;  %3180 = vmatprep.subr.bf16.mxu0 %v7216_v56  ;;  %v7723_v54 = vld [vmem:[%s8019_s8 + $0x1b4] ss:$36 sps:$4 sm:$0xff]  }
  0xd2   : > { %3293 = vmatprep.subr.bf16.mxu1 %v7219_v57  ;;  %2228 = vmatprep.mubr.bf16.mxu0 %v7816_v50  ;;  %v7285_v55 = vld [vmem:[%s8019_s8 + $0x218] ss:$36 sps:$4 sm:$0xff]  }
  0xd3   : > { %3107 = vmatprep.mubr.bf16.mxu1 %v7713_v62  ;;  %v7286_v56 = vld [vmem:[%s10169_s1 + $0x1b0] ss:$8 sps:$4 sm:$0xff]   ;;  %v7295_v62 = vld [vmem:[%s10169_s1 + $0x2a0] ss:$8 sps:$4 sm:$0xff]  }
  0xd4   : > { %3181 = vmatpush1.bf16.msra.mxu0 %v7214_v58  ;;  %v7289_v57 = vld [vmem:[%s10169_s1 + $0x2b0] ss:$8 sps:$4 sm:$0xff]   ;;  %v7294_v58 = vld [vmem:[%s10169_s1 + $0x1a4] ss:$8 sps:$4 sm:$0xff]  }
  0xd5   : > { %3294 = vmatpush1.bf16.msra.mxu1 %v7217_v59  ;;  %3182 = vmatprep.subr.bf16.mxu0 %v7223_v60  ;;  %v7297_v59 = vld [vmem:[%s10169_s1 + $0x2a4] ss:$8 sps:$4 sm:$0xff]   ;;  %v7724_v60 = vld [vmem:[%s8019_s8 + $0x1b0] ss:$36 sps:$4 sm:$0xff]  }
  0xd6   : > { %3295 = vmatprep.subr.bf16.mxu1 %v7226_v61  ;;  %v7292_v61 = vld [vmem:[%s10169_s1 + $0x1a0] ss:$8 sps:$4 sm:$0xff]  }
  0xd7   : > { %2229 = vmatmul.mubr.bf16.gmra.mxu0 %v7220_v63  ;;  %v7301_v63 = vld [vmem:[%s10169_s1 + $0x194] ss:$8 sps:$4 sm:$0xff]  }
  0xd8   : > { %3108 = vmatmul.mubr.bf16.gmra.mxu1 %v7714_v4  ;;  %3183 = vmatpush1.bf16.msra.mxu0 %v7221_v0  ;;  %v7304_v0 = vld [vmem:[%s10169_s1 + $0x294] ss:$8 sps:$4 sm:$0xff]   ;;  %v7302_v4 = vld [vmem:[%s10169_s1 + $0x290] ss:$8 sps:$4 sm:$0xff]  }
  0xd9   : > { %3296 = vmatpush1.bf16.msra.mxu1 %v7224_v1  ;;  %3184 = vmatprep.subr.bf16.mxu0 %v7229_v2  ;;  %v7725_v1 = vld [vmem:[%s8019_s8 + $0x1fc] ss:$36 sps:$4 sm:$0xff]  }
  0xda   : > { %3297 = vmatprep.subr.bf16.mxu1 %v7232_v3  ;;  %2238 = vmatprep.mubr.bf16.mxu0 %v7816_v50  ;;  %v7298_v2 = vld [vmem:[%s8019_s8 + $0x260] ss:$36 sps:$4 sm:$0xff]   ;;  %v7299_v3 = vld [vmem:[%s10169_s1 + $0x190] ss:$8 sps:$4 sm:$0xff]  }
  0xdb   : > { %3117 = vmatprep.mubr.bf16.mxu1 %v7715_v9  ;;  %v7726_v9 = vld [vmem:[%s8019_s8 + $0x1f8] ss:$36 sps:$4 sm:$0xff]  }
  0xdc   : > { %3185 = vmatpush1.bf16.msra.mxu0 %v7227_v5  ;;  %v7307_v5 = vld [vmem:[%s10169_s1 + $0x184] ss:$8 sps:$4 sm:$0xff]  }
  0xdd   : > { %3298 = vmatpush1.bf16.msra.mxu1 %v7230_v6  ;;  %3186 = vmatprep.subr.bf16.mxu0 %v7236_v7  ;;  %v7310_v6 = vld [vmem:[%s10169_s1 + $0x284] ss:$8 sps:$4 sm:$0xff]  }
  0xde   : > { %3299 = vmatprep.subr.bf16.mxu1 %v7239_v8  ;;  %v7313_v7 = vld [vmem:[%s8019_s8 + $0xc] ss:$36 sps:$4 sm:$0xff]   ;;  %v7316_v8 = vld [vmem:[%s8019_s8 + $0x14] ss:$36 sps:$4 sm:$0xff]  }
  0xdf   : > { %2239 = vmatmul.mubr.bf16.gmra.mxu0 %v7233_v10  ;;  %v7305_v10 = vld [vmem:[%s10169_s1 + $0x180] ss:$8 sps:$4 sm:$0xff]  }
  0xe0   : > { %3118 = vmatmul.mubr.bf16.gmra.mxu1 %v7716_v15  ;;  %3187 = vmatpush1.bf16.msra.mxu0 %v7234_v11  ;;  %v7308_v11 = vld [vmem:[%s10169_s1 + $0x280] ss:$8 sps:$4 sm:$0xff]   ;;  %v7314_v15 = vld [vmem:[%s8019_s8 + $0x10] ss:$36 sps:$4 sm:$0xff]  }
  0xe1   : > { %3300 = vmatpush1.bf16.msra.mxu1 %v7237_v12  ;;  %3188 = vmatprep.subr.bf16.mxu0 %v7242_v13  ;;  %v7319_v12 = vld [vmem:[%s10169_s1 + $0x374] ss:$8 sps:$4 sm:$0xff]  }
  0xe2   : > { %3301 = vmatprep.subr.bf16.mxu1 %v7245_v14  ;;  %2248 = vmatprep.mubr.bf16.mxu0 %v7816_v50  ;;  %v7322_v13 = vld [vmem:[%s10169_s1 + $0x474] ss:$8 sps:$4 sm:$0xff]   ;;  %v7311_v14 = vld [vmem:[%s8019_s8 + $0x8] ss:$36 sps:$4 sm:$0xff]  }
  0xe3   : > { %3127 = vmatprep.mubr.bf16.mxu1 %v7717_v20 }
  0xe4   : > { %3189 = vmatpush1.bf16.msra.mxu0 %v7240_v16  ;;  %v7317_v16 = vld [vmem:[%s10169_s1 + $0x370] ss:$8 sps:$4 sm:$0xff]  }
  0xe5   : > { %3302 = vmatpush1.bf16.msra.mxu1 %v7243_v17  ;;  %3190 = vmatprep.subr.bf16.mxu0 %v7249_v18  ;;  %v7320_v17 = vld [vmem:[%s10169_s1 + $0x470] ss:$8 sps:$4 sm:$0xff]   ;;  %v7325_v18 = vld [vmem:[%s10169_s1 + $0x364] ss:$8 sps:$4 sm:$0xff]  }
  0xe6   : > { %3303 = vmatprep.subr.bf16.mxu1 %v7252_v19  ;;  %v7331_v19 = vld [vmem:[%s10169_s1 + $0x464] ss:$8 sps:$4 sm:$0xff]  }
  0xe7   : > { %2249 = vmatmul.mubr.bf16.gmra.mxu0 %v7246_v21 }
  0xe8   : > { %3128 = vmatmul.mubr.bf16.gmra.mxu1 %v7718_v26  ;;  %3191 = vmatpush1.bf16.msra.mxu0 %v7247_v22  ;;  %v7323_v22 = vld [vmem:[%s10169_s1 + $0x360] ss:$8 sps:$4 sm:$0xff]  }
  0xe9   : > { %3304 = vmatpush1.bf16.msra.mxu1 %v7250_v23  ;;  %3192 = vmatprep.subr.bf16.mxu0 %v7255_v24  ;;  %v7328_v24 = vld [vmem:[%s10169_s1 + $0x354] ss:$8 sps:$4 sm:$0xff]  }
  0xea   : > { %3305 = vmatprep.subr.bf16.mxu1 %v7258_v25  ;;  %2258 = vmatprep.mubr.bf16.mxu0 %v7816_v50  ;;  %v7329_v25 = vld [vmem:[%s10169_s1 + $0x460] ss:$8 sps:$4 sm:$0xff]  }
  0xeb   : > { %3137 = vmatprep.mubr.bf16.mxu1 %v7719_v31  ;;  %v7728_v31 = vld [vmem:[%s8019_s8 + $0x5c] ss:$36 sps:$4 sm:$0xff]  }
  0xec   : > { %3193 = vmatpush1.bf16.msra.mxu0 %v7253_v27 }
  0xed   : > { %3306 = vmatpush1.bf16.msra.mxu1 %v7256_v28  ;;  %3194 = vmatprep.subr.bf16.mxu0 %v7262_v29  ;;  %v7727_v28 = vld [vmem:[%s8019_s8 + $0x54] ss:$36 sps:$4 sm:$0xff]  }
  0xee   : > { %3307 = vmatprep.subr.bf16.mxu1 %v7265_v30  ;;  %v7340_v29 = vld [vmem:[%s10169_s1 + $0x454] ss:$8 sps:$4 sm:$0xff]  }
  0xef   : > { %2259 = vmatmul.mubr.bf16.gmra.mxu0 %v7259_v32 }
  0xf0   : > { %3138 = vmatmul.mubr.bf16.gmra.mxu1 %v7720_v37  ;;  %3195 = vmatpush2.bf16.msra.mxu0 %v7260_v33 }
  0xf1   : > { %3308 = vmatpush2.bf16.msra.mxu1 %v7263_v34  ;;  %3196 = vmatprep.subr.bf16.mxu0 %v7268_v35  ;;  %v7326_v35 = vld [vmem:[%s10169_s1 + $0x350] ss:$8 sps:$4 sm:$0xff]  }
  0xf2   : > { %3309 = vmatprep.subr.bf16.mxu1 %v7271_v36  ;;  %2268 = vmatprep.mubr.bf16.mxu0 %v7816_v50 }
  0xf3   : > { %3147 = vmatprep.mubr.bf16.mxu1 %v7721_v42 }
  0xf4   : > { %3197 = vmatpush2.bf16.msra.mxu0 %v7266_v38  ;;  %v7334_v38 = vld [vmem:[%s10169_s1 + $0x344] ss:$8 sps:$4 sm:$0xff]  }
  0xf5   : > { %3310 = vmatpush2.bf16.msra.mxu1 %v7269_v39  ;;  %3198 = vmatprep.subr.bf16.mxu0 %v7275_v40  ;;  %v7338_v40 = vld [vmem:[%s10169_s1 + $0x450] ss:$8 sps:$4 sm:$0xff]  }
  0xf6   : > { %3311 = vmatprep.subr.bf16.mxu1 %v7278_v41 }
  0xf7   : > { %2269 = vmatmul.mubr.bf16.gmra.mxu0 %v7272_v43  ;;  %v7729_v43 = vld [vmem:[%s8019_s8 + $0x50] ss:$36 sps:$4 sm:$0xff]  }
  0xf8   : > { %3148 = vmatmul.mubr.bf16.gmra.mxu1 %v7722_v48  ;;  %3199 = vmatpush2.bf16.msra.mxu0 %v7273_v44  ;;  %v7730_v44 = vld [vmem:[%s8019_s8 + $0x58] ss:$36 sps:$4 sm:$0xff]  }
  0xf9   : > { %3312 = vmatpush2.bf16.msra.mxu1 %v7276_v45  ;;  %3200 = vmatprep.subr.bf16.mxu0 %v7281_v46  ;;  %v7349_v45 = vld [vmem:[%s10169_s1 + $0x444] ss:$8 sps:$4 sm:$0xff]   ;;  %v7731_v48 = vld [vmem:[%s8019_s8 + $0x9c] ss:$36 sps:$4 sm:$0xff]  }
  0xfa   : > { %3313 = vmatprep.subr.bf16.mxu1 %v7284_v47  ;;  %2278 = vmatprep.mubr.bf16.mxu0 %v7816_v50  ;;  %v7332_v47 = vld [vmem:[%s10169_s1 + $0x340] ss:$8 sps:$4 sm:$0xff]  }
  0xfb   : > { %3157 = vmatprep.mubr.bf16.mxu1 %v7723_v54 }
  0xfc   : > { %3201 = vmatpush2.bf16.msra.mxu0 %v7279_v49 }
  0xfd   : > { %3314 = vmatpush2.bf16.msra.mxu1 %v7282_v51  ;;  %3202 = vmatprep.subr.bf16.mxu0 %v7288_v52  ;;  %v7732_v52 = vld [vmem:[%s8019_s8 + $0xa4] ss:$36 sps:$4 sm:$0xff]  }
  0xfe   : > { %3315 = vmatprep.subr.bf16.mxu1 %v7291_v53  ;;  %v7337_v53 = vld [vmem:[%s10169_s1 + $0x334] ss:$8 sps:$4 sm:$0xff]  }
  0xff   : > { %2279 = vmatmul.mubr.bf16.gmra.mxu0 %v7285_v55  ;;  %v7347_v55 = vld [vmem:[%s10169_s1 + $0x440] ss:$8 sps:$4 sm:$0xff]  }
 0x100   : > { %3158 = vmatmul.mubr.bf16.gmra.mxu1 %v7724_v60  ;;  %3203 = vmatpush2.bf16.msra.mxu0 %v7286_v56 }
 0x101   : > { %3316 = vmatpush2.bf16.msra.mxu1 %v7289_v57  ;;  %3204 = vmatprep.subr.bf16.mxu0 %v7294_v58 }
 0x102   : > { %3317 = vmatprep.subr.bf16.mxu1 %v7297_v59  ;;  %2288 = vmatprep.mubr.bf16.mxu0 %v7816_v50  ;;  %v7335_v59 = vld [vmem:[%s10169_s1 + $0x330] ss:$8 sps:$4 sm:$0xff]  }
 0x103   : > { %3167 = vmatprep.mubr.bf16.mxu1 %v7725_v1 }
 0x104   : > { %3205 = vmatpush2.bf16.msra.mxu0 %v7292_v61 }
 0x105   : > { %3318 = vmatpush2.bf16.msra.mxu1 %v7295_v62  ;;  %3206 = vmatprep.subr.bf16.mxu0 %v7301_v63  ;;  %v7343_v62 = vld [vmem:[%s10169_s1 + $0x324] ss:$8 sps:$4 sm:$0xff]  }
 0x106   : > { %3319 = vmatprep.subr.bf16.mxu1 %v7304_v0  ;;  %v7358_v0 = vld [vmem:[%s10169_s1 + $0x434] ss:$8 sps:$4 sm:$0xff]  }
 0x107   : > { %2289 = vmatmul.mubr.bf16.gmra.mxu0 %v7298_v2 }
 0x108   : > { %3168 = vmatmul.mubr.bf16.gmra.mxu1 %v7726_v9  ;;  %3207 = vmatpush2.bf16.msra.mxu0 %v7299_v3  ;;  %v7733_v3 = vld [vmem:[%s8019_s8 + $0x98] ss:$36 sps:$4 sm:$0xff]   ;;  %v7367_v9 = vld [vmem:[%s10169_s1 + $0x424] ss:$8 sps:$4 sm:$0xff]  }
 0x109   : > { %3320 = vmatpush2.bf16.msra.mxu1 %v7302_v4  ;;  %3208 = vmatprep.subr.bf16.mxu0 %v7307_v5  ;;  %v7734_v4 = vld [vmem:[%s8019_s8 + $0xa0] ss:$36 sps:$4 sm:$0xff]   ;;  %v7356_v5 = vld [vmem:[%s10169_s1 + $0x430] ss:$8 sps:$4 sm:$0xff]  }
 0x10a   : > { %3321 = vmatprep.subr.bf16.mxu1 %v7310_v6  ;;  %3210 = vmatprep.mubr.bf16.mxu0 %v7313_v7  ;;  %v7341_v7 = vld [vmem:[%s10169_s1 + $0x320] ss:$8 sps:$4 sm:$0xff]  }
 0x10b   : > { %3323 = vmatprep.mubr.bf16.mxu1 %v7316_v8  ;;  %v7735_v8 = vld [vmem:[%s8019_s8 + $0xe4] ss:$36 sps:$4 sm:$0xff]  }
 0x10c   : > { %3209 = vmatpush2.bf16.msra.mxu0 %v7305_v10 }
 0x10d   : > { %3322 = vmatpush2.bf16.msra.mxu1 %v7308_v11  ;;  %3404 = vmatprep.subr.bf16.mxu0 %v7319_v12  ;;  %v7736_v12 = vld [vmem:[%s8019_s8 + $0xec] ss:$36 sps:$4 sm:$0xff]  }
 0x10e   : > { %3517 = vmatprep.subr.bf16.mxu1 %v7322_v13  ;;  %v7346_v13 = vld [vmem:[%s10169_s1 + $0x314] ss:$8 sps:$4 sm:$0xff]  }
 0x10f   : > { %v1768_v20 = vpop.f32.mrf.mxu0  ;;  %3211 = vmatmul.mubr.bf16.vlgmr.msra.gmra.mxu0 %v7311_v14 }
 0x110   : > { %v1881_v21 = vpop.f32.mrf.mxu1  ;;  %3324 = vmatmul.mubr.bf16.vlgmr.msra.gmra.mxu1 %v7314_v15  ;;  %3405 = vmatpush1.bf16.msra.mxu0 %v7317_v16 }
 0x111   : > { %v8727_v23 = vadd.f32 %v1881_v21, %v1768_v20  ;;  %3518 = vmatpush1.bf16.msra.mxu1 %v7320_v17  ;;  %v1770_v26 = vpop.f32.mrf.mxu0  ;;  %3406 = vmatprep.subr.bf16.mxu0 %v7325_v18  ;;  %v7344_v18 = vld [vmem:[%s10169_s1 + $0x310] ss:$8 sps:$4 sm:$0xff]   ;;  %v7352_v21 = vld [vmem:[%s10169_s1 + $0x304] ss:$8 sps:$4 sm:$0xff]  }
 0x112   : > { %v1883_v27 = vpop.f32.mrf.mxu1  ;;  %3220 = vmatprep.mubr.bf16.mxu0 %v7727_v28  ;;  %3333 = vmatprep.mubr.bf16.mxu1 %v7728_v31  ;;  %v7738_v28 = vld [vmem:[%s8019_s8 + $0xe8] ss:$36 sps:$4 sm:$0xff]  }
 0x113   : > { %v8739_v30 = vadd.f32 %v1883_v27, %v1770_v26  ;;  %3519 = vmatprep.subr.bf16.mxu1 %v7331_v19  ;;  %v1772_v32 = vpop.f32.mrf.mxu0  ;;  %v7737_v27 = vld [vmem:[%s8019_s8 + $0xe0] ss:$36 sps:$4 sm:$0xff]  }
 0x114   : > { %v1885_v33 = vpop.f32.mrf.mxu1  ;;  %3407 = vmatpush1.bf16.msra.mxu0 %v7323_v22 }
 0x115   : > { %v8742_v34 = vadd.f32 %v1885_v33, %v1772_v32  ;;  %3520 = vmatpush1.bf16.msra.mxu1 %v7329_v25  ;;  %v1774_v36 = vpop.f32.mrf.mxu0  ;;  %3408 = vmatprep.subr.bf16.mxu0 %v7328_v24  ;;  %v7365_v24 = vld [vmem:[%s10169_s1 + $0x420] ss:$8 sps:$4 sm:$0xff]   ;;  %v7739_v33 = vld [vmem:[%s8019_s8 + $0x12c] ss:$36 sps:$4 sm:$0xff]  }
 0x116   : > { %v1887_v37 = vpop.f32.mrf.mxu1  ;;  %3521 = vmatprep.subr.bf16.mxu1 %v7340_v29  ;;  %v7376_v29 = vld [vmem:[%s10169_s1 + $0x414] ss:$8 sps:$4 sm:$0xff]   ;;  %v7350_v32 = vld [vmem:[%s10169_s1 + $0x300] ss:$8 sps:$4 sm:$0xff]  }
 0x117   : > { %v8750_v39 = vadd.f32 %v1887_v37, %v1774_v36  ;;  %v1778_v41 = vpop.f32.mrf.mxu0  ;;  %3221 = vmatmul.mubr.bf16.gmra.mxu0 %v7729_v43  ;;  %v7740_v37 = vld [vmem:[%s8019_s8 + $0x134] ss:$36 sps:$4 sm:$0xff]  }
 0x118   : > { %v1891_v42 = vpop.f32.mrf.mxu1  ;;  %3334 = vmatmul.mubr.bf16.gmra.mxu1 %v7730_v44  ;;  %3409 = vmatpush1.bf16.msra.mxu0 %v7326_v35 }
 0x119   : > { %v8760_v46 = vadd.f32 %v1891_v42, %v1778_v41  ;;  %3230 = vmatprep.mubr.bf16.mxu0 %v7731_v48  ;;  %v1780_v49 = vpop.f32.mrf.mxu0  ;;  %3410 = vmatprep.subr.bf16.mxu0 %v7334_v38  ;;  %v7355_v38 = vld [vmem:[%s10169_s1 + $0x3f4] ss:$8 sps:$4 sm:$0xff]   ;;  %v7374_v41 = vld [vmem:[%s10169_s1 + $0x410] ss:$8 sps:$4 sm:$0xff]  }
 0x11a   : > { %v1893_v51 = vpop.f32.mrf.mxu1  ;;  %3343 = vmatprep.mubr.bf16.mxu1 %v7732_v52  ;;  %3522 = vmatpush1.bf16.msra.mxu1 %v7338_v40  ;;  %v7385_v52 = vld [vmem:[%s10169_s1 + $0x404] ss:$8 sps:$4 sm:$0xff]  }
 0x11b   : > { %v8770_v54 = vadd.f32 %v1893_v51, %v1780_v49  ;;  %v1782_v56 = vpop.f32.mrf.mxu0  ;;  %3523 = vmatprep.subr.bf16.mxu1 %v7349_v45  ;;  %v7353_v45 = vld [vmem:[%s10169_s1 + $0x3f0] ss:$8 sps:$4 sm:$0xff]   ;;  %v7361_v49 = vld [vmem:[%s10169_s1 + $0x3e4] ss:$8 sps:$4 sm:$0xff]  }
 0x11c   : > { %v1895_v57 = vpop.f32.mrf.mxu1  ;;  %3411 = vmatpush1.bf16.msra.mxu0 %v7332_v47 }
 0x11d   : > { %v8775_v58 = vadd.f32 %v1895_v57, %v1782_v56  ;;  %v1784_v60 = vpop.f32.mrf.mxu0  ;;  %3412 = vmatprep.subr.bf16.mxu0 %v7337_v53  ;;  %v7741_v56 = vld [vmem:[%s8019_s8 + $0x128] ss:$36 sps:$4 sm:$0xff]   ;;  %v7742_v57 = vld [vmem:[%s8019_s8 + $0x130] ss:$36 sps:$4 sm:$0xff]  }
 0x11e   : > { %v1897_v61 = vpop.f32.mrf.mxu1  ;;  %3524 = vmatpush1.bf16.msra.mxu1 %v7347_v55 }
 0x11f   : > { %v8783_v63 = vadd.f32 %v1897_v61, %v1784_v60  ;;  %v1788_v1 = vpop.f32.mrf.mxu0  ;;  %3231 = vmatmul.mubr.bf16.gmra.mxu0 %v7733_v3  ;;  %3525 = vmatprep.subr.bf16.mxu1 %v7358_v0  ;;  %v7359_v61 = vld [vmem:[%s10169_s1 + $0x3e0] ss:$8 sps:$4 sm:$0xff]   ;;  %v7398_v0 = vld [vmem:[%s10169_s1 + $0xa74] ss:$8 sps:$4 sm:$0xff]  }
 0x120   : > { %v1901_v2 = vpop.f32.mrf.mxu1  ;;  %3344 = vmatmul.mubr.bf16.gmra.mxu1 %v7734_v4  ;;  %3413 = vmatpush1.bf16.msra.mxu0 %v7335_v59  ;;  %v7383_v59 = vld [vmem:[%s10169_s1 + $0x400] ss:$8 sps:$4 sm:$0xff]   ;;  %v7364_v4 = vld [vmem:[%s10169_s1 + $0x3d4] ss:$8 sps:$4 sm:$0xff]  }
 0x121   : > { %v8793_v6 = vadd.f32 %v1901_v2, %v1788_v1  ;;  %3240 = vmatprep.mubr.bf16.mxu0 %v7735_v8  ;;  %v1790_v10 = vpop.f32.mrf.mxu0  ;;  %3414 = vmatprep.subr.bf16.mxu0 %v7343_v62  ;;  %v7743_v62 = vld [vmem:[%s8019_s8 + $0x174] ss:$36 sps:$4 sm:$0xff]   ;;  %v7744_v3 = vld [vmem:[%s8019_s8 + $0x17c] ss:$36 sps:$4 sm:$0xff]  }
 0x122   : > { %v1903_v11 = vpop.f32.mrf.mxu1  ;;  %3353 = vmatprep.mubr.bf16.mxu1 %v7736_v12  ;;  %3526 = vmatpush1.bf16.msra.mxu1 %v7356_v5 }
 0x123   : > { %v8806_v14 = vadd.f32 %v1903_v11, %v1790_v10  ;;  %v1792_v15 = vpop.f32.mrf.mxu0  ;;  %3527 = vmatprep.subr.bf16.mxu1 %v7367_v9  ;;  %v7362_v10 = vld [vmem:[%s10169_s1 + $0x3d0] ss:$8 sps:$4 sm:$0xff]  }
 0x124   : > { %v1905_v16 = vpop.f32.mrf.mxu1  ;;  %3415 = vmatpush1.bf16.msra.mxu0 %v7341_v7 }
 0x125   : > { %v8808_v17 = vadd.f32 %v1905_v16, %v1792_v15  ;;  %v1794_v19 = vpop.f32.mrf.mxu0  ;;  %3416 = vmatprep.subr.bf16.mxu0 %v7346_v13  ;;  %v7370_v13 = vld [vmem:[%s10169_s1 + $0x3c4] ss:$8 sps:$4 sm:$0xff]  }
 0x126   : > { %v1907_v20 = vpop.f32.mrf.mxu1  ;;  %3528 = vmatpush1.bf16.msra.mxu1 %v7365_v24  ;;  %v7368_v24 = vld [vmem:[%s10169_s1 + $0x3c0] ss:$8 sps:$4 sm:$0xff]  }
 0x127   : > { %v8816_v22 = vadd.f32 %v1907_v20, %v1794_v19  ;;  %v1798_v25 = vpop.f32.mrf.mxu0  ;;  %3241 = vmatmul.mubr.bf16.gmra.mxu0 %v7737_v27  ;;  %3529 = vmatprep.subr.bf16.mxu1 %v7376_v29  ;;  %v7745_v19 = vld [vmem:[%s8019_s8 + $0x170] ss:$36 sps:$4 sm:$0xff]   ;;  %v7746_v20 = vld [vmem:[%s8019_s8 + $0x178] ss:$36 sps:$4 sm:$0xff]  }
 0x128   : > { %v1911_v26 = vpop.f32.mrf.mxu1  ;;  %3354 = vmatmul.mubr.bf16.gmra.mxu1 %v7738_v28  ;;  %3417 = vmatpush1.bf16.msra.mxu0 %v7344_v18  ;;  %v7748_v28 = vld [vmem:[%s8019_s8 + $0x1c4] ss:$36 sps:$4 sm:$0xff]   ;;  %v7373_v29 = vld [vmem:[%s10169_s1 + $0x3b4] ss:$8 sps:$4 sm:$0xff]  }
 0x129   : > { %v8826_v31 = vadd.f32 %v1911_v26, %v1798_v25  ;;  %3250 = vmatprep.mubr.bf16.mxu0 %v7739_v33  ;;  %v1800_v35 = vpop.f32.mrf.mxu0  ;;  %3418 = vmatprep.subr.bf16.mxu0 %v7352_v21  ;;  %v7747_v25 = vld [vmem:[%s8019_s8 + $0x1bc] ss:$36 sps:$4 sm:$0xff]  }
 0x12a   : > { %v1913_v36 = vpop.f32.mrf.mxu1  ;;  %3363 = vmatprep.mubr.bf16.mxu1 %v7740_v37  ;;  %3530 = vmatpush1.bf16.msra.mxu1 %v7374_v41  ;;  %v7371_v37 = vld [vmem:[%s10169_s1 + $0x3b0] ss:$8 sps:$4 sm:$0xff]  }
 0x12b   : > { %v8836_v40 = vadd.f32 %v1913_v36, %v1800_v35  ;;  %v1802_v42 = vpop.f32.mrf.mxu0  ;;  %3531 = vmatprep.subr.bf16.mxu1 %v7385_v52 }
 0x12c   : > { %v1915_v43 = vpop.f32.mrf.mxu1  ;;  %3419 = vmatpush1.bf16.msra.mxu0 %v7350_v32 }
 0x12d   : > { %v8841_v44 = vadd.f32 %v1915_v43, %v1802_v42  ;;  %v1804_v47 = vpop.f32.mrf.mxu0  ;;  %3420 = vmatprep.subr.bf16.mxu0 %v7355_v38  ;;  %v7379_v42 = vld [vmem:[%s10169_s1 + $0x3a4] ss:$8 sps:$4 sm:$0xff]  }
 0x12e   : > { %v1917_v48 = vpop.f32.mrf.mxu1  ;;  %3532 = vmatpush1.bf16.msra.mxu1 %v7383_v59  ;;  %v7752_v59 = vld [vmem:[%s8019_s8 + $0x20c] ss:$36 sps:$4 sm:$0xff]  }
 0x12f   : > { %v8849_v51 = vadd.f32 %v1917_v48, %v1804_v47  ;;  %v1808_v53 = vpop.f32.mrf.mxu0  ;;  %3251 = vmatmul.mubr.bf16.gmra.mxu0 %v7741_v56  ;;  %5056 = vmatprep.subr.bf16.mxu1 %v7398_v0  ;;  %v7749_v48 = vld [vmem:[%s8019_s8 + $0x1b8] ss:$36 sps:$4 sm:$0xff]  }
 0x130   : > { %v1921_v55 = vpop.f32.mrf.mxu1  ;;  %3364 = vmatmul.mubr.bf16.gmra.mxu1 %v7742_v57  ;;  %3421 = vmatpush2.bf16.msra.mxu0 %v7353_v45 }
 0x131   : > { %v8859_v60 = vadd.f32 %v1921_v55, %v1808_v53  ;;  %3260 = vmatprep.mubr.bf16.mxu0 %v7743_v62  ;;  %v1810_v1 = vpop.f32.mrf.mxu0  ;;  %3422 = vmatprep.subr.bf16.mxu0 %v7361_v49  ;;  %v7750_v49 = vld [vmem:[%s8019_s8 + $0x1c0] ss:$36 sps:$4 sm:$0xff]  }
 0x132   : > { %v1923_v2 = vpop.f32.mrf.mxu1  ;;  %3373 = vmatprep.mubr.bf16.mxu1 %v7744_v3  ;;  %v7377_v53 = vld [vmem:[%s10169_s1 + $0x3a0] ss:$8 sps:$4 sm:$0xff]   ;;  %v7380_v3 = vld [vmem:[%s10169_s1 + $0x390] ss:$8 sps:$4 sm:$0xff]  }
 0x133   : > { %v8872_v5 = vadd.f32 %v1923_v2, %v1810_v1  ;;  %v1812_v7 = vpop.f32.mrf.mxu0  ;;  %v7751_v55 = vld [vmem:[%s8019_s8 + $0x204] ss:$36 sps:$4 sm:$0xff]  }
 0x134   : > { %v1925_v8 = vpop.f32.mrf.mxu1  ;;  %3423 = vmatpush2.bf16.msra.mxu0 %v7359_v61  ;;  %v7382_v61 = vld [vmem:[%s10169_s1 + $0x394] ss:$8 sps:$4 sm:$0xff]  }
 0x135   : > { %v8874_v9 = vadd.f32 %v1925_v8, %v1812_v7  ;;  %v1814_v11 = vpop.f32.mrf.mxu0  ;;  %3424 = vmatprep.subr.bf16.mxu0 %v7364_v4  ;;  %v7391_v4 = vld [vmem:[%s8019_s8 + $0x1c] ss:$36 sps:$4 sm:$0xff]  }
 0x136   : > { %v1927_v12 = vpop.f32.mrf.mxu1 }
 0x137   : > { %v8882_v15 = vadd.f32 %v1927_v12, %v1814_v11  ;;  %v1818_v16 = vpop.f32.mrf.mxu0  ;;  %3261 = vmatmul.mubr.bf16.gmra.mxu0 %v7745_v19 }
 0x138   : > { %v1931_v18 = vpop.f32.mrf.mxu1  ;;  %3374 = vmatmul.mubr.bf16.gmra.mxu1 %v7746_v20  ;;  %3425 = vmatpush2.bf16.msra.mxu0 %v7362_v10  ;;  %v7388_v10 = vld [vmem:[%s10169_s1 + $0x384] ss:$8 sps:$4 sm:$0xff]   ;;  %v7386_v20 = vld [vmem:[%s10169_s1 + $0x380] ss:$8 sps:$4 sm:$0xff]  }
 0x139   : > { %v8886_v21 = vadd.f32 %v1931_v18, %v1818_v16  ;;  %3270 = vmatprep.mubr.bf16.mxu0 %v7747_v25  ;;  %v1820_v26 = vpop.f32.mrf.mxu0  ;;  %3426 = vmatprep.subr.bf16.mxu0 %v7370_v13  ;;  %v7753_v16 = vld [vmem:[%s8019_s8 + $0x200] ss:$36 sps:$4 sm:$0xff]   ;;  %v7754_v18 = vld [vmem:[%s8019_s8 + $0x208] ss:$36 sps:$4 sm:$0xff]  }
 0x13a   : > { %v1933_v27 = vpop.f32.mrf.mxu1  ;;  %3383 = vmatprep.mubr.bf16.mxu1 %v7748_v28  ;;  %v7389_v28 = vld [vmem:[%s8019_s8 + $0x18] ss:$36 sps:$4 sm:$0xff]  }
 0x13b   : > { %v8896_v32 = vadd.f32 %v1933_v27, %v1820_v26  ;;  %v1822_v33 = vpop.f32.mrf.mxu0  ;;  %v7395_v26 = vld [vmem:[%s10169_s1 + $0x974] ss:$8 sps:$4 sm:$0xff]  }
 0x13c   : > { %v1935_v35 = vpop.f32.mrf.mxu1  ;;  %3427 = vmatpush2.bf16.msra.mxu0 %v7368_v24 }
 0x13d   : > { %v8898_v36 = vadd.f32 %v1935_v35, %v1822_v33  ;;  %v1824_v38 = vpop.f32.mrf.mxu0  ;;  %3428 = vmatprep.subr.bf16.mxu0 %v7373_v29  ;;  %v7392_v35 = vld [vmem:[%s8019_s8 + $0x20] ss:$36 sps:$4 sm:$0xff]  }
 0x13e   : > { %v1937_v41 = vpop.f32.mrf.mxu1 }
 0x13f   : > { %v8906_v43 = vadd.f32 %v1937_v41, %v1824_v38  ;;  %v1828_v45 = vpop.f32.mrf.mxu0  ;;  %3271 = vmatmul.mubr.bf16.gmra.mxu0 %v7749_v48  ;;  %v7396_v41 = vld [vmem:[%s10169_s1 + $0xa70] ss:$8 sps:$4 sm:$0xff]   ;;  %v7404_v48 = vld [vmem:[%s10169_s1 + $0xa64] ss:$8 sps:$4 sm:$0xff]  }
 0x140   : > { %v1941_v47 = vpop.f32.mrf.mxu1  ;;  %3384 = vmatmul.mubr.bf16.gmra.mxu1 %v7750_v49  ;;  %3429 = vmatpush2.bf16.msra.mxu0 %v7371_v37  ;;  %v7393_v37 = vld [vmem:[%s10169_s1 + $0x970] ss:$8 sps:$4 sm:$0xff]  }
 0x141   : > { %v8910_v52 = vadd.f32 %v1941_v47, %v1828_v45  ;;  %3280 = vmatprep.mubr.bf16.mxu0 %v7751_v55  ;;  %v1830_v56 = vpop.f32.mrf.mxu0  ;;  %3430 = vmatprep.subr.bf16.mxu0 %v7379_v42  ;;  %v7401_v42 = vld [vmem:[%s10169_s1 + $0x964] ss:$8 sps:$4 sm:$0xff]  }
 0x142   : > { %v1943_v57 = vpop.f32.mrf.mxu1  ;;  %3393 = vmatprep.mubr.bf16.mxu1 %v7752_v59  ;;  %v7402_v59 = vld [vmem:[%s10169_s1 + $0xa60] ss:$8 sps:$4 sm:$0xff]  }
 0x143   : > { %v8920_v62 = vadd.f32 %v1943_v57, %v1830_v56  ;;  %v1832_v0 = vpop.f32.mrf.mxu0  ;;  %v7399_v56 = vld [vmem:[%s10169_s1 + $0x960] ss:$8 sps:$4 sm:$0xff]  }
 0x144   : > { %v1945_v1 = vpop.f32.mrf.mxu1  ;;  %3431 = vmatpush2.bf16.msra.mxu0 %v7377_v53 }
 0x145   : > { %v8922_v2 = vadd.f32 %v1945_v1, %v1832_v0  ;;  %v1834_v7 = vpop.f32.mrf.mxu0  ;;  %3432 = vmatprep.subr.bf16.mxu0 %v7382_v61  ;;  %v7407_v61 = vld [vmem:[%s10169_s1 + $0x954] ss:$8 sps:$4 sm:$0xff]  }
 0x146   : > { %v1947_v8 = vpop.f32.mrf.mxu1 }
 0x147   : > { %v8931_v11 = vadd.f32 %v1947_v8, %v1834_v7  ;;  %v1838_v12 = vpop.f32.mrf.mxu0  ;;  %3281 = vmatmul.mubr.bf16.gmra.mxu0 %v7753_v16  ;;  %v7755_v7 = vld [vmem:[%s8019_s8 + $0x64] ss:$36 sps:$4 sm:$0xff]  }
 0x148   : > { %v1951_v13 = vpop.f32.mrf.mxu1  ;;  %3394 = vmatmul.mubr.bf16.gmra.mxu1 %v7754_v18  ;;  %3433 = vmatpush2.bf16.msra.mxu0 %v7380_v3  ;;  %v7410_v3 = vld [vmem:[%s10169_s1 + $0xa54] ss:$8 sps:$4 sm:$0xff]   ;;  %v7413_v18 = vld [vmem:[%s10169_s1 + $0x944] ss:$8 sps:$4 sm:$0xff]  }
 0x149   : > { %v8935_v19 = vadd.f32 %v1951_v13, %v1838_v12  ;;  %3436 = vmatprep.mubr.bf16.mxu0 %v7391_v4  ;;  %v1840_v24 = vpop.f32.mrf.mxu0  ;;  %3434 = vmatprep.subr.bf16.mxu0 %v7388_v10  ;;  %v7405_v12 = vld [vmem:[%s10169_s1 + $0x950] ss:$8 sps:$4 sm:$0xff]  }
 0x14a   : > { %v1953_v25 = vpop.f32.mrf.mxu1  ;;  %3549 = vmatprep.mubr.bf16.mxu1 %v7816_v50 }
 0x14b   : > { %v8944_v27 = vadd.f32 %v1953_v25, %v1840_v24  ;;  %v1842_v29 = vpop.f32.mrf.mxu0  ;;  %v7416_v25 = vld [vmem:[%s10169_s1 + $0xa44] ss:$8 sps:$4 sm:$0xff]  }
 0x14c   : > { %v1955_v33 = vpop.f32.mrf.mxu1  ;;  %3435 = vmatpush2.bf16.msra.mxu0 %v7386_v20 }
 0x14d   : > { %v8951_v38 = vadd.f32 %v1955_v33, %v1842_v29  ;;  %v1844_v45 = vpop.f32.mrf.mxu0  ;;  %4943 = vmatprep.subr.bf16.mxu0 %v7395_v26  ;;  %v7756_v33 = vld [vmem:[%s8019_s8 + $0x60] ss:$36 sps:$4 sm:$0xff]  }
 0x14e   : > { %v1957_v47 = vpop.f32.mrf.mxu1 }
 0x14f   : > { %v8962_v49 = vadd.f32 %v1957_v47, %v1844_v45  ;;  %v1994_v53 = vpop.f32.mrf.mxu0  ;;  %3437 = vmatmul.mubr.bf16.vlgmr.msra.gmra.mxu0 %v7389_v28  ;;  %v7419_v45 = vld [vmem:[%s10169_s1 + $0x934] ss:$8 sps:$4 sm:$0xff]  }
 0x150   : > { %v2107_v55 = vpop.f32.mrf.mxu1  ;;  %3550 = vmatmul.mubr.bf16.vlgmr.msra.gmra.mxu1 %v7392_v35  ;;  %v1995_v57 = vadd.f32 %v1994_v53, %v8727_v23  ;;  %4944 = vmatpush1.bf16.msra.mxu0 %v7393_v37  ;;  %v7757_v35 = vld [vmem:[%s8019_s8 + $0x68] ss:$36 sps:$4 sm:$0xff]   ;;  %v7422_v53 = vld [vmem:[%s10169_s1 + $0xa34] ss:$8 sps:$4 sm:$0xff]  }
 0x151   : > { %5057 = vmatpush1.bf16.msra.mxu1 %v7396_v41  ;;  %v1996_v0 = vpop.f32.mrf.mxu0  ;;  %4945 = vmatprep.subr.bf16.mxu0 %v7401_v42  ;;  %v7411_v37 = vld [vmem:[%s10169_s1 + $0x940] ss:$8 sps:$4 sm:$0xff]  }
 0x152   : > { %v2109_v1 = vpop.f32.mrf.mxu1  ;;  %5058 = vmatprep.subr.bf16.mxu1 %v7404_v48  ;;  %v8977_v4 = vadd.f32 %v2107_v55, %v1995_v57  ;;  %v1997_v23 = vadd.f32 %v1996_v0, %v8739_v30  ;;  %3446 = vmatprep.mubr.bf16.mxu0 %v7755_v7  ;;  %v7408_v30 = vld [vmem:[%s10169_s1 + $0xa50] ss:$8 sps:$4 sm:$0xff]  }
 0x153   : > { %3559 = vmatprep.mubr.bf16.mxu1 %v7816_v50  ;;  %v1998_v8 = vpop.f32.mrf.mxu0 }
 0x154   : > { %v2111_v10 = vpop.f32.mrf.mxu1  ;;  %v8985_v13 = vadd.f32 %v2109_v1, %v1997_v23  ;;  %v1999_v16 = vadd.f32 %v1998_v8, %v8742_v34  ;;  %4946 = vmatpush1.bf16.msra.mxu0 %v7399_v56  ;;  %v7758_v56 = vld [vmem:[%s8019_s8 + $0xac] ss:$36 sps:$4 sm:$0xff]  }
 0x155   : > { %5059 = vmatpush1.bf16.msra.mxu1 %v7402_v59  ;;  %v2000_v20 = vpop.f32.mrf.mxu0  ;;  %4947 = vmatprep.subr.bf16.mxu0 %v7407_v61  ;;  %v7417_v61 = vld [vmem:[%s10169_s1 + $0x930] ss:$8 sps:$4 sm:$0xff]   ;;  %v7428_v8 = vld [vmem:[%s10169_s1 + $0xa24] ss:$8 sps:$4 sm:$0xff]  }
 0x156   : > { %v2113_v24 = vpop.f32.mrf.mxu1  ;;  %5060 = vmatprep.subr.bf16.mxu1 %v7410_v3  ;;  %v8997_v34 = vadd.f32 %v2111_v10, %v1999_v16  ;;  %v2001_v26 = vadd.f32 %v2000_v20, %v8750_v39  ;;  %v7414_v39 = vld [vmem:[%s10169_s1 + $0xa40] ss:$8 sps:$4 sm:$0xff]   ;;  %v7425_v3 = vld [vmem:[%s10169_s1 + $0x924] ss:$8 sps:$4 sm:$0xff]  }
 0x157   : > { %v2004_v28 = vpop.f32.mrf.mxu0  ;;  %3447 = vmatmul.mubr.bf16.gmra.mxu0 %v7756_v33  ;;  %v7423_v20 = vld [vmem:[%s10169_s1 + $0x920] ss:$8 sps:$4 sm:$0xff]   ;;  %v7434_v33 = vld [vmem:[%s10169_s1 + $0xa14] ss:$8 sps:$4 sm:$0xff]  }
 0x158   : > { %v2117_v29 = vpop.f32.mrf.mxu1  ;;  %3560 = vmatmul.mubr.bf16.gmra.mxu1 %v7757_v35  ;;  %v9005_v41 = vadd.f32 %v2113_v24, %v2001_v26  ;;  %v2005_v42 = vadd.f32 %v2004_v28, %v8760_v46  ;;  %4948 = vmatpush1.bf16.msra.mxu0 %v7405_v12  ;;  %v7431_v26 = vld [vmem:[%s10169_s1 + $0x914] ss:$8 sps:$4 sm:$0xff]  }
 0x159   : > { %5061 = vmatpush1.bf16.msra.mxu1 %v7408_v30  ;;  %v2006_v47 = vpop.f32.mrf.mxu0  ;;  %4949 = vmatprep.subr.bf16.mxu0 %v7413_v18  ;;  %v7759_v30 = vld [vmem:[%s8019_s8 + $0xa8] ss:$36 sps:$4 sm:$0xff]   ;;  %v7760_v18 = vld [vmem:[%s8019_s8 + $0xb0] ss:$36 sps:$4 sm:$0xff]  }
 0x15a   : > { %v2119_v48 = vpop.f32.mrf.mxu1  ;;  %5062 = vmatprep.subr.bf16.mxu1 %v7416_v25  ;;  %v9017_v55 = vadd.f32 %v2117_v29, %v2005_v42  ;;  %v2007_v46 = vadd.f32 %v2006_v47, %v8770_v54  ;;  %3456 = vmatprep.mubr.bf16.mxu0 %v7758_v56  ;;  %v7420_v54 = vld [vmem:[%s10169_s1 + $0xa30] ss:$8 sps:$4 sm:$0xff]  }
 0x15b   : > { %3569 = vmatprep.mubr.bf16.mxu1 %v7816_v50  ;;  %v2008_v57 = vpop.f32.mrf.mxu0 }
 0x15c   : > { %v2121_v59 = vpop.f32.mrf.mxu1  ;;  %v9025_v0 = vadd.f32 %v2119_v48, %v2007_v46  ;;  %v2009_v1 = vadd.f32 %v2008_v57, %v8775_v58  ;;  %4950 = vmatpush1.bf16.msra.mxu0 %v7411_v37  ;;  %v7761_v37 = vld [vmem:[%s8019_s8 + $0xf4] ss:$36 sps:$4 sm:$0xff]   ;;  %v7440_v57 = vld [vmem:[%s10169_s1 + $0xa04] ss:$8 sps:$4 sm:$0xff]  }
 0x15d   : > { %5063 = vmatpush1.bf16.msra.mxu1 %v7414_v39  ;;  %v2010_v23 = vpop.f32.mrf.mxu0  ;;  %4951 = vmatprep.subr.bf16.mxu0 %v7419_v45  ;;  %v7429_v45 = vld [vmem:[%s10169_s1 + $0x910] ss:$8 sps:$4 sm:$0xff]  }
 0x15e   : > { %v2123_v7 = vpop.f32.mrf.mxu1  ;;  %5064 = vmatprep.subr.bf16.mxu1 %v7422_v53  ;;  %v9037_v58 = vadd.f32 %v2121_v59, %v2009_v1  ;;  %v2011_v10 = vadd.f32 %v2010_v23, %v8783_v63  ;;  %v7426_v63 = vld [vmem:[%s10169_s1 + $0xa20] ss:$8 sps:$4 sm:$0xff]   ;;  %v7437_v53 = vld [vmem:[%s10169_s1 + $0x904] ss:$8 sps:$4 sm:$0xff]  }
 0x15f   : > { %v2014_v12 = vpop.f32.mrf.mxu0  ;;  %3457 = vmatmul.mubr.bf16.gmra.mxu0 %v7759_v30  ;;  %v7435_v23 = vld [vmem:[%s10169_s1 + $0x900] ss:$8 sps:$4 sm:$0xff]   ;;  %v7446_v30 = vld [vmem:[%s10169_s1 + $0xaf4] ss:$8 sps:$4 sm:$0xff]  }
 0x160   : > { %v2127_v16 = vpop.f32.mrf.mxu1  ;;  %3570 = vmatmul.mubr.bf16.gmra.mxu1 %v7760_v18  ;;  %v9045_v24 = vadd.f32 %v2123_v7, %v2011_v10  ;;  %v2015_v25 = vadd.f32 %v2014_v12, %v8793_v6  ;;  %4952 = vmatpush1.bf16.msra.mxu0 %v7417_v61  ;;  %v7443_v10 = vld [vmem:[%s10169_s1 + $0x9f4] ss:$8 sps:$4 sm:$0xff]  }
 0x161   : > { %5065 = vmatpush1.bf16.msra.mxu1 %v7420_v54  ;;  %v2016_v28 = vpop.f32.mrf.mxu0  ;;  %4953 = vmatprep.subr.bf16.mxu0 %v7425_v3  ;;  %v7762_v54 = vld [vmem:[%s8019_s8 + $0xf0] ss:$36 sps:$4 sm:$0xff]   ;;  %v7763_v3 = vld [vmem:[%s8019_s8 + $0xf8] ss:$36 sps:$4 sm:$0xff]  }
 0x162   : > { %v2129_v29 = vpop.f32.mrf.mxu1  ;;  %5066 = vmatprep.subr.bf16.mxu1 %v7428_v8  ;;  %v9057_v35 = vadd.f32 %v2127_v16, %v2015_v25  ;;  %v2017_v6 = vadd.f32 %v2016_v28, %v8806_v14  ;;  %3466 = vmatprep.mubr.bf16.mxu0 %v7761_v37  ;;  %v7432_v14 = vld [vmem:[%s10169_s1 + $0xa10] ss:$8 sps:$4 sm:$0xff]  }
 0x163   : > { %3579 = vmatprep.mubr.bf16.mxu1 %v7816_v50  ;;  %v2018_v42 = vpop.f32.mrf.mxu0 }
 0x164   : > { %v2131_v39 = vpop.f32.mrf.mxu1  ;;  %v9065_v47 = vadd.f32 %v2129_v29, %v2017_v6  ;;  %v2019_v48 = vadd.f32 %v2018_v42, %v8808_v17  ;;  %4954 = vmatpush1.bf16.msra.mxu0 %v7423_v20  ;;  %v7764_v20 = vld [vmem:[%s8019_s8 + $0x13c] ss:$36 sps:$4 sm:$0xff]   ;;  %v7452_v42 = vld [vmem:[%s10169_s1 + $0xae4] ss:$8 sps:$4 sm:$0xff]  }
 0x165   : > { %5067 = vmatpush1.bf16.msra.mxu1 %v7426_v63  ;;  %v2020_v46 = vpop.f32.mrf.mxu0  ;;  %4955 = vmatprep.subr.bf16.mxu0 %v7431_v26  ;;  %v7441_v26 = vld [vmem:[%s10169_s1 + $0x9f0] ss:$8 sps:$4 sm:$0xff]  }
 0x166   : > { %v2133_v56 = vpop.f32.mrf.mxu1  ;;  %5068 = vmatprep.subr.bf16.mxu1 %v7434_v33  ;;  %v9077_v17 = vadd.f32 %v2131_v39, %v2019_v48  ;;  %v2021_v59 = vadd.f32 %v2020_v46, %v8816_v22  ;;  %v7438_v22 = vld [vmem:[%s10169_s1 + $0xa00] ss:$8 sps:$4 sm:$0xff]   ;;  %v7449_v33 = vld [vmem:[%s10169_s1 + $0x9e4] ss:$8 sps:$4 sm:$0xff]  }
 0x167   : > { %v2024_v61 = vpop.f32.mrf.mxu0  ;;  %3467 = vmatmul.mubr.bf16.gmra.mxu0 %v7762_v54  ;;  %v7447_v46 = vld [vmem:[%s10169_s1 + $0x9e0] ss:$8 sps:$4 sm:$0xff]   ;;  %v7458_v54 = vld [vmem:[%s10169_s1 + $0xad4] ss:$8 sps:$4 sm:$0xff]  }
 0x168   : > { %v2137_v1 = vpop.f32.mrf.mxu1  ;;  %3580 = vmatmul.mubr.bf16.gmra.mxu1 %v7763_v3  ;;  %v9085_v7 = vadd.f32 %v2133_v56, %v2021_v59  ;;  %v2025_v8 = vadd.f32 %v2024_v61, %v8826_v31  ;;  %4956 = vmatpush1.bf16.msra.mxu0 %v7429_v45  ;;  %v7455_v59 = vld [vmem:[%s10169_s1 + $0x9d4] ss:$8 sps:$4 sm:$0xff]  }
 0x169   : > { %5069 = vmatpush1.bf16.msra.mxu1 %v7432_v14  ;;  %v2026_v12 = vpop.f32.mrf.mxu0  ;;  %4957 = vmatprep.subr.bf16.mxu0 %v7437_v53  ;;  %v7765_v14 = vld [vmem:[%s8019_s8 + $0x138] ss:$36 sps:$4 sm:$0xff]   ;;  %v7766_v53 = vld [vmem:[%s8019_s8 + $0x140] ss:$36 sps:$4 sm:$0xff]  }
 0x16a   : > { %v2139_v16 = vpop.f32.mrf.mxu1  ;;  %5070 = vmatprep.subr.bf16.mxu1 %v7440_v57  ;;  %v9097_v18 = vadd.f32 %v2137_v1, %v2025_v8  ;;  %v2027_v31 = vadd.f32 %v2026_v12, %v8836_v40  ;;  %3476 = vmatprep.mubr.bf16.mxu0 %v7764_v20  ;;  %v7444_v40 = vld [vmem:[%s10169_s1 + $0xaf0] ss:$8 sps:$4 sm:$0xff]  }
 0x16b   : > { %3589 = vmatprep.mubr.bf16.mxu1 %v7816_v50  ;;  %v2028_v25 = vpop.f32.mrf.mxu0 }
 0x16c   : > { %v2141_v63 = vpop.f32.mrf.mxu1  ;;  %v9105_v28 = vadd.f32 %v2139_v16, %v2027_v31  ;;  %v2029_v29 = vadd.f32 %v2028_v25, %v8841_v44  ;;  %4958 = vmatpush1.bf16.msra.mxu0 %v7435_v23  ;;  %v7767_v23 = vld [vmem:[%s8019_s8 + $0x184] ss:$36 sps:$4 sm:$0xff]  }
 0x16d   : > { %5071 = vmatpush1.bf16.msra.mxu1 %v7438_v22  ;;  %v2030_v6 = vpop.f32.mrf.mxu0  ;;  %4959 = vmatprep.subr.bf16.mxu0 %v7443_v10  ;;  %v7453_v10 = vld [vmem:[%s10169_s1 + $0x9d0] ss:$8 sps:$4 sm:$0xff]   ;;  %v7464_v25 = vld [vmem:[%s10169_s1 + $0xac4] ss:$8 sps:$4 sm:$0xff]  }
 0x16e   : > { %v2143_v37 = vpop.f32.mrf.mxu1  ;;  %5072 = vmatprep.subr.bf16.mxu1 %v7446_v30  ;;  %v9117_v44 = vadd.f32 %v2141_v63, %v2029_v29  ;;  %v2031_v39 = vadd.f32 %v2030_v6, %v8849_v51  ;;  %v7450_v51 = vld [vmem:[%s10169_s1 + $0xae0] ss:$8 sps:$4 sm:$0xff]   ;;  %v7461_v30 = vld [vmem:[%s10169_s1 + $0x9c4] ss:$8 sps:$4 sm:$0xff]  }
 0x16f   : > { %v2034_v45 = vpop.f32.mrf.mxu0  ;;  %3477 = vmatmul.mubr.bf16.gmra.mxu0 %v7765_v14  ;;  %v7459_v6 = vld [vmem:[%s10169_s1 + $0x9c0] ss:$8 sps:$4 sm:$0xff]   ;;  %v7470_v14 = vld [vmem:[%s10169_s1 + $0xab4] ss:$8 sps:$4 sm:$0xff]  }
 0x170   : > { %v2147_v48 = vpop.f32.mrf.mxu1  ;;  %3590 = vmatmul.mubr.bf16.gmra.mxu1 %v7766_v53  ;;  %v9125_v56 = vadd.f32 %v2143_v37, %v2031_v39  ;;  %v2035_v57 = vadd.f32 %v2034_v45, %v8859_v60  ;;  %4960 = vmatpush2.bf16.msra.mxu0 %v7441_v26  ;;  %v7467_v39 = vld [vmem:[%s10169_s1 + $0x9b4] ss:$8 sps:$4 sm:$0xff]  }
 0x171   : > { %5073 = vmatpush2.bf16.msra.mxu1 %v7444_v40  ;;  %v2036_v61 = vpop.f32.mrf.mxu0  ;;  %4961 = vmatprep.subr.bf16.mxu0 %v7449_v33  ;;  %v7768_v40 = vld [vmem:[%s8019_s8 + $0x180] ss:$36 sps:$4 sm:$0xff]   ;;  %v7769_v33 = vld [vmem:[%s8019_s8 + $0x188] ss:$36 sps:$4 sm:$0xff]  }
 0x172   : > { %v2149_v1 = vpop.f32.mrf.mxu1  ;;  %5074 = vmatprep.subr.bf16.mxu1 %v7452_v42  ;;  %v9137_v3 = vadd.f32 %v2147_v48, %v2035_v57  ;;  %v2037_v60 = vadd.f32 %v2036_v61, %v8872_v5  ;;  %3486 = vmatprep.mubr.bf16.mxu0 %v7767_v23  ;;  %v7456_v5 = vld [vmem:[%s10169_s1 + $0xad0] ss:$8 sps:$4 sm:$0xff]  }
 0x173   : > { %3599 = vmatprep.mubr.bf16.mxu1 %v7816_v50  ;;  %v2038_v8 = vpop.f32.mrf.mxu0 }
 0x174   : > { %v2151_v22 = vpop.f32.mrf.mxu1  ;;  %v9145_v12 = vadd.f32 %v2149_v1, %v2037_v60  ;;  %v2039_v16 = vadd.f32 %v2038_v8, %v8874_v9  ;;  %4962 = vmatpush2.bf16.msra.mxu0 %v7447_v46  ;;  %v7770_v46 = vld [vmem:[%s8019_s8 + $0x1cc] ss:$36 sps:$4 sm:$0xff]  }
 0x175   : > { %5075 = vmatpush2.bf16.msra.mxu1 %v7450_v51  ;;  %v2040_v31 = vpop.f32.mrf.mxu0  ;;  %4963 = vmatprep.subr.bf16.mxu0 %v7455_v59  ;;  %v7465_v59 = vld [vmem:[%s10169_s1 + $0x9b0] ss:$8 sps:$4 sm:$0xff]   ;;  %v7476_v8 = vld [vmem:[%s10169_s1 + $0xaa4] ss:$8 sps:$4 sm:$0xff]  }
 0x176   : > { %v2153_v20 = vpop.f32.mrf.mxu1  ;;  %5076 = vmatprep.subr.bf16.mxu1 %v7458_v54  ;;  %v9157_v9 = vadd.f32 %v2151_v22, %v2039_v16  ;;  %v2041_v63 = vadd.f32 %v2040_v31, %v8882_v15  ;;  %v7462_v15 = vld [vmem:[%s10169_s1 + $0xac0] ss:$8 sps:$4 sm:$0xff]   ;;  %v7473_v54 = vld [vmem:[%s10169_s1 + $0x9a4] ss:$8 sps:$4 sm:$0xff]  }
 0x177   : > { %v2044_v26 = vpop.f32.mrf.mxu0  ;;  %3487 = vmatmul.mubr.bf16.gmra.mxu0 %v7768_v40  ;;  %v7471_v31 = vld [vmem:[%s10169_s1 + $0x9a0] ss:$8 sps:$4 sm:$0xff]   ;;  %v7482_v40 = vld [vmem:[%s10169_s1 + $0xa94] ss:$8 sps:$4 sm:$0xff]  }
 0x178   : > { %v2157_v29 = vpop.f32.mrf.mxu1  ;;  %3600 = vmatmul.mubr.bf16.gmra.mxu1 %v7769_v33  ;;  %v9165_v37 = vadd.f32 %v2153_v20, %v2041_v63  ;;  %v2045_v42 = vadd.f32 %v2044_v26, %v8886_v21  ;;  %4964 = vmatpush2.bf16.msra.mxu0 %v7453_v10  ;;  %v7479_v63 = vld [vmem:[%s10169_s1 + $0x994] ss:$8 sps:$4 sm:$0xff]  }
 0x179   : > { %5077 = vmatpush2.bf16.msra.mxu1 %v7456_v5  ;;  %v2046_v45 = vpop.f32.mrf.mxu0  ;;  %4965 = vmatprep.subr.bf16.mxu0 %v7461_v30  ;;  %v7771_v5 = vld [vmem:[%s8019_s8 + $0x1c8] ss:$36 sps:$4 sm:$0xff]   ;;  %v7772_v30 = vld [vmem:[%s8019_s8 + $0x1d0] ss:$36 sps:$4 sm:$0xff]  }
 0x17a   : > { %v2159_v48 = vpop.f32.mrf.mxu1  ;;  %5078 = vmatprep.subr.bf16.mxu1 %v7464_v25  ;;  %v9177_v53 = vadd.f32 %v2157_v29, %v2045_v42  ;;  %v2047_v21 = vadd.f32 %v2046_v45, %v8896_v32  ;;  %3496 = vmatprep.mubr.bf16.mxu0 %v7770_v46  ;;  %v7468_v32 = vld [vmem:[%s10169_s1 + $0xab0] ss:$8 sps:$4 sm:$0xff]  }
 0x17b   : > { %3609 = vmatprep.mubr.bf16.mxu1 %v7816_v50  ;;  %v2048_v57 = vpop.f32.mrf.mxu0  ;;  %v7480_v45 = vld [vmem:[%s10169_s1 + $0xa90] ss:$8 sps:$4 sm:$0xff]  }
 0x17c   : > { %v2161_v51 = vpop.f32.mrf.mxu1  ;;  %v9185_v61 = vadd.f32 %v2159_v48, %v2047_v21  ;;  %v2049_v1 = vadd.f32 %v2048_v57, %v8898_v36  ;;  %4966 = vmatpush2.bf16.msra.mxu0 %v7459_v6  ;;  %v7773_v6 = vld [vmem:[%s8019_s8 + $0x214] ss:$36 sps:$4 sm:$0xff]   ;;  %v7488_v21 = vld [vmem:[%s10169_s1 + $0xa84] ss:$8 sps:$4 sm:$0xff]  }
 0x17d   : > { %5079 = vmatpush2.bf16.msra.mxu1 %v7462_v15  ;;  %v2050_v60 = vpop.f32.mrf.mxu0  ;;  %4967 = vmatprep.subr.bf16.mxu0 %v7467_v39  ;;  %v7477_v39 = vld [vmem:[%s10169_s1 + $0x990] ss:$8 sps:$4 sm:$0xff]  }
 0x17e   : > { %v2163_v23 = vpop.f32.mrf.mxu1  ;;  %5080 = vmatprep.subr.bf16.mxu1 %v7470_v14  ;;  %v9197_v36 = vadd.f32 %v2161_v51, %v2049_v1  ;;  %v2051_v22 = vadd.f32 %v2050_v60, %v8906_v43  ;;  %v7474_v43 = vld [vmem:[%s10169_s1 + $0xaa0] ss:$8 sps:$4 sm:$0xff]   ;;  %v7485_v14 = vld [vmem:[%s10169_s1 + $0x984] ss:$8 sps:$4 sm:$0xff]   ;;  %v7491_v51 = vld [vmem:[%s8019_s8 + $0x94] ss:$36 sps:$4 sm:$0xff]  }
 0x17f   : > { %v2054_v10 = vpop.f32.mrf.mxu0  ;;  %3497 = vmatmul.mubr.bf16.gmra.mxu0 %v7771_v5  ;;  %v7494_v1 = vld [vmem:[%s8019_s8 + $0x9c] ss:$36 sps:$4 sm:$0xff]   ;;  %v7774_v60 = vld [vmem:[%s8019_s8 + $0x210] ss:$36 sps:$4 sm:$0xff]  }
 0x180   : > { %v2167_v16 = vpop.f32.mrf.mxu1  ;;  %3610 = vmatmul.mubr.bf16.gmra.mxu1 %v7772_v30  ;;  %v9205_v20 = vadd.f32 %v2163_v23, %v2051_v22  ;;  %v2055_v25 = vadd.f32 %v2054_v10, %v8910_v52  ;;  %4968 = vmatpush2.bf16.msra.mxu0 %v7465_v59  ;;  %v7775_v23 = vld [vmem:[%s8019_s8 + $0x218] ss:$36 sps:$4 sm:$0xff]  }
 0x181   : > { %5081 = vmatpush2.bf16.msra.mxu1 %v7468_v32  ;;  %v2056_v26 = vpop.f32.mrf.mxu0  ;;  %4969 = vmatprep.subr.bf16.mxu0 %v7473_v54 }
 0x182   : > { %v2169_v29 = vpop.f32.mrf.mxu1  ;;  %5082 = vmatprep.subr.bf16.mxu1 %v7476_v8  ;;  %v9217_v33 = vadd.f32 %v2167_v16, %v2055_v25  ;;  %v2057_v52 = vadd.f32 %v2056_v26, %v8920_v62  ;;  %3506 = vmatprep.mubr.bf16.mxu0 %v7773_v6  ;;  %v7483_v8 = vld [vmem:[%s10169_s1 + $0x980] ss:$8 sps:$4 sm:$0xff]   ;;  %v7497_v16 = vld [vmem:[%s10169_s1 + $0xb74] ss:$8 sps:$4 sm:$0xff]  }
 0x183   : > { %3619 = vmatprep.mubr.bf16.mxu1 %v7816_v50  ;;  %v2058_v42 = vpop.f32.mrf.mxu0  ;;  %v7500_v25 = vld [vmem:[%s10169_s1 + $0xc74] ss:$8 sps:$4 sm:$0xff]  }
 0x184   : > { %v2171_v15 = vpop.f32.mrf.mxu1  ;;  %v9228_v48 = vadd.f32 %v2169_v29, %v2057_v52  ;;  %v2059_v62 = vadd.f32 %v2058_v42, %v8922_v2  ;;  %4970 = vmatpush2.bf16.msra.mxu0 %v7471_v31  ;;  %v7489_v31 = vld [vmem:[%s8019_s8 + $0x90] ss:$36 sps:$4 sm:$0xff]  }
 0x185   : > { %5083 = vmatpush2.bf16.msra.mxu1 %v7474_v43  ;;  %v2060_v46 = vpop.f32.mrf.mxu0  ;;  %4971 = vmatprep.subr.bf16.mxu0 %v7479_v63  ;;  %v7492_v63 = vld [vmem:[%s8019_s8 + $0x98] ss:$36 sps:$4 sm:$0xff]  }
 0x186   : > { %v2173_v57 = vpop.f32.mrf.mxu1  ;;  %5084 = vmatprep.subr.bf16.mxu1 %v7482_v40  ;;  %v9238_v59 = vadd.f32 %v2171_v15, %v2059_v62  ;;  %v2061_v2 = vadd.f32 %v2060_v46, %v8931_v11  ;;  %v7486_v11 = vld [vmem:[%s10169_s1 + $0xa80] ss:$8 sps:$4 sm:$0xff]   ;;  %v7495_v40 = vld [vmem:[%s10169_s1 + $0xb70] ss:$8 sps:$4 sm:$0xff]   ;;  %v7506_v15 = vld [vmem:[%s10169_s1 + $0xc64] ss:$8 sps:$4 sm:$0xff]  }
 0x187   : > { %v2064_v32 = vpop.f32.mrf.mxu0  ;;  %3507 = vmatmul.mubr.bf16.gmra.mxu0 %v7774_v60  ;;  %v7498_v52 = vld [vmem:[%s10169_s1 + $0xc70] ss:$8 sps:$4 sm:$0xff]   ;;  %v7509_v62 = vld [vmem:[%s8019_s8 + $0xdc] ss:$36 sps:$4 sm:$0xff]  }
 0x188   : > { %v2177_v54 = vpop.f32.mrf.mxu1  ;;  %3620 = vmatmul.mubr.bf16.gmra.mxu1 %v7775_v23  ;;  %v9247_v22 = vadd.f32 %v2173_v57, %v2061_v2  ;;  %v2065_v10 = vadd.f32 %v2064_v32, %v8935_v19  ;;  %4972 = vmatpush2.bf16.msra.mxu0 %v7477_v39  ;;  %v7504_v2 = vld [vmem:[%s10169_s1 + $0xc60] ss:$8 sps:$4 sm:$0xff]   ;;  %v7507_v23 = vld [vmem:[%s8019_s8 + $0xd8] ss:$36 sps:$4 sm:$0xff]  }
 0x189   : > { %5085 = vmatpush2.bf16.msra.mxu1 %v7480_v45  ;;  %v2066_v5 = vpop.f32.mrf.mxu0  ;;  %4973 = vmatprep.subr.bf16.mxu0 %v7485_v14 }
 0x18a   : > { %v2179_v30 = vpop.f32.mrf.mxu1  ;;  %5086 = vmatprep.subr.bf16.mxu1 %v7488_v21  ;;  %v9260_v19 = vadd.f32 %v2177_v54, %v2065_v10  ;;  %v2067_v43 = vadd.f32 %v2066_v5, %v8944_v27  ;;  %4975 = vmatprep.mubr.bf16.mxu0 %v7491_v51  ;;  %v7503_v27 = vld [vmem:[%s10169_s1 + $0xb64] ss:$8 sps:$4 sm:$0xff]   ;;  %v7501_v51 = vld [vmem:[%s10169_s1 + $0xb60] ss:$8 sps:$4 sm:$0xff]   ;;  %v7518_v10 = vld [vmem:[%s10169_s1 + $0xc54] ss:$8 sps:$4 sm:$0xff]  }
 0x18b   : > { %5088 = vmatprep.mubr.bf16.mxu1 %v7494_v1  ;;  %v2068_v26 = vpop.f32.mrf.mxu0  ;;  %v7516_v5 = vld [vmem:[%s10169_s1 + $0xc50] ss:$8 sps:$4 sm:$0xff]  }
 0x18c   : > { %v2181_v29 = vpop.f32.mrf.mxu1  ;;  %v9270_v6 = vadd.f32 %v2179_v30, %v2067_v43  ;;  %v2069_v42 = vadd.f32 %v2068_v26, %v8951_v38  ;;  %4974 = vmatpush2.bf16.msra.mxu0 %v7483_v8  ;;  %v7512_v38 = vld [vmem:[%s8019_s8 + $0xe4] ss:$36 sps:$4 sm:$0xff]  }
 0x18d   : > { %5087 = vmatpush2.bf16.msra.mxu1 %v7486_v11  ;;  %v2070_v39 = vpop.f32.mrf.mxu0  ;;  %5169 = vmatprep.subr.bf16.mxu0 %v7497_v16  ;;  %v7510_v8 = vld [vmem:[%s8019_s8 + $0xe0] ss:$36 sps:$4 sm:$0xff]   ;;  %v7513_v16 = vld [vmem:[%s10169_s1 + $0xb50] ss:$8 sps:$4 sm:$0xff]  }
 0x18e   : > { %v2183_v45 = vpop.f32.mrf.mxu1  ;;  %5282 = vmatprep.subr.bf16.mxu1 %v7500_v25  ;;  %v9280_v14 = vadd.f32 %v2181_v29, %v2069_v42  ;;  %v2071_v21 = vadd.f32 %v2070_v39, %v8962_v49  ;;  %v7515_v49 = vld [vmem:[%s10169_s1 + $0xb54] ss:$8 sps:$4 sm:$0xff]   ;;  %v7521_v26 = vld [vmem:[%s10169_s1 + $0xb44] ss:$8 sps:$4 sm:$0xff]  }
 0x18f   : > { %v2220_v46 = vpop.f32.mrf.mxu0  ;;  %4976 = vmatmul.mubr.bf16.vlgmr.msra.gmra.mxu0 %v7489_v31  ;;  %v7524_v29 = vld [vmem:[%s10169_s1 + $0xc44] ss:$8 sps:$4 sm:$0xff]  }
 0x190   : > { %v3099_v57 = vpop.f32.mrf.mxu1  ;;  %5089 = vmatmul.mubr.bf16.vlgmr.msra.gmra.mxu1 %v7492_v63  ;;  %v9290_v1 = vadd.f32 %v2183_v45, %v2071_v21  ;;  %v2221_v32 = vadd.f32 %v2220_v46, %v8977_v4  ;;  %5170 = vmatpush1.bf16.msra.mxu0 %v7495_v40  ;;  %v7527_v42 = vld [vmem:[%s8019_s8 + $0x124] ss:$36 sps:$4 sm:$0xff]   ;;  %v7536_v46 = vld [vmem:[%s10169_s1 + $0xc34] ss:$8 sps:$4 sm:$0xff]  }
 0x191   : > { %5283 = vmatpush1.bf16.msra.mxu1 %v7498_v52  ;;  %v2222_v54 = vpop.f32.mrf.mxu0  ;;  %5171 = vmatprep.subr.bf16.mxu0 %v7503_v27 }
 0x192   : > { %v3101_v60 = vpop.f32.mrf.mxu1  ;;  %5284 = vmatprep.subr.bf16.mxu1 %v7506_v15  ;;  %v9301_v11 = vadd.f32 %v3099_v57, %v2221_v32  ;;  %v2223_v4 = vadd.f32 %v2222_v54, %v8985_v13  ;;  %4985 = vmatprep.mubr.bf16.mxu0 %v7509_v62  ;;  %v7519_v62 = vld [vmem:[%s10169_s1 + $0xb40] ss:$8 sps:$4 sm:$0xff]  }
 0x193   : > { %5098 = vmatprep.mubr.bf16.mxu1 %v7512_v38  ;;  %v2224_v30 = vpop.f32.mrf.mxu0  ;;  %v7528_v54 = vld [vmem:[%s8019_s8 + $0x128] ss:$36 sps:$4 sm:$0xff]  }
 0x194   : > { %v3103_v31 = vpop.f32.mrf.mxu1  ;;  %v9310_v25 = vadd.f32 %v3101_v60, %v2223_v4  ;;  %v2225_v43 = vadd.f32 %v2224_v30, %v8997_v34  ;;  %5172 = vmatpush1.bf16.msra.mxu0 %v7501_v51  ;;  %v7530_v34 = vld [vmem:[%s8019_s8 + $0x12c] ss:$36 sps:$4 sm:$0xff]  }
 0x195   : > { %5285 = vmatpush1.bf16.msra.mxu1 %v7504_v2  ;;  %v2226_v13 = vpop.f32.mrf.mxu0  ;;  %5173 = vmatprep.subr.bf16.mxu0 %v7515_v49  ;;  %v7525_v49 = vld [vmem:[%s8019_s8 + $0x120] ss:$36 sps:$4 sm:$0xff]  }
 0x196   : > { %v3105_v63 = vpop.f32.mrf.mxu1  ;;  %5286 = vmatprep.subr.bf16.mxu1 %v7518_v10  ;;  %v9319_v40 = vadd.f32 %v3103_v31, %v2225_v43  ;;  %v2227_v52 = vadd.f32 %v2226_v13, %v9005_v41  ;;  %v7522_v41 = vld [vmem:[%s10169_s1 + $0xc40] ss:$8 sps:$4 sm:$0xff]   ;;  %v7545_v31 = vld [vmem:[%s8019_s8 + $0x16c] ss:$36 sps:$4 sm:$0xff]   ;;  %v7548_v43 = vld [vmem:[%s8019_s8 + $0x174] ss:$36 sps:$4 sm:$0xff]  }
 0x197   : > { %v2230_v27 = vpop.f32.mrf.mxu0  ;;  %4986 = vmatmul.mubr.bf16.gmra.mxu0 %v7507_v23 }
 0x198   : > { %v3109_v15 = vpop.f32.mrf.mxu1  ;;  %5099 = vmatmul.mubr.bf16.gmra.mxu1 %v7510_v8  ;;  %v9324_v39 = vadd.f32 %v3105_v63, %v2227_v52  ;;  %v2231_v45 = vadd.f32 %v2230_v27, %v9017_v55  ;;  %5174 = vmatpush1.bf16.msra.mxu0 %v7513_v16  ;;  %v7533_v55 = vld [vmem:[%s10169_s1 + $0xb34] ss:$8 sps:$4 sm:$0xff]   ;;  %v7531_v8 = vld [vmem:[%s10169_s1 + $0xb30] ss:$8 sps:$4 sm:$0xff]   ;;  %v7539_v16 = vld [vmem:[%s10169_s1 + $0xb24] ss:$8 sps:$4 sm:$0xff]  }
 0x199   : > { %5287 = vmatpush1.bf16.msra.mxu1 %v7516_v5  ;;  %v2232_v21 = vpop.f32.mrf.mxu0  ;;  %5175 = vmatprep.subr.bf16.mxu0 %v7521_v26  ;;  %v7537_v52 = vld [vmem:[%s10169_s1 + $0xb20] ss:$8 sps:$4 sm:$0xff]   ;;  %v7554_v27 = vld [vmem:[%s10169_s1 + $0xc14] ss:$8 sps:$4 sm:$0xff]  }
 0x19a   : > { %v3111_v38 = vpop.f32.mrf.mxu1  ;;  %5288 = vmatprep.subr.bf16.mxu1 %v7524_v29  ;;  %v9339_v57 = vadd.f32 %v3109_v15, %v2231_v45  ;;  %v2233_v51 = vadd.f32 %v2232_v21, %v9025_v0  ;;  %4995 = vmatprep.mubr.bf16.mxu0 %v7527_v42  ;;  %v7534_v0 = vld [vmem:[%s10169_s1 + $0xc30] ss:$8 sps:$4 sm:$0xff]   ;;  %v7543_v21 = vld [vmem:[%s8019_s8 + $0x168] ss:$36 sps:$4 sm:$0xff]  }
 0x19b   : > { %5108 = vmatprep.mubr.bf16.mxu1 %v7530_v34  ;;  %v2234_v2 = vpop.f32.mrf.mxu0 }
 0x19c   : > { %v3113_v32 = vpop.f32.mrf.mxu1  ;;  %v9344_v60 = vadd.f32 %v3111_v38, %v2233_v51  ;;  %v2235_v23 = vadd.f32 %v2234_v2, %v9037_v58  ;;  %5176 = vmatpush1.bf16.msra.mxu0 %v7519_v62  ;;  %v7542_v58 = vld [vmem:[%s10169_s1 + $0xc24] ss:$8 sps:$4 sm:$0xff]   ;;  %v7546_v38 = vld [vmem:[%s8019_s8 + $0x170] ss:$36 sps:$4 sm:$0xff]  }
 0x19d   : > { %5289 = vmatpush1.bf16.msra.mxu1 %v7522_v41  ;;  %v2236_v10 = vpop.f32.mrf.mxu0  ;;  %5177 = vmatprep.subr.bf16.mxu0 %v7533_v55  ;;  %v7549_v51 = vld [vmem:[%s10169_s1 + $0xb10] ss:$8 sps:$4 sm:$0xff]  }
 0x19e   : > { %v3115_v4 = vpop.f32.mrf.mxu1  ;;  %5290 = vmatprep.subr.bf16.mxu1 %v7536_v46  ;;  %v9359_v5 = vadd.f32 %v3113_v32, %v2235_v23  ;;  %v2237_v30 = vadd.f32 %v2236_v10, %v9045_v24  ;;  %v7540_v24 = vld [vmem:[%s10169_s1 + $0xc20] ss:$8 sps:$4 sm:$0xff]  }
 0x19f   : > { %v2240_v13 = vpop.f32.mrf.mxu0  ;;  %4996 = vmatmul.mubr.bf16.gmra.mxu0 %v7525_v49  ;;  %v7557_v49 = vld [vmem:[%s10169_s1 + $0xb04] ss:$8 sps:$4 sm:$0xff]  }
 0x1a0   : > { %v3119_v63 = vpop.f32.mrf.mxu1  ;;  %5109 = vmatmul.mubr.bf16.gmra.mxu1 %v7528_v54  ;;  %v9364_v26 = vadd.f32 %v3115_v4, %v2237_v30  ;;  %v2241_v29 = vadd.f32 %v2240_v13, %v9057_v35  ;;  %5178 = vmatpush1.bf16.msra.mxu0 %v7531_v8  ;;  %v7551_v35 = vld [vmem:[%s10169_s1 + $0xb14] ss:$8 sps:$4 sm:$0xff]   ;;  %v7555_v30 = vld [vmem:[%s10169_s1 + $0xb00] ss:$8 sps:$4 sm:$0xff]  }
 0x1a1   : > { %5291 = vmatpush1.bf16.msra.mxu1 %v7534_v0  ;;  %v2242_v42 = vpop.f32.mrf.mxu0  ;;  %5179 = vmatprep.subr.bf16.mxu0 %v7539_v16  ;;  %v7563_v8 = vld [vmem:[%s8019_s8 + $0x1b4] ss:$36 sps:$4 sm:$0xff]   ;;  %v7566_v0 = vld [vmem:[%s8019_s8 + $0x1bc] ss:$36 sps:$4 sm:$0xff]  }
 0x1a2   : > { %v3121_v34 = vpop.f32.mrf.mxu1  ;;  %5292 = vmatprep.subr.bf16.mxu1 %v7542_v58  ;;  %v9379_v15 = vadd.f32 %v3119_v63, %v2241_v29  ;;  %v2243_v45 = vadd.f32 %v2242_v42, %v9065_v47  ;;  %5005 = vmatprep.mubr.bf16.mxu0 %v7545_v31  ;;  %v7552_v47 = vld [vmem:[%s10169_s1 + $0xc10] ss:$8 sps:$4 sm:$0xff]   ;;  %v7572_v13 = vld [vmem:[%s10169_s1 + $0xcf4] ss:$8 sps:$4 sm:$0xff]  }
 0x1a3   : > { %5118 = vmatprep.mubr.bf16.mxu1 %v7548_v43  ;;  %v2244_v62 = vpop.f32.mrf.mxu0  ;;  %v7561_v42 = vld [vmem:[%s8019_s8 + $0x1b0] ss:$36 sps:$4 sm:$0xff]  }
 0x1a4   : > { %v3123_v41 = vpop.f32.mrf.mxu1  ;;  %v9384_v55 = vadd.f32 %v3121_v34, %v2243_v45  ;;  %v2245_v46 = vadd.f32 %v2244_v62, %v9077_v17  ;;  %5180 = vmatpush1.bf16.msra.mxu0 %v7537_v52  ;;  %v7560_v17 = vld [vmem:[%s10169_s1 + $0xc04] ss:$8 sps:$4 sm:$0xff]   ;;  %v7564_v34 = vld [vmem:[%s8019_s8 + $0x1b8] ss:$36 sps:$4 sm:$0xff]  }
 0x1a5   : > { %5293 = vmatpush1.bf16.msra.mxu1 %v7540_v24  ;;  %v2246_v2 = vpop.f32.mrf.mxu0  ;;  %5181 = vmatprep.subr.bf16.mxu0 %v7551_v35  ;;  %v7567_v45 = vld [vmem:[%s10169_s1 + $0xbf0] ss:$8 sps:$4 sm:$0xff]  }
 0x1a6   : > { %v3125_v32 = vpop.f32.mrf.mxu1  ;;  %5294 = vmatprep.subr.bf16.mxu1 %v7554_v27  ;;  %v9399_v54 = vadd.f32 %v3123_v41, %v2245_v46  ;;  %v2247_v23 = vadd.f32 %v2246_v2, %v9085_v7  ;;  %v7558_v7 = vld [vmem:[%s10169_s1 + $0xc00] ss:$8 sps:$4 sm:$0xff]  }
 0x1a7   : > { %v2250_v10 = vpop.f32.mrf.mxu0  ;;  %5006 = vmatmul.mubr.bf16.gmra.mxu0 %v7543_v21  ;;  %v7575_v21 = vld [vmem:[%s10169_s1 + $0xbe4] ss:$8 sps:$4 sm:$0xff]  }
 0x1a8   : > { %v3129_v4 = vpop.f32.mrf.mxu1  ;;  %5119 = vmatmul.mubr.bf16.gmra.mxu1 %v7546_v38  ;;  %v9404_v16 = vadd.f32 %v3125_v32, %v2247_v23  ;;  %v2251_v58 = vadd.f32 %v2250_v10, %v9097_v18  ;;  %5182 = vmatpush1.bf16.msra.mxu0 %v7549_v51  ;;  %v7569_v18 = vld [vmem:[%s10169_s1 + $0xbf4] ss:$8 sps:$4 sm:$0xff]   ;;  %v7573_v23 = vld [vmem:[%s10169_s1 + $0xbe0] ss:$8 sps:$4 sm:$0xff]  }
 0x1a9   : > { %5295 = vmatpush1.bf16.msra.mxu1 %v7552_v47  ;;  %v2252_v31 = vpop.f32.mrf.mxu0  ;;  %5183 = vmatprep.subr.bf16.mxu0 %v7557_v49  ;;  %v7581_v51 = vld [vmem:[%s8019_s8 + $0x1fc] ss:$36 sps:$4 sm:$0xff]   ;;  %v7584_v47 = vld [vmem:[%s8019_s8 + $0x204] ss:$36 sps:$4 sm:$0xff]  }
 0x1aa   : > { %v3131_v43 = vpop.f32.mrf.mxu1  ;;  %5296 = vmatprep.subr.bf16.mxu1 %v7560_v17  ;;  %v9419_v63 = vadd.f32 %v3129_v4, %v2251_v58  ;;  %v2253_v29 = vadd.f32 %v2252_v31, %v9105_v28  ;;  %5015 = vmatprep.mubr.bf16.mxu0 %v7563_v8  ;;  %v7570_v28 = vld [vmem:[%s10169_s1 + $0xcf0] ss:$8 sps:$4 sm:$0xff]   ;;  %v7590_v10 = vld [vmem:[%s10169_s1 + $0xcd4] ss:$8 sps:$4 sm:$0xff]  }
 0x1ab   : > { %5128 = vmatprep.mubr.bf16.mxu1 %v7566_v0  ;;  %v2254_v52 = vpop.f32.mrf.mxu0  ;;  %v7579_v31 = vld [vmem:[%s8019_s8 + $0x1f8] ss:$36 sps:$4 sm:$0xff]  }
 0x1ac   : > { %v3133_v24 = vpop.f32.mrf.mxu1  ;;  %v9424_v35 = vadd.f32 %v3131_v43, %v2253_v29  ;;  %v2255_v27 = vadd.f32 %v2254_v52, %v9117_v44  ;;  %5184 = vmatpush1.bf16.msra.mxu0 %v7555_v30  ;;  %v7578_v44 = vld [vmem:[%s10169_s1 + $0xce4] ss:$8 sps:$4 sm:$0xff]   ;;  %v7585_v29 = vld [vmem:[%s10169_s1 + $0xbd0] ss:$8 sps:$4 sm:$0xff]  }
 0x1ad   : > { %5297 = vmatpush1.bf16.msra.mxu1 %v7558_v7  ;;  %v2256_v62 = vpop.f32.mrf.mxu0  ;;  %5185 = vmatprep.subr.bf16.mxu0 %v7569_v18  ;;  %v7582_v43 = vld [vmem:[%s8019_s8 + $0x200] ss:$36 sps:$4 sm:$0xff]  }
 0x1ae   : > { %v3135_v41 = vpop.f32.mrf.mxu1  ;;  %5298 = vmatprep.subr.bf16.mxu1 %v7572_v13  ;;  %v9439_v38 = vadd.f32 %v3133_v24, %v2255_v27  ;;  %v2257_v46 = vadd.f32 %v2256_v62, %v9125_v56  ;;  %v7576_v56 = vld [vmem:[%s10169_s1 + $0xce0] ss:$8 sps:$4 sm:$0xff]  }
 0x1af   : > { %v2260_v2 = vpop.f32.mrf.mxu0  ;;  %5016 = vmatmul.mubr.bf16.gmra.mxu0 %v7561_v42  ;;  %v7593_v42 = vld [vmem:[%s10169_s1 + $0xbc4] ss:$8 sps:$4 sm:$0xff]  }
 0x1b0   : > { %v3139_v32 = vpop.f32.mrf.mxu1  ;;  %5129 = vmatmul.mubr.bf16.gmra.mxu1 %v7564_v34  ;;  %v9444_v49 = vadd.f32 %v3135_v41, %v2257_v46  ;;  %v2261_v17 = vadd.f32 %v2260_v2, %v9137_v3  ;;  %5186 = vmatpush2.bf16.msra.mxu0 %v7567_v45  ;;  %v7587_v3 = vld [vmem:[%s10169_s1 + $0xbd4] ss:$8 sps:$4 sm:$0xff]   ;;  %v7599_v45 = vld [vmem:[%s8019_s8 + $0x244] ss:$36 sps:$4 sm:$0xff]  }
 0x1b1   : > { %5299 = vmatpush2.bf16.msra.mxu1 %v7570_v28  ;;  %v2262_v8 = vpop.f32.mrf.mxu0  ;;  %5187 = vmatprep.subr.bf16.mxu0 %v7575_v21  ;;  %v7602_v28 = vld [vmem:[%s8019_s8 + $0x24c] ss:$36 sps:$4 sm:$0xff]   ;;  %v7591_v46 = vld [vmem:[%s10169_s1 + $0xbc0] ss:$8 sps:$4 sm:$0xff]   ;;  %v7608_v2 = vld [vmem:[%s10169_s1 + $0xcb4] ss:$8 sps:$4 sm:$0xff]  }
 0x1b2   : > { %v3141_v0 = vpop.f32.mrf.mxu1  ;;  %5300 = vmatprep.subr.bf16.mxu1 %v7578_v44  ;;  %v9459_v4 = vadd.f32 %v3139_v32, %v2261_v17  ;;  %v2263_v58 = vadd.f32 %v2262_v8, %v9145_v12  ;;  %5025 = vmatprep.mubr.bf16.mxu0 %v7581_v51  ;;  %v7588_v12 = vld [vmem:[%s10169_s1 + $0xcd0] ss:$8 sps:$4 sm:$0xff]   ;;  %v7597_v8 = vld [vmem:[%s8019_s8 + $0x240] ss:$36 sps:$4 sm:$0xff]  }
 0x1b3   : > { %5138 = vmatprep.mubr.bf16.mxu1 %v7584_v47  ;;  %v2264_v30 = vpop.f32.mrf.mxu0 }
 0x1b4   : > { %v3143_v7 = vpop.f32.mrf.mxu1  ;;  %v9464_v18 = vadd.f32 %v3141_v0, %v2263_v58  ;;  %v2265_v13 = vadd.f32 %v2264_v30, %v9157_v9  ;;  %5188 = vmatpush2.bf16.msra.mxu0 %v7573_v23  ;;  %v7596_v9 = vld [vmem:[%s10169_s1 + $0xcc4] ss:$8 sps:$4 sm:$0xff]   ;;  %v7603_v58 = vld [vmem:[%s10169_s1 + $0xbb0] ss:$8 sps:$4 sm:$0xff]  }
 0x1b5   : > { %5301 = vmatpush2.bf16.msra.mxu1 %v7576_v56  ;;  %v2266_v52 = vpop.f32.mrf.mxu0  ;;  %5189 = vmatprep.subr.bf16.mxu0 %v7587_v3  ;;  %v7600_v0 = vld [vmem:[%s8019_s8 + $0x248] ss:$36 sps:$4 sm:$0xff]  }
 0x1b6   : > { %v3145_v24 = vpop.f32.mrf.mxu1  ;;  %5302 = vmatprep.subr.bf16.mxu1 %v7590_v10  ;;  %v9479_v34 = vadd.f32 %v3143_v7, %v2265_v13  ;;  %v2267_v27 = vadd.f32 %v2266_v52, %v9165_v37  ;;  %v7594_v37 = vld [vmem:[%s10169_s1 + $0xcc0] ss:$8 sps:$4 sm:$0xff]  }
 0x1b7   : > { %v2270_v62 = vpop.f32.mrf.mxu0  ;;  %5026 = vmatmul.mubr.bf16.gmra.mxu0 %v7579_v31  ;;  %v7611_v31 = vld [vmem:[%s10169_s1 + $0xba4] ss:$8 sps:$4 sm:$0xff]  }
 0x1b8   : > { %v3149_v41 = vpop.f32.mrf.mxu1  ;;  %5139 = vmatmul.mubr.bf16.gmra.mxu1 %v7582_v43  ;;  %v9484_v21 = vadd.f32 %v3145_v24, %v2267_v27  ;;  %v2271_v44 = vadd.f32 %v2270_v62, %v9177_v53  ;;  %5190 = vmatpush2.bf16.msra.mxu0 %v7585_v29  ;;  %v7605_v53 = vld [vmem:[%s10169_s1 + $0xbb4] ss:$8 sps:$4 sm:$0xff]   ;;  %v7617_v29 = vld [vmem:[%s8019_s8 + $0x28c] ss:$36 sps:$4 sm:$0xff]   ;;  %v7609_v27 = vld [vmem:[%s10169_s1 + $0xba0] ss:$8 sps:$4 sm:$0xff]  }
 0x1b9   : > { %5303 = vmatpush2.bf16.msra.mxu1 %v7588_v12  ;;  %v2272_v51 = vpop.f32.mrf.mxu0  ;;  %5191 = vmatprep.subr.bf16.mxu0 %v7593_v42  ;;  %v7620_v12 = vld [vmem:[%s8019_s8 + $0x294] ss:$36 sps:$4 sm:$0xff]  }
 0x1ba   : > { %v3151_v47 = vpop.f32.mrf.mxu1  ;;  %5304 = vmatprep.subr.bf16.mxu1 %v7596_v9  ;;  %v9499_v32 = vadd.f32 %v3149_v41, %v2271_v44  ;;  %v2273_v17 = vadd.f32 %v2272_v51, %v9185_v61  ;;  %5035 = vmatprep.mubr.bf16.mxu0 %v7599_v45  ;;  %v7606_v61 = vld [vmem:[%s10169_s1 + $0xcb0] ss:$8 sps:$4 sm:$0xff]   ;;  %v7626_v62 = vld [vmem:[%s10169_s1 + $0xc94] ss:$8 sps:$4 sm:$0xff]   ;;  %v7615_v51 = vld [vmem:[%s8019_s8 + $0x288] ss:$36 sps:$4 sm:$0xff]  }
 0x1bb   : > { %5148 = vmatprep.mubr.bf16.mxu1 %v7602_v28  ;;  %v2274_v23 = vpop.f32.mrf.mxu0 }
 0x1bc   : > { %v3153_v56 = vpop.f32.mrf.mxu1  ;;  %v9504_v3 = vadd.f32 %v3151_v47, %v2273_v17  ;;  %v2275_v10 = vadd.f32 %v2274_v23, %v9197_v36  ;;  %5192 = vmatpush2.bf16.msra.mxu0 %v7591_v46  ;;  %v7614_v36 = vld [vmem:[%s10169_s1 + $0xca4] ss:$8 sps:$4 sm:$0xff]   ;;  %v7618_v47 = vld [vmem:[%s8019_s8 + $0x290] ss:$36 sps:$4 sm:$0xff]  }
 0x1bd   : > { %5305 = vmatpush2.bf16.msra.mxu1 %v7594_v37  ;;  %v2276_v30 = vpop.f32.mrf.mxu0  ;;  %5193 = vmatprep.subr.bf16.mxu0 %v7605_v53  ;;  %v7621_v17 = vld [vmem:[%s10169_s1 + $0xb90] ss:$8 sps:$4 sm:$0xff]  }
 0x1be   : > { %v3155_v7 = vpop.f32.mrf.mxu1  ;;  %5306 = vmatprep.subr.bf16.mxu1 %v7608_v2  ;;  %v9519_v43 = vadd.f32 %v3153_v56, %v2275_v10  ;;  %v2277_v13 = vadd.f32 %v2276_v30, %v9205_v20  ;;  %v7612_v20 = vld [vmem:[%s10169_s1 + $0xca0] ss:$8 sps:$4 sm:$0xff]  }
 0x1bf   : > { %v2280_v52 = vpop.f32.mrf.mxu0  ;;  %5036 = vmatmul.mubr.bf16.gmra.mxu0 %v7597_v8  ;;  %v7629_v8 = vld [vmem:[%s10169_s1 + $0xb84] ss:$8 sps:$4 sm:$0xff]  }
 0x1c0   : > { %v3159_v24 = vpop.f32.mrf.mxu1  ;;  %5149 = vmatmul.mubr.bf16.gmra.mxu1 %v7600_v0  ;;  %v9524_v42 = vadd.f32 %v3155_v7, %v2277_v13  ;;  %v2281_v9 = vadd.f32 %v2280_v52, %v9217_v33  ;;  %5194 = vmatpush2.bf16.msra.mxu0 %v7603_v58  ;;  %v7623_v33 = vld [vmem:[%s10169_s1 + $0xb94] ss:$8 sps:$4 sm:$0xff]   ;;  %v7635_v58 = vld [vmem:[%s8019_s8 + $0xa4] ss:$36 sps:$4 sm:$0xff]  }
 0x1c1   : > { %5307 = vmatpush2.bf16.msra.mxu1 %v7606_v61  ;;  %v2282_v45 = vpop.f32.mrf.mxu0  ;;  %5195 = vmatprep.subr.bf16.mxu0 %v7611_v31  ;;  %v7638_v61 = vld [vmem:[%s8019_s8 + $0xac] ss:$36 sps:$4 sm:$0xff]   ;;  %v7627_v13 = vld [vmem:[%s10169_s1 + $0xb80] ss:$8 sps:$4 sm:$0xff]  }
 0x1c2   : > { %v3161_v28 = vpop.f32.mrf.mxu1  ;;  %5308 = vmatprep.subr.bf16.mxu1 %v7614_v36  ;;  %v9539_v41 = vadd.f32 %v3159_v24, %v2281_v9  ;;  %v2283_v44 = vadd.f32 %v2282_v45, %v9228_v48  ;;  %5045 = vmatprep.mubr.bf16.mxu0 %v7617_v29  ;;  %v7624_v48 = vld [vmem:[%s10169_s1 + $0xc90] ss:$8 sps:$4 sm:$0xff]   ;;  %v7636_v45 = vld [vmem:[%s8019_s8 + $0xa8] ss:$36 sps:$4 sm:$0xff]  }
 0x1c3   : > { %5158 = vmatprep.mubr.bf16.mxu1 %v7620_v12  ;;  %v2284_v46 = vpop.f32.mrf.mxu0 }
 0x1c4   : > { %v3163_v37 = vpop.f32.mrf.mxu1  ;;  %v9544_v53 = vadd.f32 %v3161_v28, %v2283_v44  ;;  %v2285_v2 = vadd.f32 %v2284_v46, %v9238_v59  ;;  %5196 = vmatpush2.bf16.msra.mxu0 %v7609_v27  ;;  %v7632_v59 = vld [vmem:[%s10169_s1 + $0xc84] ss:$8 sps:$4 sm:$0xff]  }
 0x1c5   : > { %5309 = vmatpush2.bf16.msra.mxu1 %v7612_v20  ;;  %v2286_v23 = vpop.f32.mrf.mxu0  ;;  %5197 = vmatprep.subr.bf16.mxu0 %v7623_v33  ;;  %v7633_v20 = vld [vmem:[%s8019_s8 + $0xa0] ss:$36 sps:$4 sm:$0xff]   ;;  %v7644_v46 = vld [vmem:[%s8019_s8 + $0xec] ss:$36 sps:$4 sm:$0xff]  }
 0x1c6   : > { %v3165_v56 = vpop.f32.mrf.mxu1  ;;  %5310 = vmatprep.subr.bf16.mxu1 %v7626_v62  ;;  %v9559_v0 = vadd.f32 %v3163_v37, %v2285_v2  ;;  %v2287_v10 = vadd.f32 %v2286_v23, %v9247_v22  ;;  %v7630_v22 = vld [vmem:[%s10169_s1 + $0xc80] ss:$8 sps:$4 sm:$0xff]   ;;  %v7639_v62 = vld [vmem:[%s10169_s1 + $0xd70] ss:$8 sps:$4 sm:$0xff]  }
 0x1c7   : > { %v2290_v30 = vpop.f32.mrf.mxu0  ;;  %5046 = vmatmul.mubr.bf16.gmra.mxu0 %v7615_v51  ;;  %v7647_v37 = vld [vmem:[%s8019_s8 + $0xf4] ss:$36 sps:$4 sm:$0xff]  }
 0x1c8   : > { %v3169_v7 = vpop.f32.mrf.mxu1  ;;  %5159 = vmatmul.mubr.bf16.gmra.mxu1 %v7618_v47  ;;  %v9564_v31 = vadd.f32 %v3165_v56, %v2287_v10  ;;  %v2291_v36 = vadd.f32 %v2290_v30, %v9260_v19  ;;  %5198 = vmatpush2.bf16.msra.mxu0 %v7621_v17  ;;  %v7641_v19 = vld [vmem:[%s10169_s1 + $0xd74] ss:$8 sps:$4 sm:$0xff]   ;;  %v7642_v30 = vld [vmem:[%s8019_s8 + $0xe8] ss:$36 sps:$4 sm:$0xff]  }
 0x1c9   : > { %5311 = vmatpush2.bf16.msra.mxu1 %v7624_v48  ;;  %v2292_v29 = vpop.f32.mrf.mxu0  ;;  %5199 = vmatprep.subr.bf16.mxu0 %v7629_v8 }
 0x1ca   : > { %v3171_v12 = vpop.f32.mrf.mxu1  ;;  %5312 = vmatprep.subr.bf16.mxu1 %v7632_v59  ;;  %v9576_v52 = vadd.f32 %v3169_v7, %v2291_v36  ;;  %v2293_v24 = vadd.f32 %v2292_v29, %v9270_v6  ;;  %5201 = vmatprep.mubr.bf16.mxu0 %v7635_v58  ;;  %v7659_v59 = vld [vmem:[%s10169_s1 + $0xd54] ss:$8 sps:$4 sm:$0xff]  }
 0x1cb   : > { %5314 = vmatprep.mubr.bf16.mxu1 %v7638_v61  ;;  %v2294_v9 = vpop.f32.mrf.mxu0  ;;  %v7645_v7 = vld [vmem:[%s8019_s8 + $0xf0] ss:$36 sps:$4 sm:$0xff]   ;;  %v7656_v29 = vld [vmem:[%s8019_s8 + $0x13c] ss:$36 sps:$4 sm:$0xff]  }
 0x1cc   : > { %v3173_v27 = vpop.f32.mrf.mxu1  ;;  %v9581_v28 = vadd.f32 %v3171_v12, %v2293_v24  ;;  %v2295_v33 = vadd.f32 %v2294_v9, %v9280_v14  ;;  %5200 = vmatpush2.bf16.msra.mxu0 %v7627_v13  ;;  %v7650_v14 = vld [vmem:[%s10169_s1 + $0xd64] ss:$8 sps:$4 sm:$0xff]  }
 0x1cd   : > { %5313 = vmatpush2.bf16.msra.mxu1 %v7630_v22  ;;  %v2296_v44 = vpop.f32.mrf.mxu0  ;;  %5395 = vmatprep.subr.bf16.mxu0 %v7641_v19  ;;  %v7653_v22 = vld [vmem:[%s8019_s8 + $0x134] ss:$36 sps:$4 sm:$0xff]  }
 0x1ce   : > { %v3175_v6 = vpop.f32.mrf.mxu1  ;;  %6785 = vmatprep.subr.bf16.mxu1 %v7641_v19  ;;  %v9589_v51 = vadd.f32 %v3173_v27, %v2295_v33  ;;  %v2297_v47 = vadd.f32 %v2296_v44, %v9290_v1  ;;  %v7648_v1 = vld [vmem:[%s10169_s1 + $0xd60] ss:$8 sps:$4 sm:$0xff]  }
 0x1cf   : > { %v3212_v2 = vpop.f32.mrf.mxu0  ;;  %5202 = vmatmul.mubr.bf16.vlgmr.msra.gmra.mxu0 %v7633_v20 }
 0x1d0   : > { %v3325_v17 = vpop.f32.mrf.mxu1  ;;  %5315 = vmatmul.mubr.bf16.vlgmr.msra.gmra.mxu1 %v7636_v45  ;;  %v9595_v48 = vadd.f32 %v3175_v6, %v2297_v47  ;;  %v3213_v23 = vadd.f32 %v3212_v2, %v9301_v11  ;;  %5396 = vmatpush1.bf16.msra.mxu0 %v7639_v62  ;;  %v7654_v2 = vld [vmem:[%s8019_s8 + $0x138] ss:$36 sps:$4 sm:$0xff]  }
 0x1d1   : > { %6793 = vmatpush1.bf16.msra.mxu1 %v7639_v62  ;;  %v3214_v56 = vpop.f32.mrf.mxu0  ;;  %5211 = vmatprep.mubr.bf16.mxu0 %v7644_v46 }
 0x1d2   : > { %v3327_v8 = vpop.f32.mrf.mxu1  ;;  %5324 = vmatprep.mubr.bf16.mxu1 %v7647_v37  ;;  %v9604_v10 = vadd.f32 %v3325_v17, %v3213_v23  ;;  %v3215_v11 = vadd.f32 %v3214_v56, %v9310_v25  ;;  %5397 = vmatprep.subr.bf16.mxu0 %v7650_v14  ;;  %v7657_v25 = vld [vmem:[%s10169_s1 + $0xd50] ss:$8 sps:$4 sm:$0xff]   ;;  %v7665_v56 = vld [vmem:[%s8019_s8 + $0x184] ss:$36 sps:$4 sm:$0xff]  }
 0x1d3   : > { %6786 = vmatprep.subr.bf16.mxu1 %v7650_v14  ;;  %v3216_v58 = vpop.f32.mrf.mxu0  ;;  %v7651_v14 = vld [vmem:[%s8019_s8 + $0x130] ss:$36 sps:$4 sm:$0xff]  }
 0x1d4   : > { %v3329_v61 = vpop.f32.mrf.mxu1  ;;  %v9609_v36 = vadd.f32 %v3327_v8, %v3215_v11  ;;  %v3217_v13 = vadd.f32 %v3216_v58, %v9319_v40  ;;  %5398 = vmatpush1.bf16.msra.mxu0 %v7648_v1  ;;  %v7668_v40 = vld [vmem:[%s10169_s1 + $0xd44] ss:$8 sps:$4 sm:$0xff]  }
 0x1d5   : > { %6794 = vmatpush1.bf16.msra.mxu1 %v7648_v1  ;;  %v3218_v12 = vpop.f32.mrf.mxu0  ;;  %5399 = vmatprep.subr.bf16.mxu0 %v7659_v59  ;;  %v7662_v1 = vld [vmem:[%s8019_s8 + $0x17c] ss:$36 sps:$4 sm:$0xff]  }
 0x1d6   : > { %v3331_v19 = vpop.f32.mrf.mxu1  ;;  %6787 = vmatprep.subr.bf16.mxu1 %v7659_v59  ;;  %v9617_v24 = vadd.f32 %v3329_v61, %v3217_v13  ;;  %v3219_v9 = vadd.f32 %v3218_v12, %v9324_v39  ;;  %v7666_v39 = vld [vmem:[%s10169_s1 + $0xd40] ss:$8 sps:$4 sm:$0xff]  }
 0x1d7   : > { %v3222_v27 = vpop.f32.mrf.mxu0  ;;  %5212 = vmatmul.mubr.bf16.gmra.mxu0 %v7642_v30 }
 0x1d8   : > { %v3335_v20 = vpop.f32.mrf.mxu1  ;;  %5325 = vmatmul.mubr.bf16.gmra.mxu1 %v7645_v7  ;;  %v9623_v45 = vadd.f32 %v3331_v19, %v3219_v9  ;;  %v3223_v33 = vadd.f32 %v3222_v27, %v9339_v57  ;;  %5221 = vmatprep.mubr.bf16.mxu0 %v7653_v22  ;;  %v7677_v57 = vld [vmem:[%s10169_s1 + $0xd34] ss:$8 sps:$4 sm:$0xff]   ;;  %v7663_v27 = vld [vmem:[%s8019_s8 + $0x180] ss:$36 sps:$4 sm:$0xff]  }
 0x1d9   : > { %5334 = vmatprep.mubr.bf16.mxu1 %v7656_v29  ;;  %v3224_v62 = vpop.f32.mrf.mxu0  ;;  %5400 = vmatpush1.bf16.msra.mxu0 %v7657_v25  ;;  %v7684_v29 = vld [vmem:[%s10169_s1 + $0xd20] ss:$8 sps:$4 sm:$0xff]  }
 0x1da   : > { %v3337_v44 = vpop.f32.mrf.mxu1  ;;  %6795 = vmatpush1.bf16.msra.mxu1 %v7657_v25  ;;  %v9629_v6 = vadd.f32 %v3335_v20, %v3223_v33  ;;  %v3225_v46 = vadd.f32 %v3224_v62, %v9344_v60  ;;  %5401 = vmatprep.subr.bf16.mxu0 %v7668_v40  ;;  %v7675_v60 = vld [vmem:[%s10169_s1 + $0xd30] ss:$8 sps:$4 sm:$0xff]   ;;  %v7671_v62 = vld [vmem:[%s8019_s8 + $0x1c4] ss:$36 sps:$4 sm:$0xff]  }
 0x1db   : > { %6788 = vmatprep.subr.bf16.mxu1 %v7668_v40  ;;  %v3226_v37 = vpop.f32.mrf.mxu0  ;;  %v7660_v40 = vld [vmem:[%s8019_s8 + $0x178] ss:$36 sps:$4 sm:$0xff]  }
 0x1dc   : > { %v3339_v47 = vpop.f32.mrf.mxu1  ;;  %v9637_v17 = vadd.f32 %v3337_v44, %v3225_v46  ;;  %v3227_v23 = vadd.f32 %v3226_v37, %v9359_v5  ;;  %v7686_v5 = vld [vmem:[%s10169_s1 + $0xd24] ss:$8 sps:$4 sm:$0xff]  }
 0x1dd   : > { %v3228_v8 = vpop.f32.mrf.mxu0  ;;  %5402 = vmatpush1.bf16.msra.mxu0 %v7666_v39  ;;  %v7674_v44 = vld [vmem:[%s8019_s8 + $0x1cc] ss:$36 sps:$4 sm:$0xff]  }
 0x1de   : > { %v3341_v59 = vpop.f32.mrf.mxu1  ;;  %6796 = vmatpush1.bf16.msra.mxu1 %v7666_v39  ;;  %v9645_v11 = vadd.f32 %v3339_v47, %v3227_v23  ;;  %v3229_v58 = vadd.f32 %v3228_v8, %v9364_v26  ;;  %5403 = vmatprep.subr.bf16.mxu0 %v7677_v57 }
 0x1df   : > { %6789 = vmatprep.subr.bf16.mxu1 %v7677_v57  ;;  %v3232_v61 = vpop.f32.mrf.mxu0  ;;  %5222 = vmatmul.mubr.bf16.gmra.mxu0 %v7651_v14 }
 0x1e0   : > { %v3345_v30 = vpop.f32.mrf.mxu1  ;;  %5335 = vmatmul.mubr.bf16.gmra.mxu1 %v7654_v2  ;;  %v9651_v7 = vadd.f32 %v3341_v59, %v3229_v58  ;;  %v3233_v13 = vadd.f32 %v3232_v61, %v9379_v15  ;;  %5231 = vmatprep.mubr.bf16.mxu0 %v7662_v1  ;;  %v7695_v15 = vld [vmem:[%s10169_s1 + $0xd14] ss:$8 sps:$4 sm:$0xff]   ;;  %v7669_v58 = vld [vmem:[%s8019_s8 + $0x1c0] ss:$36 sps:$4 sm:$0xff]  }
 0x1e1   : > { %5344 = vmatprep.mubr.bf16.mxu1 %v7665_v56  ;;  %v3234_v22 = vpop.f32.mrf.mxu0  ;;  %5404 = vmatpush1.bf16.msra.mxu0 %v7675_v60  ;;  %v7702_v56 = vld [vmem:[%s10169_s1 + $0xd00] ss:$8 sps:$4 sm:$0xff]  }
 0x1e2   : > { %v3347_v26 = vpop.f32.mrf.mxu1  ;;  %6797 = vmatpush1.bf16.msra.mxu1 %v7675_v60  ;;  %v9657_v12 = vadd.f32 %v3345_v30, %v3233_v13  ;;  %v3235_v19 = vadd.f32 %v3234_v22, %v9384_v55  ;;  %5405 = vmatprep.subr.bf16.mxu0 %v7686_v5  ;;  %v7693_v55 = vld [vmem:[%s10169_s1 + $0xd10] ss:$8 sps:$4 sm:$0xff]  }
 0x1e3   : > { %6790 = vmatprep.subr.bf16.mxu1 %v7686_v5  ;;  %v3236_v25 = vpop.f32.mrf.mxu0  ;;  %v7672_v5 = vld [vmem:[%s8019_s8 + $0x1c8] ss:$36 sps:$4 sm:$0xff]   ;;  %v7683_v22 = vld [vmem:[%s8019_s8 + $0x214] ss:$36 sps:$4 sm:$0xff]  }
 0x1e4   : > { %v3349_v9 = vpop.f32.mrf.mxu1  ;;  %v9665_v20 = vadd.f32 %v3347_v26, %v3235_v19  ;;  %v3237_v33 = vadd.f32 %v3236_v25, %v9399_v54  ;;  %v7704_v54 = vld [vmem:[%s10169_s1 + $0xd04] ss:$8 sps:$4 sm:$0xff]  }
 0x1e5   : > { %v3238_v39 = vpop.f32.mrf.mxu0  ;;  %5406 = vmatpush1.bf16.msra.mxu0 %v7684_v29  ;;  %v7680_v13 = vld [vmem:[%s8019_s8 + $0x20c] ss:$36 sps:$4 sm:$0xff]  }
 0x1e6   : > { %v3351_v46 = vpop.f32.mrf.mxu1  ;;  %6798 = vmatpush1.bf16.msra.mxu1 %v7684_v29  ;;  %v9673_v57 = vadd.f32 %v3349_v9, %v3237_v33  ;;  %v3239_v37 = vadd.f32 %v3238_v39, %v9404_v16  ;;  %5407 = vmatprep.subr.bf16.mxu0 %v7695_v15  ;;  %v7678_v39 = vld [vmem:[%s8019_s8 + $0x208] ss:$36 sps:$4 sm:$0xff]  }
 0x1e7   : > { %6791 = vmatprep.subr.bf16.mxu1 %v7695_v15  ;;  %v3242_v47 = vpop.f32.mrf.mxu0  ;;  %5232 = vmatmul.mubr.bf16.gmra.mxu0 %v7660_v40 }
 0x1e8   : > { %v3355_v14 = vpop.f32.mrf.mxu1  ;;  %5345 = vmatmul.mubr.bf16.gmra.mxu1 %v7663_v27  ;;  %v9679_v2 = vadd.f32 %v3351_v46, %v3239_v37  ;;  %v3243_v23 = vadd.f32 %v3242_v47, %v9419_v63  ;;  %5241 = vmatprep.mubr.bf16.mxu0 %v7671_v62  ;;  %v7681_v46 = vld [vmem:[%s8019_s8 + $0x210] ss:$36 sps:$4 sm:$0xff]   ;;  %v7692_v47 = vld [vmem:[%s8019_s8 + $0x25c] ss:$36 sps:$4 sm:$0xff]  }
 0x1e9   : > { %5354 = vmatprep.mubr.bf16.mxu1 %v7674_v44  ;;  %v3244_v16 = vpop.f32.mrf.mxu0  ;;  %5408 = vmatpush1.bf16.msra.mxu0 %v7693_v55 }
 0x1ea   : > { %v3357_v1 = vpop.f32.mrf.mxu1  ;;  %6799 = vmatpush1.bf16.msra.mxu1 %v7693_v55  ;;  %v9685_v8 = vadd.f32 %v3355_v14, %v3243_v23  ;;  %v3245_v59 = vadd.f32 %v3244_v16, %v9424_v35  ;;  %5409 = vmatprep.subr.bf16.mxu0 %v7704_v54 }
 0x1eb   : > { %6792 = vmatprep.subr.bf16.mxu1 %v7704_v54  ;;  %v3246_v60 = vpop.f32.mrf.mxu0  ;;  %v7689_v54 = vld [vmem:[%s8019_s8 + $0x254] ss:$36 sps:$4 sm:$0xff]  }
 0x1ec   : > { %v3359_v63 = vpop.f32.mrf.mxu1  ;;  %v9690_v61 = vadd.f32 %v3357_v1, %v3245_v59  ;;  %v3247_v30 = vadd.f32 %v3246_v60, %v9439_v38 }
 0x1ed   : > { %v3248_v26 = vpop.f32.mrf.mxu0  ;;  %5410 = vmatpush1.bf16.msra.mxu0 %v7702_v56 }
 0x1ee   : > { %v3361_v29 = vpop.f32.mrf.mxu1  ;;  %6800 = vmatpush1.bf16.msra.mxu1 %v7702_v56  ;;  %v9695_v19 = vadd.f32 %v3359_v63, %v3247_v30  ;;  %v3249_v35 = vadd.f32 %v3248_v26, %v9444_v49  ;;  %v7687_v30 = vld [vmem:[%s8019_s8 + $0x250] ss:$36 sps:$4 sm:$0xff]  }
 0x1ef   : > { %v3252_v15 = vpop.f32.mrf.mxu0  ;;  %5242 = vmatmul.mubr.bf16.gmra.mxu0 %v7669_v58 }
 0x1f0   : > { %v3365_v25 = vpop.f32.mrf.mxu1  ;;  %5355 = vmatmul.mubr.bf16.gmra.mxu1 %v7672_v5  ;;  %v9698_v9 = vadd.f32 %v3361_v29, %v3249_v35  ;;  %v3253_v38 = vadd.f32 %v3252_v15, %v9459_v4  ;;  %5251 = vmatprep.mubr.bf16.mxu0 %v7680_v13  ;;  %v7690_v13 = vld [vmem:[%s8019_s8 + $0x258] ss:$36 sps:$4 sm:$0xff]   ;;  %v7701_v35 = vld [vmem:[%s8019_s8 + $0x2a4] ss:$36 sps:$4 sm:$0xff]  }
 0x1f1   : > { %5364 = vmatprep.mubr.bf16.mxu1 %v7683_v22  ;;  %v3254_v40 = vpop.f32.mrf.mxu0  ;;  %v7698_v29 = vld [vmem:[%s8019_s8 + $0x29c] ss:$36 sps:$4 sm:$0xff]  }
 0x1f2   : > { %v3367_v27 = vpop.f32.mrf.mxu1  ;;  %v9701_v33 = vadd.f32 %v3365_v25, %v3253_v38  ;;  %v3255_v62 = vadd.f32 %v3254_v40, %v9464_v18 }
 0x1f3   : > { %v3256_v49 = vpop.f32.mrf.mxu0 }
 0x1f4   : > { %v3369_v44 = vpop.f32.mrf.mxu1  ;;  %v9706_v55 = vadd.f32 %v3367_v27, %v3255_v62  ;;  %v3257_v37 = vadd.f32 %v3256_v49, %v9479_v34 }
 0x1f5   : > { %v3258_v14 = vpop.f32.mrf.mxu0 }
 0x1f6   : > { %v3371_v4 = vpop.f32.mrf.mxu1  ;;  %v9711_v23 = vadd.f32 %v3369_v44, %v3257_v37  ;;  %v3259_v16 = vadd.f32 %v3258_v14, %v9484_v21 }
 0x1f7   : > { %v3262_v1 = vpop.f32.mrf.mxu0  ;;  %5252 = vmatmul.mubr.bf16.gmra.mxu0 %v7678_v39 }
 0x1f8   : > { %v3375_v18 = vpop.f32.mrf.mxu1  ;;  %5365 = vmatmul.mubr.bf16.gmra.mxu1 %v7681_v46  ;;  %v9714_v56 = vadd.f32 %v3371_v4, %v3259_v16  ;;  %v3263_v34 = vadd.f32 %v3262_v1, %v9499_v32  ;;  %5261 = vmatprep.mubr.bf16.mxu0 %v7689_v54  ;;  %v7699_v54 = vld [vmem:[%s8019_s8 + $0x2a0] ss:$36 sps:$4 sm:$0xff]  }
 0x1f9   : > { %5374 = vmatprep.mubr.bf16.mxu1 %v7692_v47  ;;  %v3264_v59 = vpop.f32.mrf.mxu0 }
 0x1fa   : > { %v3377_v60 = vpop.f32.mrf.mxu1  ;;  %v9717_v63 = vadd.f32 %v3375_v18, %v3263_v34  ;;  %v3265_v58 = vadd.f32 %v3264_v59, %v9504_v3 }
 0x1fb   : > { %v3266_v21 = vpop.f32.mrf.mxu0 }
 0x1fc   : > { %v3379_v5 = vpop.f32.mrf.mxu1  ;;  %v9722_v22 = vadd.f32 %v3377_v60, %v3265_v58  ;;  %v3267_v26 = vadd.f32 %v3266_v21, %v9519_v43 }
 0x1fd   : > { %v3268_v15 = vpop.f32.mrf.mxu0 }
 0x1fe   : > { %v3381_v32 = vpop.f32.mrf.mxu1  ;;  %v9727_v25 = vadd.f32 %v3379_v5, %v3267_v26  ;;  %v3269_v38 = vadd.f32 %v3268_v15, %v9524_v42  ;;  %v7696_v42 = vld [vmem:[%s8019_s8 + $0x298] ss:$36 sps:$4 sm:$0xff]  }
 0x1ff   : > { %v3272_v40 = vpop.f32.mrf.mxu0  ;;  %5262 = vmatmul.mubr.bf16.gmra.mxu0 %v7687_v30  ;;  %v7705_v30 = vld [vmem:[%s8019_s8 + $0xb0] ss:$36 sps:$4 sm:$0xff]  }
 0x200   : > { %v3385_v3 = vpop.f32.mrf.mxu1  ;;  %5375 = vmatmul.mubr.bf16.gmra.mxu1 %v7690_v13  ;;  %v9730_v27 = vadd.f32 %v3381_v32, %v3269_v38  ;;  %v3273_v62 = vadd.f32 %v3272_v40, %v9539_v41  ;;  %5271 = vmatprep.mubr.bf16.mxu0 %v7698_v29  ;;  %v7706_v13 = vld [vmem:[%s8019_s8 + $0x1d0] ss:$36 sps:$4 sm:$0xff]  }
 0x201   : > { %5384 = vmatprep.mubr.bf16.mxu1 %v7701_v35  ;;  %v3274_v43 = vpop.f32.mrf.mxu0 }
 0x202   : > { %v3387_v49 = vpop.f32.mrf.mxu1  ;;  %v9733_v44 = vadd.f32 %v3385_v3, %v3273_v62  ;;  %v3275_v39 = vadd.f32 %v3274_v43, %v9544_v53 }
 0x203   : > { %v3276_v46 = vpop.f32.mrf.mxu0 }
 0x204   : > { %v3389_v37 = vpop.f32.mrf.mxu1  ;;  %v9738_v47 = vadd.f32 %v3387_v49, %v3275_v39  ;;  %v3277_v14 = vadd.f32 %v3276_v46, %v9559_v0  ;;  %v7707_v46 = vld [vmem:[%s8019_s8 + $0xf8] ss:$36 sps:$4 sm:$0xff]  }
 0x205   : > { %v3278_v4 = vpop.f32.mrf.mxu0 }
 0x206   : > { %v3391_v16 = vpop.f32.mrf.mxu1  ;;  %v9741_v1 = vadd.f32 %v3389_v37, %v3277_v14  ;;  %v3279_v41 = vadd.f32 %v3278_v4, %v9564_v31  ;;  %v7708_v37 = vld [vmem:[%s8019_s8 + $0x218] ss:$36 sps:$4 sm:$0xff]  }
 0x207   : > { %v3282_v18 = vpop.f32.mrf.mxu0  ;;  %5272 = vmatmul.mubr.bf16.gmra.mxu0 %v7696_v42 }
 0x208   : > { %v3395_v34 = vpop.f32.mrf.mxu1  ;;  %5385 = vmatmul.mubr.bf16.gmra.mxu1 %v7699_v54  ;;  %v9744_v53 = vadd.f32 %v3391_v16, %v3279_v41  ;;  %v3283_v59 = vadd.f32 %v3282_v18, %v9576_v52  ;;  %5427 = vmatprep.mubr.bf16.mxu0 %v7816_v50 }
 0x209   : > { %5467 = vmatprep.mubr.bf16.mxu1 %v7816_v50  ;;  %v3284_v0 = vpop.f32.mrf.mxu0 }
 0x20a   : > { %v3397_v60 = vpop.f32.mrf.mxu1  ;;  %v9749_v58 = vadd.f32 %v3395_v34, %v3283_v59  ;;  %v3285_v21 = vadd.f32 %v3284_v0, %v9581_v28 }
 0x20b   : > { %v3286_v31 = vpop.f32.mrf.mxu0 }
 0x20c   : > { %v3399_v5 = vpop.f32.mrf.mxu1  ;;  %v9754_v26 = vadd.f32 %v3397_v60, %v3285_v21  ;;  %v3287_v29 = vadd.f32 %v3286_v31, %v9589_v51  ;;  %v7709_v31 = vld [vmem:[%s8019_s8 + $0x140] ss:$36 sps:$4 sm:$0xff]  }
 0x20d   : > { %v3288_v35 = vpop.f32.mrf.mxu0 }
 0x20e   : > { %v3401_v52 = vpop.f32.mrf.mxu1  ;;  %v9757_v15 = vadd.f32 %v3399_v5, %v3287_v29  ;;  %v3289_v32 = vadd.f32 %v3288_v35, %v9595_v48  ;;  %v7710_v5 = vld [vmem:[%s8019_s8 + $0x260] ss:$36 sps:$4 sm:$0xff]  }
 0x20f   : > { %v3438_v38 = vpop.f32.mrf.mxu0  ;;  %5428 = vmatmul.mubr.bf16.vlgmr.msra.gmra.mxu0 %v7705_v30 }
 0x210   : > { %v3551_v40 = vpop.f32.mrf.mxu1  ;;  %5468 = vmatmul.mubr.bf16.vlgmr.msra.gmra.mxu1 %v7706_v13  ;;  %v9760_v28 = vadd.f32 %v3401_v52, %v3289_v32  ;;  %v3439_v3 = vadd.f32 %v3438_v38, %v9604_v10  ;;  %5437 = vmatprep.mubr.bf16.mxu0 %v7816_v50 }
 0x211   : > { %5477 = vmatprep.mubr.bf16.mxu1 %v7816_v50  ;;  %v3440_v51 = vpop.f32.mrf.mxu0 }
 0x212   : > { %v3553_v62 = vpop.f32.mrf.mxu1  ;;  %v9765_v43 = vadd.f32 %v3551_v40, %v3439_v3  ;;  %v3441_v49 = vadd.f32 %v3440_v51, %v9609_v36 }
 0x213   : > { %v3442_v48 = vpop.f32.mrf.mxu0 }
 0x214   : > { %v3555_v39 = vpop.f32.mrf.mxu1  ;;  %v9770_v42 = vadd.f32 %v3553_v62, %v3441_v49  ;;  %v3443_v54 = vadd.f32 %v3442_v48, %v9617_v24  ;;  %v7711_v48 = vld [vmem:[%s8019_s8 + $0x188] ss:$36 sps:$4 sm:$0xff]  }
 0x215   : > { %v3444_v14 = vpop.f32.mrf.mxu0 }
 0x216   : > { %v3557_v10 = vpop.f32.mrf.mxu1  ;;  %v9773_v4 = vadd.f32 %v3555_v39, %v3443_v54  ;;  %v3445_v16 = vadd.f32 %v3444_v14, %v9623_v45  ;;  %v7712_v39 = vld [vmem:[%s8019_s8 + $0x2a8] ss:$36 sps:$4 sm:$0xff]  }
 0x217   : > { %v3448_v41 = vpop.f32.mrf.mxu0  ;;  %5438 = vmatmul.mubr.bf16.gmra.mxu0 %v7707_v46 }
 0x218   : > { %10172 = vst [vmem:[#allocation2_spill] sm:$0xff] %v9773_v4  ;;  %v3561_v18 = vpop.f32.mrf.mxu1  ;;  %5478 = vmatmul.mubr.bf16.gmra.mxu1 %v7708_v37  ;;  %v9776_v36 = vadd.f32 %v3557_v10, %v3445_v16  ;;  %v3449_v34 = vadd.f32 %v3448_v41, %v9629_v6  ;;  %5447 = vmatprep.mubr.bf16.mxu0 %v7816_v50 }
 0x219   : > { %5487 = vmatprep.mubr.bf16.mxu1 %v7816_v50  ;;  %v3450_v24 = vpop.f32.mrf.mxu0 }
 0x21a   : > { %10173 = vst [vmem:[#allocation3_spill] sm:$0xff] %v9776_v36  ;;  %v3563_v59 = vpop.f32.mrf.mxu1  ;;  %v9781_v0 = vadd.f32 %v3561_v18, %v3449_v34  ;;  %v3451_v60 = vadd.f32 %v3450_v24, %v9637_v17  ;;  %v5540_v36 = vld [vmem:[%s10170_s2] sm:$0x3] }
 0x21b   : > { %v3452_v45 = vpop.f32.mrf.mxu0 }
 0x21c   : > { %10174 = vst [vmem:[#allocation4_spill] sm:$0xff] %v9781_v0  ;;  %v3565_v21 = vpop.f32.mrf.mxu1  ;;  %v9786_v30 = vadd.f32 %v3563_v59, %v3451_v60  ;;  %v3453_v13 = vadd.f32 %v3452_v45, %v9645_v11 }
 0x21d   : > { %v3454_v29 = vpop.f32.mrf.mxu0 }
 0x21e   : > { %10175 = vst [vmem:[#allocation5_spill] sm:$0xff] %v9786_v30  ;;  %v3567_v6 = vpop.f32.mrf.mxu1  ;;  %v9789_v35 = vadd.f32 %v3565_v21, %v3453_v13  ;;  %v3455_v52 = vadd.f32 %v3454_v29, %v9651_v7 }
 0x21f   : > { %v3458_v32 = vpop.f32.mrf.mxu0  ;;  %5448 = vmatmul.mubr.bf16.gmra.mxu0 %v7709_v31 }
 0x220   : > { %10176 = vst [vmem:[#allocation6_spill] sm:$0xff] %v9789_v35  ;;  %v3571_v38 = vpop.f32.mrf.mxu1  ;;  %5488 = vmatmul.mubr.bf16.gmra.mxu1 %v7710_v5  ;;  %v9792_v17 = vadd.f32 %v3567_v6, %v3455_v52  ;;  %v3459_v40 = vadd.f32 %v3458_v32, %v9657_v12  ;;  %5457 = vmatprep.mubr.bf16.mxu0 %v7816_v50 }
 0x221   : > { %5497 = vmatprep.mubr.bf16.mxu1 %v7816_v50  ;;  %v3460_v11 = vpop.f32.mrf.mxu0 }
 0x222   : > { %10177 = vst [vmem:[#allocation7_spill] sm:$0xff] %v9792_v17  ;;  %v3573_v3 = vpop.f32.mrf.mxu1  ;;  %v9797_v51 = vadd.f32 %v3571_v38, %v3459_v40  ;;  %v3461_v62 = vadd.f32 %v3460_v11, %v9665_v20 }
 0x223   : > { %v3462_v7 = vpop.f32.mrf.mxu0 }
 0x224   : > { %10178 = vst [vmem:[#allocation8_spill] sm:$0xff] %v9797_v51  ;;  %v3575_v49 = vpop.f32.mrf.mxu1  ;;  %v9802_v46 = vadd.f32 %v3573_v3, %v3461_v62  ;;  %v3463_v37 = vadd.f32 %v3462_v7, %v9673_v57 }
 0x225   : > { %v3464_v54 = vpop.f32.mrf.mxu0 }
 0x226   : > { %10179 = vst [vmem:[#allocation9_spill] sm:$0xff] %v9802_v46  ;;  %v3577_v12 = vpop.f32.mrf.mxu1  ;;  %v9805_v14 = vadd.f32 %v3575_v49, %v3463_v37  ;;  %v3465_v50 = vadd.f32 %v3464_v54, %v9679_v2 }
 0x227   : > { %v3468_v10 = vpop.f32.mrf.mxu0  ;;  %5458 = vmatmul.mubr.bf16.gmra.mxu0 %v7711_v48 }
 0x228   : > { %10180 = vst [vmem:[#allocation10_spill] sm:$0xff] %v9805_v14  ;;  %v3581_v16 = vpop.f32.mrf.mxu1  ;;  %5498 = vmatmul.mubr.bf16.gmra.mxu1 %v7712_v39  ;;  %v9808_v41 = vadd.f32 %v3577_v12, %v3465_v50  ;;  %v3469_v20 = vadd.f32 %v3468_v10, %v9685_v8 }
 0x229   : > { %v3470_v18 = vpop.f32.mrf.mxu0 }
 0x22a   : > { %10181 = vst [vmem:[#allocation11_spill] sm:$0xff] %v9808_v41  ;;  %v3583_v34 = vpop.f32.mrf.mxu1  ;;  %v9811_v24 = vadd.f32 %v3581_v16, %v3469_v20  ;;  %v3471_v57 = vadd.f32 %v3470_v18, %v9690_v61 }
 0x22b   : > { %v3472_v59 = vpop.f32.mrf.mxu0 }
 0x22c   : > { %10182 = vst [vmem:[#allocation12_spill] sm:$0xff] %v9811_v24  ;;  %v3585_v60 = vpop.f32.mrf.mxu1  ;;  %v9814_v45 = vadd.f32 %v3583_v34, %v3471_v57  ;;  %v3473_v2 = vadd.f32 %v3472_v59, %v9695_v19 }
 0x22d   : > { %v3474_v21 = vpop.f32.mrf.mxu0 }
 0x22e   : > { %10183 = vst [vmem:[#allocation13_spill] sm:$0xff] %v9814_v45  ;;  %v3587_v31 = vpop.f32.mrf.mxu1  ;;  %v9817_v5 = vadd.f32 %v3585_v60, %v3473_v2  ;;  %v3475_v13 = vadd.f32 %v3474_v21, %v9698_v9 }
 0x22f   : > { %v3478_v29 = vpop.f32.mrf.mxu0 }
 0x230   : > { %10184 = vst [vmem:[#allocation14_spill] sm:$0xff] %v9817_v5  ;;  %v3591_v8 = vpop.f32.mrf.mxu1  ;;  %v9820_v6 = vadd.f32 %v3587_v31, %v3475_v13  ;;  %v3479_v52 = vadd.f32 %v3478_v29, %v9701_v33 }
 0x231   : > { %v3480_v32 = vpop.f32.mrf.mxu0 }
 0x232   : > { %10185 = vst [vmem:[#allocation15_spill] sm:$0xff] %v9820_v6  ;;  %v3593_v61 = vpop.f32.mrf.mxu1  ;;  %v9823_v38 = vadd.f32 %v3591_v8, %v3479_v52  ;;  %v3481_v40 = vadd.f32 %v3480_v32, %v9706_v55 }
 0x233   : > { %v3482_v11 = vpop.f32.mrf.mxu0 }
 0x234   : > { %v3595_v19 = vpop.f32.mrf.mxu1  ;;  %v9826_v3 = vadd.f32 %v3593_v61, %v3481_v40  ;;  %v3483_v62 = vadd.f32 %v3482_v11, %v9711_v23 }
 0x235   : > { %v3484_v7 = vpop.f32.mrf.mxu0 }
 0x236   : > { %10186 = vst [vmem:[#allocation16_spill] sm:$0xff] %v9826_v3  ;;  %v3597_v9 = vpop.f32.mrf.mxu1  ;;  %v9829_v49 = vadd.f32 %v3595_v19, %v3483_v62  ;;  %v3485_v48 = vadd.f32 %v3484_v7, %v9714_v56 }
 0x237   : > { %v3488_v39 = vpop.f32.mrf.mxu0 }
 0x238   : > { %10187 = vst [vmem:[#allocation17_spill] sm:$0xff] %v9829_v49  ;;  %v3601_v33 = vpop.f32.mrf.mxu1  ;;  %v9832_v37 = vadd.f32 %v3597_v9, %v3485_v48  ;;  %v3489_v54 = vadd.f32 %v3488_v39, %v9717_v63 }
 0x239   : > { %v3490_v12 = vpop.f32.mrf.mxu0 }
 0x23a   : > { %10188 = vst [vmem:[#allocation18_spill] sm:$0xff] %v9832_v37  ;;  %v3603_v55 = vpop.f32.mrf.mxu1  ;;  %v9835_v50 = vadd.f32 %v3601_v33, %v3489_v54  ;;  %v3491_v10 = vadd.f32 %v3490_v12, %v9722_v22 }
 0x23b   : > { %v3492_v16 = vpop.f32.mrf.mxu0 }
 0x23c   : > { %10189 = vst [vmem:[#allocation19_spill] sm:$0xff] %v9835_v50  ;;  %v3605_v23 = vpop.f32.mrf.mxu1  ;;  %v9838_v20 = vadd.f32 %v3603_v55, %v3491_v10  ;;  %v3493_v18 = vadd.f32 %v3492_v16, %v9727_v25 }
 0x23d   : > { %v3494_v34 = vpop.f32.mrf.mxu0 }
 0x23e   : > { %10190 = vst [vmem:[#allocation20_spill] sm:$0xff] %v9838_v20  ;;  %v3607_v56 = vpop.f32.mrf.mxu1  ;;  %v9841_v57 = vadd.f32 %v3605_v23, %v3493_v18  ;;  %v3495_v59 = vadd.f32 %v3494_v34, %v9730_v27 }
 0x23f   : > { %v3498_v60 = vpop.f32.mrf.mxu0 }
 0x240   : > { %10191 = vst [vmem:[#allocation21_spill] sm:$0xff] %v9841_v57  ;;  %v3611_v63 = vpop.f32.mrf.mxu1  ;;  %v9844_v2 = vadd.f32 %v3607_v56, %v3495_v59  ;;  %v3499_v21 = vadd.f32 %v3498_v60, %v9733_v44 }
 0x241   : > { %v3500_v31 = vpop.f32.mrf.mxu0 }
 0x242   : > { %10192 = vst [vmem:[#allocation22_spill] sm:$0xff] %v9844_v2  ;;  %v3613_v22 = vpop.f32.mrf.mxu1  ;;  %v9847_v13 = vadd.f32 %v3611_v63, %v3499_v21  ;;  %v3501_v29 = vadd.f32 %v3500_v31, %v9738_v47 }
 0x243   : > { %v3502_v8 = vpop.f32.mrf.mxu0 }
 0x244   : > { %10193 = vst [vmem:[#allocation23_spill] sm:$0xff] %v9847_v13  ;;  %v3615_v25 = vpop.f32.mrf.mxu1  ;;  %v9850_v52 = vadd.f32 %v3613_v22, %v3501_v29  ;;  %v3503_v32 = vadd.f32 %v3502_v8, %v9741_v1 }
 0x245   : > { %v3504_v61 = vpop.f32.mrf.mxu0 }
 0x246   : > { %10194 = vst [vmem:[#allocation24_spill] sm:$0xff] %v9850_v52  ;;  %v3617_v27 = vpop.f32.mrf.mxu1  ;;  %v9853_v40 = vadd.f32 %v3615_v25, %v3503_v32  ;;  %v3505_v11 = vadd.f32 %v3504_v61, %v9744_v53 }
 0x247   : > { %v3508_v19 = vpop.f32.mrf.mxu0 }
 0x248   : > { %10195 = vst [vmem:[#allocation25_spill] sm:$0xff] %v9853_v40  ;;  %v3621_v44 = vpop.f32.mrf.mxu1  ;;  %v9856_v62 = vadd.f32 %v3617_v27, %v3505_v11  ;;  %v3509_v7 = vadd.f32 %v3508_v19, %v9749_v58 }
 0x249   : > { %v3510_v9 = vpop.f32.mrf.mxu0 }
 0x24a   : > { %10196 = vst [vmem:[#allocation26_spill] sm:$0xff] %v9856_v62  ;;  %v3623_v47 = vpop.f32.mrf.mxu1  ;;  %v9859_v48 = vadd.f32 %v3621_v44, %v3509_v7  ;;  %v3511_v39 = vadd.f32 %v3510_v9, %v9754_v26 }
 0x24b   : > { %v3512_v33 = vpop.f32.mrf.mxu0 }
 0x24c   : > { %10197 = vst [vmem:[#allocation27_spill] sm:$0xff] %v9859_v48  ;;  %v3625_v1 = vpop.f32.mrf.mxu1  ;;  %v9862_v54 = vadd.f32 %v3623_v47, %v3511_v39  ;;  %v3513_v12 = vadd.f32 %v3512_v33, %v9757_v15 }
 0x24d   : > { %v3514_v55 = vpop.f32.mrf.mxu0 }
 0x24e   : > { %10198 = vst [vmem:[#allocation28_spill] sm:$0xff] %v9862_v54  ;;  %v3627_v53 = vpop.f32.mrf.mxu1  ;;  %v9865_v10 = vadd.f32 %v3625_v1, %v3513_v12  ;;  %v3515_v16 = vadd.f32 %v3514_v55, %v9760_v28 }
 0x24f   : > { %v4977_v23 = vpop.f32.mrf.mxu0 }
 0x250   : > { %10199 = vst [vmem:[#allocation29_spill] sm:$0xff] %v9865_v10  ;;  %v5090_v58 = vpop.f32.mrf.mxu1  ;;  %v9868_v18 = vadd.f32 %v3627_v53, %v3515_v16 }
 0x251   : > { %v9870_v34 = vadd.f32 %v5090_v58, %v4977_v23  ;;  %v4979_v56 = vpop.f32.mrf.mxu0 }
 0x252   : > { %10200 = vst [vmem:[#allocation30_spill] sm:$0xff] %v9868_v18  ;;  %v5092_v26 = vpop.f32.mrf.mxu1 }
 0x253   : > { %v9872_v59 = vadd.f32 %v5092_v26, %v4979_v56  ;;  %v4981_v60 = vpop.f32.mrf.mxu0 }
 0x254   : > { %v5094_v63 = vpop.f32.mrf.mxu1 }
 0x255   : > { %v9874_v21 = vadd.f32 %v5094_v63, %v4981_v60  ;;  %v4983_v15 = vpop.f32.mrf.mxu0 }
 0x256   : > { %v5096_v31 = vpop.f32.mrf.mxu1 }
 0x257   : > { %v9876_v22 = vadd.f32 %v5096_v31, %v4983_v15  ;;  %v4987_v29 = vpop.f32.mrf.mxu0 }
 0x258   : > { %v5100_v28 = vpop.f32.mrf.mxu1 }
 0x259   : > { %v9878_v8 = vadd.f32 %v5100_v28, %v4987_v29  ;;  %v4989_v25 = vpop.f32.mrf.mxu0 }
 0x25a   : > { %v5102_v32 = vpop.f32.mrf.mxu1 }
 0x25b   : > { %v9880_v61 = vadd.f32 %v5102_v32, %v4989_v25  ;;  %v4991_v27 = vpop.f32.mrf.mxu0 }
 0x25c   : > { %v5104_v11 = vpop.f32.mrf.mxu1 }
 0x25d   : > { %v9882_v19 = vadd.f32 %v5104_v11, %v4991_v27  ;;  %v4993_v44 = vpop.f32.mrf.mxu0 }
 0x25e   : > { %v5106_v7 = vpop.f32.mrf.mxu1 }
 0x25f   : > { %v9884_v9 = vadd.f32 %v5106_v7, %v4993_v44  ;;  %v4997_v47 = vpop.f32.mrf.mxu0 }
 0x260   : > { %v5110_v39 = vpop.f32.mrf.mxu1 }
 0x261   : > { %v9886_v33 = vadd.f32 %v5110_v39, %v4997_v47  ;;  %v4999_v1 = vpop.f32.mrf.mxu0 }
 0x262   : > { %v5112_v12 = vpop.f32.mrf.mxu1 }
 0x263   : > { %v9888_v55 = vadd.f32 %v5112_v12, %v4999_v1  ;;  %v5001_v53 = vpop.f32.mrf.mxu0 }
 0x264   : > { %v5114_v16 = vpop.f32.mrf.mxu1 }
 0x265   : > { %v9890_v23 = vadd.f32 %v5114_v16, %v5001_v53  ;;  %v5003_v58 = vpop.f32.mrf.mxu0 }
 0x266   : > { %v5116_v56 = vpop.f32.mrf.mxu1 }
 0x267   : > { %v9892_v26 = vadd.f32 %v5116_v56, %v5003_v58  ;;  %v5007_v60 = vpop.f32.mrf.mxu0 }
 0x268   : > { %v5120_v63 = vpop.f32.mrf.mxu1 }
 0x269   : > { %v9894_v15 = vadd.f32 %v5120_v63, %v5007_v60  ;;  %v5009_v31 = vpop.f32.mrf.mxu0 }
 0x26a   : > { %v5122_v29 = vpop.f32.mrf.mxu1 }
 0x26b   : > { %v9896_v28 = vadd.f32 %v5122_v29, %v5009_v31  ;;  %v5011_v25 = vpop.f32.mrf.mxu0 }
 0x26c   : > { %v5124_v32 = vpop.f32.mrf.mxu1 }
 0x26d   : > { %v9898_v27 = vadd.f32 %v5124_v32, %v5011_v25  ;;  %v5013_v11 = vpop.f32.mrf.mxu0 }
 0x26e   : > { %v5126_v44 = vpop.f32.mrf.mxu1 }
 0x26f   : > { %v9900_v7 = vadd.f32 %v5126_v44, %v5013_v11  ;;  %v5017_v47 = vpop.f32.mrf.mxu0 }
 0x270   : > { %v5130_v39 = vpop.f32.mrf.mxu1 }
 0x271   : > { %v9902_v1 = vadd.f32 %v5130_v39, %v5017_v47  ;;  %v5019_v12 = vpop.f32.mrf.mxu0 }
 0x272   : > { %v5132_v53 = vpop.f32.mrf.mxu1 }
 0x273   : > { %v9904_v16 = vadd.f32 %v5132_v53, %v5019_v12  ;;  %v5021_v58 = vpop.f32.mrf.mxu0 }
 0x274   : > { %v5134_v56 = vpop.f32.mrf.mxu1 }
 0x275   : > { %v9906_v60 = vadd.f32 %v5134_v56, %v5021_v58  ;;  %v5023_v63 = vpop.f32.mrf.mxu0 }
 0x276   : > { %v5136_v31 = vpop.f32.mrf.mxu1 }
 0x277   : > { %v9908_v29 = vadd.f32 %v5136_v31, %v5023_v63  ;;  %v5027_v25 = vpop.f32.mrf.mxu0 }
 0x278   : > { %v5140_v32 = vpop.f32.mrf.mxu1 }
 0x279   : > { %v9910_v11 = vadd.f32 %v5140_v32, %v5027_v25  ;;  %v5029_v44 = vpop.f32.mrf.mxu0 }
 0x27a   : > { %v5142_v18 = vpop.f32.mrf.mxu1 }
 0x27b   : > { %v9912_v47 = vadd.f32 %v5142_v18, %v5029_v44  ;;  %v5031_v39 = vpop.f32.mrf.mxu0 }
 0x27c   : > { %v5144_v6 = vpop.f32.mrf.mxu1 }
 0x27d   : > { %v9914_v12 = vadd.f32 %v5144_v6, %v5031_v39  ;;  %v5033_v53 = vpop.f32.mrf.mxu0 }
 0x27e   : > { %v5146_v10 = vpop.f32.mrf.mxu1 }
 0x27f   : > { %v9916_v58 = vadd.f32 %v5146_v10, %v5033_v53  ;;  %v5037_v56 = vpop.f32.mrf.mxu0 }
 0x280   : > { %v5150_v5 = vpop.f32.mrf.mxu1 }
 0x281   : > { %v9918_v63 = vadd.f32 %v5150_v5, %v5037_v56  ;;  %v5039_v31 = vpop.f32.mrf.mxu0 }
 0x282   : > { %v5152_v54 = vpop.f32.mrf.mxu1 }
 0x283   : > { %v9920_v25 = vadd.f32 %v5152_v54, %v5039_v31  ;;  %v5041_v32 = vpop.f32.mrf.mxu0 }
 0x284   : > { %v5154_v45 = vpop.f32.mrf.mxu1 }
 0x285   : > { %v9922_v18 = vadd.f32 %v5154_v45, %v5041_v32  ;;  %v5043_v44 = vpop.f32.mrf.mxu0 }
 0x286   : > { %v5156_v48 = vpop.f32.mrf.mxu1 }
 0x287   : > { %v9924_v6 = vadd.f32 %v5156_v48, %v5043_v44  ;;  %v5047_v39 = vpop.f32.mrf.mxu0 }
 0x288   : > { %v5160_v24 = vpop.f32.mrf.mxu1 }
 0x289   : > { %v9926_v10 = vadd.f32 %v5160_v24, %v5047_v39  ;;  %v5049_v53 = vpop.f32.mrf.mxu0 }
 0x28a   : > { %v5162_v62 = vpop.f32.mrf.mxu1 }
 0x28b   : > { %v9928_v5 = vadd.f32 %v5162_v62, %v5049_v53  ;;  %v5051_v56 = vpop.f32.mrf.mxu0 }
 0x28c   : > { %v5164_v41 = vpop.f32.mrf.mxu1 }
 0x28d   : > { %v9930_v54 = vadd.f32 %v5164_v41, %v5051_v56  ;;  %v5053_v31 = vpop.f32.mrf.mxu0 }
 0x28e   : > { %v5166_v40 = vpop.f32.mrf.mxu1 }
 0x28f   : > { %v9932_v45 = vadd.f32 %v5166_v40, %v5053_v31  ;;  %v5203_v32 = vpop.f32.mrf.mxu0 }
 0x290   : > { %v5316_v14 = vpop.f32.mrf.mxu1  ;;  %v5204_v48 = vadd.f32 %v5203_v32, %v9870_v34 }
 0x291   : > { %10201 = vst [vmem:[#allocation31_spill] sm:$0xff] %v9932_v45  ;;  %v9935_v44 = vpop.f32.mrf.mxu0 }
 0x292   : > { %v9937_v24 = vpop.f32.mrf.mxu1  ;;  %v9939_v39 = vadd.f32 %v5316_v14, %v5204_v48  ;;  %v5206_v0 = vadd.f32 %v9935_v44, %v9872_v59 }
 0x293   : > { %v5207_v62 = vpop.f32.mrf.mxu0 }
 0x294   : > { %v5320_v53 = vpop.f32.mrf.mxu1  ;;  %v5208_v52 = vadd.f32 %v5207_v62, %v9874_v21 }
 0x295   : > { %v9942_v41 = vpop.f32.mrf.mxu0 }
 0x296   : > { %v9944_v56 = vpop.f32.mrf.mxu1  ;;  %v9946_v40 = vadd.f32 %v5320_v53, %v5208_v52  ;;  %v5210_v37 = vadd.f32 %v9942_v41, %v9876_v22  ;;  %v5319_v41 = vadd.f32 %v9937_v24, %v5206_v0 }
 0x297   : > { %v5213_v31 = vpop.f32.mrf.mxu0 }
 0x298   : > { %10202 = vst [vmem:[#allocation32_spill] sm:$0xff] %v9946_v40  ;;  %v5326_v46 = vpop.f32.mrf.mxu1  ;;  %v5214_v34 = vadd.f32 %v5213_v31, %v9878_v8 }
 0x299   : > { %v5215_v32 = vpop.f32.mrf.mxu0 }
 0x29a   : > { %v5328_v13 = vpop.f32.mrf.mxu1  ;;  %v9949_v51 = vadd.f32 %v5326_v46, %v5214_v34  ;;  %v5216_v14 = vadd.f32 %v5215_v32, %v9880_v61 }
 0x29b   : > { %v5217_v48 = vpop.f32.mrf.mxu0 }
 0x29c   : > { %10203 = vst [vmem:[#allocation33_spill] sm:$0xff] %v9949_v51  ;;  %v5330_v2 = vpop.f32.mrf.mxu1  ;;  %v9952_v17 = vadd.f32 %v5328_v13, %v5216_v14  ;;  %v5218_v21 = vadd.f32 %v5217_v48, %v9882_v19 }
 0x29d   : > { %v5219_v62 = vpop.f32.mrf.mxu0 }
 0x29e   : > { %10204 = vst [vmem:[#allocation34_spill] sm:$0xff] %v9952_v17  ;;  %v5332_v57 = vpop.f32.mrf.mxu1  ;;  %v9955_v52 = vadd.f32 %v5330_v2, %v5218_v21  ;;  %v5220_v53 = vadd.f32 %v5219_v62, %v9884_v9 }
 0x29f   : > { %v5223_v35 = vpop.f32.mrf.mxu0 }
 0x2a0   : > { %10205 = vst [vmem:[#allocation35_spill] sm:$0xff] %v9955_v52  ;;  %v5336_v8 = vpop.f32.mrf.mxu1  ;;  %v9958_v31 = vadd.f32 %v5332_v57, %v5220_v53  ;;  %v5224_v46 = vadd.f32 %v5223_v35, %v9886_v33 }
 0x2a1   : > { %v5225_v34 = vpop.f32.mrf.mxu0 }
 0x2a2   : > { %10206 = vst [vmem:[#allocation36_spill] sm:$0xff] %v9958_v31  ;;  %v5338_v61 = vpop.f32.mrf.mxu1  ;;  %v9961_v32 = vadd.f32 %v5336_v8, %v5224_v46  ;;  %v5226_v13 = vadd.f32 %v5225_v34, %v9888_v55 }
 0x2a3   : > { %v5227_v14 = vpop.f32.mrf.mxu0 }
 0x2a4   : > { %10207 = vst [vmem:[#allocation37_spill] sm:$0xff] %v9961_v32  ;;  %v5340_v19 = vpop.f32.mrf.mxu1  ;;  %v9964_v48 = vadd.f32 %v5338_v61, %v5226_v13  ;;  %v5228_v2 = vadd.f32 %v5227_v14, %v9890_v23 }
 0x2a5   : > { %v5229_v21 = vpop.f32.mrf.mxu0 }
 0x2a6   : > { %10208 = vst [vmem:[#allocation38_spill] sm:$0xff] %v9964_v48  ;;  %v5342_v9 = vpop.f32.mrf.mxu1  ;;  %v9967_v62 = vadd.f32 %v5340_v19, %v5228_v2  ;;  %v5230_v57 = vadd.f32 %v5229_v21, %v9892_v26 }
 0x2a7   : > { %v5233_v53 = vpop.f32.mrf.mxu0 }
 0x2a8   : > { %10209 = vst [vmem:[#allocation39_spill] sm:$0xff] %v9967_v62  ;;  %v5346_v35 = vpop.f32.mrf.mxu1  ;;  %v9970_v33 = vadd.f32 %v5342_v9, %v5230_v57  ;;  %v5234_v8 = vadd.f32 %v5233_v53, %v9894_v15 }
 0x2a9   : > { %v5235_v46 = vpop.f32.mrf.mxu0 }
 0x2aa   : > { %10210 = vst [vmem:[#allocation40_spill] sm:$0xff] %v9970_v33  ;;  %v5348_v55 = vpop.f32.mrf.mxu1  ;;  %v9973_v34 = vadd.f32 %v5346_v35, %v5234_v8  ;;  %v5236_v61 = vadd.f32 %v5235_v46, %v9896_v28 }
 0x2ab   : > { %v5237_v13 = vpop.f32.mrf.mxu0 }
 0x2ac   : > { %10211 = vst [vmem:[#allocation41_spill] sm:$0xff] %v9973_v34  ;;  %v5350_v23 = vpop.f32.mrf.mxu1  ;;  %v9976_v14 = vadd.f32 %v5348_v55, %v5236_v61  ;;  %v5238_v19 = vadd.f32 %v5237_v13, %v9898_v27 }
 0x2ad   : > { %v5239_v2 = vpop.f32.mrf.mxu0 }
 0x2ae   : > { %10212 = vst [vmem:[#allocation42_spill] sm:$0xff] %v9976_v14  ;;  %v5352_v26 = vpop.f32.mrf.mxu1  ;;  %v9979_v21 = vadd.f32 %v5350_v23, %v5238_v19  ;;  %v5240_v9 = vadd.f32 %v5239_v2, %v9900_v7  ;;  %v5542_v2 = vlaneseq }
 0x2af   : > { %v5243_v57 = vpop.f32.mrf.mxu0 }
 0x2b0   : > { %10213 = vst [vmem:[#allocation43_spill] sm:$0xff] %v9979_v21  ;;  %v5356_v15 = vpop.f32.mrf.mxu1  ;;  %v9982_v53 = vadd.f32 %v5352_v26, %v5240_v9  ;;  %v5543_v32 = vshrl.u32 %v5542_v2, 7  ;;  %v5244_v51 = vadd.f32 %v5243_v57, %v9902_v1  ;;  %v5323_v1 = vadd.f32 %v9944_v56, %v5210_v37 }
 0x2b1   : > { %v5245_v35 = vpop.f32.mrf.mxu0 }
 0x2b2   : > { %10214 = vst [vmem:[#allocation44_spill] sm:$0xff] %v9982_v53  ;;  %v5358_v8 = vpop.f32.mrf.mxu1  ;;  %v5544_v17 = vsub.s32 0, %v5543_v32  ;;  %v5548_v50 = vsub.s32 1, %v5543_v32  ;;  %v5246_v4 = vadd.f32 %v5245_v35, %v9904_v16  ;;  %v5357_v35 = vadd.f32 %v5356_v15, %v5244_v51 }
 0x2b3   : > { %v5247_v34 = vpop.f32.mrf.mxu0 }
 0x2b4   : > { %v5360_v28 = vpop.f32.mrf.mxu1  ;;  %v5248_v40 = vadd.f32 %v5247_v34, %v9906_v60  ;;  %v9996_v3 = vrot.slane %v5540_v36, %v5544_v17  ;;  %v9998_v22 = vrot.slane %v5540_v36, %v5548_v50  ;;  %v5359_v36 = vadd.f32 %v5358_v8, %v5246_v4 }
 0x2b5   : > { %v5249_v46 = vpop.f32.mrf.mxu0 }
 0x2b6   : > { %v5362_v33 = vpop.f32.mrf.mxu1  ;;  %v5250_v32 = vadd.f32 %v5249_v46, %v9908_v29  ;;  %v5361_v0 = vadd.f32 %v5360_v28, %v5248_v40  ;;  %v10215_v28 = vld [vmem:[#allocation16_spill] sm:$0xff] }
 0x2b7   : > { %v5253_v55 = vpop.f32.mrf.mxu0 }
 0x2b8   : > { %v5366_v61 = vpop.f32.mrf.mxu1  ;;  %v5254_v45 = vadd.f32 %v5253_v55, %v9910_v11  ;;  %v5363_v50 = vadd.f32 %v5362_v33, %v5250_v32  ;;  %v10217_v55 = vld [vmem:[#allocation32_spill] sm:$0xff]  ;;  %v10219_v32 = vld [vmem:[#allocation17_spill] sm:$0xff] }
 0x2b9   : > { %v5255_v14 = vpop.f32.mrf.mxu0 }
 0x2ba   : > { %v5368_v27 = vpop.f32.mrf.mxu1  ;;  %v5256_v57 = vadd.f32 %v5255_v14, %v9912_v47  ;;  %v5367_v37 = vadd.f32 %v5366_v61, %v5254_v45 }
 0x2bb   : > { %v5257_v13 = vpop.f32.mrf.mxu0 }
 0x2bc   : > { %v5370_v62 = vpop.f32.mrf.mxu1  ;;  %v5258_v16 = vadd.f32 %v5257_v13, %v9914_v12 }
 0x2bd   : > { %v5259_v23 = vpop.f32.mrf.mxu0 }
 0x2be   : > { %v5372_v19 = vpop.f32.mrf.mxu1  ;;  %v5260_v60 = vadd.f32 %v5259_v23, %v9916_v58  ;;  %v10015_v56 = vadd.f32 %v5370_v62, %v5258_v16 }
 0x2bf   : > { %v5263_v21 = vpop.f32.mrf.mxu0 }
 0x2c0   : > { %v5376_v7 = vpop.f32.mrf.mxu1  ;;  %v5264_v29 = vadd.f32 %v5263_v21, %v9918_v63  ;;  %v10020_v45 = vadd.f32 %v5372_v19, %v5260_v60 }
 0x2c1   : > { %v5265_v48 = vpop.f32.mrf.mxu0 }
 0x2c2   : > { %v5378_v26 = vpop.f32.mrf.mxu1  ;;  %v5266_v11 = vadd.f32 %v5265_v48, %v9920_v25  ;;  %v10013_v25 = vadd.f32 %v5368_v27, %v5256_v57 }
 0x2c3   : > { %v5267_v9 = vpop.f32.mrf.mxu0 }
 0x2c4   : > { %v5380_v53 = vpop.f32.mrf.mxu1  ;;  %v5268_v47 = vadd.f32 %v5267_v9, %v9922_v18  ;;  %v10022_v18 = vadd.f32 %v5376_v7, %v5264_v29  ;;  %v10220_v29 = vld [vmem:[#allocation33_spill] sm:$0xff] }
 0x2c5   : > { %v5269_v31 = vpop.f32.mrf.mxu0 }
 0x2c6   : > { %v5382_v20 = vpop.f32.mrf.mxu1  ;;  %v5270_v12 = vadd.f32 %v5269_v31, %v9924_v6  ;;  %v10024_v6 = vadd.f32 %v5378_v26, %v5266_v11 }
 0x2c7   : > { %v5273_v30 = vpop.f32.mrf.mxu0 }
 0x2c8   : > { %v5386_v52 = vpop.f32.mrf.mxu1  ;;  %v5274_v51 = vadd.f32 %v5273_v30, %v9926_v10  ;;  %v10031_v33 = vadd.f32 %v5382_v20, %v5270_v12  ;;  %v10216_v20 = vld [vmem:[#allocation31_spill] sm:$0xff] }
 0x2c9   : > { %v5275_v49 = vpop.f32.mrf.mxu0 }
 0x2ca   : > { %v5388_v2 = vpop.f32.mrf.mxu1  ;;  %v5276_v58 = vadd.f32 %v5275_v49, %v9928_v5  ;;  %v10033_v14 = vadd.f32 %v5386_v52, %v5274_v51 }
 0x2cb   : > { %v5277_v59 = vpop.f32.mrf.mxu0 }
 0x2cc   : > { %v5390_v44 = vpop.f32.mrf.mxu1  ;;  %v5278_v30 = vadd.f32 %v5277_v59, %v9930_v54  ;;  %v10035_v21 = vadd.f32 %v5388_v2, %v5276_v58 }
 0x2cd   : > { %v5279_v34 = vpop.f32.mrf.mxu0 }
 0x2ce   : > { %v10007_v17 = vpop.f32.mrf.mxu1  ;;  %v10043_v46 = vadd.f32 %v5390_v44, %v5278_v30  ;;  %v10046_v52 = vadd.f32 %v5279_v34, %v10216_v20  ;;  %v10226_v20 = vld [vmem:[#allocation35_spill] sm:$0xff] }
 0x2cf   : > { %v5429_v63 = vpop.f32.mrf.mxu0 }
 0x2d0   : > { %v5469_v24 = vpop.f32.mrf.mxu1  ;;  %v5430_v48 = vadd.f32 %v5429_v63, %v9939_v39  ;;  %v10029_v39 = vadd.f32 %v5380_v53, %v5268_v47  ;;  %v10221_v47 = vld [vmem:[#allocation3_spill] sm:$0xff] }
 0x2d1   : > { %v5470_v4 = vadd.f32 %v5469_v24, %v5357_v35  ;;  %v5431_v49 = vpop.f32.mrf.mxu0 }
 0x2d2   : > { %v5471_v10 = vpop.f32.mrf.mxu1  ;;  %v5508_v5 = vadd.f32 %v5430_v48, %v9765_v43  ;;  %v5432_v31 = vadd.f32 %v5431_v49, %v5319_v41 }
 0x2d3   : > { %v5524_v40 = vadd.f32 %v5470_v4, %v9823_v38  ;;  %v5472_v62 = vadd.f32 %v5471_v10, %v5359_v36  ;;  %v5433_v54 = vpop.f32.mrf.mxu0  ;;  %v10224_v4 = vld [vmem:[#allocation19_spill] sm:$0xff] }
 0x2d4   : > { %v5473_v15 = vpop.f32.mrf.mxu1  ;;  %v5552_v8 = vadd.f32 %v9996_v3, %v5508_v5  ;;  %v5509_v38 = vadd.f32 %v5432_v31, %v9770_v42  ;;  %v5434_v61 = vadd.f32 %v5433_v54, %v10217_v55  ;;  %v10218_v42 = vld [vmem:[#allocation2_spill] sm:$0xff] }
 0x2d5   : > { %v5568_v43 = vadd.f32 %v9996_v3, %v5524_v40  ;;  %v5525_v53 = vadd.f32 %v5472_v62, %v10215_v28  ;;  %v5474_v27 = vadd.f32 %v5473_v15, %v5361_v0  ;;  %v5435_v13 = vpop.f32.mrf.mxu0 }
 0x2d6   : > { %v5475_v23 = vpop.f32.mrf.mxu1  ;;  %v5584_v19 = vmax.f32 %v5552_v8, 0.0  ;;  %v5553_v26 = vadd.f32 %v9998_v22, %v5509_v38  ;;  %v5510_v2 = vadd.f32 %v5434_v61, %v10218_v42  ;;  %v5436_v44 = vadd.f32 %v5435_v13, %v5323_v1  ;;  %v10225_v8 = vld [vmem:[#allocation34_spill] sm:$0xff] }
 0x2d7   : > { %v5600_v7 = vmax.f32 %v5568_v43, 0.0  ;;  %v5569_v9 = vadd.f32 %v9998_v22, %v5525_v53  ;;  %v5526_v59 = vadd.f32 %v5474_v27, %v10219_v32  ;;  %v5476_v41 = vadd.f32 %v5475_v23, %v5363_v50  ;;  %v5439_v57 = vpop.f32.mrf.mxu0  ;;  %v10222_v50 = vld [vmem:[#allocation18_spill] sm:$0xff] }
 0x2d8   : > { %v5479_v16 = vpop.f32.mrf.mxu1  ;;  %v5585_v35 = vmax.f32 %v5553_v26, 0.0  ;;  %v5440_v11 = vadd.f32 %v5439_v57, %v10220_v29  ;;  %v5554_v36 = vadd.f32 %v9996_v3, %v5510_v2  ;;  %v5511_v1 = vadd.f32 %v5436_v44, %v10221_v47  ;;  %v10230_v44 = vld [vmem:[#allocation21_spill] sm:$0xff] }
 0x2d9   : > { %v5601_v60 = vmax.f32 %v5569_v9, 0.0  ;;  %v5480_v34 = vadd.f32 %v5479_v16, %v5367_v37  ;;  %v5570_v0 = vadd.f32 %v9996_v3, %v5526_v59  ;;  %v5527_v12 = vadd.f32 %v5476_v41, %v10222_v50  ;;  %v5441_v51 = vpop.f32.mrf.mxu0  ;;  %v10223_v37 = vld [vmem:[#allocation4_spill] sm:$0xff]  ;;  %v10229_v59 = vld [vmem:[#allocation6_spill] sm:$0xff] }
 0x2da   : > { %v5481_v58 = vpop.f32.mrf.mxu1  ;;  %v6769_v63 = vpack.c.bf16 %v5585_v35, %v5584_v19  ;;  %v5512_v48 = vadd.f32 %v5440_v11, %v10223_v37  ;;  %v5586_v49 = vmax.f32 %v5554_v36, 0.0  ;;  %v5555_v5 = vadd.f32 %v9998_v22, %v5511_v1  ;;  %v10228_v9 = vld [vmem:[#allocation20_spill] sm:$0xff]  ;;  %v10234_v37 = vld [vmem:[#allocation22_spill] sm:$0xff] }
 0x2db   : > { %v6777_v24 = vpack.c.bf16 %v5601_v60, %v5600_v7  ;;  %v5528_v30 = vadd.f32 %v5480_v34, %v10224_v4  ;;  %v5602_v10 = vmax.f32 %v5570_v0, 0.0  ;;  %v5571_v40 = vadd.f32 %v9998_v22, %v5527_v12  ;;  %v5443_v31 = vpop.f32.mrf.mxu0  ;;  %v10227_v7 = vld [vmem:[#allocation5_spill] sm:$0xff]  ;;  %v10231_v60 = vld [vmem:[#allocation36_spill] sm:$0xff] }
 0x2dc   : > { %v5483_v62 = vpop.f32.mrf.mxu1  ;;  %5712 = vst [vmem:[%s10058_s9] sm:$0xff] %v6769_v63  ;;  %v5556_v54 = vadd.f32 %v9996_v3, %v5512_v48  ;;  %v5442_v43 = vadd.f32 %v5441_v51, %v10225_v8  ;;  %v5482_v38 = vadd.f32 %v5481_v58, %v10013_v25  ;;  %v5587_v28 = vmax.f32 %v5555_v5, 0.0  ;;  %v10232_v0 = vld [vmem:[#allocation37_spill] sm:$0xff]  ;;  %v10233_v63 = vld [vmem:[#allocation7_spill] sm:$0xff] }
 0x2dd   : > { %5720 = vst [vmem:[%s10058_s9 + $0x40] sm:$0xff] %v6777_v24  ;;  %v5572_v15 = vadd.f32 %v9996_v3, %v5528_v30  ;;  %v5603_v53 = vmax.f32 %v5571_v40, 0.0  ;;  %v5444_v55 = vadd.f32 %v5443_v31, %v10226_v20  ;;  %v5484_v61 = vadd.f32 %v5483_v62, %v10015_v56  ;;  %v5445_v27 = vpop.f32.mrf.mxu0  ;;  %v10235_v30 = vld [vmem:[#allocation8_spill] sm:$0xff] }
 0x2de   : > { %v5485_v13 = vpop.f32.mrf.mxu1  ;;  %v5588_v23 = vmax.f32 %v5556_v54, 0.0  ;;  %v5513_v26 = vadd.f32 %v5442_v43, %v10227_v7  ;;  %v5529_v42 = vadd.f32 %v5482_v38, %v10228_v9  ;;  %v6770_v2 = vpack.c.bf16 %v5587_v28, %v5586_v49  ;;  %v10237_v38 = vld [vmem:[#allocation38_spill] sm:$0xff]  ;;  %v10239_v9 = vld [vmem:[#allocation9_spill] sm:$0xff] }
 0x2df   : > { %v5604_v19 = vmax.f32 %v5572_v15, 0.0  ;;  %v6778_v32 = vpack.c.bf16 %v5603_v53, %v5602_v10  ;;  %v5514_v25 = vadd.f32 %v5444_v55, %v10229_v59  ;;  %v5530_v41 = vadd.f32 %v5484_v61, %v10230_v44  ;;  %v5449_v57 = vpop.f32.mrf.mxu0  ;;  %v10236_v10 = vld [vmem:[#allocation23_spill] sm:$0xff] }
 0x2e0   : > { %v5489_v16 = vpop.f32.mrf.mxu1  ;;  %v5557_v56 = vadd.f32 %v9998_v22, %v5513_v26  ;;  %v5573_v35 = vadd.f32 %v9998_v22, %v5529_v42  ;;  %v5446_v29 = vadd.f32 %v5445_v27, %v10231_v60  ;;  %v5486_v11 = vadd.f32 %v5485_v13, %v10020_v45  ;;  %5713 = vst [vmem:[%s10058_s9 + $0x8] sm:$0xff] %v6770_v2  ;;  %v10238_v13 = vld [vmem:[#allocation39_spill] sm:$0xff]  ;;  %v10240_v2 = vld [vmem:[#allocation24_spill] sm:$0xff] }
 0x2e1   : > { %5721 = vst [vmem:[%s10058_s9 + $0x48] sm:$0xff] %v6778_v32  ;;  %v5558_v34 = vadd.f32 %v9996_v3, %v5514_v25  ;;  %v5574_v36 = vadd.f32 %v9996_v3, %v5530_v41  ;;  %v5450_v47 = vadd.f32 %v5449_v57, %v10232_v0  ;;  %v5490_v1 = vadd.f32 %v5489_v16, %v10022_v18  ;;  %v5451_v50 = vpop.f32.mrf.mxu0  ;;  %v10241_v41 = vld [vmem:[#allocation10_spill] sm:$0xff]  ;;  %v10242_v16 = vld [vmem:[#allocation25_spill] sm:$0xff]  ;;  %v10243_v60 = vld [vmem:[#allocation40_spill] sm:$0xff] }
 0x2e2   : > { %v5491_v12 = vpop.f32.mrf.mxu1  ;;  %v5589_v51 = vmax.f32 %v5557_v56, 0.0  ;;  %v5605_v58 = vmax.f32 %v5573_v35, 0.0  ;;  %v5515_v24 = vadd.f32 %v5446_v29, %v10233_v63  ;;  %v5531_v48 = vadd.f32 %v5486_v11, %v10234_v37  ;;  %v10245_v63 = vld [vmem:[#allocation11_spill] sm:$0xff]  ;;  %v10246_v37 = vld [vmem:[#allocation26_spill] sm:$0xff] }
 0x2e3   : > { %v5590_v4 = vmax.f32 %v5558_v34, 0.0  ;;  %v5606_v45 = vmax.f32 %v5574_v36, 0.0  ;;  %v5516_v49 = vadd.f32 %v5450_v47, %v10235_v30  ;;  %v5532_v5 = vadd.f32 %v5490_v1, %v10236_v10  ;;  %v5453_v40 = vpop.f32.mrf.mxu0  ;;  %v10244_v1 = vld [vmem:[#allocation41_spill] sm:$0xff] }
 0x2e4   : > { %v5493_v31 = vpop.f32.mrf.mxu1  ;;  %v6771_v62 = vpack.c.bf16 %v5589_v51, %v5588_v23  ;;  %v6779_v18 = vpack.c.bf16 %v5605_v58, %v5604_v19  ;;  %v5559_v54 = vadd.f32 %v9998_v22, %v5515_v24  ;;  %v5575_v15 = vadd.f32 %v9998_v22, %v5531_v48 }
 0x2e5   : > { %v5560_v8 = vadd.f32 %v9996_v3, %v5516_v49  ;;  %v5576_v43 = vadd.f32 %v9996_v3, %v5532_v5  ;;  %v5452_v28 = vadd.f32 %v5451_v50, %v10237_v38  ;;  %v5492_v53 = vadd.f32 %v5491_v12, %v10024_v6  ;;  %v5455_v20 = vpop.f32.mrf.mxu0  ;;  %v10247_v49 = vld [vmem:[#allocation12_spill] sm:$0xff]  ;;  %v10248_v5 = vld [vmem:[#allocation27_spill] sm:$0xff] }
 0x2e6   : > { %v5495_v55 = vpop.f32.mrf.mxu1  ;;  %5714 = vst [vmem:[%s10058_s9 + $0x10] sm:$0xff] %v6771_v62  ;;  %5722 = vst [vmem:[%s10058_s9 + $0x50] sm:$0xff] %v6779_v18  ;;  %v5591_v61 = vmax.f32 %v5559_v54, 0.0  ;;  %v5607_v27 = vmax.f32 %v5575_v15, 0.0  ;;  %v5454_v23 = vadd.f32 %v5453_v40, %v10238_v13  ;;  %v5494_v19 = vadd.f32 %v5493_v31, %v10029_v39 }
 0x2e7   : > { %v5592_v7 = vmax.f32 %v5560_v8, 0.0  ;;  %v5608_v26 = vmax.f32 %v5576_v43, 0.0  ;;  %v5517_v42 = vadd.f32 %v5452_v28, %v10239_v9  ;;  %v5533_v32 = vadd.f32 %v5492_v53, %v10240_v2  ;;  %v5459_v59 = vpop.f32.mrf.mxu0  ;;  %v10249_v8 = vld [vmem:[#allocation42_spill] sm:$0xff] }
 0x2e8   : > { %v5499_v6 = vpop.f32.mrf.mxu1  ;;  %v6772_v25 = vpack.c.bf16 %v5591_v61, %v5590_v4  ;;  %v6780_v44 = vpack.c.bf16 %v5607_v27, %v5606_v45  ;;  %v5518_v57 = vadd.f32 %v5454_v23, %v10241_v41  ;;  %v5534_v56 = vadd.f32 %v5494_v19, %v10242_v16  ;;  %v10251_v19 = vld [vmem:[#allocation13_spill] sm:$0xff]  ;;  %v10253_v2 = vld [vmem:[#allocation14_spill] sm:$0xff] }
 0x2e9   : > { %v5561_v35 = vadd.f32 %v9998_v22, %v5517_v42  ;;  %v5577_v39 = vadd.f32 %v9998_v22, %v5533_v32  ;;  %v5456_v29 = vadd.f32 %v5455_v20, %v10243_v60  ;;  %v5496_v11 = vadd.f32 %v5495_v55, %v10031_v33  ;;  %v5461_v34 = vpop.f32.mrf.mxu0  ;;  %v10250_v20 = vld [vmem:[#allocation43_spill] sm:$0xff] }
 0x2ea   : > { %v5501_v36 = vpop.f32.mrf.mxu1  ;;  %5715 = vst [vmem:[%s10058_s9 + $0x18] sm:$0xff] %v6772_v25  ;;  %5723 = vst [vmem:[%s10058_s9 + $0x58] sm:$0xff] %v6780_v44  ;;  %v5562_v0 = vadd.f32 %v9996_v3, %v5518_v57  ;;  %v5578_v47 = vadd.f32 %v9996_v3, %v5534_v56  ;;  %v5460_v50 = vadd.f32 %v5459_v59, %v10244_v1  ;;  %v10254_v59 = vld [vmem:[#allocation29_spill] sm:$0xff]  ;;  %v10256_v60 = vld [vmem:[#allocation15_spill] sm:$0xff] }
 0x2eb   : > { %v5500_v12 = vadd.f32 %v5499_v6, %v10033_v14  ;;  %v5593_v51 = vmax.f32 %v5561_v35, 0.0  ;;  %v5609_v58 = vmax.f32 %v5577_v39, 0.0  ;;  %v5519_v24 = vadd.f32 %v5456_v29, %v10245_v63  ;;  %v5463_v33 = vpop.f32.mrf.mxu0 }
 0x2ec   : > { %v5535_v48 = vadd.f32 %v5496_v11, %v10246_v37  ;;  %v5503_v4 = vpop.f32.mrf.mxu1  ;;  %v5594_v45 = vmax.f32 %v5562_v0, 0.0  ;;  %v5610_v30 = vmax.f32 %v5578_v47, 0.0  ;;  %v5520_v10 = vadd.f32 %v5460_v50, %v10247_v49  ;;  %v10257_v11 = vld [vmem:[#allocation30_spill] sm:$0xff] }
 0x2ed   : > { %v5536_v40 = vadd.f32 %v5500_v12, %v10248_v5  ;;  %v6773_v31 = vpack.c.bf16 %v5593_v51, %v5592_v7  ;;  %v6781_v62 = vpack.c.bf16 %v5609_v58, %v5608_v26  ;;  %v5563_v14 = vadd.f32 %v9998_v22, %v5519_v24  ;;  %v5465_v27 = vpop.f32.mrf.mxu0  ;;  %v10252_v26 = vld [vmem:[#allocation28_spill] sm:$0xff] }
 0x2ee   : > { %v5579_v18 = vadd.f32 %v9998_v22, %v5535_v48  ;;  %v5564_v54 = vadd.f32 %v9996_v3, %v5520_v10  ;;  %v5462_v43 = vadd.f32 %v5461_v34, %v10249_v8  ;;  %v5502_v38 = vadd.f32 %v5501_v36, %v10035_v21  ;;  %v5505_v13 = vpop.f32.mrf.mxu1 }
 0x2ef   : > { %v5580_v15 = vadd.f32 %v9996_v3, %v5536_v40  ;;  %5716 = vst [vmem:[%s10058_s9 + $0x20] sm:$0xff] %v6773_v31  ;;  %5724 = vst [vmem:[%s10058_s9 + $0x60] sm:$0xff] %v6781_v62  ;;  %v5595_v28 = vmax.f32 %v5563_v14, 0.0  ;;  %v5464_v55 = vadd.f32 %v5463_v33, %v10250_v20  ;;  %v5504_v61 = vadd.f32 %v5503_v4, %v10043_v46  ;;  %v10255_v46 = vld [vmem:[#allocation44_spill] sm:$0xff] }
 0x2f0   : > { %v5611_v53 = vmax.f32 %v5579_v18, 0.0  ;;  %v5393_v23 = vadd.f32 %v10007_v17, %v10046_v52  ;;  %v5521_v7 = vadd.f32 %v5462_v43, %v10251_v19  ;;  %v5537_v9 = vadd.f32 %v5502_v38, %v10252_v26 }
 0x2f1   : > { %v6774_v21 = vpack.c.bf16 %v5595_v28, %v5594_v45  ;;  %v5522_v32 = vadd.f32 %v5464_v55, %v10253_v2  ;;  %v5538_v6 = vadd.f32 %v5504_v61, %v10254_v59  ;;  %v5466_v41 = vadd.f32 %v5465_v27, %v10255_v46 }
 0x2f2   : > { %v6782_v42 = vpack.c.bf16 %v5611_v53, %v5610_v30  ;;  %v5565_v25 = vadd.f32 %v9998_v22, %v5521_v7  ;;  %v5581_v44 = vadd.f32 %v9998_v22, %v5537_v9  ;;  %v5506_v57 = vadd.f32 %v5505_v13, %v5393_v23 }
 0x2f3   : > { %5717 = vst [vmem:[%s10058_s9 + $0x28] sm:$0xff] %v6774_v21  ;;  %v5596_v17 = vmax.f32 %v5564_v54, 0.0  ;;  %v5612_v52 = vmax.f32 %v5580_v15, 0.0  ;;  %v5566_v16 = vadd.f32 %v9996_v3, %v5522_v32  ;;  %v5582_v56 = vadd.f32 %v9996_v3, %v5538_v6 }
 0x2f4   : > { %5725 = vst [vmem:[%s10058_s9 + $0x68] sm:$0xff] %v6782_v42  ;;  %v5597_v35 = vmax.f32 %v5565_v25, 0.0  ;;  %v5613_v39 = vmax.f32 %v5581_v44, 0.0  ;;  %v5523_v29 = vadd.f32 %v5466_v41, %v10256_v60  ;;  %v5539_v34 = vadd.f32 %v5506_v57, %v10257_v11 }
 0x2f5   : > { %v5598_v50 = vmax.f32 %v5566_v16, 0.0  ;;  %v5614_v12 = vmax.f32 %v5582_v56, 0.0 }
 0x2f6   : > { %v6775_v36 = vpack.c.bf16 %v5597_v35, %v5596_v17  ;;  %v6783_v0 = vpack.c.bf16 %v5613_v39, %v5612_v52  ;;  %v5567_v47 = vadd.f32 %v9998_v22, %v5523_v29  ;;  %v5583_v1 = vadd.f32 %v9998_v22, %v5539_v34 }
 0x2f8   : > { %5718 = vst [vmem:[%s10058_s9 + $0x30] sm:$0xff] %v6775_v36  ;;  %5726 = vst [vmem:[%s10058_s9 + $0x70] sm:$0xff] %v6783_v0  ;;  %v5599_v51 = vmax.f32 %v5567_v47, 0.0  ;;  %v5615_v3 = vmax.f32 %v5583_v1, 0.0 }
 0x2fa   : > { %v6776_v58 = vpack.c.bf16 %v5599_v51, %v5598_v50  ;;  %v6784_v63 = vpack.c.bf16 %v5615_v3, %v5614_v12 }
 0x2fc   : > { %5719 = vst [vmem:[%s10058_s9 + $0x38] sm:$0xff] %v6776_v58  ;;  %5727 = vst [vmem:[%s10058_s9 + $0x78] sm:$0xff] %v6784_v63 }
 0x2fd PF: > { %s13_s16 = sadd.s32 1, %s7814_s16   ;;  %s10258_s12 = smov %s7806_s14 }
 0x2fe   : > { %p10_p7 = scmp.ge.s32.totalorder %s13_s16, 6   ;;  %s10259_s13 = smov %s7810_s15 }
 0x2ff   : > { %s10260_s14 = smov %s10263_s17  ;;  %s10261_s15 = smov %s10267_s18 }
 0x300   :  { %12 = sbr.rel (!%p10_p7) target bundleno = 3 (0x3), region = 70 }

// kernel: decoder_forward.8
= control target key start
LH: loop header
LB: loop body
LE: loop exit
PB: predicated region body
PF: predicated region fallthrough
CT: control target
= control target key end

     0   :  { %s5344_s12 = smov 0   ;;  %s5346_s13 = smov 0   ;;  %s6943_s0 = inlined_call_operand.vmem [shape: bf16[2,2,160,768], index: 0, kind: input, shape index: {}]   ;;  %s6944_s1 = inlined_call_operand.vmem [shape: bf16[3,768,256], index: 1, kind: input, shape index: {}]   ;;  %s6945_s2 = inlined_call_operand.vmem [shape: f32[1,256], index: 2, kind: input, shape index: {}]   ;;  %s6946_s3 = inlined_call_operand.vmem [shape: bf16[2,2,128,256], index: 3, kind: output, shape index: {}]  }
   0x1   :  { %s5348_s14 = smov 0   ;;  %s5350_s15 = smov 0  }
   0x2   :  { %s5352_s16 = smov 0  }
   0x3 LB: > { %s28_s17 = sadd.s32 1, %s5314_s14  ;;  %s32_s18 = sadd.s32 1, %s5318_s15  ;;  %s5322_s16 = sphi %s5352_s16, %s13_s16   ;;  %s5318_s15 = sphi %s5350_s15, %s7018_s15   ;;  %s5314_s14 = sphi %s5348_s14, %s7017_s14   ;;  %s5310_s13 = sphi %s5346_s13, %s7016_s13   ;;  %s5306_s12 = sphi %s5344_s12, %s7015_s12  }
   0x4   : > { %p30_p0 = scmp.ge.s32.totalorder %s28_s17, 2  ;;  %p3990_p1 = scmp.ge.s32.totalorder %s5322_s16, 1 }
   0x5   : > { %p187_p2 = scmp.lt.s32.totalorder %s5322_s16, 5 }
   0x6   : > { %s7020_s17 = smov (%p30_p0, %s28_s17), 0  ;;  %s7022_s18 = smov (!%p30_p0, %s32_s18), %s5318_s15 }
   0x7   : > { %p188_p3 = pnand %p3990_p1, %p187_p2  ;;  %p34_p4 = scmp.ge.s32.totalorder %s7022_s18, 2 }
   0x9   : > { %s7024_s18 = smov (%p34_p4, %s7022_s18), 0  ;;  %191 = sbr.rel (%p188_p3) target bundleno = 573 (0x23d), region = 32 }
   0xe   : > { %v4685_v0 = vld [vmem:[%s6944_s1 + $0x374] ss:$8 sps:$4 sm:$0xff]   ;;  %v4689_v2 = vld [vmem:[%s6944_s1 + $0x370] ss:$8 sps:$4 sm:$0xff]   ;;  %v4691_v4 = vld [vmem:[%s6944_s1 + $0x364] ss:$8 sps:$4 sm:$0xff]  }
   0xf   : > { %v4687_v1 = vld [vmem:[%s6944_s1 + $0x474] ss:$8 sps:$4 sm:$0xff]   ;;  %1233 = vmatprep.subr.bf16.mxu0 %v4685_v0  ;;  %v4690_v3 = vld [vmem:[%s6944_s1 + $0x470] ss:$8 sps:$4 sm:$0xff]   ;;  %v4693_v5 = vld [vmem:[%s6944_s1 + $0x464] ss:$8 sps:$4 sm:$0xff]  }
  0x10   : > { %1346 = vmatprep.subr.bf16.mxu1 %v4687_v1  ;;  %1234 = vmatpush1.bf16.msra.mxu0 %v4689_v2  ;;  %v4695_v6 = vld [vmem:[%s6944_s1 + $0x360] ss:$8 sps:$4 sm:$0xff]   ;;  %v4697_v8 = vld [vmem:[%s6944_s1 + $0x354] ss:$8 sps:$4 sm:$0xff]   ;;  %v4701_v10 = vld [vmem:[%s6944_s1 + $0x350] ss:$8 sps:$4 sm:$0xff]  }
  0x11   : > { %1347 = vmatpush1.bf16.msra.mxu1 %v4690_v3  ;;  %1235 = vmatprep.subr.bf16.mxu0 %v4691_v4  ;;  %v4696_v7 = vld [vmem:[%s6944_s1 + $0x460] ss:$8 sps:$4 sm:$0xff]   ;;  %v4699_v9 = vld [vmem:[%s6944_s1 + $0x454] ss:$8 sps:$4 sm:$0xff]   ;;  %v4702_v11 = vld [vmem:[%s6944_s1 + $0x450] ss:$8 sps:$4 sm:$0xff]  }
  0x12   : > { %1348 = vmatprep.subr.bf16.mxu1 %v4693_v5  ;;  %v4703_v12 = vld [vmem:[%s6944_s1 + $0x344] ss:$8 sps:$4 sm:$0xff]   ;;  %v4707_v14 = vld [vmem:[%s6944_s1 + $0x340] ss:$8 sps:$4 sm:$0xff]   ;;  %v4709_v16 = vld [vmem:[%s6944_s1 + $0x334] ss:$8 sps:$4 sm:$0xff]  }
  0x13   : > { %v4705_v13 = vld [vmem:[%s6944_s1 + $0x444] ss:$8 sps:$4 sm:$0xff]   ;;  %v4708_v15 = vld [vmem:[%s6944_s1 + $0x440] ss:$8 sps:$4 sm:$0xff]   ;;  %v4711_v17 = vld [vmem:[%s6944_s1 + $0x434] ss:$8 sps:$4 sm:$0xff]  }
  0x14   : > { %1236 = vmatpush1.bf16.msra.mxu0 %v4695_v6  ;;  %v4713_v18 = vld [vmem:[%s6944_s1 + $0x330] ss:$8 sps:$4 sm:$0xff]   ;;  %v4715_v20 = vld [vmem:[%s6944_s1 + $0x324] ss:$8 sps:$4 sm:$0xff]   ;;  %v4719_v22 = vld [vmem:[%s6944_s1 + $0x320] ss:$8 sps:$4 sm:$0xff]  }
  0x15   : > { %1349 = vmatpush1.bf16.msra.mxu1 %v4696_v7  ;;  %1237 = vmatprep.subr.bf16.mxu0 %v4697_v8  ;;  %v4714_v19 = vld [vmem:[%s6944_s1 + $0x430] ss:$8 sps:$4 sm:$0xff]   ;;  %v4717_v21 = vld [vmem:[%s6944_s1 + $0x424] ss:$8 sps:$4 sm:$0xff]   ;;  %v4720_v23 = vld [vmem:[%s6944_s1 + $0x420] ss:$8 sps:$4 sm:$0xff]  }
  0x16   : > { %1350 = vmatprep.subr.bf16.mxu1 %v4699_v9  ;;  %v4721_v24 = vld [vmem:[%s6944_s1 + $0x314] ss:$8 sps:$4 sm:$0xff]   ;;  %p232_p5 = scmp.lt.s32.totalorder %s5310_s13, 1  ;;  %p234_p6 = scmp.lt.s32.totalorder %s5306_s12, 1  ;;  %v4725_v26 = vld [vmem:[%s6944_s1 + $0x310] ss:$8 sps:$4 sm:$0xff]  }
  0x17   : > { %v4723_v25 = vld [vmem:[%s6944_s1 + $0x414] ss:$8 sps:$4 sm:$0xff]   ;;  %v4726_v27 = vld [vmem:[%s6944_s1 + $0x410] ss:$8 sps:$4 sm:$0xff]   ;;  %v4727_v28 = vld [vmem:[%s6944_s1 + $0x304] ss:$8 sps:$4 sm:$0xff]  }
  0x18   : > { %1238 = vmatpush1.bf16.msra.mxu0 %v4701_v10  ;;  %v4729_v29 = vld [vmem:[%s6944_s1 + $0x404] ss:$8 sps:$4 sm:$0xff]   ;;  %s7026_s13 = smov (!%p232_p5, %s5310_s13), 1  ;;  %s7028_s12 = smov (!%p234_p6, %s5306_s12), 1  ;;  %v4731_v30 = vld [vmem:[%s6944_s1 + $0x300] ss:$8 sps:$4 sm:$0xff]  }
  0x19   : > { %1351 = vmatpush1.bf16.msra.mxu1 %v4702_v11  ;;  %1239 = vmatprep.subr.bf16.mxu0 %v4703_v12  ;;  %v4732_v31 = vld [vmem:[%s6944_s1 + $0x400] ss:$8 sps:$4 sm:$0xff]   ;;  %v4733_v32 = vld [vmem:[%s6944_s1 + $0x3f4] ss:$8 sps:$4 sm:$0xff]   ;;  %s4644_s27 = smul.u32 240, %s7026_s13  ;;  %s3993_s29 = sshll.u32 %s7026_s13, 6 }
  0x1a   : > { %1352 = vmatprep.subr.bf16.mxu1 %v4705_v13  ;;  %v4735_v33 = vld [vmem:[%s6944_s1 + $0x4f4] ss:$8 sps:$4 sm:$0xff]   ;;  %s4643_s28 = smul.u32 120, %s7028_s12  ;;  %v4737_v34 = vld [vmem:[%s6944_s1 + $0x3f0] ss:$8 sps:$4 sm:$0xff]  }
  0x1b   : > { %v4738_v35 = vld [vmem:[%s6944_s1 + $0x4f0] ss:$8 sps:$4 sm:$0xff]   ;;  %v4739_v36 = vld [vmem:[%s6944_s1 + $0x3e4] ss:$8 sps:$4 sm:$0xff]   ;;  %v4743_v38 = vld [vmem:[%s6944_s1 + $0x3e0] ss:$8 sps:$4 sm:$0xff]  }
  0x1c   : > { %1240 = vmatpush1.bf16.msra.mxu0 %v4707_v14  ;;  %v4741_v37 = vld [vmem:[%s6944_s1 + $0x4e4] ss:$8 sps:$4 sm:$0xff]   ;;  %s238_s10 = sadd.s32 %s4644_s27, %s4643_s28  ;;  %v4744_v39 = vld [vmem:[%s6944_s1 + $0x4e0] ss:$8 sps:$4 sm:$0xff]   ;;  %v4745_v40 = vld [vmem:[%s6944_s1 + $0x3d4] ss:$8 sps:$4 sm:$0xff]  }
  0x1d   : > { %1353 = vmatpush1.bf16.msra.mxu1 %v4708_v15  ;;  %1241 = vmatprep.subr.bf16.mxu0 %v4709_v16  ;;  %v4747_v41 = vld [vmem:[%s6944_s1 + $0x4d4] ss:$8 sps:$4 sm:$0xff]   ;;  %s3991_s26 = sshll.u32 %s238_s10, 2  ;;  %v4749_v42 = vld [vmem:[%s6944_s1 + $0x3d0] ss:$8 sps:$4 sm:$0xff]   ;;  %s3992_s28 = sshll.u32 %s7028_s12, 5 }
  0x1e   : > { %1354 = vmatprep.subr.bf16.mxu1 %v4711_v17  ;;  %v4750_v43 = vld [vmem:[%s6944_s1 + $0x4d0] ss:$8 sps:$4 sm:$0xff]   ;;  %v4751_v44 = vld [vmem:[%s6944_s1 + $0x3c4] ss:$8 sps:$4 sm:$0xff]   ;;  %s5526_s8 = scalar_lea.vmem %s6943_s0, %s3991_s26  ;;  %v4755_v46 = vld [vmem:[%s6944_s1 + $0x3c0] ss:$8 sps:$4 sm:$0xff]   ;;  %s6813_s12 = sadd.s32 %s3993_s29, %s3992_s28 }
  0x1f   : > { %v4753_v45 = vld [vmem:[%s6944_s1 + $0x4c4] ss:$8 sps:$4 sm:$0xff]   ;;  %v4756_v47 = vld [vmem:[%s6944_s1 + $0x4c0] ss:$8 sps:$4 sm:$0xff]   ;;  %v4757_v48 = vld [vmem:[%s6944_s1 + $0x3b4] ss:$8 sps:$4 sm:$0xff]  }
  0x20   : > { %1242 = vmatpush1.bf16.msra.mxu0 %v4713_v18  ;;  %v5541_v49 = vld [vmem:[%s5526_s8 + $0x34] ss:$24 sps:$4 sm:$0xff]   ;;  %v4761_v52 = vld [vmem:[%s6944_s1 + $0x3b0] ss:$8 sps:$4 sm:$0xff]   ;;  %v4767_v56 = vld [vmem:[%s6944_s1 + $0x3a0] ss:$8 sps:$4 sm:$0xff]  }
  0x21   : > { %1355 = vmatpush1.bf16.msra.mxu1 %v4714_v19  ;;  %1243 = vmatprep.subr.bf16.mxu0 %v4715_v20  ;;  %v4759_v50 = vld [vmem:[%s6944_s1 + $0x4b4] ss:$8 sps:$4 sm:$0xff]   ;;  %v4762_v53 = vld [vmem:[%s6944_s1 + $0x4b0] ss:$8 sps:$4 sm:$0xff]   ;;  %v4763_v54 = vld [vmem:[%s6944_s1 + $0x3a4] ss:$8 sps:$4 sm:$0xff]  }
  0x22   : > { %1356 = vmatprep.subr.bf16.mxu1 %v4717_v21  ;;  %v4786_v51 = vld [vmem:[%s5526_s8 + $0x3c] ss:$24 sps:$4 sm:$0xff]   ;;  %1265 = vmatprep.mubr.bf16.mxu0 %v5541_v49  ;;  %v4765_v55 = vld [vmem:[%s6944_s1 + $0x4a4] ss:$8 sps:$4 sm:$0xff]   ;;  %v4768_v57 = vld [vmem:[%s6944_s1 + $0x4a0] ss:$8 sps:$4 sm:$0xff]  }
  0x23   : > { %1378 = vmatprep.mubr.bf16.mxu1 %v4786_v51  ;;  %v4769_v58 = vld [vmem:[%s6944_s1 + $0x394] ss:$8 sps:$4 sm:$0xff]   ;;  %v4773_v60 = vld [vmem:[%s6944_s1 + $0x390] ss:$8 sps:$4 sm:$0xff]   ;;  %v4775_v62 = vld [vmem:[%s6944_s1 + $0x384] ss:$8 sps:$4 sm:$0xff]  }
  0x24   : > { %1244 = vmatpush1.bf16.msra.mxu0 %v4719_v22  ;;  %v4771_v59 = vld [vmem:[%s6944_s1 + $0x494] ss:$8 sps:$4 sm:$0xff]   ;;  %v4774_v61 = vld [vmem:[%s6944_s1 + $0x490] ss:$8 sps:$4 sm:$0xff]   ;;  %v4777_v63 = vld [vmem:[%s6944_s1 + $0x484] ss:$8 sps:$4 sm:$0xff]  }
  0x25   : > { %1357 = vmatpush1.bf16.msra.mxu1 %v4720_v23  ;;  %1245 = vmatprep.subr.bf16.mxu0 %v4721_v24  ;;  %v4779_v0 = vld [vmem:[%s6944_s1 + $0x380] ss:$8 sps:$4 sm:$0xff]   ;;  %v4789_v2 = vld [vmem:[%s6944_s1 + $0x574] ss:$8 sps:$4 sm:$0xff]   ;;  %v4784_v5 = vld [vmem:[%s5526_s8 + $0x38] ss:$24 sps:$4 sm:$0xff]  }
  0x26   : > { %1358 = vmatprep.subr.bf16.mxu1 %v4723_v25  ;;  %v4780_v1 = vld [vmem:[%s6944_s1 + $0x480] ss:$8 sps:$4 sm:$0xff]   ;;  %v4792_v3 = vld [vmem:[%s6944_s1 + $0x74] ss:$8 sps:$4 sm:$0xff]   ;;  %v4787_v6 = vld [vmem:[%s6944_s1 + $0x570] ss:$8 sps:$4 sm:$0xff]  }
  0x27   : > { %v5597_v4 = vld [vmem:[%s5526_s8 + $0x30] ss:$24 sps:$4 sm:$0xff]   ;;  %v4795_v8 = vld [vmem:[%s6944_s1 + $0x564] ss:$8 sps:$4 sm:$0xff]   ;;  %v4807_v14 = vld [vmem:[%s6944_s1 + $0x554] ss:$8 sps:$4 sm:$0xff]  }
  0x28   : > { %1246 = vmatpush1.bf16.msra.mxu0 %v4725_v26  ;;  %v4790_v7 = vld [vmem:[%s6944_s1 + $0x70] ss:$8 sps:$4 sm:$0xff]   ;;  %v4798_v9 = vld [vmem:[%s6944_s1 + $0x64] ss:$8 sps:$4 sm:$0xff]   ;;  %v4793_v12 = vld [vmem:[%s6944_s1 + $0x560] ss:$8 sps:$4 sm:$0xff]  }
  0x29   : > { %1359 = vmatpush1.bf16.msra.mxu1 %v4726_v27  ;;  %1247 = vmatprep.subr.bf16.mxu0 %v4727_v28  ;;  %v5613_v10 = vld [vmem:[%s5526_s8 + $0x64] ss:$24 sps:$4 sm:$0xff]   ;;  %v4796_v13 = vld [vmem:[%s6944_s1 + $0x60] ss:$8 sps:$4 sm:$0xff]   ;;  %v4805_v18 = vld [vmem:[%s6944_s1 + $0x550] ss:$8 sps:$4 sm:$0xff]  }
  0x2a   : > { %1360 = vmatprep.subr.bf16.mxu1 %v4729_v29  ;;  %v4801_v11 = vld [vmem:[%s5526_s8 + $0x6c] ss:$24 sps:$4 sm:$0xff]   ;;  %v4810_v15 = vld [vmem:[%s6944_s1 + $0x54] ss:$8 sps:$4 sm:$0xff]   ;;  %v5631_v16 = vld [vmem:[%s5526_s8 + $0x60] ss:$24 sps:$4 sm:$0xff]  }
  0x2b   : > { %v4804_v17 = vld [vmem:[%s5526_s8 + $0x68] ss:$24 sps:$4 sm:$0xff]   ;;  %v4808_v19 = vld [vmem:[%s6944_s1 + $0x50] ss:$8 sps:$4 sm:$0xff]   ;;  %v4813_v20 = vld [vmem:[%s6944_s1 + $0x544] ss:$8 sps:$4 sm:$0xff]  }
  0x2c   : > { %1248 = vmatpush1.bf16.msra.mxu0 %v4731_v30  ;;  %v4816_v21 = vld [vmem:[%s6944_s1 + $0x44] ss:$8 sps:$4 sm:$0xff]   ;;  %v4819_v23 = vld [vmem:[%s5526_s8 + $0x9c] ss:$24 sps:$4 sm:$0xff]   ;;  %v4811_v24 = vld [vmem:[%s6944_s1 + $0x540] ss:$8 sps:$4 sm:$0xff]  }
  0x2d   : > { %1361 = vmatpush1.bf16.msra.mxu1 %v4732_v31  ;;  %1249 = vmatprep.subr.bf16.mxu0 %v4733_v32  ;;  %v5647_v22 = vld [vmem:[%s5526_s8 + $0x94] ss:$24 sps:$4 sm:$0xff]   ;;  %v4814_v25 = vld [vmem:[%s6944_s1 + $0x40] ss:$8 sps:$4 sm:$0xff]   ;;  %v4822_v29 = vld [vmem:[%s5526_s8 + $0x98] ss:$24 sps:$4 sm:$0xff]  }
  0x2e   : > { %1362 = vmatprep.subr.bf16.mxu1 %v4735_v33  ;;  %v4825_v26 = vld [vmem:[%s6944_s1 + $0x534] ss:$8 sps:$4 sm:$0xff]   ;;  %v5665_v28 = vld [vmem:[%s5526_s8 + $0x90] ss:$24 sps:$4 sm:$0xff]   ;;  %v4831_v32 = vld [vmem:[%s6944_s1 + $0x524] ss:$8 sps:$4 sm:$0xff]  }
  0x2f   : > { %v4828_v27 = vld [vmem:[%s6944_s1 + $0x34] ss:$8 sps:$4 sm:$0xff]   ;;  %v4823_v30 = vld [vmem:[%s6944_s1 + $0x530] ss:$8 sps:$4 sm:$0xff]   ;;  %v4834_v33 = vld [vmem:[%s6944_s1 + $0x24] ss:$8 sps:$4 sm:$0xff]  }
  0x30   : > { %1250 = vmatpush2.bf16.msra.mxu0 %v4737_v34  ;;  %v4826_v31 = vld [vmem:[%s6944_s1 + $0x30] ss:$8 sps:$4 sm:$0xff]   ;;  %v5681_v34 = vld [vmem:[%s5526_s8 + $0xc4] ss:$24 sps:$4 sm:$0xff]   ;;  %s3994_s13 = sshll.u32 %s6813_s12, 2 }
  0x31   : > { %1363 = vmatpush2.bf16.msra.mxu1 %v4738_v35  ;;  %1251 = vmatprep.subr.bf16.mxu0 %v4739_v36  ;;  %v4837_v35 = vld [vmem:[%s5526_s8 + $0xcc] ss:$24 sps:$4 sm:$0xff]   ;;  %v4829_v36 = vld [vmem:[%s6944_s1 + $0x520] ss:$8 sps:$4 sm:$0xff]   ;;  %v4861_v51 = vld [vmem:[%s6944_s1 + $0x5f4] ss:$8 sps:$4 sm:$0xff]   ;;  %s6833_s5 = scalar_lea.vmem %s6946_s3, %s3994_s13 }
  0x32   : > { %1364 = vmatprep.subr.bf16.mxu1 %v4741_v37  ;;  %v4832_v37 = vld [vmem:[%s6944_s1 + $0x20] ss:$8 sps:$4 sm:$0xff]  }
  0x34   : > { %1252 = vmatpush2.bf16.msra.mxu0 %v4743_v38  ;;  %v4843_v38 = vld [vmem:[%s6944_s1 + $0x514] ss:$8 sps:$4 sm:$0xff]  }
  0x35   : > { %1365 = vmatpush2.bf16.msra.mxu1 %v4744_v39  ;;  %1253 = vmatprep.subr.bf16.mxu0 %v4745_v40  ;;  %v4846_v39 = vld [vmem:[%s6944_s1 + $0x14] ss:$8 sps:$4 sm:$0xff]   ;;  %v5699_v40 = vld [vmem:[%s5526_s8 + $0xc0] ss:$24 sps:$4 sm:$0xff]  }
  0x36   : > { %1366 = vmatprep.subr.bf16.mxu1 %v4747_v41  ;;  %v4840_v41 = vld [vmem:[%s5526_s8 + $0xc8] ss:$24 sps:$4 sm:$0xff]  }
  0x38   : > { %1254 = vmatpush2.bf16.msra.mxu0 %v4749_v42  ;;  %v4841_v42 = vld [vmem:[%s6944_s1 + $0x510] ss:$8 sps:$4 sm:$0xff]  }
  0x39   : > { %1367 = vmatpush2.bf16.msra.mxu1 %v4750_v43  ;;  %1255 = vmatprep.subr.bf16.mxu0 %v4751_v44  ;;  %v4844_v43 = vld [vmem:[%s6944_s1 + $0x10] ss:$8 sps:$4 sm:$0xff]   ;;  %v4849_v44 = vld [vmem:[%s6944_s1 + $0x504] ss:$8 sps:$4 sm:$0xff]  }
  0x3a   : > { %1368 = vmatprep.subr.bf16.mxu1 %v4753_v45  ;;  %v4852_v45 = vld [vmem:[%s6944_s1 + $0x4] ss:$8 sps:$4 sm:$0xff]  }
  0x3c   : > { %1256 = vmatpush2.bf16.msra.mxu0 %v4755_v46  ;;  %v5715_v46 = vld [vmem:[%s5526_s8 + $0xf4] ss:$24 sps:$4 sm:$0xff]  }
  0x3d   : > { %1369 = vmatpush2.bf16.msra.mxu1 %v4756_v47  ;;  %1257 = vmatprep.subr.bf16.mxu0 %v4757_v48  ;;  %v4855_v47 = vld [vmem:[%s5526_s8 + $0xfc] ss:$24 sps:$4 sm:$0xff]   ;;  %v4847_v48 = vld [vmem:[%s6944_s1 + $0x500] ss:$8 sps:$4 sm:$0xff]  }
  0x3e   : > { %1370 = vmatprep.subr.bf16.mxu1 %v4759_v50  ;;  %v4850_v50 = vld [vmem:[%s6944_s1] ss:$8 sps:$4 sm:$0xff]  }
  0x40   : > { %1258 = vmatpush2.bf16.msra.mxu0 %v4761_v52  ;;  %v4864_v52 = vld [vmem:[%s6944_s1 + $0xf4] ss:$8 sps:$4 sm:$0xff]  }
  0x41   : > { %1371 = vmatpush2.bf16.msra.mxu1 %v4762_v53  ;;  %1259 = vmatprep.subr.bf16.mxu0 %v4763_v54  ;;  %v5733_v53 = vld [vmem:[%s5526_s8 + $0xf0] ss:$24 sps:$4 sm:$0xff]  }
  0x42   : > { %1372 = vmatprep.subr.bf16.mxu1 %v4765_v55  ;;  %v4858_v54 = vld [vmem:[%s5526_s8 + $0xf8] ss:$24 sps:$4 sm:$0xff]  }
  0x43   : > { %v4859_v55 = vld [vmem:[%s6944_s1 + $0x5f0] ss:$8 sps:$4 sm:$0xff]  }
  0x44   : > { %1260 = vmatpush2.bf16.msra.mxu0 %v4767_v56  ;;  %v4862_v56 = vld [vmem:[%s6944_s1 + $0xf0] ss:$8 sps:$4 sm:$0xff]  }
  0x45   : > { %1373 = vmatpush2.bf16.msra.mxu1 %v4768_v57  ;;  %1261 = vmatprep.subr.bf16.mxu0 %v4769_v58  ;;  %v4867_v57 = vld [vmem:[%s6944_s1 + $0x5e4] ss:$8 sps:$4 sm:$0xff]  }
  0x46   : > { %1374 = vmatprep.subr.bf16.mxu1 %v4771_v59  ;;  %v4870_v58 = vld [vmem:[%s6944_s1 + $0xe4] ss:$8 sps:$4 sm:$0xff]  }
  0x47   : > { %v5749_v59 = vld [vmem:[%s5526_s8 + $0x124] ss:$24 sps:$4 sm:$0xff]  }
  0x48   : > { %1262 = vmatpush2.bf16.msra.mxu0 %v4773_v60  ;;  %v4873_v60 = vld [vmem:[%s5526_s8 + $0x12c] ss:$24 sps:$4 sm:$0xff]  }
  0x49   : > { %1375 = vmatpush2.bf16.msra.mxu1 %v4774_v61  ;;  %1263 = vmatprep.subr.bf16.mxu0 %v4775_v62  ;;  %v4865_v61 = vld [vmem:[%s6944_s1 + $0x5e0] ss:$8 sps:$4 sm:$0xff]  }
  0x4a   : > { %1376 = vmatprep.subr.bf16.mxu1 %v4777_v63  ;;  %v4868_v62 = vld [vmem:[%s6944_s1 + $0xe0] ss:$8 sps:$4 sm:$0xff]   ;;  %v4879_v63 = vld [vmem:[%s6944_s1 + $0x5d4] ss:$8 sps:$4 sm:$0xff]  }
  0x4c   : > { %1264 = vmatpush2.bf16.msra.mxu0 %v4779_v0  ;;  %v4882_v0 = vld [vmem:[%s6944_s1 + $0xd4] ss:$8 sps:$4 sm:$0xff]  }
  0x4d   : > { %1377 = vmatpush2.bf16.msra.mxu1 %v4780_v1  ;;  %1459 = vmatprep.subr.bf16.mxu0 %v4789_v2  ;;  %v5767_v1 = vld [vmem:[%s5526_s8 + $0x120] ss:$24 sps:$4 sm:$0xff]  }
  0x4e   : > { %2082 = vmatprep.subr.bf16.mxu1 %v4792_v3  ;;  %v4876_v2 = vld [vmem:[%s5526_s8 + $0x128] ss:$24 sps:$4 sm:$0xff]   ;;  %v4877_v3 = vld [vmem:[%s6944_s1 + $0x5d0] ss:$8 sps:$4 sm:$0xff]  }
  0x4f   : > { %1266 = vmatmul.mubr.bf16.vlgmr.msra.gmra.mxu0 %v5597_v4 }
  0x50   : > { %1379 = vmatmul.mubr.bf16.vlgmr.msra.gmra.mxu1 %v4784_v5  ;;  %1460 = vmatpush1.bf16.msra.mxu0 %v4787_v6  ;;  %v4880_v5 = vld [vmem:[%s6944_s1 + $0xd0] ss:$8 sps:$4 sm:$0xff]   ;;  %v4885_v6 = vld [vmem:[%s6944_s1 + $0x5c4] ss:$8 sps:$4 sm:$0xff]  }
  0x51   : > { %2083 = vmatpush1.bf16.msra.mxu1 %v4790_v7  ;;  %1461 = vmatprep.subr.bf16.mxu0 %v4795_v8  ;;  %v4888_v7 = vld [vmem:[%s6944_s1 + $0xc4] ss:$8 sps:$4 sm:$0xff]  }
  0x52   : > { %2084 = vmatprep.subr.bf16.mxu1 %v4798_v9  ;;  %1275 = vmatprep.mubr.bf16.mxu0 %v5613_v10  ;;  %v5783_v8 = vld [vmem:[%s5526_s8 + $0x154] ss:$24 sps:$4 sm:$0xff]  }
  0x53   : > { %1388 = vmatprep.mubr.bf16.mxu1 %v4801_v11  ;;  %v4891_v9 = vld [vmem:[%s5526_s8 + $0x15c] ss:$24 sps:$4 sm:$0xff]   ;;  %v4883_v11 = vld [vmem:[%s6944_s1 + $0x5c0] ss:$8 sps:$4 sm:$0xff]  }
  0x54   : > { %1462 = vmatpush1.bf16.msra.mxu0 %v4793_v12  ;;  %v4886_v12 = vld [vmem:[%s6944_s1 + $0xc0] ss:$8 sps:$4 sm:$0xff]  }
  0x55   : > { %2085 = vmatpush1.bf16.msra.mxu1 %v4796_v13  ;;  %1463 = vmatprep.subr.bf16.mxu0 %v4807_v14  ;;  %v4897_v13 = vld [vmem:[%s6944_s1 + $0x5b4] ss:$8 sps:$4 sm:$0xff]  }
  0x56   : > { %2086 = vmatprep.subr.bf16.mxu1 %v4810_v15  ;;  %v4900_v14 = vld [vmem:[%s6944_s1 + $0xb4] ss:$8 sps:$4 sm:$0xff]   ;;  %v5801_v15 = vld [vmem:[%s5526_s8 + $0x150] ss:$24 sps:$4 sm:$0xff]  }
  0x57   : > { %1276 = vmatmul.mubr.bf16.gmra.mxu0 %v5631_v16 }
  0x58   : > { %1389 = vmatmul.mubr.bf16.gmra.mxu1 %v4804_v17  ;;  %1464 = vmatpush1.bf16.msra.mxu0 %v4805_v18  ;;  %v4894_v17 = vld [vmem:[%s5526_s8 + $0x158] ss:$24 sps:$4 sm:$0xff]  }
  0x59   : > { %2087 = vmatpush1.bf16.msra.mxu1 %v4808_v19  ;;  %1465 = vmatprep.subr.bf16.mxu0 %v4813_v20  ;;  %v4895_v18 = vld [vmem:[%s6944_s1 + $0x5b0] ss:$8 sps:$4 sm:$0xff]   ;;  %v4903_v20 = vld [vmem:[%s6944_s1 + $0x5a4] ss:$8 sps:$4 sm:$0xff]  }
  0x5a   : > { %2088 = vmatprep.subr.bf16.mxu1 %v4816_v21  ;;  %1285 = vmatprep.mubr.bf16.mxu0 %v5647_v22  ;;  %v4898_v19 = vld [vmem:[%s6944_s1 + $0xb0] ss:$8 sps:$4 sm:$0xff]   ;;  %v4906_v21 = vld [vmem:[%s6944_s1 + $0xa4] ss:$8 sps:$4 sm:$0xff]  }
  0x5b   : > { %1398 = vmatprep.mubr.bf16.mxu1 %v4819_v23  ;;  %v4907_v23 = vld [vmem:[%s5526_s8 + $0x184] ss:$24 sps:$4 sm:$0xff]  }
  0x5c   : > { %1466 = vmatpush1.bf16.msra.mxu0 %v4811_v24  ;;  %v4909_v24 = vld [vmem:[%s5526_s8 + $0x18c] ss:$24 sps:$4 sm:$0xff]  }
  0x5d   : > { %2089 = vmatpush1.bf16.msra.mxu1 %v4814_v25  ;;  %1467 = vmatprep.subr.bf16.mxu0 %v4825_v26  ;;  %v4901_v25 = vld [vmem:[%s6944_s1 + $0x5a0] ss:$8 sps:$4 sm:$0xff]  }
  0x5e   : > { %2090 = vmatprep.subr.bf16.mxu1 %v4828_v27  ;;  %v4904_v26 = vld [vmem:[%s6944_s1 + $0xa0] ss:$8 sps:$4 sm:$0xff]   ;;  %v4915_v27 = vld [vmem:[%s6944_s1 + $0x594] ss:$8 sps:$4 sm:$0xff]  }
  0x5f   : > { %1286 = vmatmul.mubr.bf16.gmra.mxu0 %v5665_v28 }
  0x60   : > { %1399 = vmatmul.mubr.bf16.gmra.mxu1 %v4822_v29  ;;  %1468 = vmatpush1.bf16.msra.mxu0 %v4823_v30  ;;  %v4918_v29 = vld [vmem:[%s6944_s1 + $0x94] ss:$8 sps:$4 sm:$0xff]   ;;  %v4911_v30 = vld [vmem:[%s5526_s8 + $0x180] ss:$24 sps:$4 sm:$0xff]  }
  0x61   : > { %2091 = vmatpush1.bf16.msra.mxu1 %v4826_v31  ;;  %1469 = vmatprep.subr.bf16.mxu0 %v4831_v32  ;;  %v4912_v31 = vld [vmem:[%s5526_s8 + $0x188] ss:$24 sps:$4 sm:$0xff]   ;;  %v4913_v32 = vld [vmem:[%s6944_s1 + $0x590] ss:$8 sps:$4 sm:$0xff]  }
  0x62   : > { %2092 = vmatprep.subr.bf16.mxu1 %v4834_v33  ;;  %1295 = vmatprep.mubr.bf16.mxu0 %v5681_v34  ;;  %v4916_v33 = vld [vmem:[%s6944_s1 + $0x90] ss:$8 sps:$4 sm:$0xff]  }
  0x63   : > { %1408 = vmatprep.mubr.bf16.mxu1 %v4837_v35  ;;  %v4921_v35 = vld [vmem:[%s6944_s1 + $0x584] ss:$8 sps:$4 sm:$0xff]  }
  0x64   : > { %1470 = vmatpush1.bf16.msra.mxu0 %v4829_v36  ;;  %v4924_v36 = vld [vmem:[%s6944_s1 + $0x84] ss:$8 sps:$4 sm:$0xff]  }
  0x65   : > { %2093 = vmatpush1.bf16.msra.mxu1 %v4832_v37  ;;  %1471 = vmatprep.subr.bf16.mxu0 %v4843_v38  ;;  %v5846_v37 = vld [vmem:[%s5526_s8 + $0x44] ss:$24 sps:$4 sm:$0xff]  }
  0x66   : > { %2094 = vmatprep.subr.bf16.mxu1 %v4846_v39  ;;  %v4930_v38 = vld [vmem:[%s5526_s8 + $0x4] ss:$24 sps:$4 sm:$0xff]   ;;  %v4919_v39 = vld [vmem:[%s6944_s1 + $0x580] ss:$8 sps:$4 sm:$0xff]  }
  0x67   : > { %1296 = vmatmul.mubr.bf16.gmra.mxu0 %v5699_v40 }
  0x68   : > { %1409 = vmatmul.mubr.bf16.gmra.mxu1 %v4840_v41  ;;  %1472 = vmatpush1.bf16.msra.mxu0 %v4841_v42  ;;  %v4922_v41 = vld [vmem:[%s6944_s1 + $0x80] ss:$8 sps:$4 sm:$0xff]   ;;  %v4933_v42 = vld [vmem:[%s6944_s1 + $0x174] ss:$8 sps:$4 sm:$0xff]  }
  0x69   : > { %2095 = vmatpush1.bf16.msra.mxu1 %v4844_v43  ;;  %1473 = vmatprep.subr.bf16.mxu0 %v4849_v44  ;;  %v4936_v43 = vld [vmem:[%s6944_s1 + $0x274] ss:$8 sps:$4 sm:$0xff]   ;;  %v5862_v44 = vld [vmem:[%s5526_s8 + $0x40] ss:$24 sps:$4 sm:$0xff]  }
  0x6a   : > { %2096 = vmatprep.subr.bf16.mxu1 %v4852_v45  ;;  %1305 = vmatprep.mubr.bf16.mxu0 %v5715_v46  ;;  %v4928_v45 = vld [vmem:[%s5526_s8] ss:$24 sps:$4 sm:$0xff]  }
  0x6b   : > { %1418 = vmatprep.mubr.bf16.mxu1 %v4855_v47  ;;  %v4931_v47 = vld [vmem:[%s6944_s1 + $0x170] ss:$8 sps:$4 sm:$0xff]  }
  0x6c   : > { %1474 = vmatpush1.bf16.msra.mxu0 %v4847_v48  ;;  %v4934_v48 = vld [vmem:[%s6944_s1 + $0x270] ss:$8 sps:$4 sm:$0xff]  }
  0x6d   : > { %2097 = vmatpush1.bf16.msra.mxu1 %v4850_v50  ;;  %1475 = vmatprep.subr.bf16.mxu0 %v4861_v51  ;;  %v4939_v50 = vld [vmem:[%s6944_s1 + $0x164] ss:$8 sps:$4 sm:$0xff]  }
  0x6e   : > { %2098 = vmatprep.subr.bf16.mxu1 %v4864_v52  ;;  %v4942_v51 = vld [vmem:[%s6944_s1 + $0x264] ss:$8 sps:$4 sm:$0xff]  }
  0x6f   : > { %1306 = vmatmul.mubr.bf16.gmra.mxu0 %v5733_v53  ;;  %v5879_v52 = vld [vmem:[%s5526_s8 + $0x74] ss:$24 sps:$4 sm:$0xff]  }
  0x70   : > { %1419 = vmatmul.mubr.bf16.gmra.mxu1 %v4858_v54  ;;  %1476 = vmatpush2.bf16.msra.mxu0 %v4859_v55  ;;  %v4937_v54 = vld [vmem:[%s6944_s1 + $0x160] ss:$8 sps:$4 sm:$0xff]  }
  0x71   : > { %2099 = vmatpush2.bf16.msra.mxu1 %v4862_v56  ;;  %1477 = vmatprep.subr.bf16.mxu0 %v4867_v57  ;;  %v4940_v55 = vld [vmem:[%s6944_s1 + $0x260] ss:$8 sps:$4 sm:$0xff]   ;;  %v4948_v56 = vld [vmem:[%s6944_s1 + $0x154] ss:$8 sps:$4 sm:$0xff]  }
  0x72   : > { %2100 = vmatprep.subr.bf16.mxu1 %v4870_v58  ;;  %1315 = vmatprep.mubr.bf16.mxu0 %v5749_v59  ;;  %v4951_v57 = vld [vmem:[%s6944_s1 + $0x254] ss:$8 sps:$4 sm:$0xff]   ;;  %v5897_v58 = vld [vmem:[%s5526_s8 + $0x70] ss:$24 sps:$4 sm:$0xff]  }
  0x73   : > { %1428 = vmatprep.mubr.bf16.mxu1 %v4873_v60  ;;  %v4946_v60 = vld [vmem:[%s6944_s1 + $0x150] ss:$8 sps:$4 sm:$0xff]  }
  0x74   : > { %1478 = vmatpush2.bf16.msra.mxu0 %v4865_v61  ;;  %v4949_v61 = vld [vmem:[%s6944_s1 + $0x250] ss:$8 sps:$4 sm:$0xff]  }
  0x75   : > { %2101 = vmatpush2.bf16.msra.mxu1 %v4868_v62  ;;  %1479 = vmatprep.subr.bf16.mxu0 %v4879_v63  ;;  %v4954_v62 = vld [vmem:[%s6944_s1 + $0x144] ss:$8 sps:$4 sm:$0xff]  }
  0x76   : > { %2102 = vmatprep.subr.bf16.mxu1 %v4882_v0  ;;  %v5912_v63 = vld [vmem:[%s5526_s8 + $0xa4] ss:$24 sps:$4 sm:$0xff]   ;;  %v4952_v0 = vld [vmem:[%s6944_s1 + $0x140] ss:$8 sps:$4 sm:$0xff]  }
  0x77   : > { %1316 = vmatmul.mubr.bf16.gmra.mxu0 %v5767_v1 }
  0x78   : > { %1429 = vmatmul.mubr.bf16.gmra.mxu1 %v4876_v2  ;;  %1480 = vmatpush2.bf16.msra.mxu0 %v4877_v3  ;;  %v4955_v2 = vld [vmem:[%s6944_s1 + $0x240] ss:$8 sps:$4 sm:$0xff]   ;;  %v4963_v3 = vld [vmem:[%s6944_s1 + $0x134] ss:$8 sps:$4 sm:$0xff]  }
  0x79   : > { %2103 = vmatpush2.bf16.msra.mxu1 %v4880_v5  ;;  %1481 = vmatprep.subr.bf16.mxu0 %v4885_v6  ;;  %v5931_v5 = vld [vmem:[%s5526_s8 + $0xa0] ss:$24 sps:$4 sm:$0xff]  }
  0x7a   : > { %2104 = vmatprep.subr.bf16.mxu1 %v4888_v7  ;;  %1325 = vmatprep.mubr.bf16.mxu0 %v5783_v8  ;;  %v4961_v6 = vld [vmem:[%s6944_s1 + $0x130] ss:$8 sps:$4 sm:$0xff]  }
  0x7b   : > { %1438 = vmatprep.mubr.bf16.mxu1 %v4891_v9  ;;  %v4964_v7 = vld [vmem:[%s6944_s1 + $0x230] ss:$8 sps:$4 sm:$0xff]   ;;  %v4969_v9 = vld [vmem:[%s6944_s1 + $0x124] ss:$8 sps:$4 sm:$0xff]  }
  0x7c   : > { %1482 = vmatpush2.bf16.msra.mxu0 %v4883_v11  ;;  %v5946_v11 = vld [vmem:[%s5526_s8 + $0xd4] ss:$24 sps:$4 sm:$0xff]  }
  0x7d   : > { %2105 = vmatpush2.bf16.msra.mxu1 %v4886_v12  ;;  %1483 = vmatprep.subr.bf16.mxu0 %v4897_v13  ;;  %v4967_v12 = vld [vmem:[%s6944_s1 + $0x120] ss:$8 sps:$4 sm:$0xff]  }
  0x7e   : > { %2106 = vmatprep.subr.bf16.mxu1 %v4900_v14  ;;  %v4970_v13 = vld [vmem:[%s6944_s1 + $0x220] ss:$8 sps:$4 sm:$0xff]   ;;  %v4978_v14 = vld [vmem:[%s6944_s1 + $0x114] ss:$8 sps:$4 sm:$0xff]  }
  0x7f   : > { %1326 = vmatmul.mubr.bf16.gmra.mxu0 %v5801_v15 }
  0x80   : > { %1439 = vmatmul.mubr.bf16.gmra.mxu1 %v4894_v17  ;;  %1484 = vmatpush2.bf16.msra.mxu0 %v4895_v18  ;;  %v5965_v17 = vld [vmem:[%s5526_s8 + $0xd0] ss:$24 sps:$4 sm:$0xff]  }
  0x81   : > { %2107 = vmatpush2.bf16.msra.mxu1 %v4898_v19  ;;  %1485 = vmatprep.subr.bf16.mxu0 %v4903_v20  ;;  %v4976_v18 = vld [vmem:[%s6944_s1 + $0x110] ss:$8 sps:$4 sm:$0xff]   ;;  %v4984_v20 = vld [vmem:[%s6944_s1 + $0x104] ss:$8 sps:$4 sm:$0xff]  }
  0x82   : > { %2108 = vmatprep.subr.bf16.mxu1 %v4906_v21  ;;  %1335 = vmatprep.mubr.bf16.mxu0 %v4907_v23  ;;  %v4979_v19 = vld [vmem:[%s6944_s1 + $0x210] ss:$8 sps:$4 sm:$0xff]   ;;  %v5980_v21 = vld [vmem:[%s5526_s8 + $0x104] ss:$24 sps:$4 sm:$0xff]   ;;  %v4982_v23 = vld [vmem:[%s6944_s1 + $0x100] ss:$8 sps:$4 sm:$0xff]  }
  0x83   : > { %1448 = vmatprep.mubr.bf16.mxu1 %v4909_v24  ;;  %v4985_v24 = vld [vmem:[%s6944_s1 + $0x200] ss:$8 sps:$4 sm:$0xff]  }
  0x84   : > { %1486 = vmatpush2.bf16.msra.mxu0 %v4901_v25  ;;  %v4993_v25 = vld [vmem:[%s6944_s1 + $0x1f4] ss:$8 sps:$4 sm:$0xff]  }
  0x85   : > { %2109 = vmatpush2.bf16.msra.mxu1 %v4904_v26  ;;  %1487 = vmatprep.subr.bf16.mxu0 %v4915_v27  ;;  %v5999_v26 = vld [vmem:[%s5526_s8 + $0x100] ss:$24 sps:$4 sm:$0xff]  }
  0x86   : > { %2110 = vmatprep.subr.bf16.mxu1 %v4918_v29  ;;  %v4991_v27 = vld [vmem:[%s6944_s1 + $0x1f0] ss:$8 sps:$4 sm:$0xff]  }
  0x87   : > { %1336 = vmatmul.mubr.bf16.gmra.mxu0 %v4911_v30  ;;  %v4994_v29 = vld [vmem:[%s6944_s1 + $0x2f0] ss:$8 sps:$4 sm:$0xff]   ;;  %v4999_v30 = vld [vmem:[%s6944_s1 + $0x1e4] ss:$8 sps:$4 sm:$0xff]  }
  0x88   : > { %1449 = vmatmul.mubr.bf16.gmra.mxu1 %v4912_v31  ;;  %1488 = vmatpush2.bf16.msra.mxu0 %v4913_v32  ;;  %v6014_v31 = vld [vmem:[%s5526_s8 + $0x134] ss:$24 sps:$4 sm:$0xff]   ;;  %v4997_v32 = vld [vmem:[%s6944_s1 + $0x1e0] ss:$8 sps:$4 sm:$0xff]  }
  0x89   : > { %2111 = vmatpush2.bf16.msra.mxu1 %v4916_v33  ;;  %1489 = vmatprep.subr.bf16.mxu0 %v4921_v35  ;;  %v5000_v33 = vld [vmem:[%s6944_s1 + $0x2e0] ss:$8 sps:$4 sm:$0xff]   ;;  %v5008_v35 = vld [vmem:[%s6944_s1 + $0x1d4] ss:$8 sps:$4 sm:$0xff]  }
  0x8a   : > { %2112 = vmatprep.subr.bf16.mxu1 %v4924_v36  ;;  %1491 = vmatprep.mubr.bf16.mxu0 %v5846_v37  ;;  %v6033_v36 = vld [vmem:[%s5526_s8 + $0x130] ss:$24 sps:$4 sm:$0xff]  }
  0x8b   : > { %2114 = vmatprep.mubr.bf16.mxu1 %v4930_v38  ;;  %v5006_v38 = vld [vmem:[%s6944_s1 + $0x1d0] ss:$8 sps:$4 sm:$0xff]  }
  0x8c   : > { %1490 = vmatpush2.bf16.msra.mxu0 %v4919_v39  ;;  %v5009_v39 = vld [vmem:[%s6944_s1 + $0x2d0] ss:$8 sps:$4 sm:$0xff]  }
  0x8d   : > { %2113 = vmatpush2.bf16.msra.mxu1 %v4922_v41  ;;  %2195 = vmatprep.subr.bf16.mxu0 %v4933_v42  ;;  %v5014_v41 = vld [vmem:[%s6944_s1 + $0x1c4] ss:$8 sps:$4 sm:$0xff]  }
  0x8e   : > { %2308 = vmatprep.subr.bf16.mxu1 %v4936_v43  ;;  %v6048_v42 = vld [vmem:[%s5526_s8 + $0x164] ss:$24 sps:$4 sm:$0xff]   ;;  %v5012_v43 = vld [vmem:[%s6944_s1 + $0x1c0] ss:$8 sps:$4 sm:$0xff]  }
  0x8f   : > { %1492 = vmatmul.mubr.bf16.vlgmr.msra.gmra.mxu0 %v5862_v44 }
  0x90   : > { %2115 = vmatmul.mubr.bf16.vlgmr.msra.gmra.mxu1 %v4928_v45  ;;  %2196 = vmatpush1.bf16.msra.mxu0 %v4931_v47  ;;  %v5015_v45 = vld [vmem:[%s6944_s1 + $0x2c0] ss:$8 sps:$4 sm:$0xff]   ;;  %v5023_v47 = vld [vmem:[%s6944_s1 + $0x1b4] ss:$8 sps:$4 sm:$0xff]  }
  0x91   : > { %2309 = vmatpush1.bf16.msra.mxu1 %v4934_v48  ;;  %2197 = vmatprep.subr.bf16.mxu0 %v4939_v50  ;;  %v6067_v48 = vld [vmem:[%s5526_s8 + $0x160] ss:$24 sps:$4 sm:$0xff]  }
  0x92   : > { %2310 = vmatprep.subr.bf16.mxu1 %v4942_v51  ;;  %1501 = vmatprep.mubr.bf16.mxu0 %v5879_v52  ;;  %v5021_v50 = vld [vmem:[%s6944_s1 + $0x1b0] ss:$8 sps:$4 sm:$0xff]  }
  0x93   : > { %2124 = vmatprep.mubr.bf16.mxu1 %v5541_v49  ;;  %v4957_v49 = vld [vmem:[%s6944_s1 + $0x244] ss:$8 sps:$4 sm:$0xff]   ;;  %v5024_v51 = vld [vmem:[%s6944_s1 + $0x2b0] ss:$8 sps:$4 sm:$0xff]  }
  0x94   : > { %2198 = vmatpush1.bf16.msra.mxu0 %v4937_v54  ;;  %v5029_v54 = vld [vmem:[%s6944_s1 + $0x1a4] ss:$8 sps:$4 sm:$0xff]  }
  0x95   : > { %2311 = vmatpush1.bf16.msra.mxu1 %v4940_v55  ;;  %2199 = vmatprep.subr.bf16.mxu0 %v4948_v56  ;;  %v5033_v55 = vld [vmem:[%s5526_s8 + $0x194] ss:$24 sps:$4 sm:$0xff]   ;;  %v5027_v56 = vld [vmem:[%s6944_s1 + $0x1a0] ss:$8 sps:$4 sm:$0xff]  }
  0x96   : > { %2312 = vmatprep.subr.bf16.mxu1 %v4951_v57  ;;  %v5030_v57 = vld [vmem:[%s6944_s1 + $0x2a0] ss:$8 sps:$4 sm:$0xff]  }
  0x97   : > { %1502 = vmatmul.mubr.bf16.gmra.mxu0 %v5897_v58 }
  0x98   : > { %2125 = vmatmul.mubr.bf16.gmra.mxu1 %v5597_v4  ;;  %2200 = vmatpush1.bf16.msra.mxu0 %v4946_v60  ;;  %v4966_v4 = vld [vmem:[%s6944_s1 + $0x234] ss:$8 sps:$4 sm:$0xff]  }
  0x99   : > { %2313 = vmatpush1.bf16.msra.mxu1 %v4949_v61  ;;  %2201 = vmatprep.subr.bf16.mxu0 %v4954_v62  ;;  %v5038_v60 = vld [vmem:[%s6944_s1 + $0x194] ss:$8 sps:$4 sm:$0xff]   ;;  %v5035_v61 = vld [vmem:[%s5526_s8 + $0x190] ss:$24 sps:$4 sm:$0xff]  }
  0x9a   : > { %2314 = vmatprep.subr.bf16.mxu1 %v4957_v49  ;;  %1511 = vmatprep.mubr.bf16.mxu0 %v5912_v63  ;;  %v5036_v62 = vld [vmem:[%s6944_s1 + $0x190] ss:$8 sps:$4 sm:$0xff]  }
  0x9b   : > { %2134 = vmatprep.mubr.bf16.mxu1 %v5613_v10  ;;  %v4972_v10 = vld [vmem:[%s6944_s1 + $0x224] ss:$8 sps:$4 sm:$0xff]   ;;  %v5039_v49 = vld [vmem:[%s6944_s1 + $0x290] ss:$8 sps:$4 sm:$0xff]  }
  0x9c   : > { %2202 = vmatpush1.bf16.msra.mxu0 %v4952_v0  ;;  %v5044_v0 = vld [vmem:[%s6944_s1 + $0x184] ss:$8 sps:$4 sm:$0xff]  }
  0x9d   : > { %2315 = vmatpush1.bf16.msra.mxu1 %v4955_v2  ;;  %2203 = vmatprep.subr.bf16.mxu0 %v4963_v3  ;;  %v5050_v2 = vld [vmem:[%s5526_s8 + $0xc] ss:$24 sps:$4 sm:$0xff]  }
  0x9e   : > { %2316 = vmatprep.subr.bf16.mxu1 %v4966_v4  ;;  %v5053_v3 = vld [vmem:[%s5526_s8 + $0x14] ss:$24 sps:$4 sm:$0xff]   ;;  %v5042_v4 = vld [vmem:[%s6944_s1 + $0x180] ss:$8 sps:$4 sm:$0xff]  }
  0x9f   : > { %1512 = vmatmul.mubr.bf16.gmra.mxu0 %v5931_v5 }
  0xa0   : > { %2135 = vmatmul.mubr.bf16.gmra.mxu1 %v5631_v16  ;;  %2204 = vmatpush1.bf16.msra.mxu0 %v4961_v6  ;;  %v4981_v16 = vld [vmem:[%s6944_s1 + $0x214] ss:$8 sps:$4 sm:$0xff]   ;;  %v5045_v6 = vld [vmem:[%s6944_s1 + $0x280] ss:$8 sps:$4 sm:$0xff]  }
  0xa1   : > { %2317 = vmatpush1.bf16.msra.mxu1 %v4964_v7  ;;  %2205 = vmatprep.subr.bf16.mxu0 %v4969_v9  ;;  %v5056_v7 = vld [vmem:[%s6944_s1 + $0x674] ss:$8 sps:$4 sm:$0xff]   ;;  %v5048_v9 = vld [vmem:[%s5526_s8 + $0x8] ss:$24 sps:$4 sm:$0xff]  }
  0xa2   : > { %2318 = vmatprep.subr.bf16.mxu1 %v4972_v10  ;;  %1521 = vmatprep.mubr.bf16.mxu0 %v5946_v11  ;;  %v5051_v10 = vld [vmem:[%s5526_s8 + $0x10] ss:$24 sps:$4 sm:$0xff]  }
  0xa3   : > { %2144 = vmatprep.mubr.bf16.mxu1 %v5647_v22  ;;  %v4987_v22 = vld [vmem:[%s6944_s1 + $0x204] ss:$8 sps:$4 sm:$0xff]  }
  0xa4   : > { %2206 = vmatpush1.bf16.msra.mxu0 %v4967_v12  ;;  %v5054_v12 = vld [vmem:[%s6944_s1 + $0x670] ss:$8 sps:$4 sm:$0xff]  }
  0xa5   : > { %2319 = vmatpush1.bf16.msra.mxu1 %v4970_v13  ;;  %2207 = vmatprep.subr.bf16.mxu0 %v4978_v14  ;;  %v5057_v13 = vld [vmem:[%s6944_s1 + $0x770] ss:$8 sps:$4 sm:$0xff]   ;;  %v5062_v14 = vld [vmem:[%s6944_s1 + $0x664] ss:$8 sps:$4 sm:$0xff]  }
  0xa6   : > { %2320 = vmatprep.subr.bf16.mxu1 %v4981_v16  ;;  %v5065_v16 = vld [vmem:[%s6944_s1 + $0x764] ss:$8 sps:$4 sm:$0xff]  }
  0xa7   : > { %1522 = vmatmul.mubr.bf16.gmra.mxu0 %v5965_v17 }
  0xa8   : > { %2145 = vmatmul.mubr.bf16.gmra.mxu1 %v5665_v28  ;;  %2208 = vmatpush1.bf16.msra.mxu0 %v4976_v18  ;;  %v4996_v28 = vld [vmem:[%s6944_s1 + $0x2f4] ss:$8 sps:$4 sm:$0xff]   ;;  %v5060_v18 = vld [vmem:[%s6944_s1 + $0x660] ss:$8 sps:$4 sm:$0xff]  }
  0xa9   : > { %2321 = vmatpush1.bf16.msra.mxu1 %v4979_v19  ;;  %2209 = vmatprep.subr.bf16.mxu0 %v4984_v20  ;;  %v5063_v19 = vld [vmem:[%s6944_s1 + $0x760] ss:$8 sps:$4 sm:$0xff]   ;;  %v5068_v20 = vld [vmem:[%s6944_s1 + $0x654] ss:$8 sps:$4 sm:$0xff]  }
  0xaa   : > { %2322 = vmatprep.subr.bf16.mxu1 %v4987_v22  ;;  %1531 = vmatprep.mubr.bf16.mxu0 %v5980_v21  ;;  %v5071_v22 = vld [vmem:[%s6944_s1 + $0x754] ss:$8 sps:$4 sm:$0xff]  }
  0xab   : > { %2154 = vmatprep.mubr.bf16.mxu1 %v5681_v34  ;;  %v5002_v34 = vld [vmem:[%s6944_s1 + $0x2e4] ss:$8 sps:$4 sm:$0xff]  }
  0xac   : > { %2210 = vmatpush1.bf16.msra.mxu0 %v4982_v23  ;;  %v5270_v23 = vld [vmem:[%s5526_s8 + $0x3c] ss:$24 sps:$4 sm:$0xff]  }
  0xad   : > { %2323 = vmatpush1.bf16.msra.mxu1 %v4985_v24  ;;  %2211 = vmatprep.subr.bf16.mxu0 %v4993_v25  ;;  %v5066_v24 = vld [vmem:[%s6944_s1 + $0x650] ss:$8 sps:$4 sm:$0xff]  }
  0xae   : > { %2324 = vmatprep.subr.bf16.mxu1 %v4996_v28  ;;  %v5069_v25 = vld [vmem:[%s6944_s1 + $0x750] ss:$8 sps:$4 sm:$0xff]   ;;  %v5074_v28 = vld [vmem:[%s6944_s1 + $0x644] ss:$8 sps:$4 sm:$0xff]  }
  0xaf   : > { %1532 = vmatmul.mubr.bf16.gmra.mxu0 %v5999_v26 }
  0xb0   : > { %2155 = vmatmul.mubr.bf16.gmra.mxu1 %v5699_v40  ;;  %2212 = vmatpush2.bf16.msra.mxu0 %v4991_v27  ;;  %v5011_v40 = vld [vmem:[%s6944_s1 + $0x2d4] ss:$8 sps:$4 sm:$0xff]   ;;  %v5271_v27 = vld [vmem:[%s5526_s8 + $0x38] ss:$24 sps:$4 sm:$0xff]  }
  0xb1   : > { %2325 = vmatpush2.bf16.msra.mxu1 %v4994_v29  ;;  %2213 = vmatprep.subr.bf16.mxu0 %v4999_v30  ;;  %v5072_v29 = vld [vmem:[%s6944_s1 + $0x640] ss:$8 sps:$4 sm:$0xff]  }
  0xb2   : > { %2326 = vmatprep.subr.bf16.mxu1 %v5002_v34  ;;  %1541 = vmatprep.mubr.bf16.mxu0 %v6014_v31  ;;  %v5075_v30 = vld [vmem:[%s6944_s1 + $0x740] ss:$8 sps:$4 sm:$0xff]   ;;  %v5080_v34 = vld [vmem:[%s6944_s1 + $0x634] ss:$8 sps:$4 sm:$0xff]  }
  0xb3   : > { %2164 = vmatprep.mubr.bf16.mxu1 %v5715_v46  ;;  %v5017_v46 = vld [vmem:[%s6944_s1 + $0x2c4] ss:$8 sps:$4 sm:$0xff]  }
  0xb4   : > { %2214 = vmatpush2.bf16.msra.mxu0 %v4997_v32  ;;  %v5272_v32 = vld [vmem:[%s5526_s8 + $0x6c] ss:$24 sps:$4 sm:$0xff]  }
  0xb5   : > { %2327 = vmatpush2.bf16.msra.mxu1 %v5000_v33  ;;  %2215 = vmatprep.subr.bf16.mxu0 %v5008_v35  ;;  %v5078_v33 = vld [vmem:[%s6944_s1 + $0x630] ss:$8 sps:$4 sm:$0xff]  }
  0xb6   : > { %2328 = vmatprep.subr.bf16.mxu1 %v5011_v40  ;;  %v5081_v35 = vld [vmem:[%s6944_s1 + $0x730] ss:$8 sps:$4 sm:$0xff]   ;;  %v5086_v40 = vld [vmem:[%s6944_s1 + $0x624] ss:$8 sps:$4 sm:$0xff]  }
  0xb7   : > { %1542 = vmatmul.mubr.bf16.gmra.mxu0 %v6033_v36 }
  0xb8   : > { %2165 = vmatmul.mubr.bf16.gmra.mxu1 %v5733_v53  ;;  %2216 = vmatpush2.bf16.msra.mxu0 %v5006_v38  ;;  %v5026_v53 = vld [vmem:[%s6944_s1 + $0x2b4] ss:$8 sps:$4 sm:$0xff]   ;;  %v5273_v38 = vld [vmem:[%s5526_s8 + $0x68] ss:$24 sps:$4 sm:$0xff]  }
  0xb9   : > { %2329 = vmatpush2.bf16.msra.mxu1 %v5009_v39  ;;  %2217 = vmatprep.subr.bf16.mxu0 %v5014_v41  ;;  %v5084_v39 = vld [vmem:[%s6944_s1 + $0x620] ss:$8 sps:$4 sm:$0xff]  }
  0xba   : > { %2330 = vmatprep.subr.bf16.mxu1 %v5017_v46  ;;  %1551 = vmatprep.mubr.bf16.mxu0 %v6048_v42  ;;  %v5087_v41 = vld [vmem:[%s6944_s1 + $0x720] ss:$8 sps:$4 sm:$0xff]   ;;  %v5092_v46 = vld [vmem:[%s6944_s1 + $0x614] ss:$8 sps:$4 sm:$0xff]  }
  0xbb   : > { %2174 = vmatprep.mubr.bf16.mxu1 %v5749_v59  ;;  %v5032_v59 = vld [vmem:[%s6944_s1 + $0x2a4] ss:$8 sps:$4 sm:$0xff]  }
  0xbc   : > { %2218 = vmatpush2.bf16.msra.mxu0 %v5012_v43  ;;  %v5274_v43 = vld [vmem:[%s5526_s8 + $0x9c] ss:$24 sps:$4 sm:$0xff]  }
  0xbd   : > { %2331 = vmatpush2.bf16.msra.mxu1 %v5015_v45  ;;  %2219 = vmatprep.subr.bf16.mxu0 %v5023_v47  ;;  %v5090_v45 = vld [vmem:[%s6944_s1 + $0x610] ss:$8 sps:$4 sm:$0xff]  }
  0xbe   : > { %2332 = vmatprep.subr.bf16.mxu1 %v5026_v53  ;;  %v5093_v47 = vld [vmem:[%s6944_s1 + $0x710] ss:$8 sps:$4 sm:$0xff]   ;;  %v5098_v53 = vld [vmem:[%s6944_s1 + $0x604] ss:$8 sps:$4 sm:$0xff]  }
  0xbf   : > { %1552 = vmatmul.mubr.bf16.gmra.mxu0 %v6067_v48 }
  0xc0   : > { %2175 = vmatmul.mubr.bf16.gmra.mxu1 %v5767_v1  ;;  %2220 = vmatpush2.bf16.msra.mxu0 %v5021_v50  ;;  %v5041_v1 = vld [vmem:[%s6944_s1 + $0x294] ss:$8 sps:$4 sm:$0xff]   ;;  %v5275_v50 = vld [vmem:[%s5526_s8 + $0x98] ss:$24 sps:$4 sm:$0xff]  }
  0xc1   : > { %2333 = vmatpush2.bf16.msra.mxu1 %v5024_v51  ;;  %2221 = vmatprep.subr.bf16.mxu0 %v5029_v54  ;;  %v5096_v51 = vld [vmem:[%s6944_s1 + $0x600] ss:$8 sps:$4 sm:$0xff]  }
  0xc2   : > { %2334 = vmatprep.subr.bf16.mxu1 %v5032_v59  ;;  %1561 = vmatprep.mubr.bf16.mxu0 %v5033_v55  ;;  %v5099_v54 = vld [vmem:[%s6944_s1 + $0x700] ss:$8 sps:$4 sm:$0xff]   ;;  %v5104_v59 = vld [vmem:[%s6944_s1 + $0x6f4] ss:$8 sps:$4 sm:$0xff]   ;;  %v5276_v55 = vld [vmem:[%s5526_s8 + $0xcc] ss:$24 sps:$4 sm:$0xff]  }
  0xc3   : > { %2184 = vmatprep.mubr.bf16.mxu1 %v5783_v8  ;;  %v5047_v8 = vld [vmem:[%s6944_s1 + $0x284] ss:$8 sps:$4 sm:$0xff]  }
  0xc4   : > { %2222 = vmatpush2.bf16.msra.mxu0 %v5027_v56  ;;  %v5102_v56 = vld [vmem:[%s6944_s1 + $0x6f0] ss:$8 sps:$4 sm:$0xff]  }
  0xc5   : > { %2335 = vmatpush2.bf16.msra.mxu1 %v5030_v57  ;;  %2223 = vmatprep.subr.bf16.mxu0 %v5038_v60  ;;  %v5105_v57 = vld [vmem:[%s6944_s1 + $0x7f0] ss:$8 sps:$4 sm:$0xff]   ;;  %v5110_v60 = vld [vmem:[%s6944_s1 + $0x6e4] ss:$8 sps:$4 sm:$0xff]  }
  0xc6   : > { %2336 = vmatprep.subr.bf16.mxu1 %v5041_v1  ;;  %v5277_v1 = vld [vmem:[%s5526_s8 + $0xc8] ss:$24 sps:$4 sm:$0xff]  }
  0xc7   : > { %1562 = vmatmul.mubr.bf16.gmra.mxu0 %v5035_v61  ;;  %v5108_v61 = vld [vmem:[%s6944_s1 + $0x6e0] ss:$8 sps:$4 sm:$0xff]  }
  0xc8   : > { %2185 = vmatmul.mubr.bf16.gmra.mxu1 %v5801_v15  ;;  %2224 = vmatpush2.bf16.msra.mxu0 %v5036_v62  ;;  %v5059_v15 = vld [vmem:[%s6944_s1 + $0x774] ss:$8 sps:$4 sm:$0xff]   ;;  %v5111_v62 = vld [vmem:[%s6944_s1 + $0x7e0] ss:$8 sps:$4 sm:$0xff]  }
  0xc9   : > { %2337 = vmatpush2.bf16.msra.mxu1 %v5039_v49  ;;  %2225 = vmatprep.subr.bf16.mxu0 %v5044_v0  ;;  %v5116_v49 = vld [vmem:[%s6944_s1 + $0x6d4] ss:$8 sps:$4 sm:$0xff]  }
  0xca   : > { %2338 = vmatprep.subr.bf16.mxu1 %v5047_v8  ;;  %2227 = vmatprep.mubr.bf16.mxu0 %v5050_v2  ;;  %v5278_v0 = vld [vmem:[%s5526_s8 + $0xfc] ss:$24 sps:$4 sm:$0xff]   ;;  %v5114_v8 = vld [vmem:[%s6944_s1 + $0x6d0] ss:$8 sps:$4 sm:$0xff]  }
  0xcb   : > { %2340 = vmatprep.mubr.bf16.mxu1 %v5053_v3  ;;  %v5117_v2 = vld [vmem:[%s6944_s1 + $0x7d0] ss:$8 sps:$4 sm:$0xff]   ;;  %v5122_v3 = vld [vmem:[%s6944_s1 + $0x6c4] ss:$8 sps:$4 sm:$0xff]  }
  0xcc   : > { %2226 = vmatpush2.bf16.msra.mxu0 %v5042_v4  ;;  %v5279_v4 = vld [vmem:[%s5526_s8 + $0xf8] ss:$24 sps:$4 sm:$0xff]  }
  0xcd   : > { %2339 = vmatpush2.bf16.msra.mxu1 %v5045_v6  ;;  %3286 = vmatprep.subr.bf16.mxu0 %v5056_v7  ;;  %v5120_v6 = vld [vmem:[%s6944_s1 + $0x6c0] ss:$8 sps:$4 sm:$0xff]  }
  0xce   : > { %3399 = vmatprep.subr.bf16.mxu1 %v5059_v15  ;;  %v5123_v7 = vld [vmem:[%s6944_s1 + $0x7c0] ss:$8 sps:$4 sm:$0xff]   ;;  %v5128_v15 = vld [vmem:[%s6944_s1 + $0x6b4] ss:$8 sps:$4 sm:$0xff]  }
  0xcf   : > { %2228 = vmatmul.mubr.bf16.vlgmr.msra.gmra.mxu0 %v5048_v9  ;;  %v5280_v9 = vld [vmem:[%s5526_s8 + $0x12c] ss:$24 sps:$4 sm:$0xff]  }
  0xd0   : > { %2341 = vmatmul.mubr.bf16.vlgmr.msra.gmra.mxu1 %v5051_v10  ;;  %3287 = vmatpush1.bf16.msra.mxu0 %v5054_v12  ;;  %v5126_v10 = vld [vmem:[%s6944_s1 + $0x6b0] ss:$8 sps:$4 sm:$0xff]  }
  0xd1   : > { %3400 = vmatpush1.bf16.msra.mxu1 %v5057_v13  ;;  %3288 = vmatprep.subr.bf16.mxu0 %v5062_v14  ;;  %v5129_v12 = vld [vmem:[%s6944_s1 + $0x7b0] ss:$8 sps:$4 sm:$0xff]   ;;  %v5134_v13 = vld [vmem:[%s6944_s1 + $0x6a4] ss:$8 sps:$4 sm:$0xff]   ;;  %v5281_v14 = vld [vmem:[%s5526_s8 + $0x128] ss:$24 sps:$4 sm:$0xff]  }
  0xd2   : > { %3401 = vmatprep.subr.bf16.mxu1 %v5065_v16  ;;  %2237 = vmatprep.mubr.bf16.mxu0 %v5270_v23  ;;  %v5132_v16 = vld [vmem:[%s6944_s1 + $0x6a0] ss:$8 sps:$4 sm:$0xff]   ;;  %v5141_v23 = vld [vmem:[%s6944_s1 + $0x790] ss:$8 sps:$4 sm:$0xff]  }
  0xd3   : > { %2350 = vmatprep.mubr.bf16.mxu1 %v5846_v37  ;;  %v5077_v37 = vld [vmem:[%s6944_s1 + $0x744] ss:$8 sps:$4 sm:$0xff]  }
  0xd4   : > { %3289 = vmatpush1.bf16.msra.mxu0 %v5060_v18  ;;  %v5135_v18 = vld [vmem:[%s6944_s1 + $0x7a0] ss:$8 sps:$4 sm:$0xff]  }
  0xd5   : > { %3402 = vmatpush1.bf16.msra.mxu1 %v5063_v19  ;;  %3290 = vmatprep.subr.bf16.mxu0 %v5068_v20  ;;  %v5140_v19 = vld [vmem:[%s6944_s1 + $0x694] ss:$8 sps:$4 sm:$0xff]  }
  0xd6   : > { %3403 = vmatprep.subr.bf16.mxu1 %v5071_v22  ;;  %v5282_v20 = vld [vmem:[%s5526_s8 + $0x15c] ss:$24 sps:$4 sm:$0xff]   ;;  %v5138_v22 = vld [vmem:[%s6944_s1 + $0x690] ss:$8 sps:$4 sm:$0xff]  }
  0xd7   : > { %2238 = vmatmul.mubr.bf16.gmra.mxu0 %v5271_v27  ;;  %v5144_v27 = vld [vmem:[%s6944_s1 + $0x680] ss:$8 sps:$4 sm:$0xff]  }
  0xd8   : > { %2351 = vmatmul.mubr.bf16.gmra.mxu1 %v5862_v44  ;;  %3291 = vmatpush1.bf16.msra.mxu0 %v5066_v24  ;;  %v5083_v44 = vld [vmem:[%s6944_s1 + $0x734] ss:$8 sps:$4 sm:$0xff]   ;;  %v5146_v24 = vld [vmem:[%s6944_s1 + $0x684] ss:$8 sps:$4 sm:$0xff]  }
  0xd9   : > { %3404 = vmatpush1.bf16.msra.mxu1 %v5069_v25  ;;  %3292 = vmatprep.subr.bf16.mxu0 %v5074_v28  ;;  %v5152_v25 = vld [vmem:[%s5526_s8 + $0x64] ss:$24 sps:$4 sm:$0xff]  }
  0xda   : > { %3405 = vmatprep.subr.bf16.mxu1 %v5077_v37  ;;  %2247 = vmatprep.mubr.bf16.mxu0 %v5272_v32  ;;  %v5155_v28 = vld [vmem:[%s5526_s8 + $0x6c] ss:$24 sps:$4 sm:$0xff]   ;;  %v5283_v37 = vld [vmem:[%s5526_s8 + $0x158] ss:$24 sps:$4 sm:$0xff]  }
  0xdb   : > { %2360 = vmatprep.mubr.bf16.mxu1 %v5879_v52  ;;  %v5089_v52 = vld [vmem:[%s6944_s1 + $0x724] ss:$8 sps:$4 sm:$0xff]  }
  0xdc   : > { %3293 = vmatpush1.bf16.msra.mxu0 %v5072_v29  ;;  %v5147_v29 = vld [vmem:[%s6944_s1 + $0x780] ss:$8 sps:$4 sm:$0xff]   ;;  %v5161_v32 = vld [vmem:[%s6944_s1 + $0x864] ss:$8 sps:$4 sm:$0xff]  }
  0xdd   : > { %3406 = vmatpush1.bf16.msra.mxu1 %v5075_v30  ;;  %3294 = vmatprep.subr.bf16.mxu0 %v5080_v34  ;;  %v5158_v30 = vld [vmem:[%s6944_s1 + $0x874] ss:$8 sps:$4 sm:$0xff]   ;;  %v5153_v34 = vld [vmem:[%s5526_s8 + $0x68] ss:$24 sps:$4 sm:$0xff]  }
  0xde   : > { %3407 = vmatprep.subr.bf16.mxu1 %v5083_v44  ;;  %v5156_v44 = vld [vmem:[%s6944_s1 + $0x870] ss:$8 sps:$4 sm:$0xff]  }
  0xdf   : > { %2248 = vmatmul.mubr.bf16.gmra.mxu0 %v5273_v38 }
  0xe0   : > { %2361 = vmatmul.mubr.bf16.gmra.mxu1 %v5897_v58  ;;  %3295 = vmatpush1.bf16.msra.mxu0 %v5078_v33  ;;  %v5095_v58 = vld [vmem:[%s6944_s1 + $0x714] ss:$8 sps:$4 sm:$0xff]  }
  0xe1   : > { %3408 = vmatpush1.bf16.msra.mxu1 %v5081_v35  ;;  %3296 = vmatprep.subr.bf16.mxu0 %v5086_v40  ;;  %v5162_v33 = vld [vmem:[%s5526_s8 + $0x94] ss:$24 sps:$4 sm:$0xff]  }
  0xe2   : > { %3409 = vmatprep.subr.bf16.mxu1 %v5089_v52  ;;  %2257 = vmatprep.mubr.bf16.mxu0 %v5274_v43  ;;  %v5164_v35 = vld [vmem:[%s5526_s8 + $0x9c] ss:$24 sps:$4 sm:$0xff]  }
  0xe3   : > { %2370 = vmatprep.mubr.bf16.mxu1 %v5912_v63  ;;  %v5101_v63 = vld [vmem:[%s6944_s1 + $0x704] ss:$8 sps:$4 sm:$0xff]  }
  0xe4   : > { %3297 = vmatpush1.bf16.msra.mxu0 %v5084_v39  ;;  %v5159_v39 = vld [vmem:[%s6944_s1 + $0x860] ss:$8 sps:$4 sm:$0xff]  }
  0xe5   : > { %3410 = vmatpush1.bf16.msra.mxu1 %v5087_v41  ;;  %3298 = vmatprep.subr.bf16.mxu0 %v5092_v46 }
  0xe6   : > { %3411 = vmatprep.subr.bf16.mxu1 %v5095_v58  ;;  %v5170_v58 = vld [vmem:[%s6944_s1 + $0x854] ss:$8 sps:$4 sm:$0xff]  }
  0xe7   : > { %2258 = vmatmul.mubr.bf16.gmra.mxu0 %v5275_v50 }
  0xe8   : > { %2371 = vmatmul.mubr.bf16.gmra.mxu1 %v5931_v5  ;;  %3299 = vmatpush1.bf16.msra.mxu0 %v5090_v45  ;;  %v5107_v5 = vld [vmem:[%s6944_s1 + $0x7f4] ss:$8 sps:$4 sm:$0xff]  }
  0xe9   : > { %3412 = vmatpush1.bf16.msra.mxu1 %v5093_v47  ;;  %3300 = vmatprep.subr.bf16.mxu0 %v5098_v53  ;;  %v5166_v53 = vld [vmem:[%s5526_s8 + $0x90] ss:$24 sps:$4 sm:$0xff]  }
  0xea   : > { %3413 = vmatprep.subr.bf16.mxu1 %v5101_v63  ;;  %2267 = vmatprep.mubr.bf16.mxu0 %v5276_v55  ;;  %v5167_v63 = vld [vmem:[%s5526_s8 + $0x98] ss:$24 sps:$4 sm:$0xff]  }
  0xeb   : > { %2380 = vmatprep.mubr.bf16.mxu1 %v5946_v11  ;;  %v5113_v11 = vld [vmem:[%s6944_s1 + $0x7e4] ss:$8 sps:$4 sm:$0xff]  }
  0xec   : > { %3301 = vmatpush1.bf16.msra.mxu0 %v5096_v51  ;;  %v5168_v51 = vld [vmem:[%s6944_s1 + $0x850] ss:$8 sps:$4 sm:$0xff]  }
  0xed   : > { %3414 = vmatpush1.bf16.msra.mxu1 %v5099_v54  ;;  %3302 = vmatprep.subr.bf16.mxu0 %v5104_v59 }
  0xee   : > { %3415 = vmatprep.subr.bf16.mxu1 %v5107_v5  ;;  %v5173_v5 = vld [vmem:[%s6944_s1 + $0x844] ss:$8 sps:$4 sm:$0xff]  }
  0xef   : > { %2268 = vmatmul.mubr.bf16.gmra.mxu0 %v5277_v1 }
  0xf0   : > { %2381 = vmatmul.mubr.bf16.gmra.mxu1 %v5965_v17  ;;  %3303 = vmatpush2.bf16.msra.mxu0 %v5102_v56  ;;  %v5119_v17 = vld [vmem:[%s6944_s1 + $0x7d4] ss:$8 sps:$4 sm:$0xff]  }
  0xf1   : > { %3416 = vmatpush2.bf16.msra.mxu1 %v5105_v57  ;;  %3304 = vmatprep.subr.bf16.mxu0 %v5110_v60  ;;  %v5174_v56 = vld [vmem:[%s5526_s8 + $0xc4] ss:$24 sps:$4 sm:$0xff]  }
  0xf2   : > { %3417 = vmatprep.subr.bf16.mxu1 %v5113_v11  ;;  %2277 = vmatprep.mubr.bf16.mxu0 %v5278_v0  ;;  %v5176_v57 = vld [vmem:[%s5526_s8 + $0xcc] ss:$24 sps:$4 sm:$0xff]  }
  0xf3   : > { %2390 = vmatprep.mubr.bf16.mxu1 %v5980_v21  ;;  %v5125_v21 = vld [vmem:[%s6944_s1 + $0x7c4] ss:$8 sps:$4 sm:$0xff]  }
  0xf4   : > { %3305 = vmatpush2.bf16.msra.mxu0 %v5108_v61  ;;  %v5171_v61 = vld [vmem:[%s6944_s1 + $0x840] ss:$8 sps:$4 sm:$0xff]  }
  0xf5   : > { %3418 = vmatpush2.bf16.msra.mxu1 %v5111_v62  ;;  %3306 = vmatprep.subr.bf16.mxu0 %v5116_v49 }
  0xf6   : > { %3419 = vmatprep.subr.bf16.mxu1 %v5119_v17  ;;  %v5182_v17 = vld [vmem:[%s6944_s1 + $0x834] ss:$8 sps:$4 sm:$0xff]  }
  0xf7   : > { %2278 = vmatmul.mubr.bf16.gmra.mxu0 %v5279_v4 }
  0xf8   : > { %2391 = vmatmul.mubr.bf16.gmra.mxu1 %v5999_v26  ;;  %3307 = vmatpush2.bf16.msra.mxu0 %v5114_v8  ;;  %v5131_v26 = vld [vmem:[%s6944_s1 + $0x7b4] ss:$8 sps:$4 sm:$0xff]  }
  0xf9   : > { %3420 = vmatpush2.bf16.msra.mxu1 %v5117_v2  ;;  %3308 = vmatprep.subr.bf16.mxu0 %v5122_v3  ;;  %v5178_v3 = vld [vmem:[%s5526_s8 + $0xc0] ss:$24 sps:$4 sm:$0xff]  }
  0xfa   : > { %3421 = vmatprep.subr.bf16.mxu1 %v5125_v21  ;;  %2287 = vmatprep.mubr.bf16.mxu0 %v5280_v9  ;;  %v5179_v21 = vld [vmem:[%s5526_s8 + $0xc8] ss:$24 sps:$4 sm:$0xff]  }
  0xfb   : > { %2400 = vmatprep.mubr.bf16.mxu1 %v6014_v31  ;;  %v5137_v31 = vld [vmem:[%s6944_s1 + $0x7a4] ss:$8 sps:$4 sm:$0xff]  }
  0xfc   : > { %3309 = vmatpush2.bf16.msra.mxu0 %v5120_v6  ;;  %v5180_v6 = vld [vmem:[%s6944_s1 + $0x830] ss:$8 sps:$4 sm:$0xff]  }
  0xfd   : > { %3422 = vmatpush2.bf16.msra.mxu1 %v5123_v7  ;;  %3310 = vmatprep.subr.bf16.mxu0 %v5128_v15 }
  0xfe   : > { %3423 = vmatprep.subr.bf16.mxu1 %v5131_v26  ;;  %v5185_v26 = vld [vmem:[%s6944_s1 + $0x824] ss:$8 sps:$4 sm:$0xff]  }
  0xff   : > { %2288 = vmatmul.mubr.bf16.gmra.mxu0 %v5281_v14 }
 0x100   : > { %2401 = vmatmul.mubr.bf16.gmra.mxu1 %v6033_v36  ;;  %3311 = vmatpush2.bf16.msra.mxu0 %v5126_v10  ;;  %v5143_v36 = vld [vmem:[%s6944_s1 + $0x794] ss:$8 sps:$4 sm:$0xff]  }
 0x101   : > { %3424 = vmatpush2.bf16.msra.mxu1 %v5129_v12  ;;  %3312 = vmatprep.subr.bf16.mxu0 %v5134_v13  ;;  %v5186_v10 = vld [vmem:[%s5526_s8 + $0xf4] ss:$24 sps:$4 sm:$0xff]  }
 0x102   : > { %3425 = vmatprep.subr.bf16.mxu1 %v5137_v31  ;;  %2297 = vmatprep.mubr.bf16.mxu0 %v5282_v20  ;;  %v5188_v12 = vld [vmem:[%s5526_s8 + $0xfc] ss:$24 sps:$4 sm:$0xff]  }
 0x103   : > { %2410 = vmatprep.mubr.bf16.mxu1 %v6048_v42  ;;  %v5149_v42 = vld [vmem:[%s6944_s1 + $0x784] ss:$8 sps:$4 sm:$0xff]  }
 0x104   : > { %3313 = vmatpush2.bf16.msra.mxu0 %v5132_v16  ;;  %v5183_v16 = vld [vmem:[%s6944_s1 + $0x820] ss:$8 sps:$4 sm:$0xff]  }
 0x105   : > { %3426 = vmatpush2.bf16.msra.mxu1 %v5135_v18  ;;  %3314 = vmatprep.subr.bf16.mxu0 %v5140_v19 }
 0x106   : > { %3427 = vmatprep.subr.bf16.mxu1 %v5143_v36  ;;  %v5194_v36 = vld [vmem:[%s6944_s1 + $0x814] ss:$8 sps:$4 sm:$0xff]  }
 0x107   : > { %2298 = vmatmul.mubr.bf16.gmra.mxu0 %v5283_v37 }
 0x108   : > { %2411 = vmatmul.mubr.bf16.gmra.mxu1 %v6067_v48  ;;  %3315 = vmatpush2.bf16.msra.mxu0 %v5138_v22  ;;  %v5150_v48 = vld [vmem:[%s5526_s8 + $0x60] ss:$24 sps:$4 sm:$0xff]  }
 0x109   : > { %3428 = vmatpush2.bf16.msra.mxu1 %v5141_v23  ;;  %3316 = vmatprep.subr.bf16.mxu0 %v5146_v24  ;;  %v5190_v24 = vld [vmem:[%s5526_s8 + $0xf0] ss:$24 sps:$4 sm:$0xff]  }
 0x10a   : > { %3429 = vmatprep.subr.bf16.mxu1 %v5149_v42  ;;  %3318 = vmatprep.mubr.bf16.mxu0 %v5152_v25  ;;  %v5191_v42 = vld [vmem:[%s5526_s8 + $0xf8] ss:$24 sps:$4 sm:$0xff]  }
 0x10b   : > { %3431 = vmatprep.mubr.bf16.mxu1 %v5155_v28  ;;  %v5192_v28 = vld [vmem:[%s6944_s1 + $0x810] ss:$8 sps:$4 sm:$0xff]  }
 0x10c   : > { %3317 = vmatpush2.bf16.msra.mxu0 %v5144_v27 }
 0x10d   : > { %3430 = vmatpush2.bf16.msra.mxu1 %v5147_v29  ;;  %3512 = vmatprep.subr.bf16.mxu0 %v5158_v30  ;;  %v5197_v29 = vld [vmem:[%s6944_s1 + $0x804] ss:$8 sps:$4 sm:$0xff]  }
 0x10e   : > { %4611 = vmatprep.subr.bf16.mxu1 %v5158_v30 }
 0x10f   : > { %v1267_v40 = vpop.f32.mrf.mxu0  ;;  %3319 = vmatmul.mubr.bf16.vlgmr.msra.gmra.mxu0 %v5150_v48  ;;  %v5200_v48 = vld [vmem:[%s5526_s8 + $0x124] ss:$24 sps:$4 sm:$0xff]  }
 0x110   : > { %v1380_v52 = vpop.f32.mrf.mxu1  ;;  %3432 = vmatmul.mubr.bf16.vlgmr.msra.gmra.mxu1 %v5153_v34  ;;  %3513 = vmatpush1.bf16.msra.mxu0 %v5156_v44  ;;  %v5203_v34 = vld [vmem:[%s5526_s8 + $0x12c] ss:$24 sps:$4 sm:$0xff]  }
 0x111   : > { %v6356_v38 = vadd.f32 %v1380_v52, %v1267_v40  ;;  %4627 = vmatpush1.bf16.msra.mxu1 %v5156_v44  ;;  %v1269_v41 = vpop.f32.mrf.mxu0  ;;  %3514 = vmatprep.subr.bf16.mxu0 %v5161_v32 }
 0x112   : > { %v1382_v46 = vpop.f32.mrf.mxu1  ;;  %4612 = vmatprep.subr.bf16.mxu1 %v5161_v32  ;;  %3328 = vmatprep.mubr.bf16.mxu0 %v5162_v33 }
 0x113   : > { %v6364_v43 = vadd.f32 %v1382_v46, %v1269_v41  ;;  %3441 = vmatprep.mubr.bf16.mxu1 %v5164_v35  ;;  %v1271_v45 = vpop.f32.mrf.mxu0  ;;  %v5195_v35 = vld [vmem:[%s6944_s1 + $0x800] ss:$8 sps:$4 sm:$0xff]  }
 0x114   : > { %v1384_v47 = vpop.f32.mrf.mxu1  ;;  %3515 = vmatpush1.bf16.msra.mxu0 %v5159_v39 }
 0x115   : > { %v6368_v50 = vadd.f32 %v1384_v47, %v1271_v45  ;;  %4628 = vmatpush1.bf16.msra.mxu1 %v5159_v39  ;;  %v1273_v54 = vpop.f32.mrf.mxu0  ;;  %3516 = vmatprep.subr.bf16.mxu0 %v5170_v58  ;;  %v5206_v39 = vld [vmem:[%s6944_s1 + $0x8f4] ss:$8 sps:$4 sm:$0xff]   ;;  %v5198_v45 = vld [vmem:[%s5526_s8 + $0x120] ss:$24 sps:$4 sm:$0xff]  }
 0x116   : > { %v1386_v59 = vpop.f32.mrf.mxu1  ;;  %4613 = vmatprep.subr.bf16.mxu1 %v5170_v58  ;;  %v5201_v47 = vld [vmem:[%s5526_s8 + $0x128] ss:$24 sps:$4 sm:$0xff]  }
 0x117   : > { %v6376_v55 = vadd.f32 %v1386_v59, %v1273_v54  ;;  %v1277_v60 = vpop.f32.mrf.mxu0  ;;  %3329 = vmatmul.mubr.bf16.gmra.mxu0 %v5166_v53  ;;  %v5209_v59 = vld [vmem:[%s6944_s1 + $0x8e4] ss:$8 sps:$4 sm:$0xff]  }
 0x118   : > { %v1390_v11 = vpop.f32.mrf.mxu1  ;;  %3442 = vmatmul.mubr.bf16.gmra.mxu1 %v5167_v63  ;;  %3517 = vmatpush1.bf16.msra.mxu0 %v5168_v51  ;;  %v5204_v63 = vld [vmem:[%s6944_s1 + $0x8f0] ss:$8 sps:$4 sm:$0xff]  }
 0x119   : > { %v6380_v1 = vadd.f32 %v1390_v11, %v1277_v60  ;;  %4629 = vmatpush1.bf16.msra.mxu1 %v5168_v51  ;;  %v1279_v62 = vpop.f32.mrf.mxu0  ;;  %3518 = vmatprep.subr.bf16.mxu0 %v5173_v5 }
 0x11a   : > { %v1392_v49 = vpop.f32.mrf.mxu1  ;;  %4614 = vmatprep.subr.bf16.mxu1 %v5173_v5  ;;  %3338 = vmatprep.mubr.bf16.mxu0 %v5174_v56  ;;  %v5212_v56 = vld [vmem:[%s5526_s8 + $0x154] ss:$24 sps:$4 sm:$0xff]  }
 0x11b   : > { %v6388_v0 = vadd.f32 %v1392_v49, %v1279_v62  ;;  %3451 = vmatprep.mubr.bf16.mxu1 %v5176_v57  ;;  %v1281_v8 = vpop.f32.mrf.mxu0  ;;  %v5215_v57 = vld [vmem:[%s5526_s8 + $0x15c] ss:$24 sps:$4 sm:$0xff]   ;;  %v5207_v62 = vld [vmem:[%s6944_s1 + $0x8e0] ss:$8 sps:$4 sm:$0xff]  }
 0x11c   : > { %v1394_v2 = vpop.f32.mrf.mxu1  ;;  %3519 = vmatpush1.bf16.msra.mxu0 %v5171_v61 }
 0x11d   : > { %v6392_v4 = vadd.f32 %v1394_v2, %v1281_v8  ;;  %4630 = vmatpush1.bf16.msra.mxu1 %v5171_v61  ;;  %v1283_v7 = vpop.f32.mrf.mxu0  ;;  %3520 = vmatprep.subr.bf16.mxu0 %v5182_v17  ;;  %v5218_v8 = vld [vmem:[%s6944_s1 + $0x8d4] ss:$8 sps:$4 sm:$0xff]  }
 0x11e   : > { %v1396_v15 = vpop.f32.mrf.mxu1  ;;  %4615 = vmatprep.subr.bf16.mxu1 %v5182_v17 }
 0x11f   : > { %v6400_v9 = vadd.f32 %v1396_v15, %v1283_v7  ;;  %v1287_v13 = vpop.f32.mrf.mxu0  ;;  %3339 = vmatmul.mubr.bf16.gmra.mxu0 %v5178_v3  ;;  %v5213_v7 = vld [vmem:[%s5526_s8 + $0x158] ss:$24 sps:$4 sm:$0xff]  }
 0x120   : > { %v1400_v31 = vpop.f32.mrf.mxu1  ;;  %3452 = vmatmul.mubr.bf16.gmra.mxu1 %v5179_v21  ;;  %3521 = vmatpush1.bf16.msra.mxu0 %v5180_v6 }
 0x121   : > { %v6404_v14 = vadd.f32 %v1400_v31, %v1287_v13  ;;  %4631 = vmatpush1.bf16.msra.mxu1 %v5180_v6  ;;  %v1289_v18 = vpop.f32.mrf.mxu0  ;;  %3522 = vmatprep.subr.bf16.mxu0 %v5185_v26  ;;  %v5210_v6 = vld [vmem:[%s5526_s8 + $0x150] ss:$24 sps:$4 sm:$0xff]   ;;  %v5221_v13 = vld [vmem:[%s6944_s1 + $0x8c4] ss:$8 sps:$4 sm:$0xff]  }
 0x122   : > { %v1402_v19 = vpop.f32.mrf.mxu1  ;;  %4616 = vmatprep.subr.bf16.mxu1 %v5185_v26  ;;  %3348 = vmatprep.mubr.bf16.mxu0 %v5186_v10  ;;  %v5216_v26 = vld [vmem:[%s6944_s1 + $0x8d0] ss:$8 sps:$4 sm:$0xff]  }
 0x123   : > { %v6412_v20 = vadd.f32 %v1402_v19, %v1289_v18  ;;  %3461 = vmatprep.mubr.bf16.mxu1 %v5188_v12  ;;  %v1291_v22 = vpop.f32.mrf.mxu0  ;;  %v5227_v18 = vld [vmem:[%s5526_s8 + $0x18c] ss:$24 sps:$4 sm:$0xff]  }
 0x124   : > { %v1404_v23 = vpop.f32.mrf.mxu1  ;;  %3523 = vmatpush1.bf16.msra.mxu0 %v5183_v16 }
 0x125   : > { %v6416_v25 = vadd.f32 %v1404_v23, %v1291_v22  ;;  %4632 = vmatpush1.bf16.msra.mxu1 %v5183_v16  ;;  %v1293_v37 = vpop.f32.mrf.mxu0  ;;  %3524 = vmatprep.subr.bf16.mxu0 %v5194_v36  ;;  %v5224_v16 = vld [vmem:[%s5526_s8 + $0x184] ss:$24 sps:$4 sm:$0xff]   ;;  %v5219_v23 = vld [vmem:[%s6944_s1 + $0x8c0] ss:$8 sps:$4 sm:$0xff]  }
 0x126   : > { %v1406_v27 = vpop.f32.mrf.mxu1  ;;  %4617 = vmatprep.subr.bf16.mxu1 %v5194_v36 }
 0x127   : > { %v6424_v30 = vadd.f32 %v1406_v27, %v1293_v37  ;;  %v1297_v44 = vpop.f32.mrf.mxu0  ;;  %3349 = vmatmul.mubr.bf16.gmra.mxu0 %v5190_v24 }
 0x128   : > { %v1410_v32 = vpop.f32.mrf.mxu1  ;;  %3462 = vmatmul.mubr.bf16.gmra.mxu1 %v5191_v42  ;;  %3525 = vmatpush1.bf16.msra.mxu0 %v5192_v28 }
 0x129   : > { %v6428_v33 = vadd.f32 %v1410_v32, %v1297_v44  ;;  %4633 = vmatpush1.bf16.msra.mxu1 %v5192_v28  ;;  %v1299_v40 = vpop.f32.mrf.mxu0  ;;  %3526 = vmatprep.subr.bf16.mxu0 %v5197_v29  ;;  %v5230_v28 = vld [vmem:[%s6944_s1 + $0x8b4] ss:$8 sps:$4 sm:$0xff]   ;;  %v5228_v32 = vld [vmem:[%s6944_s1 + $0x8b0] ss:$8 sps:$4 sm:$0xff]  }
 0x12a   : > { %v1412_v52 = vpop.f32.mrf.mxu1  ;;  %4618 = vmatprep.subr.bf16.mxu1 %v5197_v29  ;;  %3358 = vmatprep.mubr.bf16.mxu0 %v5200_v48  ;;  %v5222_v48 = vld [vmem:[%s5526_s8 + $0x180] ss:$24 sps:$4 sm:$0xff]  }
 0x12b   : > { %v6436_v41 = vadd.f32 %v1412_v52, %v1299_v40  ;;  %3471 = vmatprep.mubr.bf16.mxu1 %v5203_v34  ;;  %v1301_v46 = vpop.f32.mrf.mxu0  ;;  %v5225_v34 = vld [vmem:[%s5526_s8 + $0x188] ss:$24 sps:$4 sm:$0xff]   ;;  %v5233_v52 = vld [vmem:[%s6944_s1 + $0x8a4] ss:$8 sps:$4 sm:$0xff]  }
 0x12c   : > { %v1414_v58 = vpop.f32.mrf.mxu1  ;;  %3527 = vmatpush1.bf16.msra.mxu0 %v5195_v35 }
 0x12d   : > { %v6440_v53 = vadd.f32 %v1414_v58, %v1301_v46  ;;  %4634 = vmatpush1.bf16.msra.mxu1 %v5195_v35  ;;  %v1303_v51 = vpop.f32.mrf.mxu0  ;;  %3528 = vmatprep.subr.bf16.mxu0 %v5206_v39  ;;  %v5236_v46 = vld [vmem:[%s5526_s8 + $0x1b4] ss:$24 sps:$4 sm:$0xff]  }
 0x12e   : > { %v1416_v54 = vpop.f32.mrf.mxu1  ;;  %4619 = vmatprep.subr.bf16.mxu1 %v5206_v39  ;;  %v5239_v58 = vld [vmem:[%s5526_s8 + $0x1bc] ss:$24 sps:$4 sm:$0xff]  }
 0x12f   : > { %v6448_v5 = vadd.f32 %v1416_v54, %v1303_v51  ;;  %v1307_v60 = vpop.f32.mrf.mxu0  ;;  %3359 = vmatmul.mubr.bf16.gmra.mxu0 %v5198_v45  ;;  %v5231_v51 = vld [vmem:[%s6944_s1 + $0x8a0] ss:$8 sps:$4 sm:$0xff]  }
 0x130   : > { %v1420_v11 = vpop.f32.mrf.mxu1  ;;  %3472 = vmatmul.mubr.bf16.gmra.mxu1 %v5201_v47  ;;  %3529 = vmatpush2.bf16.msra.mxu0 %v5204_v63 }
 0x131   : > { %v6452_v61 = vadd.f32 %v1420_v11, %v1307_v60  ;;  %4635 = vmatpush2.bf16.msra.mxu1 %v5204_v63  ;;  %v1309_v49 = vpop.f32.mrf.mxu0  ;;  %3530 = vmatprep.subr.bf16.mxu0 %v5209_v59 }
 0x132   : > { %v1422_v17 = vpop.f32.mrf.mxu1  ;;  %4620 = vmatprep.subr.bf16.mxu1 %v5209_v59  ;;  %3368 = vmatprep.mubr.bf16.mxu0 %v5212_v56  ;;  %v5242_v56 = vld [vmem:[%s6944_s1 + $0x894] ss:$8 sps:$4 sm:$0xff]  }
 0x133   : > { %v6460_v2 = vadd.f32 %v1422_v17, %v1309_v49  ;;  %3481 = vmatprep.mubr.bf16.mxu1 %v5215_v57  ;;  %v1311_v3 = vpop.f32.mrf.mxu0  ;;  %v5237_v49 = vld [vmem:[%s5526_s8 + $0x1b8] ss:$24 sps:$4 sm:$0xff]  }
 0x134   : > { %v1424_v21 = vpop.f32.mrf.mxu1  ;;  %3531 = vmatpush2.bf16.msra.mxu0 %v5207_v62 }
 0x135   : > { %v6464_v15 = vadd.f32 %v1424_v21, %v1311_v3  ;;  %4636 = vmatpush2.bf16.msra.mxu1 %v5207_v62  ;;  %v1313_v10 = vpop.f32.mrf.mxu0  ;;  %3532 = vmatprep.subr.bf16.mxu0 %v5218_v8  ;;  %v5234_v62 = vld [vmem:[%s5526_s8 + $0x1b0] ss:$24 sps:$4 sm:$0xff]  }
 0x136   : > { %v1426_v12 = vpop.f32.mrf.mxu1  ;;  %4621 = vmatprep.subr.bf16.mxu1 %v5218_v8  ;;  %v5240_v8 = vld [vmem:[%s6944_s1 + $0x890] ss:$8 sps:$4 sm:$0xff]  }
 0x137   : > { %v6472_v31 = vadd.f32 %v1426_v12, %v1313_v10  ;;  %v1317_v19 = vpop.f32.mrf.mxu0  ;;  %3369 = vmatmul.mubr.bf16.gmra.mxu0 %v5210_v6  ;;  %v5245_v6 = vld [vmem:[%s6944_s1 + $0x884] ss:$8 sps:$4 sm:$0xff]  }
 0x138   : > { %v1430_v36 = vpop.f32.mrf.mxu1  ;;  %3482 = vmatmul.mubr.bf16.gmra.mxu1 %v5213_v7  ;;  %3533 = vmatpush2.bf16.msra.mxu0 %v5216_v26  ;;  %v5251_v10 = vld [vmem:[%s5526_s8 + $0x134] ss:$24 sps:$4 sm:$0xff]  }
 0x139   : > { %v6476_v22 = vadd.f32 %v1430_v36, %v1317_v19  ;;  %4637 = vmatpush2.bf16.msra.mxu1 %v5216_v26  ;;  %v1319_v24 = vpop.f32.mrf.mxu0  ;;  %3534 = vmatprep.subr.bf16.mxu0 %v5221_v13  ;;  %v5248_v26 = vld [vmem:[%s5526_s8 + $0x74] ss:$24 sps:$4 sm:$0xff]  }
 0x13a   : > { %v1432_v42 = vpop.f32.mrf.mxu1  ;;  %4622 = vmatprep.subr.bf16.mxu1 %v5221_v13  ;;  %3378 = vmatprep.mubr.bf16.mxu0 %v5224_v16 }
 0x13b   : > { %v6484_v37 = vadd.f32 %v1432_v42, %v1319_v24  ;;  %3491 = vmatprep.mubr.bf16.mxu1 %v5227_v18  ;;  %v1321_v27 = vpop.f32.mrf.mxu0  ;;  %v5243_v18 = vld [vmem:[%s6944_s1 + $0x880] ss:$8 sps:$4 sm:$0xff]  }
 0x13c   : > { %v1434_v29 = vpop.f32.mrf.mxu1  ;;  %3535 = vmatpush2.bf16.msra.mxu0 %v5219_v23 }
 0x13d   : > { %v6488_v44 = vadd.f32 %v1434_v29, %v1321_v27  ;;  %4638 = vmatpush2.bf16.msra.mxu1 %v5219_v23  ;;  %v1323_v35 = vpop.f32.mrf.mxu0  ;;  %3536 = vmatprep.subr.bf16.mxu0 %v5230_v28  ;;  %v5249_v27 = vld [vmem:[%s5526_s8 + $0x130] ss:$24 sps:$4 sm:$0xff]  }
 0x13e   : > { %v1436_v40 = vpop.f32.mrf.mxu1  ;;  %4623 = vmatprep.subr.bf16.mxu1 %v5230_v28  ;;  %v5246_v28 = vld [vmem:[%s5526_s8 + $0x70] ss:$24 sps:$4 sm:$0xff]  }
 0x13f   : > { %v6496_v39 = vadd.f32 %v1436_v40, %v1323_v35  ;;  %v1327_v45 = vpop.f32.mrf.mxu0  ;;  %3379 = vmatmul.mubr.bf16.gmra.mxu0 %v5222_v48  ;;  %v5254_v48 = vld [vmem:[%s5526_s8 + $0xa4] ss:$24 sps:$4 sm:$0xff]  }
 0x140   : > { %v1440_v47 = vpop.f32.mrf.mxu1  ;;  %3492 = vmatmul.mubr.bf16.gmra.mxu1 %v5225_v34  ;;  %3537 = vmatpush2.bf16.msra.mxu0 %v5228_v32  ;;  %v5257_v34 = vld [vmem:[%s5526_s8 + $0x164] ss:$24 sps:$4 sm:$0xff]  }
 0x141   : > { %v6500_v63 = vadd.f32 %v1440_v47, %v1327_v45  ;;  %4639 = vmatpush2.bf16.msra.mxu1 %v5228_v32  ;;  %v1329_v54 = vpop.f32.mrf.mxu0  ;;  %3538 = vmatprep.subr.bf16.mxu0 %v5233_v52 }
 0x142   : > { %v1442_v59 = vpop.f32.mrf.mxu1  ;;  %4624 = vmatprep.subr.bf16.mxu1 %v5233_v52  ;;  %3388 = vmatprep.mubr.bf16.mxu0 %v5236_v46 }
 0x143   : > { %v6508_v57 = vadd.f32 %v1442_v59, %v1329_v54  ;;  %3501 = vmatprep.mubr.bf16.mxu1 %v5239_v58  ;;  %v1331_v60 = vpop.f32.mrf.mxu0 }
 0x144   : > { %v1444_v11 = vpop.f32.mrf.mxu1  ;;  %3539 = vmatpush2.bf16.msra.mxu0 %v5231_v51 }
 0x145   : > { %v6512_v17 = vadd.f32 %v1444_v11, %v1331_v60  ;;  %4640 = vmatpush2.bf16.msra.mxu1 %v5231_v51  ;;  %v1333_v3 = vpop.f32.mrf.mxu0  ;;  %3540 = vmatprep.subr.bf16.mxu0 %v5242_v56  ;;  %v5252_v60 = vld [vmem:[%s5526_s8 + $0xa0] ss:$24 sps:$4 sm:$0xff]  }
 0x146   : > { %v1446_v21 = vpop.f32.mrf.mxu1  ;;  %4625 = vmatprep.subr.bf16.mxu1 %v5242_v56  ;;  %v5255_v11 = vld [vmem:[%s5526_s8 + $0x160] ss:$24 sps:$4 sm:$0xff]  }
 0x147   : > { %v6520_v7 = vadd.f32 %v1446_v21, %v1333_v3  ;;  %v1337_v12 = vpop.f32.mrf.mxu0  ;;  %3389 = vmatmul.mubr.bf16.gmra.mxu0 %v5234_v62  ;;  %v5263_v3 = vld [vmem:[%s5526_s8 + $0x194] ss:$24 sps:$4 sm:$0xff]  }
 0x148   : > { %v1450_v13 = vpop.f32.mrf.mxu1  ;;  %3502 = vmatmul.mubr.bf16.gmra.mxu1 %v5237_v49  ;;  %3541 = vmatpush2.bf16.msra.mxu0 %v5240_v8 }
 0x149   : > { %v6524_v16 = vadd.f32 %v1450_v13, %v1337_v12  ;;  %4641 = vmatpush2.bf16.msra.mxu1 %v5240_v8  ;;  %v1339_v19 = vpop.f32.mrf.mxu0  ;;  %3542 = vmatprep.subr.bf16.mxu0 %v5245_v6  ;;  %v5260_v8 = vld [vmem:[%s5526_s8 + $0xd4] ss:$24 sps:$4 sm:$0xff]  }
 0x14a   : > { %v1452_v36 = vpop.f32.mrf.mxu1  ;;  %4626 = vmatprep.subr.bf16.mxu1 %v5245_v6  ;;  %3544 = vmatprep.mubr.bf16.mxu0 %v5248_v26 }
 0x14b   : > { %v6529_v23 = vadd.f32 %v1452_v36, %v1339_v19  ;;  %3584 = vmatprep.mubr.bf16.mxu1 %v5251_v10  ;;  %v1341_v24 = vpop.f32.mrf.mxu0 }
 0x14c   : > { %v1454_v42 = vpop.f32.mrf.mxu1  ;;  %3543 = vmatpush2.bf16.msra.mxu0 %v5243_v18 }
 0x14d   : > { %v6533_v29 = vadd.f32 %v1454_v42, %v1341_v24  ;;  %4642 = vmatpush2.bf16.msra.mxu1 %v5243_v18  ;;  %v1343_v32 = vpop.f32.mrf.mxu0  ;;  %v5258_v42 = vld [vmem:[%s5526_s8 + $0xd0] ss:$24 sps:$4 sm:$0xff]  }
 0x14e   : > { %v1456_v35 = vpop.f32.mrf.mxu1 }
 0x14f   : > { %v6537_v40 = vadd.f32 %v1456_v35, %v1343_v32  ;;  %v1493_v52 = vpop.f32.mrf.mxu0  ;;  %3545 = vmatmul.mubr.bf16.vlgmr.msra.gmra.mxu0 %v5246_v28  ;;  %v5261_v28 = vld [vmem:[%s5526_s8 + $0x190] ss:$24 sps:$4 sm:$0xff]   ;;  %v5269_v32 = vld [vmem:[%s5526_s8 + $0x1c4] ss:$24 sps:$4 sm:$0xff]  }
 0x150   : > { %v2116_v46 = vpop.f32.mrf.mxu1  ;;  %3585 = vmatmul.mubr.bf16.vlgmr.msra.gmra.mxu1 %v5249_v27  ;;  %v1494_v58 = vadd.f32 %v1493_v52, %v6356_v38  ;;  %3554 = vmatprep.mubr.bf16.mxu0 %v5254_v48 }
 0x151   : > { %3594 = vmatprep.mubr.bf16.mxu1 %v5257_v34  ;;  %v1495_v45 = vpop.f32.mrf.mxu0  ;;  %v5266_v34 = vld [vmem:[%s5526_s8 + $0x104] ss:$24 sps:$4 sm:$0xff]  }
 0x152   : > { %v2118_v47 = vpop.f32.mrf.mxu1  ;;  %v6540_v51 = vadd.f32 %v2116_v46, %v1494_v58  ;;  %v1496_v54 = vadd.f32 %v1495_v45, %v6364_v43 }
 0x153   : > { %v1497_v59 = vpop.f32.mrf.mxu0 }
 0x154   : > { %v2120_v56 = vpop.f32.mrf.mxu1  ;;  %v6545_v62 = vadd.f32 %v2118_v47, %v1496_v54  ;;  %v1498_v49 = vadd.f32 %v1497_v59, %v6368_v50 }
 0x155   : > { %v1499_v21 = vpop.f32.mrf.mxu0 }
 0x156   : > { %v2122_v38 = vpop.f32.mrf.mxu1  ;;  %v6550_v6 = vadd.f32 %v2120_v56, %v1498_v49  ;;  %v1500_v26 = vadd.f32 %v1499_v21, %v6376_v55  ;;  %v5267_v49 = vld [vmem:[%s5526_s8 + $0x1c0] ss:$24 sps:$4 sm:$0xff]  }
 0x157   : > { %v1503_v10 = vpop.f32.mrf.mxu0  ;;  %3555 = vmatmul.mubr.bf16.gmra.mxu0 %v5252_v60 }
 0x158   : > { %v2126_v43 = vpop.f32.mrf.mxu1  ;;  %3595 = vmatmul.mubr.bf16.gmra.mxu1 %v5255_v11  ;;  %v6553_v12 = vadd.f32 %v2122_v38, %v1500_v26  ;;  %v1504_v50 = vadd.f32 %v1503_v10, %v6380_v1  ;;  %3564 = vmatprep.mubr.bf16.mxu0 %v5260_v8 }
 0x159   : > { %3604 = vmatprep.mubr.bf16.mxu1 %v5263_v3  ;;  %v1505_v13 = vpop.f32.mrf.mxu0 }
 0x15a   : > { %v2128_v18 = vpop.f32.mrf.mxu1  ;;  %v6556_v19 = vadd.f32 %v2126_v43, %v1504_v50  ;;  %v1506_v36 = vadd.f32 %v1505_v13, %v6388_v0 }
 0x15b   : > { %v1507_v55 = vpop.f32.mrf.mxu0 }
 0x15c   : > { %v2130_v24 = vpop.f32.mrf.mxu1  ;;  %v6561_v27 = vadd.f32 %v2128_v18, %v1506_v36  ;;  %v1508_v48 = vadd.f32 %v1507_v55, %v6392_v4 }
 0x15d   : > { %v1509_v35 = vpop.f32.mrf.mxu0 }
 0x15e   : > { %v2132_v1 = vpop.f32.mrf.mxu1  ;;  %v6566_v52 = vadd.f32 %v2130_v24, %v1508_v48  ;;  %v1510_v46 = vadd.f32 %v1509_v35, %v6400_v9  ;;  %v5264_v9 = vld [vmem:[%s5526_s8 + $0x100] ss:$24 sps:$4 sm:$0xff]  }
 0x15f   : > { %v1513_v58 = vpop.f32.mrf.mxu0  ;;  %3565 = vmatmul.mubr.bf16.gmra.mxu0 %v5258_v42 }
 0x160   : > { %v2136_v0 = vpop.f32.mrf.mxu1  ;;  %3605 = vmatmul.mubr.bf16.gmra.mxu1 %v5261_v28  ;;  %v6569_v45 = vadd.f32 %v2132_v1, %v1510_v46  ;;  %v1514_v47 = vadd.f32 %v1513_v58, %v6404_v14  ;;  %3574 = vmatprep.mubr.bf16.mxu0 %v5266_v34 }
 0x161   : > { %3614 = vmatprep.mubr.bf16.mxu1 %v5269_v32  ;;  %v1515_v4 = vpop.f32.mrf.mxu0 }
 0x162   : > { %v2138_v54 = vpop.f32.mrf.mxu1  ;;  %v6572_v59 = vadd.f32 %v2136_v0, %v1514_v47  ;;  %v1516_v56 = vadd.f32 %v1515_v4, %v6412_v20 }
 0x163   : > { %v1517_v60 = vpop.f32.mrf.mxu0 }
 0x164   : > { %v2140_v11 = vpop.f32.mrf.mxu1  ;;  %v6577_v8 = vadd.f32 %v2138_v54, %v1516_v56  ;;  %v1518_v3 = vadd.f32 %v1517_v60, %v6416_v25 }
 0x165   : > { %v1519_v21 = vpop.f32.mrf.mxu0 }
 0x166   : > { %v2142_v38 = vpop.f32.mrf.mxu1  ;;  %v6580_v26 = vadd.f32 %v2140_v11, %v1518_v3  ;;  %v1520_v14 = vadd.f32 %v1519_v21, %v6424_v30 }
 0x167   : > { %v1523_v10 = vpop.f32.mrf.mxu0  ;;  %3575 = vmatmul.mubr.bf16.gmra.mxu0 %v5264_v9 }
 0x168   : > { %v2146_v43 = vpop.f32.mrf.mxu1  ;;  %3615 = vmatmul.mubr.bf16.gmra.mxu1 %v5267_v49  ;;  %v6583_v50 = vadd.f32 %v2142_v38, %v1520_v14  ;;  %v1524_v20 = vadd.f32 %v1523_v10, %v6428_v33 }
 0x169   : > { %v1525_v13 = vpop.f32.mrf.mxu0 }
 0x16a   : > { %v2148_v18 = vpop.f32.mrf.mxu1  ;;  %v6586_v36 = vadd.f32 %v2146_v43, %v1524_v20  ;;  %v1526_v25 = vadd.f32 %v1525_v13, %v6436_v41 }
 0x16b   : > { %v1527_v55 = vpop.f32.mrf.mxu0 }
 0x16c   : > { %v2150_v24 = vpop.f32.mrf.mxu1  ;;  %v6589_v42 = vadd.f32 %v2148_v18, %v1526_v25  ;;  %v1528_v30 = vadd.f32 %v1527_v55, %v6440_v53 }
 0x16d   : > { %v1529_v28 = vpop.f32.mrf.mxu0 }
 0x16e   : > { %v2152_v48 = vpop.f32.mrf.mxu1  ;;  %v6592_v34 = vadd.f32 %v2150_v24, %v1528_v30  ;;  %v1530_v32 = vadd.f32 %v1529_v28, %v6448_v5 }
 0x16f   : > { %v1533_v35 = vpop.f32.mrf.mxu0 }
 0x170   : > { %v2156_v33 = vpop.f32.mrf.mxu1  ;;  %v6595_v1 = vadd.f32 %v2152_v48, %v1530_v32  ;;  %v1534_v46 = vadd.f32 %v1533_v35, %v6452_v61 }
 0x171   : > { %v1535_v58 = vpop.f32.mrf.mxu0 }
 0x172   : > { %v2158_v41 = vpop.f32.mrf.mxu1  ;;  %v6598_v0 = vadd.f32 %v2156_v33, %v1534_v46  ;;  %v1536_v47 = vadd.f32 %v1535_v58, %v6460_v2 }
 0x173   : > { %v1537_v4 = vpop.f32.mrf.mxu0 }
 0x174   : > { %v2160_v53 = vpop.f32.mrf.mxu1  ;;  %v6601_v54 = vadd.f32 %v2158_v41, %v1536_v47  ;;  %v1538_v56 = vadd.f32 %v1537_v4, %v6464_v15 }
 0x175   : > { %v1539_v60 = vpop.f32.mrf.mxu0 }
 0x176   : > { %v2162_v5 = vpop.f32.mrf.mxu1  ;;  %v6604_v11 = vadd.f32 %v2160_v53, %v1538_v56  ;;  %v1540_v9 = vadd.f32 %v1539_v60, %v6472_v31 }
 0x177   : > { %v1543_v49 = vpop.f32.mrf.mxu0 }
 0x178   : > { %v2166_v61 = vpop.f32.mrf.mxu1  ;;  %v6607_v3 = vadd.f32 %v2162_v5, %v1540_v9  ;;  %v1544_v21 = vadd.f32 %v1543_v49, %v6476_v22 }
 0x179   : > { %v1545_v38 = vpop.f32.mrf.mxu0 }
 0x17a   : > { %v2168_v2 = vpop.f32.mrf.mxu1  ;;  %v6610_v14 = vadd.f32 %v2166_v61, %v1544_v21  ;;  %v1546_v10 = vadd.f32 %v1545_v38, %v6484_v37 }
 0x17b   : > { %v1547_v43 = vpop.f32.mrf.mxu0 }
 0x17c   : > { %v2170_v15 = vpop.f32.mrf.mxu1  ;;  %v6613_v20 = vadd.f32 %v2168_v2, %v1546_v10  ;;  %v1548_v13 = vadd.f32 %v1547_v43, %v6488_v44 }
 0x17d   : > { %v1549_v18 = vpop.f32.mrf.mxu0 }
 0x17e   : > { %v2172_v31 = vpop.f32.mrf.mxu1  ;;  %v6616_v25 = vadd.f32 %v2170_v15, %v1548_v13  ;;  %v1550_v55 = vadd.f32 %v1549_v18, %v6496_v39 }
 0x17f   : > { %v1553_v24 = vpop.f32.mrf.mxu0 }
 0x180   : > { %v2176_v22 = vpop.f32.mrf.mxu1  ;;  %v6619_v30 = vadd.f32 %v2172_v31, %v1550_v55  ;;  %v1554_v28 = vadd.f32 %v1553_v24, %v6500_v63 }
 0x181   : > { %v1555_v48 = vpop.f32.mrf.mxu0 }
 0x182   : > { %v2178_v37 = vpop.f32.mrf.mxu1  ;;  %v6622_v32 = vadd.f32 %v2176_v22, %v1554_v28  ;;  %v1556_v35 = vadd.f32 %v1555_v48, %v6508_v57 }
 0x183   : > { %v1557_v33 = vpop.f32.mrf.mxu0 }
 0x184   : > { %v2180_v44 = vpop.f32.mrf.mxu1  ;;  %v6625_v46 = vadd.f32 %v2178_v37, %v1556_v35  ;;  %v1558_v58 = vadd.f32 %v1557_v33, %v6512_v17 }
 0x185   : > { %v1559_v41 = vpop.f32.mrf.mxu0 }
 0x186   : > { %v2182_v39 = vpop.f32.mrf.mxu1  ;;  %v6628_v47 = vadd.f32 %v2180_v44, %v1558_v58  ;;  %v1560_v4 = vadd.f32 %v1559_v41, %v6520_v7 }
 0x187   : > { %v1563_v53 = vpop.f32.mrf.mxu0 }
 0x188   : > { %v2186_v63 = vpop.f32.mrf.mxu1  ;;  %v6631_v56 = vadd.f32 %v2182_v39, %v1560_v4  ;;  %v1564_v60 = vadd.f32 %v1563_v53, %v6524_v16 }
 0x189   : > { %v1565_v5 = vpop.f32.mrf.mxu0 }
 0x18a   : > { %v2188_v57 = vpop.f32.mrf.mxu1  ;;  %v6634_v9 = vadd.f32 %v2186_v63, %v1564_v60  ;;  %v1566_v49 = vadd.f32 %v1565_v5, %v6529_v23 }
 0x18b   : > { %v1567_v61 = vpop.f32.mrf.mxu0 }
 0x18c   : > { %v2190_v17 = vpop.f32.mrf.mxu1  ;;  %v6637_v21 = vadd.f32 %v2188_v57, %v1566_v49  ;;  %v1568_v38 = vadd.f32 %v1567_v61, %v6533_v29 }
 0x18d   : > { %v1569_v2 = vpop.f32.mrf.mxu0 }
 0x18e   : > { %v2192_v7 = vpop.f32.mrf.mxu1  ;;  %v6640_v10 = vadd.f32 %v2190_v17, %v1568_v38  ;;  %v1570_v43 = vadd.f32 %v1569_v2, %v6537_v40 }
 0x18f   : > { %v2229_v15 = vpop.f32.mrf.mxu0 }
 0x190   : > { %v2342_v16 = vpop.f32.mrf.mxu1  ;;  %v6643_v13 = vadd.f32 %v2192_v7, %v1570_v43  ;;  %v2230_v18 = vadd.f32 %v2229_v15, %v6540_v51 }
 0x191   : > { %v2231_v31 = vpop.f32.mrf.mxu0 }
 0x192   : > { %v2344_v23 = vpop.f32.mrf.mxu1  ;;  %v6646_v55 = vadd.f32 %v2342_v16, %v2230_v18  ;;  %v2232_v24 = vadd.f32 %v2231_v31, %v6545_v62 }
 0x193   : > { %v2233_v22 = vpop.f32.mrf.mxu0 }
 0x194   : > { %v2346_v29 = vpop.f32.mrf.mxu1  ;;  %v6649_v28 = vadd.f32 %v2344_v23, %v2232_v24  ;;  %v2234_v48 = vadd.f32 %v2233_v22, %v6550_v6 }
 0x195   : > { %v2235_v37 = vpop.f32.mrf.mxu0 }
 0x196   : > { %v2348_v40 = vpop.f32.mrf.mxu1  ;;  %v6652_v35 = vadd.f32 %v2346_v29, %v2234_v48  ;;  %v2236_v33 = vadd.f32 %v2235_v37, %v6553_v12 }
 0x197   : > { %v2239_v44 = vpop.f32.mrf.mxu0 }
 0x198   : > { %v2352_v51 = vpop.f32.mrf.mxu1  ;;  %v6655_v58 = vadd.f32 %v2348_v40, %v2236_v33  ;;  %v2240_v41 = vadd.f32 %v2239_v44, %v6556_v19 }
 0x199   : > { %v2241_v39 = vpop.f32.mrf.mxu0 }
 0x19a   : > { %v2354_v62 = vpop.f32.mrf.mxu1  ;;  %v6658_v4 = vadd.f32 %v2352_v51, %v2240_v41  ;;  %v2242_v53 = vadd.f32 %v2241_v39, %v6561_v27 }
 0x19b   : > { %v2243_v63 = vpop.f32.mrf.mxu0 }
 0x19c   : > { %v2356_v6 = vpop.f32.mrf.mxu1  ;;  %v6661_v60 = vadd.f32 %v2354_v62, %v2242_v53  ;;  %v2244_v5 = vadd.f32 %v2243_v63, %v6566_v52 }
 0x19d   : > { %v2245_v57 = vpop.f32.mrf.mxu0 }
 0x19e   : > { %6947 = vst [vmem:[#allocation2_spill] sm:$0xff] %v6661_v60  ;;  %v2358_v12 = vpop.f32.mrf.mxu1  ;;  %v6664_v49 = vadd.f32 %v2356_v6, %v2244_v5  ;;  %v2246_v61 = vadd.f32 %v2245_v57, %v6569_v45 }
 0x19f   : > { %v2249_v17 = vpop.f32.mrf.mxu0 }
 0x1a0   : > { %6948 = vst [vmem:[#allocation3_spill] sm:$0xff] %v6664_v49  ;;  %v2362_v19 = vpop.f32.mrf.mxu1  ;;  %v6667_v38 = vadd.f32 %v2358_v12, %v2246_v61  ;;  %v2250_v2 = vadd.f32 %v2249_v17, %v6572_v59 }
 0x1a1   : > { %v2251_v7 = vpop.f32.mrf.mxu0 }
 0x1a2   : > { %6949 = vst [vmem:[#allocation4_spill] sm:$0xff] %v6667_v38  ;;  %v2364_v27 = vpop.f32.mrf.mxu1  ;;  %v6670_v43 = vadd.f32 %v2362_v19, %v2250_v2  ;;  %v2252_v15 = vadd.f32 %v2251_v7, %v6577_v8 }
 0x1a3   : > { %v2253_v16 = vpop.f32.mrf.mxu0 }
 0x1a4   : > { %6950 = vst [vmem:[#allocation5_spill] sm:$0xff] %v6670_v43  ;;  %v2366_v52 = vpop.f32.mrf.mxu1  ;;  %v6673_v18 = vadd.f32 %v2364_v27, %v2252_v15  ;;  %v2254_v31 = vadd.f32 %v2253_v16, %v6580_v26 }
 0x1a5   : > { %v2255_v23 = vpop.f32.mrf.mxu0 }
 0x1a6   : > { %6951 = vst [vmem:[#allocation6_spill] sm:$0xff] %v6673_v18  ;;  %v2368_v45 = vpop.f32.mrf.mxu1  ;;  %v6676_v24 = vadd.f32 %v2366_v52, %v2254_v31  ;;  %v2256_v22 = vadd.f32 %v2255_v23, %v6583_v50 }
 0x1a7   : > { %v2259_v29 = vpop.f32.mrf.mxu0 }
 0x1a8   : > { %6952 = vst [vmem:[#allocation7_spill] sm:$0xff] %v6676_v24  ;;  %v2372_v59 = vpop.f32.mrf.mxu1  ;;  %v6679_v48 = vadd.f32 %v2368_v45, %v2256_v22  ;;  %v2260_v37 = vadd.f32 %v2259_v29, %v6586_v36 }
 0x1a9   : > { %v2261_v40 = vpop.f32.mrf.mxu0 }
 0x1aa   : > { %6953 = vst [vmem:[#allocation8_spill] sm:$0xff] %v6679_v48  ;;  %v2374_v8 = vpop.f32.mrf.mxu1  ;;  %v6682_v33 = vadd.f32 %v2372_v59, %v2260_v37  ;;  %v2262_v44 = vadd.f32 %v2261_v40, %v6589_v42 }
 0x1ab   : > { %v2263_v51 = vpop.f32.mrf.mxu0 }
 0x1ac   : > { %6954 = vst [vmem:[#allocation9_spill] sm:$0xff] %v6682_v33  ;;  %v2376_v26 = vpop.f32.mrf.mxu1  ;;  %v6685_v41 = vadd.f32 %v2374_v8, %v2262_v44  ;;  %v2264_v39 = vadd.f32 %v2263_v51, %v6592_v34 }
 0x1ad   : > { %v2265_v62 = vpop.f32.mrf.mxu0 }
 0x1ae   : > { %6955 = vst [vmem:[#allocation10_spill] sm:$0xff] %v6685_v41  ;;  %v2378_v50 = vpop.f32.mrf.mxu1  ;;  %v6688_v53 = vadd.f32 %v2376_v26, %v2264_v39  ;;  %v2266_v63 = vadd.f32 %v2265_v62, %v6595_v1 }
 0x1af   : > { %v2269_v6 = vpop.f32.mrf.mxu0 }
 0x1b0   : > { %6956 = vst [vmem:[#allocation11_spill] sm:$0xff] %v6688_v53  ;;  %v2382_v36 = vpop.f32.mrf.mxu1  ;;  %v6691_v5 = vadd.f32 %v2378_v50, %v2266_v63  ;;  %v2270_v57 = vadd.f32 %v2269_v6, %v6598_v0 }
 0x1b1   : > { %v2271_v12 = vpop.f32.mrf.mxu0 }
 0x1b2   : > { %6957 = vst [vmem:[#allocation12_spill] sm:$0xff] %v6691_v5  ;;  %v2384_v42 = vpop.f32.mrf.mxu1  ;;  %v6694_v61 = vadd.f32 %v2382_v36, %v2270_v57  ;;  %v2272_v17 = vadd.f32 %v2271_v12, %v6601_v54 }
 0x1b3   : > { %v2273_v19 = vpop.f32.mrf.mxu0 }
 0x1b4   : > { %v2386_v34 = vpop.f32.mrf.mxu1  ;;  %v6697_v2 = vadd.f32 %v2384_v42, %v2272_v17  ;;  %v2274_v7 = vadd.f32 %v2273_v19, %v6604_v11 }
 0x1b5   : > { %v2275_v27 = vpop.f32.mrf.mxu0 }
 0x1b6   : > { %v2388_v1 = vpop.f32.mrf.mxu1  ;;  %v6700_v15 = vadd.f32 %v2386_v34, %v2274_v7  ;;  %v2276_v16 = vadd.f32 %v2275_v27, %v6607_v3 }
 0x1b7   : > { %v2279_v52 = vpop.f32.mrf.mxu0 }
 0x1b8   : > { %v2392_v0 = vpop.f32.mrf.mxu1  ;;  %v6703_v31 = vadd.f32 %v2388_v1, %v2276_v16  ;;  %v2280_v23 = vadd.f32 %v2279_v52, %v6610_v14 }
 0x1b9   : > { %v2281_v45 = vpop.f32.mrf.mxu0 }
 0x1ba   : > { %v2394_v54 = vpop.f32.mrf.mxu1  ;;  %v6706_v22 = vadd.f32 %v2392_v0, %v2280_v23  ;;  %v2282_v29 = vadd.f32 %v2281_v45, %v6613_v20 }
 0x1bb   : > { %v2283_v59 = vpop.f32.mrf.mxu0 }
 0x1bc   : > { %v2396_v11 = vpop.f32.mrf.mxu1  ;;  %v6709_v37 = vadd.f32 %v2394_v54, %v2282_v29  ;;  %v2284_v40 = vadd.f32 %v2283_v59, %v6616_v25 }
 0x1bd   : > { %v2285_v8 = vpop.f32.mrf.mxu0 }
 0x1be   : > { %6958 = vst [vmem:[#allocation13_spill] sm:$0xff] %v6709_v37  ;;  %v2398_v3 = vpop.f32.mrf.mxu1  ;;  %v6712_v44 = vadd.f32 %v2396_v11, %v2284_v40  ;;  %v2286_v51 = vadd.f32 %v2285_v8, %v6619_v30 }
 0x1bf   : > { %v2289_v26 = vpop.f32.mrf.mxu0 }
 0x1c0   : > { %6959 = vst [vmem:[#allocation14_spill] sm:$0xff] %v6712_v44  ;;  %v2402_v14 = vpop.f32.mrf.mxu1  ;;  %v6715_v39 = vadd.f32 %v2398_v3, %v2286_v51  ;;  %v2290_v62 = vadd.f32 %v2289_v26, %v6622_v32 }
 0x1c1   : > { %v2291_v50 = vpop.f32.mrf.mxu0 }
 0x1c2   : > { %6960 = vst [vmem:[#allocation15_spill] sm:$0xff] %v6715_v39  ;;  %v2404_v20 = vpop.f32.mrf.mxu1  ;;  %v6718_v63 = vadd.f32 %v2402_v14, %v2290_v62  ;;  %v2292_v6 = vadd.f32 %v2291_v50, %v6625_v46 }
 0x1c3   : > { %v2293_v36 = vpop.f32.mrf.mxu0 }
 0x1c4   : > { %6961 = vst [vmem:[#allocation16_spill] sm:$0xff] %v6718_v63  ;;  %v2406_v25 = vpop.f32.mrf.mxu1  ;;  %v6721_v57 = vadd.f32 %v2404_v20, %v2292_v6  ;;  %v2294_v12 = vadd.f32 %v2293_v36, %v6628_v47 }
 0x1c5   : > { %v2295_v42 = vpop.f32.mrf.mxu0 }
 0x1c6   : > { %6962 = vst [vmem:[#allocation17_spill] sm:$0xff] %v6721_v57  ;;  %v2408_v30 = vpop.f32.mrf.mxu1  ;;  %v6724_v17 = vadd.f32 %v2406_v25, %v2294_v12  ;;  %v2296_v19 = vadd.f32 %v2295_v42, %v6631_v56 }
 0x1c7   : > { %v2299_v34 = vpop.f32.mrf.mxu0 }
 0x1c8   : > { %6963 = vst [vmem:[#allocation18_spill] sm:$0xff] %v6724_v17  ;;  %v2412_v32 = vpop.f32.mrf.mxu1  ;;  %v6727_v7 = vadd.f32 %v2408_v30, %v2296_v19  ;;  %v2300_v27 = vadd.f32 %v2299_v34, %v6634_v9 }
 0x1c9   : > { %v2301_v1 = vpop.f32.mrf.mxu0 }
 0x1ca   : > { %6964 = vst [vmem:[#allocation19_spill] sm:$0xff] %v6727_v7  ;;  %v2414_v46 = vpop.f32.mrf.mxu1  ;;  %v6730_v16 = vadd.f32 %v2412_v32, %v2300_v27  ;;  %v2302_v52 = vadd.f32 %v2301_v1, %v6637_v21 }
 0x1cb   : > { %v2303_v0 = vpop.f32.mrf.mxu0 }
 0x1cc   : > { %6965 = vst [vmem:[#allocation20_spill] sm:$0xff] %v6730_v16  ;;  %v2416_v47 = vpop.f32.mrf.mxu1  ;;  %v6733_v23 = vadd.f32 %v2414_v46, %v2302_v52  ;;  %v2304_v45 = vadd.f32 %v2303_v0, %v6640_v10 }
 0x1cd   : > { %v2305_v54 = vpop.f32.mrf.mxu0 }
 0x1ce   : > { %6966 = vst [vmem:[#allocation21_spill] sm:$0xff] %v6733_v23  ;;  %v2418_v56 = vpop.f32.mrf.mxu1  ;;  %v6736_v29 = vadd.f32 %v2416_v47, %v2304_v45  ;;  %v2306_v59 = vadd.f32 %v2305_v54, %v6643_v13 }
 0x1cf   : > { %v3320_v11 = vpop.f32.mrf.mxu0 }
 0x1d0   : > { %6967 = vst [vmem:[#allocation22_spill] sm:$0xff] %v6736_v29  ;;  %v3433_v9 = vpop.f32.mrf.mxu1  ;;  %v6739_v40 = vadd.f32 %v2418_v56, %v2306_v59 }
 0x1d1   : > { %v6741_v8 = vadd.f32 %v3433_v9, %v3320_v11  ;;  %v6743_v3 = vpop.f32.mrf.mxu0 }
 0x1d2   : > { %6968 = vst [vmem:[#allocation23_spill] sm:$0xff] %v6739_v40  ;;  %v6745_v21 = vpop.f32.mrf.mxu1 }
 0x1d3   : > { %v3324_v51 = vpop.f32.mrf.mxu0 }
 0x1d4   : > { %v3437_v26 = vpop.f32.mrf.mxu1 }
 0x1d5   : > { %v6747_v14 = vadd.f32 %v3437_v26, %v3324_v51  ;;  %v6749_v10 = vpop.f32.mrf.mxu0 }
 0x1d6   : > { %v6751_v62 = vpop.f32.mrf.mxu1 }
 0x1d7   : > { %v3330_v50 = vpop.f32.mrf.mxu0 }
 0x1d8   : > { %v3443_v13 = vpop.f32.mrf.mxu1 }
 0x1d9   : > { %v6753_v20 = vadd.f32 %v3443_v13, %v3330_v50  ;;  %v3332_v6 = vpop.f32.mrf.mxu0 }
 0x1da   : > { %v3445_v36 = vpop.f32.mrf.mxu1 }
 0x1db   : > { %v6755_v25 = vadd.f32 %v3445_v36, %v3332_v6  ;;  %v3334_v12 = vpop.f32.mrf.mxu0 }
 0x1dc   : > { %v3447_v42 = vpop.f32.mrf.mxu1 }
 0x1dd   : > { %v6757_v30 = vadd.f32 %v3447_v42, %v3334_v12  ;;  %v3336_v19 = vpop.f32.mrf.mxu0 }
 0x1de   : > { %v3449_v34 = vpop.f32.mrf.mxu1 }
 0x1df   : > { %6969 = vst [vmem:[#allocation24_spill] sm:$0xff] %v6757_v30  ;;  %v6759_v32 = vadd.f32 %v3449_v34, %v3336_v19  ;;  %v3340_v27 = vpop.f32.mrf.mxu0 }
 0x1e0   : > { %v3453_v1 = vpop.f32.mrf.mxu1 }
 0x1e1   : > { %6970 = vst [vmem:[#allocation25_spill] sm:$0xff] %v6759_v32  ;;  %v6761_v46 = vadd.f32 %v3453_v1, %v3340_v27  ;;  %v3342_v52 = vpop.f32.mrf.mxu0 }
 0x1e2   : > { %v3455_v0 = vpop.f32.mrf.mxu1 }
 0x1e3   : > { %6971 = vst [vmem:[#allocation26_spill] sm:$0xff] %v6761_v46  ;;  %v6763_v47 = vadd.f32 %v3455_v0, %v3342_v52  ;;  %v3344_v45 = vpop.f32.mrf.mxu0  ;;  %v3440_v46 = vadd.f32 %v6751_v62, %v6749_v10 }
 0x1e4   : > { %v3457_v54 = vpop.f32.mrf.mxu1 }
 0x1e5   : > { %6972 = vst [vmem:[#allocation27_spill] sm:$0xff] %v6763_v47  ;;  %v6765_v56 = vadd.f32 %v3457_v54, %v3344_v45  ;;  %v3346_v59 = vpop.f32.mrf.mxu0  ;;  %v3657_v47 = vld [vmem:[%s6945_s2] sm:$0x3] }
 0x1e6   : > { %v3459_v11 = vpop.f32.mrf.mxu1 }
 0x1e7   : > { %6973 = vst [vmem:[#allocation28_spill] sm:$0xff] %v6765_v56  ;;  %v6767_v9 = vadd.f32 %v3459_v11, %v3346_v59  ;;  %v3350_v51 = vpop.f32.mrf.mxu0 }
 0x1e8   : > { %v3463_v26 = vpop.f32.mrf.mxu1 }
 0x1e9   : > { %6974 = vst [vmem:[#allocation29_spill] sm:$0xff] %v6767_v9  ;;  %v6769_v50 = vadd.f32 %v3463_v26, %v3350_v51  ;;  %v3352_v13 = vpop.f32.mrf.mxu0 }
 0x1ea   : > { %v3465_v6 = vpop.f32.mrf.mxu1 }
 0x1eb   : > { %6975 = vst [vmem:[#allocation30_spill] sm:$0xff] %v6769_v50  ;;  %v6771_v36 = vadd.f32 %v3465_v6, %v3352_v13  ;;  %v3354_v12 = vpop.f32.mrf.mxu0 }
 0x1ec   : > { %v3467_v42 = vpop.f32.mrf.mxu1 }
 0x1ed   : > { %6976 = vst [vmem:[#allocation31_spill] sm:$0xff] %v6771_v36  ;;  %v6773_v19 = vadd.f32 %v3467_v42, %v3354_v12  ;;  %v3356_v34 = vpop.f32.mrf.mxu0 }
 0x1ee   : > { %v3469_v27 = vpop.f32.mrf.mxu1 }
 0x1ef   : > { %6977 = vst [vmem:[#allocation32_spill] sm:$0xff] %v6773_v19  ;;  %v6775_v1 = vadd.f32 %v3469_v27, %v3356_v34  ;;  %v3360_v52 = vpop.f32.mrf.mxu0 }
 0x1f0   : > { %v3473_v0 = vpop.f32.mrf.mxu1 }
 0x1f1   : > { %6978 = vst [vmem:[#allocation33_spill] sm:$0xff] %v6775_v1  ;;  %v3362_v45 = vpop.f32.mrf.mxu0  ;;  %v3659_v1 = vlaneseq  ;;  %v3474_v39 = vadd.f32 %v3473_v0, %v3360_v52 }
 0x1f2   : > { %v3475_v54 = vpop.f32.mrf.mxu1 }
 0x1f3   : > { %v3364_v59 = vpop.f32.mrf.mxu0  ;;  %v3660_v7 = vshrl.u32 %v3659_v1, 7  ;;  %v3476_v32 = vadd.f32 %v3475_v54, %v3362_v45 }
 0x1f4   : > { %v3477_v11 = vpop.f32.mrf.mxu1 }
 0x1f5   : > { %v3366_v51 = vpop.f32.mrf.mxu0  ;;  %v3661_v24 = vsub.s32 0, %v3660_v7  ;;  %v3665_v57 = vsub.s32 1, %v3660_v7  ;;  %v3436_v7 = vadd.f32 %v6745_v21, %v6743_v3  ;;  %v3478_v44 = vadd.f32 %v3477_v11, %v3364_v59 }
 0x1f6   : > { %v3479_v26 = vpop.f32.mrf.mxu1 }
 0x1f7   : > { %v3370_v40 = vpop.f32.mrf.mxu0  ;;  %v6784_v1 = vrot.slane %v3657_v47, %v3661_v24  ;;  %v6786_v38 = vrot.slane %v3657_v47, %v3665_v57  ;;  %v3480_v60 = vadd.f32 %v3479_v26, %v3366_v51 }
 0x1f8   : > { %v3483_v5 = vpop.f32.mrf.mxu1 }
 0x1f9   : > { %v3372_v13 = vpop.f32.mrf.mxu0 }
 0x1fa   : > { %v3485_v6 = vpop.f32.mrf.mxu1 }
 0x1fb   : > { %v3374_v29 = vpop.f32.mrf.mxu0  ;;  %v6795_v24 = vadd.f32 %v3485_v6, %v3372_v13 }
 0x1fc   : > { %v3487_v53 = vpop.f32.mrf.mxu1 }
 0x1fd   : > { %v3376_v12 = vpop.f32.mrf.mxu0  ;;  %v6797_v57 = vadd.f32 %v3487_v53, %v3374_v29 }
 0x1fe   : > { %v3489_v42 = vpop.f32.mrf.mxu1 }
 0x1ff   : > { %v3380_v23 = vpop.f32.mrf.mxu0  ;;  %v6799_v47 = vadd.f32 %v3489_v42, %v3376_v12 }
 0x200   : > { %v3493_v41 = vpop.f32.mrf.mxu1 }
 0x201   : > { %v3382_v34 = vpop.f32.mrf.mxu0  ;;  %v6801_v3 = vadd.f32 %v3493_v41, %v3380_v23 }
 0x202   : > { %v3495_v27 = vpop.f32.mrf.mxu1 }
 0x203   : > { %v3384_v19 = vpop.f32.mrf.mxu0 }
 0x204   : > { %v3497_v36 = vpop.f32.mrf.mxu1 }
 0x205   : > { %v3386_v16 = vpop.f32.mrf.mxu0 }
 0x206   : > { %v3499_v33 = vpop.f32.mrf.mxu1 }
 0x207   : > { %v3390_v48 = vpop.f32.mrf.mxu0 }
 0x208   : > { %v3503_v50 = vpop.f32.mrf.mxu1 }
 0x209   : > { %v3392_v9 = vpop.f32.mrf.mxu0  ;;  %v6811_v53 = vadd.f32 %v3503_v50, %v3390_v48 }
 0x20a   : > { %v3505_v17 = vpop.f32.mrf.mxu1 }
 0x20b   : > { %v3394_v18 = vpop.f32.mrf.mxu0 }
 0x20c   : > { %v3507_v56 = vpop.f32.mrf.mxu1 }
 0x20d   : > { %v6780_v63 = vpop.f32.mrf.mxu0 }
 0x20e   : > { %6979 = vst [vmem:[#allocation34_spill] sm:$0xff] %v6780_v63  ;;  %v6782_v43 = vpop.f32.mrf.mxu1  ;;  %v3484_v63 = vadd.f32 %v3483_v5, %v3370_v40 }
 0x20f   : > { %6980 = vst [vmem:[#allocation35_spill] sm:$0xff] %v6782_v43  ;;  %v3546_v49 = vpop.f32.mrf.mxu0 }
 0x210   : > { %v3586_v37 = vpop.f32.mrf.mxu1  ;;  %v3547_v30 = vadd.f32 %v3546_v49, %v6741_v8  ;;  %v6805_v49 = vadd.f32 %v3495_v27, %v3382_v34  ;;  %v6819_v8 = vadd.f32 %v3505_v17, %v3392_v9 }
 0x211   : > { %v3587_v43 = vadd.f32 %v3586_v37, %v3474_v39  ;;  %v3548_v21 = vpop.f32.mrf.mxu0  ;;  %v6807_v37 = vadd.f32 %v3497_v36, %v3384_v19  ;;  %v6809_v39 = vadd.f32 %v3499_v33, %v3386_v16 }
 0x212   : > { %v3588_v10 = vpop.f32.mrf.mxu1  ;;  %v3625_v62 = vadd.f32 %v3547_v30, %v6646_v55  ;;  %v3549_v5 = vadd.f32 %v3548_v21, %v3436_v7  ;;  %v6821_v30 = vadd.f32 %v3507_v56, %v3394_v18 }
 0x213   : > { %v3641_v52 = vadd.f32 %v3587_v43, %v6694_v61  ;;  %v3589_v40 = vadd.f32 %v3588_v10, %v3476_v32  ;;  %v3550_v41 = vpop.f32.mrf.mxu0  ;;  %v6981_v10 = vld [vmem:[#allocation24_spill] sm:$0xff] }
 0x214   : > { %v3590_v23 = vpop.f32.mrf.mxu1  ;;  %v3669_v29 = vadd.f32 %v6784_v1, %v3625_v62  ;;  %v3626_v43 = vadd.f32 %v3549_v5, %v6649_v28  ;;  %v3551_v48 = vadd.f32 %v3550_v41, %v6747_v14 }
 0x215   : > { %v3685_v55 = vadd.f32 %v6784_v1, %v3641_v52  ;;  %v3642_v61 = vadd.f32 %v3589_v40, %v6697_v2  ;;  %v3591_v33 = vadd.f32 %v3590_v23, %v3478_v44  ;;  %v3552_v16 = vpop.f32.mrf.mxu0 }
 0x216   : > { %v3592_v32 = vpop.f32.mrf.mxu1  ;;  %v3701_v50 = vmax.f32 %v3669_v29, 0.0  ;;  %v3670_v19 = vadd.f32 %v6786_v38, %v3626_v43  ;;  %v3627_v28 = vadd.f32 %v3551_v48, %v6652_v35  ;;  %v3553_v17 = vadd.f32 %v3552_v16, %v3440_v46  ;;  %v6982_v29 = vld [vmem:[#allocation2_spill] sm:$0xff]  ;;  %v6983_v43 = vld [vmem:[#allocation13_spill] sm:$0xff] }
 0x217   : > { %v3717_v36 = vmax.f32 %v3685_v55, 0.0  ;;  %v3686_v0 = vadd.f32 %v6786_v38, %v3642_v61  ;;  %v3643_v2 = vadd.f32 %v3591_v33, %v6700_v15  ;;  %v3593_v9 = vadd.f32 %v3592_v32, %v3480_v60  ;;  %v3556_v18 = vpop.f32.mrf.mxu0  ;;  %v6984_v33 = vld [vmem:[#allocation3_spill] sm:$0xff]  ;;  %v6985_v16 = vld [vmem:[#allocation14_spill] sm:$0xff] }
 0x218   : > { %v3596_v56 = vpop.f32.mrf.mxu1  ;;  %v3702_v45 = vmax.f32 %v3670_v19, 0.0  ;;  %v3557_v44 = vadd.f32 %v3556_v18, %v6753_v20  ;;  %v3671_v59 = vadd.f32 %v6784_v1, %v3627_v28  ;;  %v3628_v60 = vadd.f32 %v3553_v17, %v6655_v58  ;;  %v6987_v18 = vld [vmem:[#allocation26_spill] sm:$0xff] }
 0x219   : > { %v3718_v14 = vmax.f32 %v3686_v0, 0.0  ;;  %v3597_v54 = vadd.f32 %v3596_v56, %v3484_v63  ;;  %v3687_v35 = vadd.f32 %v6784_v1, %v3643_v2  ;;  %v3644_v15 = vadd.f32 %v3593_v9, %v6703_v31  ;;  %v3558_v46 = vpop.f32.mrf.mxu0  ;;  %v6986_v0 = vld [vmem:[#allocation25_spill] sm:$0xff] }
 0x21a   : > { %v3598_v11 = vpop.f32.mrf.mxu1  ;;  %v4595_v51 = vpack.c.bf16 %v3702_v45, %v3701_v50  ;;  %v3629_v63 = vadd.f32 %v3557_v44, %v6658_v4  ;;  %v3703_v13 = vmax.f32 %v3671_v59, 0.0  ;;  %v3672_v12 = vadd.f32 %v6786_v38, %v3628_v60 }
 0x21b   : > { %v4603_v20 = vpack.c.bf16 %v3718_v14, %v3717_v36  ;;  %v3645_v26 = vadd.f32 %v3597_v54, %v6706_v22  ;;  %v3719_v6 = vmax.f32 %v3687_v35, 0.0  ;;  %v3688_v42 = vadd.f32 %v6786_v38, %v3644_v15  ;;  %v3560_v34 = vpop.f32.mrf.mxu0  ;;  %v6988_v35 = vld [vmem:[#allocation4_spill] sm:$0xff]  ;;  %v6989_v15 = vld [vmem:[#allocation15_spill] sm:$0xff] }
 0x21c   : > { %v3600_v27 = vpop.f32.mrf.mxu1  ;;  %3829 = vst [vmem:[%s6833_s5] sm:$0xff] %v4595_v51  ;;  %v3673_v58 = vadd.f32 %v6784_v1, %v3629_v63  ;;  %v3559_v7 = vadd.f32 %v3558_v46, %v6755_v25  ;;  %v3599_v4 = vadd.f32 %v3598_v11, %v6795_v24  ;;  %v3704_v21 = vmax.f32 %v3672_v12, 0.0  ;;  %v6990_v51 = vld [vmem:[#allocation5_spill] sm:$0xff]  ;;  %v6991_v63 = vld [vmem:[#allocation16_spill] sm:$0xff] }
 0x21d   : > { %3837 = vst [vmem:[%s6833_s5 + $0x40] sm:$0xff] %v4603_v20  ;;  %v3689_v31 = vadd.f32 %v6784_v1, %v3645_v26  ;;  %v3720_v22 = vmax.f32 %v3688_v42, 0.0  ;;  %v3561_v62 = vadd.f32 %v3560_v34, %v6981_v10  ;;  %v3601_v52 = vadd.f32 %v3600_v27, %v6797_v57  ;;  %v3562_v5 = vpop.f32.mrf.mxu0 }
 0x21e   : > { %v3602_v40 = vpop.f32.mrf.mxu1  ;;  %v3705_v41 = vmax.f32 %v3673_v58, 0.0  ;;  %v3630_v55 = vadd.f32 %v3559_v7, %v6982_v29  ;;  %v3646_v61 = vadd.f32 %v3599_v4, %v6983_v43  ;;  %v4596_v48 = vpack.c.bf16 %v3704_v21, %v3703_v13  ;;  %v6994_v29 = vld [vmem:[#allocation6_spill] sm:$0xff]  ;;  %v6995_v43 = vld [vmem:[#allocation17_spill] sm:$0xff] }
 0x21f   : > { %v3721_v23 = vmax.f32 %v3689_v31, 0.0  ;;  %v4604_v25 = vpack.c.bf16 %v3720_v22, %v3719_v6  ;;  %v3631_v24 = vadd.f32 %v3561_v62, %v6984_v33  ;;  %v3647_v32 = vadd.f32 %v3601_v52, %v6985_v16  ;;  %v3566_v50 = vpop.f32.mrf.mxu0  ;;  %v6992_v31 = vld [vmem:[#allocation27_spill] sm:$0xff]  ;;  %v6993_v52 = vld [vmem:[#allocation28_spill] sm:$0xff] }
 0x220   : > { %v3606_v36 = vpop.f32.mrf.mxu1  ;;  %v3674_v57 = vadd.f32 %v6786_v38, %v3630_v55  ;;  %v3690_v19 = vadd.f32 %v6786_v38, %v3646_v61  ;;  %v3563_v28 = vadd.f32 %v3562_v5, %v6986_v0  ;;  %v3603_v2 = vadd.f32 %v3602_v40, %v6799_v47  ;;  %3830 = vst [vmem:[%s6833_s5 + $0x8] sm:$0xff] %v4596_v48 }
 0x221   : > { %3838 = vst [vmem:[%s6833_s5 + $0x48] sm:$0xff] %v4604_v25  ;;  %v3675_v17 = vadd.f32 %v6784_v1, %v3631_v24  ;;  %v3691_v9 = vadd.f32 %v6784_v1, %v3647_v32  ;;  %v3567_v56 = vadd.f32 %v3566_v50, %v6987_v18  ;;  %v3607_v45 = vadd.f32 %v3606_v36, %v6801_v3  ;;  %v3568_v14 = vpop.f32.mrf.mxu0  ;;  %v6996_v24 = vld [vmem:[#allocation7_spill] sm:$0xff]  ;;  %v6997_v32 = vld [vmem:[#allocation18_spill] sm:$0xff] }
 0x222   : > { %v3608_v44 = vpop.f32.mrf.mxu1  ;;  %v3706_v54 = vmax.f32 %v3674_v57, 0.0  ;;  %v3722_v59 = vmax.f32 %v3690_v19, 0.0  ;;  %v3632_v60 = vadd.f32 %v3563_v28, %v6988_v35  ;;  %v3648_v46 = vadd.f32 %v3603_v2, %v6989_v15  ;;  %v6998_v57 = vld [vmem:[#allocation29_spill] sm:$0xff]  ;;  %v6999_v18 = vld [vmem:[#allocation30_spill] sm:$0xff]  ;;  %v7001_v35 = vld [vmem:[#allocation19_spill] sm:$0xff] }
 0x223   : > { %v3707_v11 = vmax.f32 %v3675_v17, 0.0  ;;  %v3723_v47 = vmax.f32 %v3691_v9, 0.0  ;;  %v3633_v20 = vadd.f32 %v3567_v56, %v6990_v51  ;;  %v3649_v26 = vadd.f32 %v3607_v45, %v6991_v63  ;;  %v3570_v13 = vpop.f32.mrf.mxu0 }
 0x224   : > { %v3610_v6 = vpop.f32.mrf.mxu1  ;;  %v4597_v12 = vpack.c.bf16 %v3706_v54, %v3705_v41  ;;  %v4605_v3 = vpack.c.bf16 %v3722_v59, %v3721_v23  ;;  %v3676_v42 = vadd.f32 %v6786_v38, %v3632_v60  ;;  %v3692_v34 = vadd.f32 %v6786_v38, %v3648_v46  ;;  %v7000_v54 = vld [vmem:[#allocation8_spill] sm:$0xff] }
 0x225   : > { %v3677_v27 = vadd.f32 %v6784_v1, %v3633_v20  ;;  %v3693_v58 = vadd.f32 %v6784_v1, %v3649_v26  ;;  %v3569_v7 = vadd.f32 %v3568_v14, %v6992_v31  ;;  %v3609_v4 = vadd.f32 %v3608_v44, %v6805_v49  ;;  %v3572_v21 = vpop.f32.mrf.mxu0  ;;  %v7003_v20 = vld [vmem:[#allocation20_spill] sm:$0xff] }
 0x226   : > { %v3612_v22 = vpop.f32.mrf.mxu1  ;;  %3831 = vst [vmem:[%s6833_s5 + $0x10] sm:$0xff] %v4597_v12  ;;  %3839 = vst [vmem:[%s6833_s5 + $0x50] sm:$0xff] %v4605_v3  ;;  %v3708_v10 = vmax.f32 %v3676_v42, 0.0  ;;  %v3724_v62 = vmax.f32 %v3692_v34, 0.0  ;;  %v3571_v5 = vadd.f32 %v3570_v13, %v6993_v52  ;;  %v3611_v40 = vadd.f32 %v3610_v6, %v6807_v37  ;;  %v7004_v42 = vld [vmem:[#allocation31_spill] sm:$0xff] }
 0x227   : > { %v3709_v41 = vmax.f32 %v3677_v27, 0.0  ;;  %v3725_v23 = vmax.f32 %v3693_v58, 0.0  ;;  %v3634_v55 = vadd.f32 %v3569_v7, %v6994_v29  ;;  %v3650_v61 = vadd.f32 %v3609_v4, %v6995_v43  ;;  %v3576_v48 = vpop.f32.mrf.mxu0  ;;  %v7005_v7 = vld [vmem:[#allocation32_spill] sm:$0xff]  ;;  %v7007_v52 = vld [vmem:[#allocation35_spill] sm:$0xff] }
 0x228   : > { %v3616_v49 = vpop.f32.mrf.mxu1  ;;  %v4598_v25 = vpack.c.bf16 %v3708_v10, %v3707_v11  ;;  %v4606_v33 = vpack.c.bf16 %v3724_v62, %v3723_v47  ;;  %v3635_v16 = vadd.f32 %v3571_v5, %v6996_v24  ;;  %v3651_v50 = vadd.f32 %v3611_v40, %v6997_v32  ;;  %v7002_v47 = vld [vmem:[#allocation9_spill] sm:$0xff]  ;;  %v7006_v62 = vld [vmem:[#allocation34_spill] sm:$0xff]  ;;  %v7010_v43 = vld [vmem:[#allocation11_spill] sm:$0xff] }
 0x229   : > { %v3678_v36 = vadd.f32 %v6786_v38, %v3634_v55  ;;  %v3694_v37 = vadd.f32 %v6786_v38, %v3650_v61  ;;  %v3573_v19 = vadd.f32 %v3572_v21, %v6998_v57  ;;  %v3613_v0 = vadd.f32 %v3612_v22, %v6809_v39  ;;  %v3578_v28 = vpop.f32.mrf.mxu0  ;;  %v7008_v40 = vld [vmem:[#allocation10_spill] sm:$0xff] }
 0x22a   : > { %v3618_v2 = vpop.f32.mrf.mxu1  ;;  %3832 = vst [vmem:[%s6833_s5 + $0x18] sm:$0xff] %v4598_v25  ;;  %3840 = vst [vmem:[%s6833_s5 + $0x58] sm:$0xff] %v4606_v33  ;;  %v3679_v17 = vadd.f32 %v6784_v1, %v3635_v16  ;;  %v3695_v9 = vadd.f32 %v6784_v1, %v3651_v50  ;;  %v3577_v56 = vadd.f32 %v3576_v48, %v6999_v18  ;;  %v7011_v48 = vld [vmem:[#allocation22_spill] sm:$0xff] }
 0x22b   : > { %v3617_v45 = vadd.f32 %v3616_v49, %v6811_v53  ;;  %v3710_v14 = vmax.f32 %v3678_v36, 0.0  ;;  %v3726_v44 = vmax.f32 %v3694_v37, 0.0  ;;  %v3636_v59 = vadd.f32 %v3573_v19, %v7000_v54  ;;  %v3580_v39 = vpop.f32.mrf.mxu0 }
 0x22c   : > { %v3652_v60 = vadd.f32 %v3613_v0, %v7001_v35  ;;  %v3620_v15 = vpop.f32.mrf.mxu1  ;;  %v3711_v46 = vmax.f32 %v3679_v17, 0.0  ;;  %v3727_v11 = vmax.f32 %v3695_v9, 0.0  ;;  %v3637_v51 = vadd.f32 %v3577_v56, %v7002_v47  ;;  %v7013_v0 = vld [vmem:[#allocation12_spill] sm:$0xff] }
 0x22d   : > { %v3653_v63 = vadd.f32 %v3617_v45, %v7003_v20  ;;  %v4599_v26 = vpack.c.bf16 %v3710_v14, %v3709_v41  ;;  %v4607_v13 = vpack.c.bf16 %v3726_v44, %v3725_v23  ;;  %v3680_v53 = vadd.f32 %v6786_v38, %v3636_v59  ;;  %v3582_v22 = vpop.f32.mrf.mxu0  ;;  %v7009_v23 = vld [vmem:[#allocation21_spill] sm:$0xff] }
 0x22e   : > { %v3696_v6 = vadd.f32 %v6786_v38, %v3652_v60  ;;  %v3681_v12 = vadd.f32 %v6784_v1, %v3637_v51  ;;  %v3579_v34 = vadd.f32 %v3578_v28, %v7004_v42  ;;  %v3619_v27 = vadd.f32 %v3618_v2, %v6819_v8  ;;  %v3622_v10 = vpop.f32.mrf.mxu1  ;;  %v7014_v2 = vld [vmem:[#allocation23_spill] sm:$0xff] }
 0x22f   : > { %v3697_v3 = vadd.f32 %v6784_v1, %v3653_v63  ;;  %3833 = vst [vmem:[%s6833_s5 + $0x20] sm:$0xff] %v4599_v26  ;;  %3841 = vst [vmem:[%s6833_s5 + $0x60] sm:$0xff] %v4607_v13  ;;  %v3712_v58 = vmax.f32 %v3680_v53, 0.0  ;;  %v3581_v4 = vadd.f32 %v3580_v39, %v7005_v7  ;;  %v3621_v21 = vadd.f32 %v3620_v15, %v6821_v30  ;;  %v7012_v30 = vld [vmem:[#allocation33_spill] sm:$0xff] }
 0x230   : > { %v3728_v31 = vmax.f32 %v3696_v6, 0.0  ;;  %v3510_v5 = vadd.f32 %v7007_v52, %v7006_v62  ;;  %v3638_v41 = vadd.f32 %v3579_v34, %v7008_v40  ;;  %v3654_v29 = vadd.f32 %v3619_v27, %v7009_v23 }
 0x231   : > { %v4600_v8 = vpack.c.bf16 %v3712_v58, %v3711_v46  ;;  %v3639_v61 = vadd.f32 %v3581_v4, %v7010_v43  ;;  %v3655_v49 = vadd.f32 %v3621_v21, %v7011_v48  ;;  %v3583_v24 = vadd.f32 %v3582_v22, %v7012_v30 }
 0x232   : > { %v4608_v55 = vpack.c.bf16 %v3728_v31, %v3727_v11  ;;  %v3682_v25 = vadd.f32 %v6786_v38, %v3638_v41  ;;  %v3698_v33 = vadd.f32 %v6786_v38, %v3654_v29  ;;  %v3623_v16 = vadd.f32 %v3622_v10, %v3510_v5 }
 0x233   : > { %3834 = vst [vmem:[%s6833_s5 + $0x28] sm:$0xff] %v4600_v8  ;;  %v3713_v32 = vmax.f32 %v3681_v12, 0.0  ;;  %v3729_v50 = vmax.f32 %v3697_v3, 0.0  ;;  %v3683_v36 = vadd.f32 %v6784_v1, %v3639_v61  ;;  %v3699_v37 = vadd.f32 %v6784_v1, %v3655_v49 }
 0x234   : > { %3842 = vst [vmem:[%s6833_s5 + $0x68] sm:$0xff] %v4608_v55  ;;  %v3714_v57 = vmax.f32 %v3682_v25, 0.0  ;;  %v3730_v19 = vmax.f32 %v3698_v33, 0.0  ;;  %v3640_v28 = vadd.f32 %v3583_v24, %v7013_v0  ;;  %v3656_v17 = vadd.f32 %v3623_v16, %v7014_v2 }
 0x235   : > { %v3715_v14 = vmax.f32 %v3683_v36, 0.0  ;;  %v3731_v44 = vmax.f32 %v3699_v37, 0.0 }
 0x236   : > { %v4601_v9 = vpack.c.bf16 %v3714_v57, %v3713_v32  ;;  %v4609_v18 = vpack.c.bf16 %v3730_v19, %v3729_v50  ;;  %v3684_v56 = vadd.f32 %v6786_v38, %v3640_v28  ;;  %v3700_v45 = vadd.f32 %v6786_v38, %v3656_v17 }
 0x238   : > { %3835 = vst [vmem:[%s6833_s5 + $0x30] sm:$0xff] %v4601_v9  ;;  %3843 = vst [vmem:[%s6833_s5 + $0x70] sm:$0xff] %v4609_v18  ;;  %v3716_v54 = vmax.f32 %v3684_v56, 0.0  ;;  %v3732_v1 = vmax.f32 %v3700_v45, 0.0 }
 0x23a   : > { %v4602_v59 = vpack.c.bf16 %v3716_v54, %v3715_v14  ;;  %v4610_v35 = vpack.c.bf16 %v3732_v1, %v3731_v44 }
 0x23c   : > { %3836 = vst [vmem:[%s6833_s5 + $0x38] sm:$0xff] %v4602_v59  ;;  %3844 = vst [vmem:[%s6833_s5 + $0x78] sm:$0xff] %v4610_v35 }
 0x23d PF: > { %s13_s16 = sadd.s32 1, %s5322_s16   ;;  %s7015_s12 = smov %s5314_s14 }
 0x23e   : > { %p10_p7 = scmp.ge.s32.totalorder %s13_s16, 6   ;;  %s7016_s13 = smov %s5318_s15 }
 0x23f   : > { %s7017_s14 = smov %s7020_s17  ;;  %s7018_s15 = smov %s7024_s18 }
 0x240   :  { %12 = sbr.rel (!%p10_p7) target bundleno = 3 (0x3), region = 70 }

</bundles_post_ra>
